<compile_context>
chip_gen: v7x
topology: tpu7x:2x2x1
jax: 0.10.0
libtpu: 0.0.40
codegen_flags: <defaults>
</compile_context>

<pallas_src>
import jax
import jax.numpy as jnp
from jax.experimental import pallas as pl
from jax.experimental.pallas import tpu as pltpu

# Model dims from the PyTorch module.
K1 = 37 * 17 * 17          # 10693
N1 = 1024
N2 = 128
N3 = 1
N3_PAD = 128               # lane-dense padded output width (cols 1: are zeros)

# K tile for the layer-1 weight stream: ceil(10693/3584) = 3 grid steps,
# 59 zero-padded K rows, ~7 MB bf16 weight block (x2 pipeline buffers).
TK = 3584

# Layer-1 weight stream dtype (the HBM-bound array). bf16 halves HBM traffic;
# the f32 MXU accumulator is kept, layers 2/3 stay f32.
W1_DTYPE = jnp.bfloat16


def _round_up(x, m):
    return (x + m - 1) // m * m


def _num_tensorcores():
    """Best-effort detection of TensorCores per device (v7x = 2, v5e/v6e = 1)."""
    try:
        kind = jax.devices()[0].device_kind.lower()
    except Exception:
        return 1
    if "v7" in kind or "tpu7" in kind or "7x" in kind:
        return 2
    return 1


_NUM_TC = _num_tensorcores()


# ----------------------------------------------------------------------------
# Kernels
# ----------------------------------------------------------------------------
def _fused_mlp_kernel(x_ref, w1_ref, b1_ref, w2_ref, b2_ref, w3_ref, b3_ref,
                      o_ref, acc_ref):
    """Single-TensorCore path: all three Linear layers fused in one call."""
    k = pl.program_id(0)

    @pl.when(k == 0)
    def _():
        acc_ref[...] = jnp.zeros_like(acc_ref)

    # Layer-1 partial product for this K tile: bf16 x bf16 on the MXU with an
    # f32 accumulator.  Streaming w1 is the entire cost of this kernel.
    acc_ref[...] += jnp.dot(x_ref[...].astype(w1_ref.dtype), w1_ref[...],
                            preferred_element_type=jnp.float32)

    @pl.when(k == pl.num_programs(0) - 1)
    def _():
        # Epilogue: bias + ReLU, then the two tiny layers on resident f32
        # weights (w2 = 512 KB, w3 = 64 KB) -- free filler under the DMA.
        h1 = jnp.maximum(acc_ref[...] + b1_ref[...], 0.0)              # (B,1024)
        h2 = jnp.dot(h1, w2_ref[...],
                     preferred_element_type=jnp.float32) + b2_ref[...]
        h2 = jnp.maximum(h2, 0.0)                                      # (B,128)
        y = jnp.dot(h2, w3_ref[...],
                    preferred_element_type=jnp.float32) + b3_ref[...]
        o_ref[...] = y.astype(o_ref.dtype)


def _split_mlp_kernel(x_ref, w1_ref, b1_ref, w2_ref, o_ref, acc_ref):
    """Dual-TensorCore path (v7x): each core owns half the N1 columns of w1
    and the matching 512-row half of w2, emitting a partial pre-bias h2."""
    k = pl.program_id(1)

    @pl.when(k == 0)
    def _():
        acc_ref[...] = jnp.zeros_like(acc_ref)

    acc_ref[...] += jnp.dot(x_ref[...].astype(w1_ref.dtype), w1_ref[...],
                            preferred_element_type=jnp.float32)

    @pl.when(k == pl.num_programs(1) - 1)
    def _():
        h1_half = jnp.maximum(acc_ref[...] + b1_ref[...], 0.0)        # (B,512)
        o_ref[0] = jnp.dot(h1_half, w2_ref[...],
                           preferred_element_type=jnp.float32)        # (B,128) partial


# ----------------------------------------------------------------------------
# Wrappers
# ----------------------------------------------------------------------------
def prepare_params(params, *, tk=TK, w1_dtype=W1_DTYPE):
    """Pre-pad / pre-cast parameters ONCE (no per-call weight re-padding)."""
    (w1, b1), (w2, b2), (w3, b3) = params
    k_pad = _round_up(K1, tk)
    w1_p = (jnp.zeros((k_pad, N1), w1_dtype)
            .at[:K1, :].set(w1.astype(w1_dtype)))
    b1_p = b1.astype(jnp.float32).reshape(1, N1)
    w2_p = w2.astype(jnp.float32)                          # (1024, 128) resident
    b2_p = b2.astype(jnp.float32).reshape(1, N2)
    w3_p = (jnp.zeros((N2, N3_PAD), jnp.float32)
            .at[:, :N3].set(w3.astype(jnp.float32)))
    b3_p = (jnp.zeros((1, N3_PAD), jnp.float32)
            .at[:, :N3].set(b3.astype(jnp.float32).reshape(1, N3)))
    return (w1_p, b1_p, w2_p, b2_p, w3_p, b3_p)


def _call_fused(x_p, w1_p, b1_p, w2_p, b2_p, w3_p, b3_p, b_pad, k_pad):
    n_k = k_pad // TK
    cost = pl.CostEstimate(
        flops=2 * b_pad * (k_pad * N1 + N1 * N2 + N2 * N3_PAD),
        transcendentals=0,
        bytes_accessed=(x_p.size * 4 + w1_p.size * 2
                        + (b1_p.size + w2_p.size + b2_p.size
                           + w3_p.size + b3_p.size) * 4
                        + b_pad * N3_PAD * 4),
    )
    return pl.pallas_call(
        _fused_mlp_kernel,
        out_shape=jax.ShapeDtypeStruct((b_pad, N3_PAD), jnp.float32),
        grid_spec=pltpu.PrefetchScalarGridSpec(
            num_scalar_prefetch=0,
            grid=(n_k,),
            in_specs=[
                pl.BlockSpec((b_pad, TK), lambda k: (0, k)),      # x (streamed K)
                pl.BlockSpec((TK, N1), lambda k: (k, 0)),         # w1 (streamed K)
                pl.BlockSpec((1, N1), lambda k: (0, 0)),          # b1 (resident)
                pl.BlockSpec((N1, N2), lambda k: (0, 0)),         # w2 (resident)
                pl.BlockSpec((1, N2), lambda k: (0, 0)),          # b2 (resident)
                pl.BlockSpec((N2, N3_PAD), lambda k: (0, 0)),     # w3 (resident)
                pl.BlockSpec((1, N3_PAD), lambda k: (0, 0)),      # b3 (resident)
            ],
            out_specs=pl.BlockSpec((b_pad, N3_PAD), lambda k: (0, 0)),
            scratch_shapes=[pltpu.VMEM((b_pad, N1), jnp.float32)],
        ),
        compiler_params=pltpu.CompilerParams(
            dimension_semantics=("arbitrary",),       # K is a reduction axis
            vmem_limit_bytes=48 * 1024 * 1024,
        ),
        cost_estimate=cost,
    )(x_p, w1_p, b1_p, w2_p, b2_p, w3_p, b3_p)


def _call_split(x_p, w1_p, b1_p, w2_p, b2_p, w3_p, b3_p, b_pad, k_pad):
    n_k = k_pad // TK
    half = N1 // 2
    cost = pl.CostEstimate(
        flops=2 * b_pad * (k_pad * N1 + N1 * N2),
        transcendentals=0,
        bytes_accessed=(2 * x_p.size * 4 + w1_p.size * 2
                        + (b1_p.size + w2_p.size) * 4
                        + 2 * b_pad * N2 * 4),
    )
    partial_h2 = pl.pallas_call(
        _split_mlp_kernel,
        out_shape=jax.ShapeDtypeStruct((2, b_pad, N2), jnp.float32),
        grid_spec=pltpu.PrefetchScalarGridSpec(
            num_scalar_prefetch=0,
            grid=(2, n_k),                                        # (core-split, K)
            in_specs=[
                pl.BlockSpec((b_pad, TK), lambda c, k: (0, k)),   # x (streamed K)
                pl.BlockSpec((TK, half), lambda c, k: (k, c)),    # w1 column half
                pl.BlockSpec((1, half), lambda c, k: (0, c)),     # b1 half
                pl.BlockSpec((half, N2), lambda c, k: (c, 0)),    # w2 row half
            ],
            out_specs=pl.BlockSpec((1, b_pad, N2), lambda c, k: (c, 0, 0)),
            scratch_shapes=[pltpu.VMEM((b_pad, half), jnp.float32)],
        ),
        compiler_params=pltpu.CompilerParams(
            dimension_semantics=("parallel", "arbitrary"),
            vmem_limit_bytes=48 * 1024 * 1024,
        ),
        cost_estimate=cost,
    )(x_p, w1_p, b1_p, w2_p)

    # Sub-microsecond finish in the wrapper: combine the two column halves,
    # layer-2 bias + ReLU, then the 128->1 layer (kept lane-padded to 128).
    h2 = jnp.maximum(partial_h2[0] + partial_h2[1] + b2_p, 0.0)
    return jnp.dot(h2, w3_p, preferred_element_type=jnp.float32) + b3_p


@jax.jit
def mlp_forward(x_nchw, prepped):
    w1_p, b1_p, w2_p, b2_p, w3_p, b3_p = prepped
    B = x_nchw.shape[0]
    x = x_nchw.reshape(B, -1).astype(jnp.float32)   # torch .view(B, -1)
    assert x.shape[1] == K1, x.shape
    k_pad = w1_p.shape[0]
    b_pad = max(8, _round_up(B, 8))

    # Single static-width pad for the (tiny) activation; weights arrive
    # pre-padded from prepare_params.
    x_p = jnp.pad(x, ((0, b_pad - B), (0, k_pad - K1)))

    if _NUM_TC >= 2:
        y_pad = _call_split(x_p, w1_p, b1_p, w2_p, b2_p, w3_p, b3_p, b_pad, k_pad)
    else:
        y_pad = _call_fused(x_p, w1_p, b1_p, w2_p, b2_p, w3_p, b3_p, b_pad, k_pad)
    return y_pad[:B, :N3]


def init_mlp_params(key):
    """Deterministic init mimicking nn.Linear defaults (uniform +-1/sqrt(fan_in))."""
    dims = [(K1, N1), (N1, N2), (N2, N3)]
    params = []
    for i, (fan_in, fan_out) in enumerate(dims):
        kw, kb, key = jax.random.split(jax.random.fold_in(key, i), 3)
        bound = 1.0 / jnp.sqrt(float(fan_in))
        w = jax.random.uniform(kw, (fan_in, fan_out), jnp.float32, -bound, bound)
        b = jax.random.uniform(kb, (fan_out,), jnp.float32, -bound, bound)
        params.append((w, b))
    return params


if __name__ == "__main__":
    key = jax.random.PRNGKey(0)
    kx, kp = jax.random.split(key)

    # MLP's first Linear expects 37*17*17 flattened features -> input (B,37,17,17)
    x = jax.random.normal(kx, (2, 37, 17, 17), jnp.float32)
    params = init_mlp_params(kp)
    prepped = prepare_params(params)      # one-time pad/cast (not per forward)

    y = mlp_forward(x, prepped)
    y = jax.block_until_ready(y)
    assert y.shape == (2, 1), y.shape

    # Reference: identical math with the layer-1 matmul done in bf16 (matching
    # the kernel's bf16 weight stream + f32 accumulation), layers 2/3 in f32.
    # Dropout is identity at inference.  (vs. a pure-f32 module the bf16 w1
    # stream introduces ~1% relative error on this confidence head.)
    x_flat = x.reshape(x.shape[0], -1)
    (w1, b1), (w2, b2), (w3, b3) = params
    h1 = jnp.dot(x_flat.astype(jnp.bfloat16), w1.astype(jnp.bfloat16),
                 preferred_element_type=jnp.float32) + b1
    h1 = jnp.maximum(h1, 0.0)
    h2 = jnp.maximum(h1 @ w2 + b2, 0.0)
    ref = h2 @ w3 + b3

    assert jnp.allclose(y, ref, atol=5e-3, rtol=5e-3), (y, ref)
    print("KERNEL_OK")
</pallas_src>

<mosaic_0001>
module attributes {stable_mosaic.version = 11 : i64} {
  func.func @_fused_mlp_kernel(%arg0: i32, %arg1: memref<8x3584xf32, #tpu.memory_space<vmem>>, %arg2: memref<3584x1024xbf16, #tpu.memory_space<vmem>>, %arg3: memref<1x1024xf32, #tpu.memory_space<vmem>>, %arg4: memref<1024x128xf32, #tpu.memory_space<vmem>>, %arg5: memref<1x128xf32, #tpu.memory_space<vmem>>, %arg6: memref<128x128xf32, #tpu.memory_space<vmem>>, %arg7: memref<1x128xf32, #tpu.memory_space<vmem>>, %arg8: memref<8x128xf32, #tpu.memory_space<vmem>>, %arg9: memref<8x1024xf32, #tpu.memory_space<vmem>>) attributes {dimension_semantics = [#tpu.dimension_semantics<arbitrary>], iteration_bounds = array<i64: 3>, scalar_prefetch = 0 : i64, scratch_operands = 1 : i64, tpu.core_type = #tpu.core_type<tc>, window_params = [{transform_indices = @transform_0, window_bounds = array<i64: 8, 3584>}, {transform_indices = @transform_1, window_bounds = array<i64: 3584, 1024>}, {pipeline_mode = #tpu.pipeline_mode<synchronous>, transform_indices = @transform_2, window_bounds = array<i64: 1, 1024>}, {pipeline_mode = #tpu.pipeline_mode<synchronous>, transform_indices = @transform_3, window_bounds = array<i64: 1024, 128>}, {pipeline_mode = #tpu.pipeline_mode<synchronous>, transform_indices = @transform_4, window_bounds = array<i64: 1, 128>}, {pipeline_mode = #tpu.pipeline_mode<synchronous>, transform_indices = @transform_5, window_bounds = array<i64: 128, 128>}, {pipeline_mode = #tpu.pipeline_mode<synchronous>, transform_indices = @transform_6, window_bounds = array<i64: 1, 128>}, {pipeline_mode = #tpu.pipeline_mode<synchronous>, transform_indices = @transform_7, window_bounds = array<i64: 8, 128>}]} {
    %c0_i32 = arith.constant 0 : i32
    %0 = arith.cmpi eq, %arg0, %c0_i32 : i32
    %1 = arith.extui %0 : i1 to i32
    %c0_i32_0 = arith.constant 0 : i32
    %2 = arith.cmpi ne, %1, %c0_i32_0 : i32
    scf.if %2 {
      %cst_9 = arith.constant 0.000000e+00 : f32
      %13 = vector.broadcast %cst_9 : f32 to vector<8x1024xf32>
      %c0_10 = arith.constant 0 : index
      %c0_11 = arith.constant 0 : index
      %14 = vector.load %arg9[%c0_10, %c0_11] : memref<8x1024xf32, #tpu.memory_space<vmem>>, vector<8x1024xf32>
      tpu.vector_store %arg9[%c0_10, %c0_11], %13 {strides = array<i32>} : memref<8x1024xf32, #tpu.memory_space<vmem>>, vector<8x1024xf32>,
    } else {
    }
    %c0 = arith.constant 0 : index
    %c0_1 = arith.constant 0 : index
    %3 = vector.load %arg9[%c0, %c0_1] : memref<8x1024xf32, #tpu.memory_space<vmem>>, vector<8x1024xf32>
    %c0_2 = arith.constant 0 : index
    %c0_3 = arith.constant 0 : index
    %4 = vector.load %arg1[%c0_2, %c0_3] : memref<8x3584xf32, #tpu.memory_space<vmem>>, vector<8x3584xf32>
    %5 = arith.truncf %4 : vector<8x3584xf32> to vector<8x3584xbf16>
    %c0_4 = arith.constant 0 : index
    %c0_5 = arith.constant 0 : index
    %6 = vector.load %arg2[%c0_4, %c0_5] : memref<3584x1024xbf16, #tpu.memory_space<vmem>>, vector<3584x1024xbf16>
    %cst = arith.constant dense<0.000000e+00> : vector<8x1024xf32>
    %7 = tpu.matmul %5, %6, %cst {dimension_numbers = #tpu.dot_dimension_numbers<[1], [0], [0], [1], [0, 0, 1, 1], [], []>} : vector<8x3584xbf16>, vector<3584x1024xbf16>, vector<8x1024xf32> -> vector<8x1024xf32>
    %8 = arith.addf %3, %7 : vector<8x1024xf32>
    %c0_6 = arith.constant 0 : index
    %c0_7 = arith.constant 0 : index
    %9 = vector.load %arg9[%c0_6, %c0_7] : memref<8x1024xf32, #tpu.memory_space<vmem>>, vector<8x1024xf32>
    tpu.vector_store %arg9[%c0_6, %c0_7], %8 {strides = array<i32>} : memref<8x1024xf32, #tpu.memory_space<vmem>>, vector<8x1024xf32>,
    %c2_i32 = arith.constant 2 : i32
    %10 = arith.cmpi eq, %arg0, %c2_i32 : i32
    %11 = arith.extui %10 : i1 to i32
    %c0_i32_8 = arith.constant 0 : i32
    %12 = arith.cmpi ne, %11, %c0_i32_8 : i32
    scf.if %12 {
      %c0_9 = arith.constant 0 : index
      %c0_10 = arith.constant 0 : index
      %13 = vector.load %arg9[%c0_9, %c0_10] : memref<8x1024xf32, #tpu.memory_space<vmem>>, vector<8x1024xf32>
      %c0_11 = arith.constant 0 : index
      %c0_12 = arith.constant 0 : index
      %14 = vector.load %arg3[%c0_11, %c0_12] : memref<1x1024xf32, #tpu.memory_space<vmem>>, vector<1x1024xf32>
      %15 = vector.broadcast %14 : vector<1x1024xf32> to vector<8x1024xf32>
      %16 = arith.addf %13, %15 : vector<8x1024xf32>
      %cst_13 = arith.constant 0.000000e+00 : f32
      %17 = vector.broadcast %cst_13 : f32 to vector<8x1024xf32>
      %18 = arith.maximumf %16, %17 : vector<8x1024xf32>
      %c0_14 = arith.constant 0 : index
      %c0_15 = arith.constant 0 : index
      %19 = vector.load %arg4[%c0_14, %c0_15] : memref<1024x128xf32, #tpu.memory_space<vmem>>, vector<1024x128xf32>
      %cst_16 = arith.constant dense<0.000000e+00> : vector<8x128xf32>
      %20 = tpu.matmul %18, %19, %cst_16 {dimension_numbers = #tpu.dot_dimension_numbers<[1], [0], [0], [1], [0, 0, 1, 1], [], []>} : vector<8x1024xf32>, vector<1024x128xf32>, vector<8x128xf32> -> vector<8x128xf32>
      %c0_17 = arith.constant 0 : index
      %c0_18 = arith.constant 0 : index
      %21 = vector.load %arg5[%c0_17, %c0_18] : memref<1x128xf32, #tpu.memory_space<vmem>>, vector<1x128xf32>
      %22 = vector.broadcast %21 : vector<1x128xf32> to vector<8x128xf32>
      %23 = arith.addf %20, %22 : vector<8x128xf32>
      %cst_19 = arith.constant 0.000000e+00 : f32
      %24 = vector.broadcast %cst_19 : f32 to vector<8x128xf32>
      %25 = arith.maximumf %23, %24 : vector<8x128xf32>
      %c0_20 = arith.constant 0 : index
      %c0_21 = arith.constant 0 : index
      %26 = vector.load %arg6[%c0_20, %c0_21] : memref<128x128xf32, #tpu.memory_space<vmem>>, vector<128x128xf32>
      %cst_22 = arith.constant dense<0.000000e+00> : vector<8x128xf32>
      %27 = tpu.matmul %25, %26, %cst_22 {dimension_numbers = #tpu.dot_dimension_numbers<[1], [0], [0], [1], [0, 0, 1, 1], [], []>} : vector<8x128xf32>, vector<128x128xf32>, vector<8x128xf32> -> vector<8x128xf32>
      %c0_23 = arith.constant 0 : index
      %c0_24 = arith.constant 0 : index
      %28 = vector.load %arg7[%c0_23, %c0_24] : memref<1x128xf32, #tpu.memory_space<vmem>>, vector<1x128xf32>
      %29 = vector.broadcast %28 : vector<1x128xf32> to vector<8x128xf32>
      %30 = arith.addf %27, %29 : vector<8x128xf32>
      %c0_25 = arith.constant 0 : index
      %c0_26 = arith.constant 0 : index
      %31 = vector.load %arg8[%c0_25, %c0_26] : memref<8x128xf32, #tpu.memory_space<vmem>>, vector<8x128xf32>
      tpu.vector_store %arg8[%c0_25, %c0_26], %30 {strides = array<i32>} : memref<8x128xf32, #tpu.memory_space<vmem>>, vector<8x128xf32>,
    } else {
    }
    return
  }
  func.func @transform_0(%arg0: i32) -> (i32, i32) {
    %c0_i32 = arith.constant 0 : i32
    %c0_i32_0 = arith.constant 0 : i32
    return %c0_i32, %arg0 : i32, i32
  }
  func.func @transform_1(%arg0: i32) -> (i32, i32) {
    %c0_i32 = arith.constant 0 : i32
    %c0_i32_0 = arith.constant 0 : i32
    return %arg0, %c0_i32 : i32, i32
  }
  func.func @transform_2(%arg0: i32) -> (i32, i32) {
    %c0_i32 = arith.constant 0 : i32
    %c0_i32_0 = arith.constant 0 : i32
    %c0_i32_1 = arith.constant 0 : i32
    return %c0_i32, %c0_i32_0 : i32, i32
  }
  func.func @transform_3(%arg0: i32) -> (i32, i32) {
    %c0_i32 = arith.constant 0 : i32
    %c0_i32_0 = arith.constant 0 : i32
    %c0_i32_1 = arith.constant 0 : i32
    return %c0_i32, %c0_i32_0 : i32, i32
  }
  func.func @transform_4(%arg0: i32) -> (i32, i32) {
    %c0_i32 = arith.constant 0 : i32
    %c0_i32_0 = arith.constant 0 : i32
    %c0_i32_1 = arith.constant 0 : i32
    return %c0_i32, %c0_i32_0 : i32, i32
  }
  func.func @transform_5(%arg0: i32) -> (i32, i32) {
    %c0_i32 = arith.constant 0 : i32
    %c0_i32_0 = arith.constant 0 : i32
    %c0_i32_1 = arith.constant 0 : i32
    return %c0_i32, %c0_i32_0 : i32, i32
  }
  func.func @transform_6(%arg0: i32) -> (i32, i32) {
    %c0_i32 = arith.constant 0 : i32
    %c0_i32_0 = arith.constant 0 : i32
    %c0_i32_1 = arith.constant 0 : i32
    return %c0_i32, %c0_i32_0 : i32, i32
  }
  func.func @transform_7(%arg0: i32) -> (i32, i32) {
    %c0_i32 = arith.constant 0 : i32
    %c0_i32_0 = arith.constant 0 : i32
    %c0_i32_1 = arith.constant 0 : i32
    return %c0_i32, %c0_i32_0 : i32, i32
  }
}

</mosaic_0001>

<bundles_post_ra>
// kernel: mlp_forward.1
= control target key start
LH: loop header
LB: loop body
LE: loop exit
PB: predicated region body
PF: predicated region fallthrough
CT: control target
= control target key end

     0   :  { %s19120_s0 = inlined_call_operand.vmem [shape: f32[8,10752], index: 0, kind: input, shape index: {}]   ;;  %s19121_s1 = inlined_call_operand.hbm [shape: bf16[10752,1024], index: 1, kind: input, shape index: {}]   ;;  %s19122_s2 = inlined_call_operand.hbm [shape: f32[1,1024], index: 2, kind: input, shape index: {}]   ;;  %s19123_s3 = inlined_call_operand.hbm [shape: f32[1024,128], index: 3, kind: input, shape index: {}]   ;;  %s19124_s4 = inlined_call_operand.hbm [shape: f32[1,128], index: 4, kind: input, shape index: {}]   ;;  %s19125_s5 = inlined_call_operand.hbm [shape: f32[128,128], index: 5, kind: input, shape index: {}]   ;;  %s19126_s6 = inlined_call_operand.hbm [shape: f32[1,128], index: 6, kind: input, shape index: {}]   ;;  %s19127_s7 = inlined_call_operand.vmem [shape: f32[8,128], index: 7, kind: output, shape index: {}]  }
   0x1   :  { %19130 = sst [smem:[#allocation17_spill]] %s19122_s2 }
   0x2   :  { %12 = vsyncpa [#allocation4], 0 }
   0x3   :  { %14 = vsyncpa [#allocation4 + $0x1], 0 }
   0x4   :  { %15 = vsyncpa [#allocation6], 0 }
   0x5   :  { %16 = vsyncpa [#allocation9], 0 }
   0x6   :  { %17 = vsyncpa [#allocation12], 0  ;;  %s16728_s24 = smov 0   ;;  %s16730_s25 = smov 0  }
   0x7   :  { %s16732_s26 = smov 0   ;;  %s16734_s27 = smov 0  }
   0x8 LB: > { %s16674_s28 = smov [#allocation5]   ;;  %s16749_s30 = sadd.s32 4294967295, %s16672_s27   ;;  %s16672_s27 = sphi %s16734_s27, %s19149_s27   ;;  %s16668_s26 = sphi %s16732_s26, %s19148_s26   ;;  %s16664_s25 = sphi %s16730_s25, %s19147_s25   ;;  %s16660_s24 = sphi %s16728_s24, %s19146_s24  }
   0x9   : > { %s219_s29 = sshll.u32 %s16674_s28, 4  ;;  %p14195_p0 = scmp.ge.s32.totalorder %s16672_s27, 1  ;;  %s220_s29 = int_to_ptr.vmem [resolvable:$true] %s219_s29 }
   0xa   : > { %p19128_p1 = scmp.eq.s32.totalorder %s16749_s30, 0  ;;  %p206_p2 = scmp.lt.s32.totalorder %s16672_s27, 4 }
   0xb   : > { %s16675_s9 = smov [#allocation8]   ;;  %s16676_s11 = smov [#allocation7]  }
   0xc   : > { %p16755_p4 = pnand %p14195_p0, %p206_p2  ;;  %s243_s10 = sshll.u32 %s16675_s9, 4  ;;  %s16761_s10 = int_to_ptr.vmem [resolvable:$true] %s243_s10 }
   0xd   : > { %s229_s12 = sshll.u32 %s16676_s11, 4  ;;  %s19133_s2 = sld [smem:[#allocation17_spill]]  ;;  %s16769_s12 = int_to_ptr.vmem [resolvable:$true] %s229_s12 }
   0xe   : > { %s19131_s8 = scalar_select %p16755_p4, 1, 0 }
   0xf   : > { %p16380_p5 = pneg %p16755_p4 }
  0x11   : > { %p16765_p6 = pnand %p16380_p5, %p19128_p1 }
  0x13   : > { %s16456_s16 = scalar_lea.hbm %s19133_s2, 128  ;;  %p16779_p8 = pneg %p16765_p6 }
  0x14   : > { %p16457_p7 = scmp.ne.s32.totalorder %s19133_s2, %s16456_s16  ;;  %p16463_p11 = scmp.lt.u32.totalorder %s16456_s16, %s19133_s2 }
  0x16   : > { %p16459_p9 = pnand %p16779_p8, %p16457_p7 }
  0x18   : > { %p16460_p10 = pneg %p16459_p9 }
  0x1a   : > { %p16465_p12 = pnand %p16463_p11, %p16460_p10 }
  0x1c   : > { %16468 = shalt.err (!%p16465_p12)
}
  0x1d   : > { %s16469_s22 = scalar_lea.vmem %s220_s29, 128  ;;  %p16477_p5 = scmp.lt.s32.totalorder %s220_s29, %s220_s29 }
  0x1e   : > { %p16470_p13 = scmp.ne.s32.totalorder %s220_s29, %s16469_s22  ;;  %p16478_p3 = scmp.lt.s32.totalorder %s16469_s22, %s16469_s22 }
  0x20   : > { %p16472_p0 = pnand %p16470_p13, %p16779_p8  ;;  %p16479_p1 = por %p16478_p3, %p16477_p5 }
  0x22   : > { %p16473_p2 = pneg %p16472_p0 }
  0x24   : > { %p16480_p4 = pnand %p16479_p1, %p16473_p2 }
  0x26   : > { %16483 = shalt.err (!%p16480_p4)
}
  0x27   : > { %16383 = dma.hbm_to_vmem [thread:$0]  (!%p16765_p6), %s19133_s2, 128, %s220_s29, [#allocation6]  }
  0x28   : > { %s16484_s14 = scalar_lea.hbm %s19124_s4, 16 }
  0x29   : > { %p16485_p7 = scmp.ne.s32.totalorder %s19124_s4, %s16484_s14  ;;  %p16491_p1 = scmp.lt.u32.totalorder %s16484_s14, %s19124_s4 }
  0x2b   : > { %p16487_p9 = pnand %p16485_p7, %p16779_p8 }
  0x2d   : > { %p16488_p3 = pneg %p16487_p9 }
  0x2f   : > { %p16493_p4 = pnand %p16491_p1, %p16488_p3 }
  0x31   : > { %16496 = shalt.err (!%p16493_p4)
}
  0x32   : > { %s16497_s29 = scalar_lea.vmem %s16761_s10, 16  ;;  %s16504_s20 = scalar_lea.vmem %s16761_s10, 32 }
  0x33   : > { %p16498_p10 = scmp.ne.s32.totalorder %s16761_s10, %s16497_s29  ;;  %p16505_p13 = scmp.lt.s32.totalorder %s16761_s10, %s16761_s10 }
  0x34   : > { %p16506_p0 = scmp.lt.s32.totalorder %s16504_s20, %s16497_s29 }
  0x35   : > { %p16500_p11 = pnand %p16498_p10, %p16779_p8 }
  0x36   : > { %p16507_p2 = por %p16506_p0, %p16505_p13 }
  0x37   : > { %p16501_p12 = pneg %p16500_p11 }
  0x39   : > { %p16508_p5 = pnand %p16507_p2, %p16501_p12 }
  0x3b   : > { %16511 = shalt.err (!%p16508_p5)
}
  0x3c   : > { %16389 = dma.hbm_to_vmem [thread:$0]  (!%p16765_p6), %s19124_s4, 16, %s16761_s10, [#allocation9]  }
  0x3d   : > { %s16512_s9 = scalar_lea.hbm %s19123_s3, 16384 }
  0x3e   : > { %p16513_p7 = scmp.ne.s32.totalorder %s19123_s3, %s16512_s9  ;;  %p16519_p1 = scmp.lt.u32.totalorder %s16512_s9, %s19123_s3 }
  0x40   : > { %p16515_p9 = pnand %p16513_p7, %p16779_p8 }
  0x42   : > { %p16516_p3 = pneg %p16515_p9 }
  0x44   : > { %p16521_p4 = pnand %p16519_p1, %p16516_p3 }
  0x46   : > { %16524 = shalt.err (!%p16521_p4)
}
  0x47   : > { %s16525_s10 = scalar_lea.vmem %s16769_s12, 16384  ;;  %p16533_p13 = scmp.lt.s32.totalorder %s16769_s12, %s16769_s12 }
  0x48   : > { %p16526_p10 = scmp.ne.s32.totalorder %s16769_s12, %s16525_s10  ;;  %p16534_p0 = scmp.lt.s32.totalorder %s16525_s10, %s16525_s10 }
  0x4a   : > { %p16528_p11 = pnand %p16526_p10, %p16779_p8  ;;  %p16535_p2 = por %p16534_p0, %p16533_p13 }
  0x4c   : > { %p16529_p12 = pneg %p16528_p11 }
  0x4e   : > { %p16536_p5 = pnand %p16535_p2, %p16529_p12 }
  0x50   : > { %16539 = shalt.err (!%p16536_p5)
}
  0x51   : > { %s16677_s17 = smov 128   ;;  %s16678_s18 = smov 8  }
  0x52   : > { %16386 = dma.hbm_to_vmem [thread:$0]  (!%p16765_p6), %s19123_s3, 16384, %s16769_s12, [#allocation6], %s16677_s17, %s16677_s17, %s16678_s18  }
  0x53   : > { %s16679_s21 = smov [#allocation10]   ;;  %s16680_s23 = smov [#allocation11]  }
  0x54   : > { %s253_s22 = sshll.u32 %s16679_s21, 4  ;;  %s267_s28 = sshll.u32 %s16680_s23, 4  ;;  %s254_s22 = int_to_ptr.vmem [resolvable:$true] %s253_s22  ;;  %s268_s28 = int_to_ptr.vmem [resolvable:$true] %s267_s28 }
  0x55   : > { %s16540_s14 = scalar_lea.hbm %s19125_s5, 2048 }
  0x56   : > { %p16541_p7 = scmp.ne.s32.totalorder %s19125_s5, %s16540_s14  ;;  %p16547_p1 = scmp.lt.u32.totalorder %s16540_s14, %s19125_s5 }
  0x58   : > { %p16543_p9 = pnand %p16541_p7, %p16779_p8 }
  0x5a   : > { %p16544_p3 = pneg %p16543_p9 }
  0x5c   : > { %p16549_p4 = pnand %p16547_p1, %p16544_p3 }
  0x5e   : > { %16552 = shalt.err (!%p16549_p4)
}
  0x5f   : > { %s16553_s12 = scalar_lea.vmem %s254_s22, 2048  ;;  %p16561_p13 = scmp.lt.s32.totalorder %s254_s22, %s254_s22 }
  0x60   : > { %p16554_p10 = scmp.ne.s32.totalorder %s254_s22, %s16553_s12  ;;  %p16562_p0 = scmp.lt.s32.totalorder %s16553_s12, %s16553_s12 }
  0x62   : > { %p16556_p11 = pnand %p16554_p10, %p16779_p8  ;;  %p16563_p2 = por %p16562_p0, %p16561_p13 }
  0x64   : > { %p16557_p12 = pneg %p16556_p11 }
  0x66   : > { %p16564_p5 = pnand %p16563_p2, %p16557_p12 }
  0x68   : > { %16567 = shalt.err (!%p16564_p5)
}
  0x69   : > { %16392 = dma.hbm_to_vmem [thread:$0]  (!%p16765_p6), %s19125_s5, 2048, %s254_s22, [#allocation9], %s16677_s17, %s16677_s17, %s16678_s18  }
  0x6a   : > { %s16568_s23 = scalar_lea.hbm %s19126_s6, 16 }
  0x6b   : > { %p16569_p7 = scmp.ne.s32.totalorder %s19126_s6, %s16568_s23  ;;  %p16575_p1 = scmp.lt.u32.totalorder %s16568_s23, %s19126_s6 }
  0x6d   : > { %p16571_p9 = pnand %p16569_p7, %p16779_p8 }
  0x6f   : > { %p16572_p3 = pneg %p16571_p9 }
  0x71   : > { %p16577_p4 = pnand %p16575_p1, %p16572_p3 }
  0x73   : > { %16580 = shalt.err (!%p16577_p4)
}
  0x74   : > { %s16581_s16 = scalar_lea.vmem %s268_s28, 16  ;;  %s16588_s17 = scalar_lea.vmem %s268_s28, 32 }
  0x75   : > { %p16582_p10 = scmp.ne.s32.totalorder %s268_s28, %s16581_s16  ;;  %p16589_p13 = scmp.lt.s32.totalorder %s268_s28, %s268_s28 }
  0x76   : > { %p16590_p0 = scmp.lt.s32.totalorder %s16588_s17, %s16581_s16 }
  0x77   : > { %p16584_p11 = pnand %p16582_p10, %p16779_p8 }
  0x78   : > { %p16591_p2 = por %p16590_p0, %p16589_p13 }
  0x79   : > { %p16585_p12 = pneg %p16584_p11 }
  0x7b   : > { %p16592_p5 = pnand %p16591_p2, %p16585_p12 }
  0x7d   : > { %16595 = shalt.err (!%p16592_p5)
}
  0x7e   : > { %16395 = dma.hbm_to_vmem [thread:$0]  (!%p16765_p6), %s19126_s6, 16, %s268_s28, [#allocation12]  }
  0x7f   : > { %s16879_s19 = sadd.s32 1, %s16672_s27   ;;  %s56_s10 = sadd.s32 1, %s16668_s26 }
  0x80   : > { %s53_s13 = ssub.s32 %s16672_s27, %s16879_s19  ;;  %p63_p7 = scmp.ne.s32.totalorder %s16668_s26, %s16664_s25 }
  0x81   : > { %p54_p8 = scmp.eq.s32.totalorder %s53_s13, 0  ;;  %p64_p9 = scmp.eq.s32.totalorder %s16672_s27, 0 }
  0x82   : > { %p69_p3 = scmp.ne.s32.totalorder %s16664_s25, %s16660_s24  ;;  %p19135_p4 = scmp.eq.s32.totalorder %s16749_s30, 0 }
  0x83   : > { %s16890_s12 = scalar_select %p54_p8, %s16668_s26, %s56_s10  }
  0x84   : > { %p65_p1 = por %p64_p9, %p63_p7  ;;  %p16894_p10 = por %p19135_p4, %p69_p3 }
  0x85   : > { %p16405_p11 = scmp.lt.s32.totalorder %s16672_s27, 3  ;;  %s287_s20 = sand.u32 1, %s16668_s26  }
  0x86   : > { %s16356_s28 = smul.u32 14336, %s287_s20  ;;  %s16601_s18 = scalar_lea.hbm %s19121_s1, 688128 }
  0x87   : > { %s16011_s2 = smul.u32 229376, %s16672_s27  ;;  %p16901_p6 = pnand %p16405_p11, %p65_p1 }
  0x88   : > { %s291_s11 = scalar_lea.vmem [#allocation3], %s16356_s28  ;;  %s16912_s27 = scalar_lea.sflag [#allocation4], %s287_s20 }
  0x89   : > { %s16908_s24 = scalar_lea.hbm %s19121_s1, %s16011_s2  ;;  %s299_s14 = sshll.u32 %s291_s11, 4  ;;  %s16910_s14 = int_to_ptr.vmem [resolvable:$true] %s299_s14 }
  0x8a   : > { %s16596_s15 = scalar_lea.hbm %s16908_s24, 229376  ;;  %p16598_p13 = pneg %p16901_p6 }
  0x8b   : > { %p16597_p12 = scmp.ne.s32.totalorder %s16908_s24, %s16596_s15  ;;  %p16602_p5 = scmp.lt.u32.totalorder %s16908_s24, %s19121_s1 }
  0x8c   : > { %p16603_p8 = scmp.lt.u32.totalorder %s16601_s18, %s16596_s15  ;;  %p16605_p9 = scmp.lt.u32.totalorder %s16596_s15, %s16908_s24 }
  0x8d   : > { %p16599_p0 = pnand %p16598_p13, %p16597_p12 }
  0x8e   : > { %p16604_p7 = por %p16603_p8, %p16602_p5 }
  0x8f   : > { %p16600_p2 = pneg %p16599_p0 }
  0x90   : > { %p16606_p3 = por %p16605_p9, %p16604_p7 }
  0x92   : > { %p16607_p1 = pnand %p16606_p3, %p16600_p2 }
  0x94   : > { %16610 = shalt.err (!%p16607_p1)
}
  0x95   : > { %s16611_s10 = scalar_lea.vmem %s16910_s14, 229376  ;;  %s16681_s20 = smov [#allocation3]  }
  0x96   : > { %p16612_p4 = scmp.ne.s32.totalorder %s16910_s14, %s16611_s10  ;;  %s16616_s28 = sshll.u32 %s16681_s20, 4  ;;  %s16617_s28 = int_to_ptr.vmem [resolvable:$false] %s16616_s28 }
  0x97   : > { %s16618_s2 = scalar_lea.vmem %s16617_s28, 458752  ;;  %p16619_p0 = scmp.lt.s32.totalorder %s16910_s14, %s16617_s28 }
  0x98   : > { %p16614_p11 = pnand %p16612_p4, %p16598_p13  ;;  %p16620_p5 = scmp.lt.s32.totalorder %s16618_s2, %s16611_s10 }
  0x9a   : > { %p16615_p12 = pneg %p16614_p11  ;;  %p16621_p8 = por %p16620_p5, %p16619_p0 }
  0x9c   : > { %p16622_p7 = pnand %p16621_p8, %p16615_p12 }
  0x9e   : > { %16625 = shalt.err (!%p16622_p7)
}
  0x9f   : > { %s16682_s23 = smov 512   ;;  %s16683_s9 = smov 32  }
  0xa0   : > { %16399 = dma.hbm_to_vmem [thread:$0]  (!%p16901_p6), %s16908_s24, 229376, %s16910_s14, %s16912_s27, %s16682_s23, %s16682_s23, %s16683_s9  }
  0xa1   : > { %p19138_p13 = scmp.ne.s32.totalorder %s19131_s8, 0 }
  0xa2   : > { %s313_s11 = sand.u32 (!%p19138_p13), 1, %s16664_s25  }
  0xa3   : > { %311 = sbr.rel (%p19138_p13) target bundleno = 2696 (0xa88), region = 48  ;;  %s314_s16 = scalar_lea.sflag (!%p19138_p13), [#allocation4], %s313_s11 }
  0xa4   : > { %s16357_s15 = smul.u32 (!%p19138_p13), 14336, %s313_s11 }
  0xa6   : > { %s16943_s17 = scalar_lea.vmem (!%p19138_p13), [#allocation3], %s16357_s15 }
  0xaa   : > { %16643 = dma.done.wait (%p16894_p10), %s314_s16, 229376  }
  0xab   : > { %16645 = vsyncadd (%p16894_p10), %s314_s16, 4294737920  ;;  %p19139_p2 = scmp.eq.s32.totalorder %s16749_s30, 0 }
  0xad   : > { %16647 = dma.done.wait (%p19139_p2), [#allocation6], 16512   ;;  %p19140_p6 = pmov %p19139_p2 }
  0xae   : > { %p19141_p9 = pmov %p19139_p2 }
  0xaf   : > { %16649 = vsyncadd (%p19140_p6), [#allocation6], 4294950784 }
  0xb0   : > { %16651 = dma.done.wait (%p19141_p9), [#allocation9], 2064   ;;  %p19142_p3 = pmov %p19139_p2 }
  0xb1   : > { %p19143_p1 = pmov %p19139_p2 }
  0xb2   : > { %16653 = vsyncadd (%p19142_p3), [#allocation9], 4294965232 }
  0xb3   : > { %16655 = dma.done.wait (%p19143_p1), [#allocation12], 16   ;;  %p19144_p4 = pmov %p19143_p1 }
  0xb4   : > { %s368_s8 = smul.u32 28, %s16749_s30  ;;  %p19145_p11 = scmp.ne.s32.totalorder %s16749_s30, 0 }
  0xb5   : > { %16657 = vsyncadd (%p19144_p4), [#allocation12], 4294967280  ;;  %v16684_v0 = vmov (!%p19145_p11), 0.0  }
  0xb6   : > { %p369_p10 = scmp.lt.s32.totalorder %s368_s8, 83  ;;  %378 = sbr.rel (%p19145_p11) target bundleno = 189 (0xbd), region = 76  ;;  %379 = vst [vmem:[#allocation2] sm:$0xff] (!%p19145_p11), %v16684_v0  ;;  %380 = vst [vmem:[#allocation2 + $0x8] sm:$0xff] (!%p19145_p11), %v16684_v0 }
  0xb7   : > { %381 = vst [vmem:[#allocation2 + $0x10] sm:$0xff] (!%p19145_p11), %v16684_v0  ;;  %382 = vst [vmem:[#allocation2 + $0x18] sm:$0xff] (!%p19145_p11), %v16684_v0 }
  0xb8   : > { %s19151_s8 = smov (!%p369_p10, %s368_s8), 83  ;;  %383 = vst [vmem:[#allocation2 + $0x20] sm:$0xff] (!%p19145_p11), %v16684_v0  ;;  %384 = vst [vmem:[#allocation2 + $0x28] sm:$0xff] (!%p19145_p11), %v16684_v0 }
  0xb9   : > { %s14210_s29 = sshll.u32 %s19151_s8, 3  ;;  %385 = vst [vmem:[#allocation2 + $0x30] sm:$0xff] (!%p19145_p11), %v16684_v0  ;;  %386 = vst [vmem:[#allocation2 + $0x38] sm:$0xff] (!%p19145_p11), %v16684_v0 }
  0xba   : > { %s16965_s14 = scalar_lea.vmem %s19120_s0, %s14210_s29 }
  0xbd PF: > { %v451_v1 = vld [vmem:[%s16943_s17] sm:$0xff]  ;;  %v396_v54 = vld [vmem:[%s16965_s14 + $0x8] sm:$0xff]  ;;  %v398_v55 = vld [vmem:[%s16965_s14 + $0x18] sm:$0xff]  ;;  %p16004_p12 = scmp.ne.s32.totalorder %s16749_s30, 2 }
  0xbe   : > { %v455_v2 = vld [vmem:[%s16943_s17 + $0x20] sm:$0xff]  ;;  %v17001_v59 = vpack.c.bf16 %v396_v54, %v396_v54  ;;  %v17003_v60 = vpack.c.bf16 %v398_v55, %v398_v55  ;;  %vm16686_vm0 = vmmov (!%p16004_p12), 0  }
  0xbf   : > { %v579_v3 = vld [vmem:[%s16943_s17 + $0x400] sm:$0xff]  ;;  %v14213_v4 = vcombine.high %v451_v1, %v455_v2  ;;  %v14212_v6 = vcombine.low %v451_v1, %v455_v2 }
  0xc0   : > { %v583_v5 = vld [vmem:[%s16943_s17 + $0x420] sm:$0xff]  ;;  %11235 = vmatprep.mubr.bf16.mxu0 %v17001_v59  ;;  %11276 = vmatprep.mubr.bf16.mxu1 %v17003_v60 }
  0xc1   : > { %v459_v7 = vld [vmem:[%s16943_s17 + $0x40] sm:$0xff]  ;;  %v14341_v9 = vcombine.high %v579_v3, %v583_v5  ;;  %v14340_v10 = vcombine.low %v579_v3, %v583_v5  ;;  %11203 = vmatprep.subr.bf16.mxu0 %v14213_v4 }
  0xc2   : > { %v463_v8 = vld [vmem:[%s16943_s17 + $0x60] sm:$0xff]  ;;  %11204 = vmatpush1.bf16.msra.mxu0 %v14212_v6 }
  0xc3   : > { %v14221_v11 = vcombine.high %v459_v7, %v463_v8  ;;  %v587_v12 = vld [vmem:[%s16943_s17 + $0x440] sm:$0xff]  ;;  %11244 = vmatprep.subr.bf16.mxu1 %v14341_v9  ;;  %v14220_v19 = vcombine.low %v459_v7, %v463_v8 }
  0xc4   : > { %v591_v13 = vld [vmem:[%s16943_s17 + $0x460] sm:$0xff]  ;;  %11245 = vmatpush1.bf16.msra.mxu1 %v14340_v10 }
  0xc5   : > { %v467_v14 = vld [vmem:[%s16943_s17 + $0x80] sm:$0xff]  ;;  %v14349_v15 = vcombine.high %v587_v12, %v591_v13  ;;  %11205 = vmatprep.subr.bf16.mxu0 %v14221_v11  ;;  %v14348_v20 = vcombine.low %v587_v12, %v591_v13 }
  0xc6   : > { %v471_v16 = vld [vmem:[%s16943_s17 + $0xa0] sm:$0xff]  ;;  %11206 = vmatpush1.bf16.msra.mxu0 %v14220_v19 }
  0xc7   : > { %v595_v17 = vld [vmem:[%s16943_s17 + $0x480] sm:$0xff]  ;;  %v14229_v21 = vcombine.high %v467_v14, %v471_v16  ;;  %11246 = vmatprep.subr.bf16.mxu1 %v14349_v15  ;;  %v14228_v27 = vcombine.low %v467_v14, %v471_v16 }
  0xc8   : > { %v599_v18 = vld [vmem:[%s16943_s17 + $0x4a0] sm:$0xff]  ;;  %11247 = vmatpush1.bf16.msra.mxu1 %v14348_v20 }
  0xc9   : > { %v14357_v22 = vcombine.high %v595_v17, %v599_v18  ;;  %v475_v23 = vld [vmem:[%s16943_s17 + $0xc0] sm:$0xff]  ;;  %11207 = vmatprep.subr.bf16.mxu0 %v14229_v21  ;;  %v14356_v28 = vcombine.low %v595_v17, %v599_v18 }
  0xca   : > { %v479_v24 = vld [vmem:[%s16943_s17 + $0xe0] sm:$0xff]  ;;  %11208 = vmatpush1.bf16.msra.mxu0 %v14228_v27 }
  0xcb   : > { %v603_v25 = vld [vmem:[%s16943_s17 + $0x4c0] sm:$0xff]  ;;  %v14237_v29 = vcombine.high %v475_v23, %v479_v24  ;;  %11248 = vmatprep.subr.bf16.mxu1 %v14357_v22  ;;  %v14236_v35 = vcombine.low %v475_v23, %v479_v24 }
  0xcc   : > { %v607_v26 = vld [vmem:[%s16943_s17 + $0x4e0] sm:$0xff]  ;;  %11249 = vmatpush1.bf16.msra.mxu1 %v14356_v28 }
  0xcd   : > { %v14365_v30 = vcombine.high %v603_v25, %v607_v26  ;;  %v483_v31 = vld [vmem:[%s16943_s17 + $0x100] sm:$0xff]  ;;  %11209 = vmatprep.subr.bf16.mxu0 %v14237_v29  ;;  %v14364_v36 = vcombine.low %v603_v25, %v607_v26 }
  0xce   : > { %v487_v32 = vld [vmem:[%s16943_s17 + $0x120] sm:$0xff]  ;;  %11210 = vmatpush1.bf16.msra.mxu0 %v14236_v35 }
  0xcf   : > { %v611_v33 = vld [vmem:[%s16943_s17 + $0x500] sm:$0xff]  ;;  %v14245_v37 = vcombine.high %v483_v31, %v487_v32  ;;  %11250 = vmatprep.subr.bf16.mxu1 %v14365_v30  ;;  %v14244_v43 = vcombine.low %v483_v31, %v487_v32 }
  0xd0   : > { %v615_v34 = vld [vmem:[%s16943_s17 + $0x520] sm:$0xff]  ;;  %11251 = vmatpush1.bf16.msra.mxu1 %v14364_v36 }
  0xd1   : > { %v14373_v38 = vcombine.high %v611_v33, %v615_v34  ;;  %v491_v39 = vld [vmem:[%s16943_s17 + $0x140] sm:$0xff]  ;;  %11211 = vmatprep.subr.bf16.mxu0 %v14245_v37  ;;  %v14372_v44 = vcombine.low %v611_v33, %v615_v34 }
  0xd2   : > { %v495_v40 = vld [vmem:[%s16943_s17 + $0x160] sm:$0xff]  ;;  %11212 = vmatpush1.bf16.msra.mxu0 %v14244_v43 }
  0xd3   : > { %v619_v41 = vld [vmem:[%s16943_s17 + $0x540] sm:$0xff]  ;;  %v14253_v45 = vcombine.high %v491_v39, %v495_v40  ;;  %11252 = vmatprep.subr.bf16.mxu1 %v14373_v38  ;;  %v14252_v51 = vcombine.low %v491_v39, %v495_v40 }
  0xd4   : > { %v623_v42 = vld [vmem:[%s16943_s17 + $0x560] sm:$0xff]  ;;  %11253 = vmatpush1.bf16.msra.mxu1 %v14372_v44 }
  0xd5   : > { %v14381_v46 = vcombine.high %v619_v41, %v623_v42  ;;  %v499_v47 = vld [vmem:[%s16943_s17 + $0x180] sm:$0xff]  ;;  %11213 = vmatprep.subr.bf16.mxu0 %v14253_v45  ;;  %v14380_v52 = vcombine.low %v619_v41, %v623_v42 }
  0xd6   : > { %v503_v48 = vld [vmem:[%s16943_s17 + $0x1a0] sm:$0xff]  ;;  %11214 = vmatpush1.bf16.msra.mxu0 %v14252_v51 }
  0xd7   : > { %v627_v49 = vld [vmem:[%s16943_s17 + $0x580] sm:$0xff]  ;;  %v14261_v53 = vcombine.high %v499_v47, %v503_v48  ;;  %11254 = vmatprep.subr.bf16.mxu1 %v14381_v46  ;;  %v14260_v63 = vcombine.low %v499_v47, %v503_v48 }
  0xd8   : > { %v631_v50 = vld [vmem:[%s16943_s17 + $0x5a0] sm:$0xff]  ;;  %11255 = vmatpush1.bf16.msra.mxu1 %v14380_v52 }
  0xd9   : > { %v14389_v56 = vcombine.high %v627_v49, %v631_v50  ;;  %v507_v57 = vld [vmem:[%s16943_s17 + $0x1c0] sm:$0xff]  ;;  %11215 = vmatprep.subr.bf16.mxu0 %v14261_v53  ;;  %v14388_v0 = vcombine.low %v627_v49, %v631_v50 }
  0xda   : > { %v511_v58 = vld [vmem:[%s16943_s17 + $0x1e0] sm:$0xff]  ;;  %11216 = vmatpush1.bf16.msra.mxu0 %v14260_v63 }
  0xdb   : > { %v635_v61 = vld [vmem:[%s16943_s17 + $0x5c0] sm:$0xff]  ;;  %v14269_v1 = vcombine.high %v507_v57, %v511_v58  ;;  %11256 = vmatprep.subr.bf16.mxu1 %v14389_v56  ;;  %v14268_v7 = vcombine.low %v507_v57, %v511_v58 }
  0xdc   : > { %v639_v62 = vld [vmem:[%s16943_s17 + $0x5e0] sm:$0xff]  ;;  %11257 = vmatpush1.bf16.msra.mxu1 %v14388_v0 }
  0xdd   : > { %v14397_v2 = vcombine.high %v635_v61, %v639_v62  ;;  %v515_v3 = vld [vmem:[%s16943_s17 + $0x200] sm:$0xff]  ;;  %11217 = vmatprep.subr.bf16.mxu0 %v14269_v1  ;;  %v14396_v8 = vcombine.low %v635_v61, %v639_v62 }
  0xde   : > { %v519_v4 = vld [vmem:[%s16943_s17 + $0x220] sm:$0xff]  ;;  %11218 = vmatpush1.bf16.msra.mxu0 %v14268_v7 }
  0xdf   : > { %v643_v5 = vld [vmem:[%s16943_s17 + $0x600] sm:$0xff]  ;;  %v14277_v9 = vcombine.high %v515_v3, %v519_v4  ;;  %11258 = vmatprep.subr.bf16.mxu1 %v14397_v2  ;;  %v14276_v15 = vcombine.low %v515_v3, %v519_v4 }
  0xe0   : > { %v647_v6 = vld [vmem:[%s16943_s17 + $0x620] sm:$0xff]  ;;  %11259 = vmatpush1.bf16.msra.mxu1 %v14396_v8 }
  0xe1   : > { %v14405_v10 = vcombine.high %v643_v5, %v647_v6  ;;  %v523_v11 = vld [vmem:[%s16943_s17 + $0x240] sm:$0xff]  ;;  %11219 = vmatprep.subr.bf16.mxu0 %v14277_v9  ;;  %v14404_v16 = vcombine.low %v643_v5, %v647_v6 }
  0xe2   : > { %v527_v12 = vld [vmem:[%s16943_s17 + $0x260] sm:$0xff]  ;;  %11220 = vmatpush1.bf16.msra.mxu0 %v14276_v15 }
  0xe3   : > { %v651_v13 = vld [vmem:[%s16943_s17 + $0x640] sm:$0xff]  ;;  %v14285_v17 = vcombine.high %v523_v11, %v527_v12  ;;  %11260 = vmatprep.subr.bf16.mxu1 %v14405_v10  ;;  %v14284_v23 = vcombine.low %v523_v11, %v527_v12  ;;  %v397_v12 = vld [vmem:[%s16965_s14 + $0x10] sm:$0xff] }
  0xe4   : > { %v655_v14 = vld [vmem:[%s16943_s17 + $0x660] sm:$0xff]  ;;  %11261 = vmatpush1.bf16.msra.mxu1 %v14404_v16 }
  0xe5   : > { %v14413_v18 = vcombine.high %v651_v13, %v655_v14  ;;  %v531_v19 = vld [vmem:[%s16943_s17 + $0x280] sm:$0xff]  ;;  %11221 = vmatprep.subr.bf16.mxu0 %v14285_v17  ;;  %v14412_v24 = vcombine.low %v651_v13, %v655_v14 }
  0xe6   : > { %v535_v20 = vld [vmem:[%s16943_s17 + $0x2a0] sm:$0xff]  ;;  %11222 = vmatpush1.bf16.msra.mxu0 %v14284_v23  ;;  %v402_v23 = vld [vmem:[%s16965_s14 + $0x38] sm:$0xff] }
  0xe7   : > { %v659_v21 = vld [vmem:[%s16943_s17 + $0x680] sm:$0xff]  ;;  %v14293_v25 = vcombine.high %v531_v19, %v535_v20  ;;  %11262 = vmatprep.subr.bf16.mxu1 %v14413_v18  ;;  %v14292_v31 = vcombine.low %v531_v19, %v535_v20  ;;  %v400_v20 = vld [vmem:[%s16965_s14 + $0x28] sm:$0xff] }
  0xe8   : > { %v663_v22 = vld [vmem:[%s16943_s17 + $0x6a0] sm:$0xff]  ;;  %11263 = vmatpush1.bf16.msra.mxu1 %v14412_v24 }
  0xe9   : > { %v14421_v26 = vcombine.high %v659_v21, %v663_v22  ;;  %v539_v27 = vld [vmem:[%s16943_s17 + $0x2c0] sm:$0xff]  ;;  %11223 = vmatprep.subr.bf16.mxu0 %v14293_v25  ;;  %v14420_v32 = vcombine.low %v659_v21, %v663_v22  ;;  %v17054_v21 = vpack.c.bf16 %v397_v12, %v397_v12 }
  0xea   : > { %v543_v28 = vld [vmem:[%s16943_s17 + $0x2e0] sm:$0xff]  ;;  %11224 = vmatpush1.bf16.msra.mxu0 %v14292_v31 }
  0xeb   : > { %v667_v29 = vld [vmem:[%s16943_s17 + $0x6c0] sm:$0xff]  ;;  %v14301_v33 = vcombine.high %v539_v27, %v543_v28  ;;  %11264 = vmatprep.subr.bf16.mxu1 %v14421_v26  ;;  %v14300_v39 = vcombine.low %v539_v27, %v543_v28 }
  0xec   : > { %v671_v30 = vld [vmem:[%s16943_s17 + $0x6e0] sm:$0xff]  ;;  %11265 = vmatpush1.bf16.msra.mxu1 %v14420_v32  ;;  %v17064_v32 = vpack.c.bf16 %v402_v23, %v402_v23 }
  0xed   : > { %v14429_v34 = vcombine.high %v667_v29, %v671_v30  ;;  %v547_v35 = vld [vmem:[%s16943_s17 + $0x300] sm:$0xff]  ;;  %11225 = vmatprep.subr.bf16.mxu0 %v14301_v33  ;;  %v14428_v40 = vcombine.low %v667_v29, %v671_v30  ;;  %v17059_v29 = vpack.c.bf16 %v400_v20, %v400_v20 }
  0xee   : > { %v551_v36 = vld [vmem:[%s16943_s17 + $0x320] sm:$0xff]  ;;  %11226 = vmatpush1.bf16.msra.mxu0 %v14300_v39 }
  0xef   : > { %v675_v37 = vld [vmem:[%s16943_s17 + $0x700] sm:$0xff]  ;;  %v14309_v41 = vcombine.high %v547_v35, %v551_v36  ;;  %11266 = vmatprep.subr.bf16.mxu1 %v14429_v34  ;;  %v14308_v47 = vcombine.low %v547_v35, %v551_v36 }
  0xf0   : > { %v679_v38 = vld [vmem:[%s16943_s17 + $0x720] sm:$0xff]  ;;  %11267 = vmatpush1.bf16.msra.mxu1 %v14428_v40 }
  0xf1   : > { %v14437_v42 = vcombine.high %v675_v37, %v679_v38  ;;  %v555_v43 = vld [vmem:[%s16943_s17 + $0x340] sm:$0xff]  ;;  %11227 = vmatprep.subr.bf16.mxu0 %v14309_v41  ;;  %v14436_v48 = vcombine.low %v675_v37, %v679_v38 }
  0xf2   : > { %v559_v44 = vld [vmem:[%s16943_s17 + $0x360] sm:$0xff]  ;;  %11228 = vmatpush1.bf16.msra.mxu0 %v14308_v47 }
  0xf3   : > { %v683_v45 = vld [vmem:[%s16943_s17 + $0x740] sm:$0xff]  ;;  %v14317_v49 = vcombine.high %v555_v43, %v559_v44  ;;  %11268 = vmatprep.subr.bf16.mxu1 %v14437_v42  ;;  %v14316_v55 = vcombine.low %v555_v43, %v559_v44 }
  0xf4   : > { %v687_v46 = vld [vmem:[%s16943_s17 + $0x760] sm:$0xff]  ;;  %11269 = vmatpush1.bf16.msra.mxu1 %v14436_v48 }
  0xf5   : > { %v14445_v50 = vcombine.high %v683_v45, %v687_v46  ;;  %v563_v51 = vld [vmem:[%s16943_s17 + $0x380] sm:$0xff]  ;;  %11229 = vmatprep.subr.bf16.mxu0 %v14317_v49  ;;  %v14444_v56 = vcombine.low %v683_v45, %v687_v46 }
  0xf6   : > { %v567_v52 = vld [vmem:[%s16943_s17 + $0x3a0] sm:$0xff]  ;;  %11230 = vmatpush1.bf16.msra.mxu0 %v14316_v55 }
  0xf7   : > { %v691_v53 = vld [vmem:[%s16943_s17 + $0x780] sm:$0xff]  ;;  %v14325_v57 = vcombine.high %v563_v51, %v567_v52  ;;  %11270 = vmatprep.subr.bf16.mxu1 %v14445_v50  ;;  %v14324_v1 = vcombine.low %v563_v51, %v567_v52 }
  0xf8   : > { %v695_v54 = vld [vmem:[%s16943_s17 + $0x7a0] sm:$0xff]  ;;  %11271 = vmatpush1.bf16.msra.mxu1 %v14444_v56 }
  0xf9   : > { %v14453_v58 = vcombine.high %v691_v53, %v695_v54  ;;  %v571_v61 = vld [vmem:[%s16943_s17 + $0x3c0] sm:$0xff]  ;;  %11231 = vmatprep.subr.bf16.mxu0 %v14325_v57  ;;  %v14452_v2 = vcombine.low %v691_v53, %v695_v54 }
  0xfa   : > { %v575_v62 = vld [vmem:[%s16943_s17 + $0x3e0] sm:$0xff]  ;;  %11232 = vmatpush1.bf16.msra.mxu0 %v14324_v1 }
  0xfb   : > { %v699_v63 = vld [vmem:[%s16943_s17 + $0x7c0] sm:$0xff]  ;;  %v14333_v3 = vcombine.high %v571_v61, %v575_v62  ;;  %11272 = vmatprep.subr.bf16.mxu1 %v14453_v58  ;;  %v14332_v9 = vcombine.low %v571_v61, %v575_v62 }
  0xfc   : > { %v703_v0 = vld [vmem:[%s16943_s17 + $0x7e0] sm:$0xff]  ;;  %11273 = vmatpush1.bf16.msra.mxu1 %v14452_v2 }
  0xfd   : > { %v14461_v4 = vcombine.high %v699_v63, %v703_v0  ;;  %v707_v5 = vld [vmem:[%s16943_s17 + $0x800] sm:$0xff]  ;;  %11233 = vmatprep.subr.bf16.mxu0 %v14333_v3  ;;  %v14460_v11 = vcombine.low %v699_v63, %v703_v0 }
  0xfe   : > { %v711_v6 = vld [vmem:[%s16943_s17 + $0x820] sm:$0xff]  ;;  %11234 = vmatpush1.bf16.msra.mxu0 %v14332_v9 }
  0xff   : > { %v835_v7 = vld [vmem:[%s16943_s17 + $0xc00] sm:$0xff]  ;;  %v14469_v13 = vcombine.high %v707_v5, %v711_v6  ;;  %11274 = vmatprep.subr.bf16.mxu1 %v14461_v4  ;;  %v14468_v22 = vcombine.low %v707_v5, %v711_v6 }
 0x100   : > { %v839_v8 = vld [vmem:[%s16943_s17 + $0xc20] sm:$0xff]  ;;  %11275 = vmatpush1.bf16.msra.mxu1 %v14460_v11 }
 0x101   : > { %v395_v10 = vld [vmem:[%s16965_s14] sm:$0xff]  ;;  %v14597_v14 = vcombine.high %v835_v7, %v839_v8  ;;  %11285 = vmatprep.subr.bf16.mxu0 %v14469_v13  ;;  %v14596_v24 = vcombine.low %v835_v7, %v839_v8 }
 0x102   : > { %v715_v15 = vld [vmem:[%s16943_s17 + $0x840] sm:$0xff]  ;;  %v17049_v17 = vpack.c.bf16 %v395_v10, %v395_v10 }
 0x103   : > { %v719_v16 = vld [vmem:[%s16943_s17 + $0x860] sm:$0xff]  ;;  %11326 = vmatprep.subr.bf16.mxu1 %v14597_v14  ;;  %11277 = vmatmul.mubr.bf16.vlgmr.msra.gmra.mrb[0].mxu1 %v17054_v21 }
 0x104   : > { %v843_v18 = vld [vmem:[%s16943_s17 + $0xc40] sm:$0xff]  ;;  %v14477_v25 = vcombine.high %v715_v15, %v719_v16  ;;  %11236 = vmatmul.mubr.bf16.vlgmr.msra.gmra.mrb[0].mxu0 %v17049_v17  ;;  %v14476_v33 = vcombine.low %v715_v15, %v719_v16  ;;  %11327 = vmatpush1.bf16.msra.mxu1 %v14596_v24 }
 0x105   : > { %v847_v19 = vld [vmem:[%s16943_s17 + $0xc60] sm:$0xff]  ;;  %11286 = vmatpush1.bf16.msra.mxu0 %v14468_v22  ;;  %11317 = vmatprep.mubr.bf16.mxu0 %v17059_v29 }
 0x106   : > { %v14605_v26 = vcombine.high %v843_v18, %v847_v19  ;;  %v723_v27 = vld [vmem:[%s16943_s17 + $0x880] sm:$0xff]  ;;  %11287 = vmatprep.subr.bf16.mxu0 %v14477_v25  ;;  %v14604_v34 = vcombine.low %v843_v18, %v847_v19  ;;  %11358 = vmatprep.mubr.bf16.mxu1 %v17064_v32 }
 0x107   : > { %v727_v28 = vld [vmem:[%s16943_s17 + $0x8a0] sm:$0xff] }
 0x108   : > { %v851_v30 = vld [vmem:[%s16943_s17 + $0xc80] sm:$0xff]  ;;  %v14485_v35 = vcombine.high %v723_v27, %v727_v28  ;;  %11328 = vmatprep.subr.bf16.mxu1 %v14605_v26  ;;  %v14484_v41 = vcombine.low %v723_v27, %v727_v28 }
 0x109   : > { %v855_v31 = vld [vmem:[%s16943_s17 + $0xca0] sm:$0xff]  ;;  %11288 = vmatpush1.bf16.msra.mxu0 %v14476_v33  ;;  %11329 = vmatpush1.bf16.msra.mxu1 %v14604_v34 }
 0x10a   : > { %v14613_v36 = vcombine.high %v851_v30, %v855_v31  ;;  %v731_v37 = vld [vmem:[%s16943_s17 + $0x8c0] sm:$0xff]  ;;  %11289 = vmatprep.subr.bf16.mxu0 %v14485_v35  ;;  %v14612_v42 = vcombine.low %v851_v30, %v855_v31 }
 0x10b   : > { %v735_v38 = vld [vmem:[%s16943_s17 + $0x8e0] sm:$0xff] }
 0x10c   : > { %v859_v39 = vld [vmem:[%s16943_s17 + $0xcc0] sm:$0xff]  ;;  %v14493_v43 = vcombine.high %v731_v37, %v735_v38  ;;  %11330 = vmatprep.subr.bf16.mxu1 %v14613_v36  ;;  %v14492_v49 = vcombine.low %v731_v37, %v735_v38 }
 0x10d   : > { %v863_v40 = vld [vmem:[%s16943_s17 + $0xce0] sm:$0xff]  ;;  %11290 = vmatpush1.bf16.msra.mxu0 %v14484_v41  ;;  %11331 = vmatpush1.bf16.msra.mxu1 %v14612_v42 }
 0x10e   : > { %v14621_v44 = vcombine.high %v859_v39, %v863_v40  ;;  %v739_v45 = vld [vmem:[%s16943_s17 + $0x900] sm:$0xff]  ;;  %11291 = vmatprep.subr.bf16.mxu0 %v14493_v43  ;;  %v14620_v50 = vcombine.low %v859_v39, %v863_v40 }
 0x10f   : > { %v743_v46 = vld [vmem:[%s16943_s17 + $0x920] sm:$0xff] }
 0x110   : > { %v867_v47 = vld [vmem:[%s16943_s17 + $0xd00] sm:$0xff]  ;;  %v14501_v51 = vcombine.high %v739_v45, %v743_v46  ;;  %11332 = vmatprep.subr.bf16.mxu1 %v14621_v44  ;;  %v14500_v57 = vcombine.low %v739_v45, %v743_v46 }
 0x111   : > { %v871_v48 = vld [vmem:[%s16943_s17 + $0xd20] sm:$0xff]  ;;  %11292 = vmatpush1.bf16.msra.mxu0 %v14492_v49  ;;  %11333 = vmatpush1.bf16.msra.mxu1 %v14620_v50 }
 0x112   : > { %v14629_v52 = vcombine.high %v867_v47, %v871_v48  ;;  %v747_v53 = vld [vmem:[%s16943_s17 + $0x940] sm:$0xff]  ;;  %11293 = vmatprep.subr.bf16.mxu0 %v14501_v51  ;;  %v14628_v58 = vcombine.low %v867_v47, %v871_v48 }
 0x113   : > { %v751_v54 = vld [vmem:[%s16943_s17 + $0x960] sm:$0xff] }
 0x114   : > { %v875_v55 = vld [vmem:[%s16943_s17 + $0xd40] sm:$0xff]  ;;  %v14509_v61 = vcombine.high %v747_v53, %v751_v54  ;;  %11334 = vmatprep.subr.bf16.mxu1 %v14629_v52  ;;  %v14508_v3 = vcombine.low %v747_v53, %v751_v54 }
 0x115   : > { %v879_v56 = vld [vmem:[%s16943_s17 + $0xd60] sm:$0xff]  ;;  %11294 = vmatpush1.bf16.msra.mxu0 %v14500_v57  ;;  %11335 = vmatpush1.bf16.msra.mxu1 %v14628_v58 }
 0x116   : > { %v14637_v62 = vcombine.high %v875_v55, %v879_v56  ;;  %v755_v63 = vld [vmem:[%s16943_s17 + $0x980] sm:$0xff]  ;;  %11295 = vmatprep.subr.bf16.mxu0 %v14509_v61  ;;  %v14636_v4 = vcombine.low %v875_v55, %v879_v56 }
 0x117   : > { %v759_v0 = vld [vmem:[%s16943_s17 + $0x9a0] sm:$0xff] }
 0x118   : > { %v883_v1 = vld [vmem:[%s16943_s17 + $0xd80] sm:$0xff]  ;;  %v14517_v5 = vcombine.high %v755_v63, %v759_v0  ;;  %11336 = vmatprep.subr.bf16.mxu1 %v14637_v62  ;;  %v14516_v11 = vcombine.low %v755_v63, %v759_v0 }
 0x119   : > { %v887_v2 = vld [vmem:[%s16943_s17 + $0xda0] sm:$0xff]  ;;  %11296 = vmatpush1.bf16.msra.mxu0 %v14508_v3  ;;  %11337 = vmatpush1.bf16.msra.mxu1 %v14636_v4 }
 0x11a   : > { %v14645_v6 = vcombine.high %v883_v1, %v887_v2  ;;  %v763_v7 = vld [vmem:[%s16943_s17 + $0x9c0] sm:$0xff]  ;;  %11297 = vmatprep.subr.bf16.mxu0 %v14517_v5  ;;  %v14644_v12 = vcombine.low %v883_v1, %v887_v2 }
 0x11b   : > { %v767_v8 = vld [vmem:[%s16943_s17 + $0x9e0] sm:$0xff] }
 0x11c   : > { %v891_v9 = vld [vmem:[%s16943_s17 + $0xdc0] sm:$0xff]  ;;  %v14525_v13 = vcombine.high %v763_v7, %v767_v8  ;;  %11338 = vmatprep.subr.bf16.mxu1 %v14645_v6  ;;  %v14524_v20 = vcombine.low %v763_v7, %v767_v8 }
 0x11d   : > { %v895_v10 = vld [vmem:[%s16943_s17 + $0xde0] sm:$0xff]  ;;  %11298 = vmatpush1.bf16.msra.mxu0 %v14516_v11  ;;  %11339 = vmatpush1.bf16.msra.mxu1 %v14644_v12 }
 0x11e   : > { %v14653_v14 = vcombine.high %v891_v9, %v895_v10  ;;  %v771_v15 = vld [vmem:[%s16943_s17 + $0xa00] sm:$0xff]  ;;  %11299 = vmatprep.subr.bf16.mxu0 %v14525_v13  ;;  %v14652_v22 = vcombine.low %v891_v9, %v895_v10 }
 0x11f   : > { %v775_v16 = vld [vmem:[%s16943_s17 + $0xa20] sm:$0xff] }
 0x120   : > { %v899_v18 = vld [vmem:[%s16943_s17 + $0xe00] sm:$0xff]  ;;  %v14533_v23 = vcombine.high %v771_v15, %v775_v16  ;;  %11340 = vmatprep.subr.bf16.mxu1 %v14653_v14  ;;  %v14532_v30 = vcombine.low %v771_v15, %v775_v16 }
 0x121   : > { %v903_v19 = vld [vmem:[%s16943_s17 + $0xe20] sm:$0xff]  ;;  %11300 = vmatpush1.bf16.msra.mxu0 %v14524_v20  ;;  %11341 = vmatpush1.bf16.msra.mxu1 %v14652_v22 }
 0x122   : > { %v14661_v24 = vcombine.high %v899_v18, %v903_v19  ;;  %v779_v25 = vld [vmem:[%s16943_s17 + $0xa40] sm:$0xff]  ;;  %11301 = vmatprep.subr.bf16.mxu0 %v14533_v23  ;;  %v14660_v31 = vcombine.low %v899_v18, %v903_v19 }
 0x123   : > { %v783_v26 = vld [vmem:[%s16943_s17 + $0xa60] sm:$0xff] }
 0x124   : > { %v907_v27 = vld [vmem:[%s16943_s17 + $0xe40] sm:$0xff]  ;;  %v14541_v33 = vcombine.high %v779_v25, %v783_v26  ;;  %11342 = vmatprep.subr.bf16.mxu1 %v14661_v24  ;;  %v14540_v39 = vcombine.low %v779_v25, %v783_v26 }
 0x125   : > { %v911_v28 = vld [vmem:[%s16943_s17 + $0xe60] sm:$0xff]  ;;  %11302 = vmatpush1.bf16.msra.mxu0 %v14532_v30  ;;  %11343 = vmatpush1.bf16.msra.mxu1 %v14660_v31  ;;  %v401_v31 = vld [vmem:[%s16965_s14 + $0x30] sm:$0xff] }
 0x126   : > { %v14669_v34 = vcombine.high %v907_v27, %v911_v28  ;;  %v787_v35 = vld [vmem:[%s16943_s17 + $0xa80] sm:$0xff]  ;;  %11303 = vmatprep.subr.bf16.mxu0 %v14541_v33  ;;  %v14668_v40 = vcombine.low %v907_v27, %v911_v28 }
 0x127   : > { %v791_v36 = vld [vmem:[%s16943_s17 + $0xaa0] sm:$0xff] }
 0x128   : > { %v915_v37 = vld [vmem:[%s16943_s17 + $0xe80] sm:$0xff]  ;;  %v14549_v41 = vcombine.high %v787_v35, %v791_v36  ;;  %11344 = vmatprep.subr.bf16.mxu1 %v14669_v34  ;;  %v14548_v47 = vcombine.low %v787_v35, %v791_v36 }
 0x129   : > { %v919_v38 = vld [vmem:[%s16943_s17 + $0xea0] sm:$0xff]  ;;  %11304 = vmatpush1.bf16.msra.mxu0 %v14540_v39  ;;  %11345 = vmatpush1.bf16.msra.mxu1 %v14668_v40  ;;  %v404_v40 = vld [vmem:[%s16965_s14 + $0x48] sm:$0xff] }
 0x12a   : > { %v14677_v42 = vcombine.high %v915_v37, %v919_v38  ;;  %v795_v43 = vld [vmem:[%s16943_s17 + $0xac0] sm:$0xff]  ;;  %11305 = vmatprep.subr.bf16.mxu0 %v14549_v41  ;;  %v14676_v48 = vcombine.low %v915_v37, %v919_v38  ;;  %v17134_v41 = vpack.c.bf16 %v401_v31, %v401_v31 }
 0x12b   : > { %v799_v44 = vld [vmem:[%s16943_s17 + $0xae0] sm:$0xff] }
 0x12c   : > { %v923_v45 = vld [vmem:[%s16943_s17 + $0xec0] sm:$0xff]  ;;  %v14557_v49 = vcombine.high %v795_v43, %v799_v44  ;;  %11346 = vmatprep.subr.bf16.mxu1 %v14677_v42  ;;  %v14556_v55 = vcombine.low %v795_v43, %v799_v44  ;;  %v406_v43 = vld [vmem:[%s16965_s14 + $0x58] sm:$0xff] }
 0x12d   : > { %v927_v46 = vld [vmem:[%s16943_s17 + $0xee0] sm:$0xff]  ;;  %11306 = vmatpush1.bf16.msra.mxu0 %v14548_v47  ;;  %11347 = vmatpush1.bf16.msra.mxu1 %v14676_v48 }
 0x12e   : > { %v14685_v50 = vcombine.high %v923_v45, %v927_v46  ;;  %v803_v51 = vld [vmem:[%s16943_s17 + $0xb00] sm:$0xff]  ;;  %11307 = vmatprep.subr.bf16.mxu0 %v14557_v49  ;;  %v14684_v56 = vcombine.low %v923_v45, %v927_v46  ;;  %v17139_v49 = vpack.c.bf16 %v404_v40, %v404_v40 }
 0x12f   : > { %v807_v52 = vld [vmem:[%s16943_s17 + $0xb20] sm:$0xff] }
 0x130   : > { %v931_v53 = vld [vmem:[%s16943_s17 + $0xf00] sm:$0xff]  ;;  %v14565_v57 = vcombine.high %v803_v51, %v807_v52  ;;  %11348 = vmatprep.subr.bf16.mxu1 %v14685_v50  ;;  %v14564_v1 = vcombine.low %v803_v51, %v807_v52  ;;  %v17144_v52 = vpack.c.bf16 %v406_v43, %v406_v43 }
 0x131   : > { %v935_v54 = vld [vmem:[%s16943_s17 + $0xf20] sm:$0xff]  ;;  %11308 = vmatpush1.bf16.msra.mxu0 %v14556_v55  ;;  %11349 = vmatpush1.bf16.msra.mxu1 %v14684_v56 }
 0x132   : > { %v14693_v58 = vcombine.high %v931_v53, %v935_v54  ;;  %v811_v61 = vld [vmem:[%s16943_s17 + $0xb40] sm:$0xff]  ;;  %11309 = vmatprep.subr.bf16.mxu0 %v14565_v57  ;;  %v14692_v2 = vcombine.low %v931_v53, %v935_v54 }
 0x133   : > { %v815_v62 = vld [vmem:[%s16943_s17 + $0xb60] sm:$0xff] }
 0x134   : > { %v939_v63 = vld [vmem:[%s16943_s17 + $0xf40] sm:$0xff]  ;;  %v14573_v3 = vcombine.high %v811_v61, %v815_v62  ;;  %11350 = vmatprep.subr.bf16.mxu1 %v14693_v58  ;;  %v14572_v9 = vcombine.low %v811_v61, %v815_v62 }
 0x135   : > { %v943_v0 = vld [vmem:[%s16943_s17 + $0xf60] sm:$0xff]  ;;  %11310 = vmatpush1.bf16.msra.mxu0 %v14564_v1  ;;  %11351 = vmatpush1.bf16.msra.mxu1 %v14692_v2 }
 0x136   : > { %v14701_v4 = vcombine.high %v939_v63, %v943_v0  ;;  %v819_v5 = vld [vmem:[%s16943_s17 + $0xb80] sm:$0xff]  ;;  %11311 = vmatprep.subr.bf16.mxu0 %v14573_v3  ;;  %v14700_v10 = vcombine.low %v939_v63, %v943_v0 }
 0x137   : > { %v823_v6 = vld [vmem:[%s16943_s17 + $0xba0] sm:$0xff] }
 0x138   : > { %v947_v7 = vld [vmem:[%s16943_s17 + $0xf80] sm:$0xff]  ;;  %v14581_v11 = vcombine.high %v819_v5, %v823_v6  ;;  %11352 = vmatprep.subr.bf16.mxu1 %v14701_v4  ;;  %v14580_v18 = vcombine.low %v819_v5, %v823_v6 }
 0x139   : > { %v951_v8 = vld [vmem:[%s16943_s17 + $0xfa0] sm:$0xff]  ;;  %11312 = vmatpush1.bf16.msra.mxu0 %v14572_v9  ;;  %11353 = vmatpush1.bf16.msra.mxu1 %v14700_v10 }
 0x13a   : > { %v14709_v12 = vcombine.high %v947_v7, %v951_v8  ;;  %v827_v13 = vld [vmem:[%s16943_s17 + $0xbc0] sm:$0xff]  ;;  %11313 = vmatprep.subr.bf16.mxu0 %v14581_v11  ;;  %v14708_v19 = vcombine.low %v947_v7, %v951_v8 }
 0x13b   : > { %v831_v14 = vld [vmem:[%s16943_s17 + $0xbe0] sm:$0xff] }
 0x13c   : > { %v955_v15 = vld [vmem:[%s16943_s17 + $0xfc0] sm:$0xff]  ;;  %v14589_v20 = vcombine.high %v827_v13, %v831_v14  ;;  %11354 = vmatprep.subr.bf16.mxu1 %v14709_v12  ;;  %v14588_v27 = vcombine.low %v827_v13, %v831_v14 }
 0x13d   : > { %v959_v16 = vld [vmem:[%s16943_s17 + $0xfe0] sm:$0xff]  ;;  %11314 = vmatpush1.bf16.msra.mxu0 %v14580_v18  ;;  %11355 = vmatpush1.bf16.msra.mxu1 %v14708_v19 }
 0x13e   : > { %v14717_v22 = vcombine.high %v955_v15, %v959_v16  ;;  %v963_v23 = vld [vmem:[%s16943_s17 + $0x1000] sm:$0xff]  ;;  %11315 = vmatprep.subr.bf16.mxu0 %v14589_v20  ;;  %v14716_v30 = vcombine.low %v955_v15, %v959_v16 }
 0x13f   : > { %v967_v24 = vld [vmem:[%s16943_s17 + $0x1020] sm:$0xff] }
 0x140   : > { %v1091_v25 = vld [vmem:[%s16943_s17 + $0x1400] sm:$0xff]  ;;  %v14725_v33 = vcombine.high %v963_v23, %v967_v24  ;;  %11356 = vmatprep.subr.bf16.mxu1 %v14717_v22  ;;  %v14724_v42 = vcombine.low %v963_v23, %v967_v24 }
 0x141   : > { %v1095_v26 = vld [vmem:[%s16943_s17 + $0x1420] sm:$0xff]  ;;  %11316 = vmatpush1.bf16.msra.mxu0 %v14588_v27  ;;  %11357 = vmatpush1.bf16.msra.mxu1 %v14716_v30 }
 0x142   : > { %v399_v28 = vld [vmem:[%s16965_s14 + $0x20] sm:$0xff]  ;;  %v14853_v34 = vcombine.high %v1091_v25, %v1095_v26  ;;  %11367 = vmatprep.subr.bf16.mxu0 %v14725_v33  ;;  %v14852_v44 = vcombine.low %v1091_v25, %v1095_v26 }
 0x143   : > { %v971_v35 = vld [vmem:[%s16943_s17 + $0x1040] sm:$0xff]  ;;  %v17129_v37 = vpack.c.bf16 %v399_v28, %v399_v28 }
 0x144   : > { %v975_v36 = vld [vmem:[%s16943_s17 + $0x1060] sm:$0xff]  ;;  %11408 = vmatprep.subr.bf16.mxu1 %v14853_v34  ;;  %11359 = vmatmul.mubr.bf16.vlgmr.msra.gmra.mrb[4].mxu1 %v17134_v41 }
 0x145   : > { %v1099_v38 = vld [vmem:[%s16943_s17 + $0x1440] sm:$0xff]  ;;  %v14733_v45 = vcombine.high %v971_v35, %v975_v36  ;;  %11318 = vmatmul.mubr.bf16.vlgmr.msra.gmra.mrb[4].mxu0 %v17129_v37  ;;  %v14732_v53 = vcombine.low %v971_v35, %v975_v36  ;;  %11409 = vmatpush1.bf16.msra.mxu1 %v14852_v44 }
 0x146   : > { %v1103_v39 = vld [vmem:[%s16943_s17 + $0x1460] sm:$0xff]  ;;  %11368 = vmatpush1.bf16.msra.mxu0 %v14724_v42  ;;  %11399 = vmatprep.mubr.bf16.mxu0 %v17139_v49 }
 0x147   : > { %v14861_v46 = vcombine.high %v1099_v38, %v1103_v39  ;;  %v979_v47 = vld [vmem:[%s16943_s17 + $0x1080] sm:$0xff]  ;;  %11369 = vmatprep.subr.bf16.mxu0 %v14733_v45  ;;  %v14860_v54 = vcombine.low %v1099_v38, %v1103_v39  ;;  %11440 = vmatprep.mubr.bf16.mxu1 %v17144_v52 }
 0x148   : > { %v983_v48 = vld [vmem:[%s16943_s17 + $0x10a0] sm:$0xff] }
 0x149   : > { %v1107_v50 = vld [vmem:[%s16943_s17 + $0x1480] sm:$0xff]  ;;  %v14741_v55 = vcombine.high %v979_v47, %v983_v48  ;;  %11410 = vmatprep.subr.bf16.mxu1 %v14861_v46  ;;  %v14740_v63 = vcombine.low %v979_v47, %v983_v48 }
 0x14a   : > { %v1111_v51 = vld [vmem:[%s16943_s17 + $0x14a0] sm:$0xff]  ;;  %11370 = vmatpush1.bf16.msra.mxu0 %v14732_v53  ;;  %11411 = vmatpush1.bf16.msra.mxu1 %v14860_v54 }
 0x14b   : > { %v14869_v56 = vcombine.high %v1107_v50, %v1111_v51  ;;  %v987_v57 = vld [vmem:[%s16943_s17 + $0x10c0] sm:$0xff]  ;;  %11371 = vmatprep.subr.bf16.mxu0 %v14741_v55  ;;  %v14868_v0 = vcombine.low %v1107_v50, %v1111_v51 }
 0x14c   : > { %v991_v58 = vld [vmem:[%s16943_s17 + $0x10e0] sm:$0xff] }
 0x14d   : > { %v1115_v61 = vld [vmem:[%s16943_s17 + $0x14c0] sm:$0xff]  ;;  %v14749_v1 = vcombine.high %v987_v57, %v991_v58  ;;  %11412 = vmatprep.subr.bf16.mxu1 %v14869_v56  ;;  %v14748_v7 = vcombine.low %v987_v57, %v991_v58 }
 0x14e   : > { %v1119_v62 = vld [vmem:[%s16943_s17 + $0x14e0] sm:$0xff]  ;;  %11372 = vmatpush1.bf16.msra.mxu0 %v14740_v63  ;;  %11413 = vmatpush1.bf16.msra.mxu1 %v14868_v0 }
 0x14f   : > { %v14877_v2 = vcombine.high %v1115_v61, %v1119_v62  ;;  %v995_v3 = vld [vmem:[%s16943_s17 + $0x1100] sm:$0xff]  ;;  %11373 = vmatprep.subr.bf16.mxu0 %v14749_v1  ;;  %v14876_v8 = vcombine.low %v1115_v61, %v1119_v62 }
 0x150   : > { %v999_v4 = vld [vmem:[%s16943_s17 + $0x1120] sm:$0xff] }
 0x151   : > { %v1123_v5 = vld [vmem:[%s16943_s17 + $0x1500] sm:$0xff]  ;;  %v14757_v9 = vcombine.high %v995_v3, %v999_v4  ;;  %11414 = vmatprep.subr.bf16.mxu1 %v14877_v2  ;;  %v14756_v15 = vcombine.low %v995_v3, %v999_v4 }
 0x152   : > { %v1127_v6 = vld [vmem:[%s16943_s17 + $0x1520] sm:$0xff]  ;;  %11374 = vmatpush1.bf16.msra.mxu0 %v14748_v7  ;;  %11415 = vmatpush1.bf16.msra.mxu1 %v14876_v8 }
 0x153   : > { %v14885_v10 = vcombine.high %v1123_v5, %v1127_v6  ;;  %v1003_v11 = vld [vmem:[%s16943_s17 + $0x1140] sm:$0xff]  ;;  %11375 = vmatprep.subr.bf16.mxu0 %v14757_v9  ;;  %v14884_v16 = vcombine.low %v1123_v5, %v1127_v6 }
 0x154   : > { %v1007_v12 = vld [vmem:[%s16943_s17 + $0x1160] sm:$0xff] }
 0x155   : > { %v1131_v13 = vld [vmem:[%s16943_s17 + $0x1540] sm:$0xff]  ;;  %v14765_v18 = vcombine.high %v1003_v11, %v1007_v12  ;;  %11416 = vmatprep.subr.bf16.mxu1 %v14885_v10  ;;  %v14764_v25 = vcombine.low %v1003_v11, %v1007_v12 }
 0x156   : > { %v1135_v14 = vld [vmem:[%s16943_s17 + $0x1560] sm:$0xff]  ;;  %11376 = vmatpush1.bf16.msra.mxu0 %v14756_v15  ;;  %11417 = vmatpush1.bf16.msra.mxu1 %v14884_v16 }
 0x157   : > { %v14893_v19 = vcombine.high %v1131_v13, %v1135_v14  ;;  %v1011_v20 = vld [vmem:[%s16943_s17 + $0x1180] sm:$0xff]  ;;  %11377 = vmatprep.subr.bf16.mxu0 %v14765_v18  ;;  %v14892_v26 = vcombine.low %v1131_v13, %v1135_v14 }
 0x158   : > { %v1015_v22 = vld [vmem:[%s16943_s17 + $0x11a0] sm:$0xff] }
 0x159   : > { %v1139_v23 = vld [vmem:[%s16943_s17 + $0x1580] sm:$0xff]  ;;  %v14773_v27 = vcombine.high %v1011_v20, %v1015_v22  ;;  %11418 = vmatprep.subr.bf16.mxu1 %v14893_v19  ;;  %v14772_v35 = vcombine.low %v1011_v20, %v1015_v22 }
 0x15a   : > { %v1143_v24 = vld [vmem:[%s16943_s17 + $0x15a0] sm:$0xff]  ;;  %11378 = vmatpush1.bf16.msra.mxu0 %v14764_v25  ;;  %11419 = vmatpush1.bf16.msra.mxu1 %v14892_v26 }
 0x15b   : > { %v14901_v28 = vcombine.high %v1139_v23, %v1143_v24  ;;  %v1019_v30 = vld [vmem:[%s16943_s17 + $0x11c0] sm:$0xff]  ;;  %11379 = vmatprep.subr.bf16.mxu0 %v14773_v27  ;;  %v14900_v36 = vcombine.low %v1139_v23, %v1143_v24 }
 0x15c   : > { %v1023_v31 = vld [vmem:[%s16943_s17 + $0x11e0] sm:$0xff] }
 0x15d   : > { %v1147_v33 = vld [vmem:[%s16943_s17 + $0x15c0] sm:$0xff]  ;;  %v14781_v38 = vcombine.high %v1019_v30, %v1023_v31  ;;  %11420 = vmatprep.subr.bf16.mxu1 %v14901_v28  ;;  %v14780_v45 = vcombine.low %v1019_v30, %v1023_v31 }
 0x15e   : > { %v1151_v34 = vld [vmem:[%s16943_s17 + $0x15e0] sm:$0xff]  ;;  %11380 = vmatpush1.bf16.msra.mxu0 %v14772_v35  ;;  %11421 = vmatpush1.bf16.msra.mxu1 %v14900_v36 }
 0x15f   : > { %v14909_v39 = vcombine.high %v1147_v33, %v1151_v34  ;;  %v1027_v40 = vld [vmem:[%s16943_s17 + $0x1200] sm:$0xff]  ;;  %11381 = vmatprep.subr.bf16.mxu0 %v14781_v38  ;;  %v14908_v46 = vcombine.low %v1147_v33, %v1151_v34 }
 0x160   : > { %v1031_v42 = vld [vmem:[%s16943_s17 + $0x1220] sm:$0xff] }
 0x161   : > { %v1155_v43 = vld [vmem:[%s16943_s17 + $0x1600] sm:$0xff]  ;;  %v14789_v47 = vcombine.high %v1027_v40, %v1031_v42  ;;  %11422 = vmatprep.subr.bf16.mxu1 %v14909_v39  ;;  %v14788_v55 = vcombine.low %v1027_v40, %v1031_v42 }
 0x162   : > { %v1159_v44 = vld [vmem:[%s16943_s17 + $0x1620] sm:$0xff]  ;;  %11382 = vmatpush1.bf16.msra.mxu0 %v14780_v45  ;;  %11423 = vmatpush1.bf16.msra.mxu1 %v14908_v46 }
 0x163   : > { %v14917_v48 = vcombine.high %v1155_v43, %v1159_v44  ;;  %v1035_v50 = vld [vmem:[%s16943_s17 + $0x1240] sm:$0xff]  ;;  %11383 = vmatprep.subr.bf16.mxu0 %v14789_v47  ;;  %v14916_v56 = vcombine.low %v1155_v43, %v1159_v44 }
 0x164   : > { %v1039_v51 = vld [vmem:[%s16943_s17 + $0x1260] sm:$0xff] }
 0x165   : > { %v1163_v53 = vld [vmem:[%s16943_s17 + $0x1640] sm:$0xff]  ;;  %v14797_v57 = vcombine.high %v1035_v50, %v1039_v51  ;;  %11424 = vmatprep.subr.bf16.mxu1 %v14917_v48  ;;  %v14796_v1 = vcombine.low %v1035_v50, %v1039_v51 }
 0x166   : > { %v1167_v54 = vld [vmem:[%s16943_s17 + $0x1660] sm:$0xff]  ;;  %11384 = vmatpush1.bf16.msra.mxu0 %v14788_v55  ;;  %11425 = vmatpush1.bf16.msra.mxu1 %v14916_v56 }
 0x167   : > { %v14925_v58 = vcombine.high %v1163_v53, %v1167_v54  ;;  %v1043_v61 = vld [vmem:[%s16943_s17 + $0x1280] sm:$0xff]  ;;  %11385 = vmatprep.subr.bf16.mxu0 %v14797_v57  ;;  %v14924_v2 = vcombine.low %v1163_v53, %v1167_v54 }
 0x168   : > { %v1047_v62 = vld [vmem:[%s16943_s17 + $0x12a0] sm:$0xff] }
 0x169   : > { %v1171_v63 = vld [vmem:[%s16943_s17 + $0x1680] sm:$0xff]  ;;  %v14805_v3 = vcombine.high %v1043_v61, %v1047_v62  ;;  %11426 = vmatprep.subr.bf16.mxu1 %v14925_v58  ;;  %v14804_v9 = vcombine.low %v1043_v61, %v1047_v62  ;;  %v405_v62 = vld [vmem:[%s16965_s14 + $0x50] sm:$0xff] }
 0x16a   : > { %v1175_v0 = vld [vmem:[%s16943_s17 + $0x16a0] sm:$0xff]  ;;  %11386 = vmatpush1.bf16.msra.mxu0 %v14796_v1  ;;  %11427 = vmatpush1.bf16.msra.mxu1 %v14924_v2 }
 0x16b   : > { %v14933_v4 = vcombine.high %v1171_v63, %v1175_v0  ;;  %v1051_v5 = vld [vmem:[%s16943_s17 + $0x12c0] sm:$0xff]  ;;  %11387 = vmatprep.subr.bf16.mxu0 %v14805_v3  ;;  %v14932_v10 = vcombine.low %v1171_v63, %v1175_v0 }
 0x16c   : > { %v1055_v6 = vld [vmem:[%s16943_s17 + $0x12e0] sm:$0xff] }
 0x16d   : > { %v1179_v7 = vld [vmem:[%s16943_s17 + $0x16c0] sm:$0xff]  ;;  %v14813_v11 = vcombine.high %v1051_v5, %v1055_v6  ;;  %11428 = vmatprep.subr.bf16.mxu1 %v14933_v4  ;;  %v14812_v18 = vcombine.low %v1051_v5, %v1055_v6  ;;  %v408_v6 = vld [vmem:[%s16965_s14 + $0x68] sm:$0xff] }
 0x16e   : > { %v1183_v8 = vld [vmem:[%s16943_s17 + $0x16e0] sm:$0xff]  ;;  %11388 = vmatpush1.bf16.msra.mxu0 %v14804_v9  ;;  %11429 = vmatpush1.bf16.msra.mxu1 %v14932_v10  ;;  %v410_v9 = vld [vmem:[%s16965_s14 + $0x78] sm:$0xff] }
 0x16f   : > { %v14941_v12 = vcombine.high %v1179_v7, %v1183_v8  ;;  %v1059_v13 = vld [vmem:[%s16943_s17 + $0x1300] sm:$0xff]  ;;  %11389 = vmatprep.subr.bf16.mxu0 %v14813_v11  ;;  %v14940_v19 = vcombine.low %v1179_v7, %v1183_v8  ;;  %v17214_v7 = vpack.c.bf16 %v405_v62, %v405_v62 }
 0x170   : > { %v1063_v14 = vld [vmem:[%s16943_s17 + $0x1320] sm:$0xff] }
 0x171   : > { %v1187_v15 = vld [vmem:[%s16943_s17 + $0x1700] sm:$0xff]  ;;  %v14821_v20 = vcombine.high %v1059_v13, %v1063_v14  ;;  %11430 = vmatprep.subr.bf16.mxu1 %v14941_v12  ;;  %v14820_v27 = vcombine.low %v1059_v13, %v1063_v14 }
 0x172   : > { %v1191_v16 = vld [vmem:[%s16943_s17 + $0x1720] sm:$0xff]  ;;  %11390 = vmatpush1.bf16.msra.mxu0 %v14812_v18  ;;  %11431 = vmatpush1.bf16.msra.mxu1 %v14940_v19  ;;  %v17224_v19 = vpack.c.bf16 %v410_v9, %v410_v9 }
 0x173   : > { %v14949_v22 = vcombine.high %v1187_v15, %v1191_v16  ;;  %v1067_v23 = vld [vmem:[%s16943_s17 + $0x1340] sm:$0xff]  ;;  %11391 = vmatprep.subr.bf16.mxu0 %v14821_v20  ;;  %v14948_v28 = vcombine.low %v1187_v15, %v1191_v16  ;;  %v17219_v15 = vpack.c.bf16 %v408_v6, %v408_v6 }
 0x174   : > { %v1071_v24 = vld [vmem:[%s16943_s17 + $0x1360] sm:$0xff] }
 0x175   : > { %v1195_v25 = vld [vmem:[%s16943_s17 + $0x1740] sm:$0xff]  ;;  %v14829_v30 = vcombine.high %v1067_v23, %v1071_v24  ;;  %11432 = vmatprep.subr.bf16.mxu1 %v14949_v22  ;;  %v14828_v38 = vcombine.low %v1067_v23, %v1071_v24 }
 0x176   : > { %v1199_v26 = vld [vmem:[%s16943_s17 + $0x1760] sm:$0xff]  ;;  %11392 = vmatpush1.bf16.msra.mxu0 %v14820_v27  ;;  %11433 = vmatpush1.bf16.msra.mxu1 %v14948_v28 }
 0x177   : > { %v14957_v31 = vcombine.high %v1195_v25, %v1199_v26  ;;  %v1075_v33 = vld [vmem:[%s16943_s17 + $0x1380] sm:$0xff]  ;;  %11393 = vmatprep.subr.bf16.mxu0 %v14829_v30  ;;  %v14956_v39 = vcombine.low %v1195_v25, %v1199_v26 }
 0x178   : > { %v1079_v34 = vld [vmem:[%s16943_s17 + $0x13a0] sm:$0xff] }
 0x179   : > { %v1203_v35 = vld [vmem:[%s16943_s17 + $0x1780] sm:$0xff]  ;;  %v14837_v40 = vcombine.high %v1075_v33, %v1079_v34  ;;  %11434 = vmatprep.subr.bf16.mxu1 %v14957_v31  ;;  %v14836_v47 = vcombine.low %v1075_v33, %v1079_v34 }
 0x17a   : > { %v1207_v36 = vld [vmem:[%s16943_s17 + $0x17a0] sm:$0xff]  ;;  %11394 = vmatpush1.bf16.msra.mxu0 %v14828_v38  ;;  %11435 = vmatpush1.bf16.msra.mxu1 %v14956_v39 }
 0x17b   : > { %v14965_v42 = vcombine.high %v1203_v35, %v1207_v36  ;;  %v1083_v43 = vld [vmem:[%s16943_s17 + $0x13c0] sm:$0xff]  ;;  %11395 = vmatprep.subr.bf16.mxu0 %v14837_v40  ;;  %v14964_v48 = vcombine.low %v1203_v35, %v1207_v36 }
 0x17c   : > { %v1087_v44 = vld [vmem:[%s16943_s17 + $0x13e0] sm:$0xff] }
 0x17d   : > { %v1211_v45 = vld [vmem:[%s16943_s17 + $0x17c0] sm:$0xff]  ;;  %v14845_v50 = vcombine.high %v1083_v43, %v1087_v44  ;;  %11436 = vmatprep.subr.bf16.mxu1 %v14965_v42  ;;  %v14844_v57 = vcombine.low %v1083_v43, %v1087_v44 }
 0x17e   : > { %v1215_v46 = vld [vmem:[%s16943_s17 + $0x17e0] sm:$0xff]  ;;  %11396 = vmatpush1.bf16.msra.mxu0 %v14836_v47  ;;  %11437 = vmatpush1.bf16.msra.mxu1 %v14964_v48 }
 0x17f   : > { %v14973_v51 = vcombine.high %v1211_v45, %v1215_v46  ;;  %v1219_v53 = vld [vmem:[%s16943_s17 + $0x1800] sm:$0xff]  ;;  %11397 = vmatprep.subr.bf16.mxu0 %v14845_v50  ;;  %v14972_v61 = vcombine.low %v1211_v45, %v1215_v46 }
 0x180   : > { %v1223_v54 = vld [vmem:[%s16943_s17 + $0x1820] sm:$0xff] }
 0x181   : > { %v1347_v55 = vld [vmem:[%s16943_s17 + $0x1c00] sm:$0xff]  ;;  %v14981_v63 = vcombine.high %v1219_v53, %v1223_v54  ;;  %11438 = vmatprep.subr.bf16.mxu1 %v14973_v51  ;;  %v14980_v8 = vcombine.low %v1219_v53, %v1223_v54 }
 0x182   : > { %v1351_v56 = vld [vmem:[%s16943_s17 + $0x1c20] sm:$0xff]  ;;  %11398 = vmatpush1.bf16.msra.mxu0 %v14844_v57  ;;  %11439 = vmatpush1.bf16.msra.mxu1 %v14972_v61 }
 0x183   : > { %v403_v58 = vld [vmem:[%s16965_s14 + $0x40] sm:$0xff]  ;;  %v15109_v0 = vcombine.high %v1347_v55, %v1351_v56  ;;  %11449 = vmatprep.subr.bf16.mxu0 %v14981_v63  ;;  %v15108_v10 = vcombine.low %v1347_v55, %v1351_v56 }
 0x184   : > { %v1227_v1 = vld [vmem:[%s16943_s17 + $0x1840] sm:$0xff]  ;;  %v17209_v3 = vpack.c.bf16 %v403_v58, %v403_v58 }
 0x185   : > { %v1231_v2 = vld [vmem:[%s16943_s17 + $0x1860] sm:$0xff]  ;;  %11490 = vmatprep.subr.bf16.mxu1 %v15109_v0  ;;  %11441 = vmatmul.mubr.bf16.vlgmr.msra.gmra.mrb[8].mxu1 %v17214_v7 }
 0x186   : > { %v1355_v4 = vld [vmem:[%s16943_s17 + $0x1c40] sm:$0xff]  ;;  %v14989_v11 = vcombine.high %v1227_v1, %v1231_v2  ;;  %11400 = vmatmul.mubr.bf16.vlgmr.msra.gmra.mrb[8].mxu0 %v17209_v3  ;;  %v14988_v20 = vcombine.low %v1227_v1, %v1231_v2  ;;  %11491 = vmatpush1.bf16.msra.mxu1 %v15108_v10 }
 0x187   : > { %v1359_v5 = vld [vmem:[%s16943_s17 + $0x1c60] sm:$0xff]  ;;  %11450 = vmatpush1.bf16.msra.mxu0 %v14980_v8  ;;  %11481 = vmatprep.mubr.bf16.mxu0 %v17219_v15 }
 0x188   : > { %v15117_v12 = vcombine.high %v1355_v4, %v1359_v5  ;;  %v1235_v13 = vld [vmem:[%s16943_s17 + $0x1880] sm:$0xff]  ;;  %11451 = vmatprep.subr.bf16.mxu0 %v14989_v11  ;;  %v15116_v22 = vcombine.low %v1355_v4, %v1359_v5  ;;  %11522 = vmatprep.mubr.bf16.mxu1 %v17224_v19 }
 0x189   : > { %v1239_v14 = vld [vmem:[%s16943_s17 + $0x18a0] sm:$0xff] }
 0x18a   : > { %v1363_v16 = vld [vmem:[%s16943_s17 + $0x1c80] sm:$0xff]  ;;  %v14997_v23 = vcombine.high %v1235_v13, %v1239_v14  ;;  %11492 = vmatprep.subr.bf16.mxu1 %v15117_v12  ;;  %v14996_v30 = vcombine.low %v1235_v13, %v1239_v14 }
 0x18b   : > { %v1367_v18 = vld [vmem:[%s16943_s17 + $0x1ca0] sm:$0xff]  ;;  %11452 = vmatpush1.bf16.msra.mxu0 %v14988_v20  ;;  %11493 = vmatpush1.bf16.msra.mxu1 %v15116_v22 }
 0x18c   : > { %v15125_v24 = vcombine.high %v1363_v16, %v1367_v18  ;;  %v1243_v25 = vld [vmem:[%s16943_s17 + $0x18c0] sm:$0xff]  ;;  %11453 = vmatprep.subr.bf16.mxu0 %v14997_v23  ;;  %v15124_v31 = vcombine.low %v1363_v16, %v1367_v18 }
 0x18d   : > { %v1247_v26 = vld [vmem:[%s16943_s17 + $0x18e0] sm:$0xff] }
 0x18e   : > { %v1371_v27 = vld [vmem:[%s16943_s17 + $0x1cc0] sm:$0xff]  ;;  %v15005_v33 = vcombine.high %v1243_v25, %v1247_v26  ;;  %11494 = vmatprep.subr.bf16.mxu1 %v15125_v24  ;;  %v15004_v40 = vcombine.low %v1243_v25, %v1247_v26 }
 0x18f   : > { %v1375_v28 = vld [vmem:[%s16943_s17 + $0x1ce0] sm:$0xff]  ;;  %11454 = vmatpush1.bf16.msra.mxu0 %v14996_v30  ;;  %11495 = vmatpush1.bf16.msra.mxu1 %v15124_v31 }
 0x190   : > { %v15133_v34 = vcombine.high %v1371_v27, %v1375_v28  ;;  %v1251_v35 = vld [vmem:[%s16943_s17 + $0x1900] sm:$0xff]  ;;  %11455 = vmatprep.subr.bf16.mxu0 %v15005_v33  ;;  %v15132_v42 = vcombine.low %v1371_v27, %v1375_v28 }
 0x191   : > { %v1255_v36 = vld [vmem:[%s16943_s17 + $0x1920] sm:$0xff] }
 0x192   : > { %v1379_v38 = vld [vmem:[%s16943_s17 + $0x1d00] sm:$0xff]  ;;  %v15013_v43 = vcombine.high %v1251_v35, %v1255_v36  ;;  %11496 = vmatprep.subr.bf16.mxu1 %v15133_v34  ;;  %v15012_v50 = vcombine.low %v1251_v35, %v1255_v36 }
 0x193   : > { %v1383_v39 = vld [vmem:[%s16943_s17 + $0x1d20] sm:$0xff]  ;;  %11456 = vmatpush1.bf16.msra.mxu0 %v15004_v40  ;;  %11497 = vmatpush1.bf16.msra.mxu1 %v15132_v42 }
 0x194   : > { %v15141_v44 = vcombine.high %v1379_v38, %v1383_v39  ;;  %v1259_v45 = vld [vmem:[%s16943_s17 + $0x1940] sm:$0xff]  ;;  %11457 = vmatprep.subr.bf16.mxu0 %v15013_v43  ;;  %v15140_v51 = vcombine.low %v1379_v38, %v1383_v39 }
 0x195   : > { %v1263_v46 = vld [vmem:[%s16943_s17 + $0x1960] sm:$0xff] }
 0x196   : > { %v1387_v47 = vld [vmem:[%s16943_s17 + $0x1d40] sm:$0xff]  ;;  %v15021_v53 = vcombine.high %v1259_v45, %v1263_v46  ;;  %11498 = vmatprep.subr.bf16.mxu1 %v15141_v44  ;;  %v15020_v61 = vcombine.low %v1259_v45, %v1263_v46 }
 0x197   : > { %v1391_v48 = vld [vmem:[%s16943_s17 + $0x1d60] sm:$0xff]  ;;  %11458 = vmatpush1.bf16.msra.mxu0 %v15012_v50  ;;  %11499 = vmatpush1.bf16.msra.mxu1 %v15140_v51 }
 0x198   : > { %v15149_v54 = vcombine.high %v1387_v47, %v1391_v48  ;;  %v1267_v55 = vld [vmem:[%s16943_s17 + $0x1980] sm:$0xff]  ;;  %11459 = vmatprep.subr.bf16.mxu0 %v15021_v53  ;;  %v15148_v62 = vcombine.low %v1387_v47, %v1391_v48 }
 0x199   : > { %v1271_v56 = vld [vmem:[%s16943_s17 + $0x19a0] sm:$0xff] }
 0x19a   : > { %v1395_v57 = vld [vmem:[%s16943_s17 + $0x1d80] sm:$0xff]  ;;  %v15029_v63 = vcombine.high %v1267_v55, %v1271_v56  ;;  %11500 = vmatprep.subr.bf16.mxu1 %v15149_v54  ;;  %v15028_v6 = vcombine.low %v1267_v55, %v1271_v56 }
 0x19b   : > { %v1399_v58 = vld [vmem:[%s16943_s17 + $0x1da0] sm:$0xff]  ;;  %11460 = vmatpush1.bf16.msra.mxu0 %v15020_v61  ;;  %11501 = vmatpush1.bf16.msra.mxu1 %v15148_v62 }
 0x19c   : > { %v15157_v0 = vcombine.high %v1395_v57, %v1399_v58  ;;  %v1275_v1 = vld [vmem:[%s16943_s17 + $0x19c0] sm:$0xff]  ;;  %11461 = vmatprep.subr.bf16.mxu0 %v15029_v63  ;;  %v15156_v8 = vcombine.low %v1395_v57, %v1399_v58 }
 0x19d   : > { %v1279_v2 = vld [vmem:[%s16943_s17 + $0x19e0] sm:$0xff] }
 0x19e   : > { %v1403_v4 = vld [vmem:[%s16943_s17 + $0x1dc0] sm:$0xff]  ;;  %v15037_v9 = vcombine.high %v1275_v1, %v1279_v2  ;;  %11502 = vmatprep.subr.bf16.mxu1 %v15157_v0  ;;  %v15036_v16 = vcombine.low %v1275_v1, %v1279_v2 }
 0x19f   : > { %v1407_v5 = vld [vmem:[%s16943_s17 + $0x1de0] sm:$0xff]  ;;  %11462 = vmatpush1.bf16.msra.mxu0 %v15028_v6  ;;  %11503 = vmatpush1.bf16.msra.mxu1 %v15156_v8 }
 0x1a0   : > { %v15165_v10 = vcombine.high %v1403_v4, %v1407_v5  ;;  %v1283_v11 = vld [vmem:[%s16943_s17 + $0x1a00] sm:$0xff]  ;;  %11463 = vmatprep.subr.bf16.mxu0 %v15037_v9  ;;  %v15164_v18 = vcombine.low %v1403_v4, %v1407_v5 }
 0x1a1   : > { %v1287_v12 = vld [vmem:[%s16943_s17 + $0x1a20] sm:$0xff] }
 0x1a2   : > { %v1411_v13 = vld [vmem:[%s16943_s17 + $0x1e00] sm:$0xff]  ;;  %v15045_v20 = vcombine.high %v1283_v11, %v1287_v12  ;;  %11504 = vmatprep.subr.bf16.mxu1 %v15165_v10  ;;  %v15044_v27 = vcombine.low %v1283_v11, %v1287_v12 }
 0x1a3   : > { %v1415_v14 = vld [vmem:[%s16943_s17 + $0x1e20] sm:$0xff]  ;;  %11464 = vmatpush1.bf16.msra.mxu0 %v15036_v16  ;;  %11505 = vmatpush1.bf16.msra.mxu1 %v15164_v18 }
 0x1a4   : > { %v15173_v22 = vcombine.high %v1411_v13, %v1415_v14  ;;  %v1291_v23 = vld [vmem:[%s16943_s17 + $0x1a40] sm:$0xff]  ;;  %11465 = vmatprep.subr.bf16.mxu0 %v15045_v20  ;;  %v15172_v28 = vcombine.low %v1411_v13, %v1415_v14 }
 0x1a5   : > { %v1295_v24 = vld [vmem:[%s16943_s17 + $0x1a60] sm:$0xff] }
 0x1a6   : > { %v1419_v25 = vld [vmem:[%s16943_s17 + $0x1e40] sm:$0xff]  ;;  %v15053_v30 = vcombine.high %v1291_v23, %v1295_v24  ;;  %11506 = vmatprep.subr.bf16.mxu1 %v15173_v22  ;;  %v15052_v38 = vcombine.low %v1291_v23, %v1295_v24 }
 0x1a7   : > { %v1423_v26 = vld [vmem:[%s16943_s17 + $0x1e60] sm:$0xff]  ;;  %11466 = vmatpush1.bf16.msra.mxu0 %v15044_v27  ;;  %11507 = vmatpush1.bf16.msra.mxu1 %v15172_v28 }
 0x1a8   : > { %v15181_v31 = vcombine.high %v1419_v25, %v1423_v26  ;;  %v1299_v33 = vld [vmem:[%s16943_s17 + $0x1a80] sm:$0xff]  ;;  %11467 = vmatprep.subr.bf16.mxu0 %v15053_v30  ;;  %v15180_v39 = vcombine.low %v1419_v25, %v1423_v26 }
 0x1a9   : > { %v1303_v34 = vld [vmem:[%s16943_s17 + $0x1aa0] sm:$0xff] }
 0x1aa   : > { %v1427_v35 = vld [vmem:[%s16943_s17 + $0x1e80] sm:$0xff]  ;;  %v15061_v40 = vcombine.high %v1299_v33, %v1303_v34  ;;  %11508 = vmatprep.subr.bf16.mxu1 %v15181_v31  ;;  %v15060_v47 = vcombine.low %v1299_v33, %v1303_v34 }
 0x1ab   : > { %v1431_v36 = vld [vmem:[%s16943_s17 + $0x1ea0] sm:$0xff]  ;;  %11468 = vmatpush1.bf16.msra.mxu0 %v15052_v38  ;;  %11509 = vmatpush1.bf16.msra.mxu1 %v15180_v39  ;;  %v409_v39 = vld [vmem:[%s16965_s14 + $0x70] sm:$0xff] }
 0x1ac   : > { %v15189_v42 = vcombine.high %v1427_v35, %v1431_v36  ;;  %v1307_v43 = vld [vmem:[%s16943_s17 + $0x1ac0] sm:$0xff]  ;;  %11469 = vmatprep.subr.bf16.mxu0 %v15061_v40  ;;  %v15188_v48 = vcombine.low %v1427_v35, %v1431_v36 }
 0x1ad   : > { %v1311_v44 = vld [vmem:[%s16943_s17 + $0x1ae0] sm:$0xff] }
 0x1ae   : > { %v1435_v45 = vld [vmem:[%s16943_s17 + $0x1ec0] sm:$0xff]  ;;  %v15069_v50 = vcombine.high %v1307_v43, %v1311_v44  ;;  %11510 = vmatprep.subr.bf16.mxu1 %v15189_v42  ;;  %v15068_v57 = vcombine.low %v1307_v43, %v1311_v44 }
 0x1af   : > { %v1439_v46 = vld [vmem:[%s16943_s17 + $0x1ee0] sm:$0xff]  ;;  %11470 = vmatpush1.bf16.msra.mxu0 %v15060_v47  ;;  %11511 = vmatpush1.bf16.msra.mxu1 %v15188_v48  ;;  %v412_v48 = vld [vmem:[%s16965_s14 + $0x88] sm:$0xff] }
 0x1b0   : > { %v15197_v51 = vcombine.high %v1435_v45, %v1439_v46  ;;  %v1315_v53 = vld [vmem:[%s16943_s17 + $0x1b00] sm:$0xff]  ;;  %11471 = vmatprep.subr.bf16.mxu0 %v15069_v50  ;;  %v15196_v58 = vcombine.low %v1435_v45, %v1439_v46  ;;  %v17294_v50 = vpack.c.bf16 %v409_v39, %v409_v39 }
 0x1b1   : > { %v1319_v54 = vld [vmem:[%s16943_s17 + $0x1b20] sm:$0xff] }
 0x1b2   : > { %v1443_v55 = vld [vmem:[%s16943_s17 + $0x1f00] sm:$0xff]  ;;  %v15077_v61 = vcombine.high %v1315_v53, %v1319_v54  ;;  %11512 = vmatprep.subr.bf16.mxu1 %v15197_v51  ;;  %v15076_v4 = vcombine.low %v1315_v53, %v1319_v54  ;;  %v414_v53 = vld [vmem:[%s16965_s14 + $0x98] sm:$0xff] }
 0x1b3   : > { %v1447_v56 = vld [vmem:[%s16943_s17 + $0x1f20] sm:$0xff]  ;;  %11472 = vmatpush1.bf16.msra.mxu0 %v15068_v57  ;;  %11513 = vmatpush1.bf16.msra.mxu1 %v15196_v58 }
 0x1b4   : > { %v15205_v62 = vcombine.high %v1443_v55, %v1447_v56  ;;  %v1323_v63 = vld [vmem:[%s16943_s17 + $0x1b40] sm:$0xff]  ;;  %11473 = vmatprep.subr.bf16.mxu0 %v15077_v61  ;;  %v15204_v5 = vcombine.low %v1443_v55, %v1447_v56  ;;  %v17299_v61 = vpack.c.bf16 %v412_v48, %v412_v48 }
 0x1b5   : > { %v1327_v0 = vld [vmem:[%s16943_s17 + $0x1b60] sm:$0xff] }
 0x1b6   : > { %v1451_v1 = vld [vmem:[%s16943_s17 + $0x1f40] sm:$0xff]  ;;  %v15085_v6 = vcombine.high %v1323_v63, %v1327_v0  ;;  %11514 = vmatprep.subr.bf16.mxu1 %v15205_v62  ;;  %v15084_v13 = vcombine.low %v1323_v63, %v1327_v0  ;;  %v17304_v0 = vpack.c.bf16 %v414_v53, %v414_v53 }
 0x1b7   : > { %v1455_v2 = vld [vmem:[%s16943_s17 + $0x1f60] sm:$0xff]  ;;  %11474 = vmatpush1.bf16.msra.mxu0 %v15076_v4  ;;  %11515 = vmatpush1.bf16.msra.mxu1 %v15204_v5 }
 0x1b8   : > { %v15213_v8 = vcombine.high %v1451_v1, %v1455_v2  ;;  %v1331_v9 = vld [vmem:[%s16943_s17 + $0x1b80] sm:$0xff]  ;;  %11475 = vmatprep.subr.bf16.mxu0 %v15085_v6  ;;  %v15212_v14 = vcombine.low %v1451_v1, %v1455_v2 }
 0x1b9   : > { %v1335_v10 = vld [vmem:[%s16943_s17 + $0x1ba0] sm:$0xff] }
 0x1ba   : > { %v1459_v11 = vld [vmem:[%s16943_s17 + $0x1f80] sm:$0xff]  ;;  %v15093_v16 = vcombine.high %v1331_v9, %v1335_v10  ;;  %11516 = vmatprep.subr.bf16.mxu1 %v15213_v8  ;;  %v15092_v25 = vcombine.low %v1331_v9, %v1335_v10 }
 0x1bb   : > { %v1463_v12 = vld [vmem:[%s16943_s17 + $0x1fa0] sm:$0xff]  ;;  %11476 = vmatpush1.bf16.msra.mxu0 %v15084_v13  ;;  %11517 = vmatpush1.bf16.msra.mxu1 %v15212_v14 }
 0x1bc   : > { %v15221_v18 = vcombine.high %v1459_v11, %v1463_v12  ;;  %v1339_v20 = vld [vmem:[%s16943_s17 + $0x1bc0] sm:$0xff]  ;;  %11477 = vmatprep.subr.bf16.mxu0 %v15093_v16  ;;  %v15220_v26 = vcombine.low %v1459_v11, %v1463_v12 }
 0x1bd   : > { %v1343_v22 = vld [vmem:[%s16943_s17 + $0x1be0] sm:$0xff] }
 0x1be   : > { %v1467_v23 = vld [vmem:[%s16943_s17 + $0x1fc0] sm:$0xff]  ;;  %v15101_v27 = vcombine.high %v1339_v20, %v1343_v22  ;;  %11518 = vmatprep.subr.bf16.mxu1 %v15221_v18  ;;  %v15100_v35 = vcombine.low %v1339_v20, %v1343_v22 }
 0x1bf   : > { %v1471_v24 = vld [vmem:[%s16943_s17 + $0x1fe0] sm:$0xff]  ;;  %11478 = vmatpush1.bf16.msra.mxu0 %v15092_v25  ;;  %11519 = vmatpush1.bf16.msra.mxu1 %v15220_v26 }
 0x1c0   : > { %v15229_v28 = vcombine.high %v1467_v23, %v1471_v24  ;;  %v1475_v30 = vld [vmem:[%s16943_s17 + $0x2000] sm:$0xff]  ;;  %11479 = vmatprep.subr.bf16.mxu0 %v15101_v27  ;;  %v15228_v38 = vcombine.low %v1467_v23, %v1471_v24 }
 0x1c1   : > { %v1479_v31 = vld [vmem:[%s16943_s17 + $0x2020] sm:$0xff] }
 0x1c2   : > { %v1603_v33 = vld [vmem:[%s16943_s17 + $0x2400] sm:$0xff]  ;;  %v15237_v40 = vcombine.high %v1475_v30, %v1479_v31  ;;  %11520 = vmatprep.subr.bf16.mxu1 %v15229_v28  ;;  %v15236_v51 = vcombine.low %v1475_v30, %v1479_v31 }
 0x1c3   : > { %v1607_v34 = vld [vmem:[%s16943_s17 + $0x2420] sm:$0xff]  ;;  %11480 = vmatpush1.bf16.msra.mxu0 %v15100_v35  ;;  %11521 = vmatpush1.bf16.msra.mxu1 %v15228_v38 }
 0x1c4   : > { %v407_v36 = vld [vmem:[%s16965_s14 + $0x60] sm:$0xff]  ;;  %v15365_v42 = vcombine.high %v1603_v33, %v1607_v34  ;;  %11531 = vmatprep.subr.bf16.mxu0 %v15237_v40  ;;  %v15364_v54 = vcombine.low %v1603_v33, %v1607_v34 }
 0x1c5   : > { %v1483_v43 = vld [vmem:[%s16943_s17 + $0x2040] sm:$0xff]  ;;  %v17289_v45 = vpack.c.bf16 %v407_v36, %v407_v36 }
 0x1c6   : > { %v1487_v44 = vld [vmem:[%s16943_s17 + $0x2060] sm:$0xff]  ;;  %11572 = vmatprep.subr.bf16.mxu1 %v15365_v42  ;;  %11523 = vmatmul.mubr.bf16.vlgmr.msra.gmra.mrb[12].mxu1 %v17294_v50 }
 0x1c7   : > { %v1611_v46 = vld [vmem:[%s16943_s17 + $0x2440] sm:$0xff]  ;;  %v15245_v55 = vcombine.high %v1483_v43, %v1487_v44  ;;  %11482 = vmatmul.mubr.bf16.vlgmr.msra.gmra.mrb[12].mxu0 %v17289_v45  ;;  %v15244_v1 = vcombine.low %v1483_v43, %v1487_v44  ;;  %11573 = vmatpush1.bf16.msra.mxu1 %v15364_v54 }
 0x1c8   : > { %v1615_v47 = vld [vmem:[%s16943_s17 + $0x2460] sm:$0xff]  ;;  %11532 = vmatpush1.bf16.msra.mxu0 %v15236_v51  ;;  %11563 = vmatprep.mubr.bf16.mxu0 %v17299_v61 }
 0x1c9   : > { %v15373_v56 = vcombine.high %v1611_v46, %v1615_v47  ;;  %v1491_v57 = vld [vmem:[%s16943_s17 + $0x2080] sm:$0xff]  ;;  %11533 = vmatprep.subr.bf16.mxu0 %v15245_v55  ;;  %v15372_v2 = vcombine.low %v1611_v46, %v1615_v47  ;;  %11604 = vmatprep.mubr.bf16.mxu1 %v17304_v0 }
 0x1ca   : > { %v1495_v58 = vld [vmem:[%s16943_s17 + $0x20a0] sm:$0xff] }
 0x1cb   : > { %v1619_v62 = vld [vmem:[%s16943_s17 + $0x2480] sm:$0xff]  ;;  %v15253_v4 = vcombine.high %v1491_v57, %v1495_v58  ;;  %11574 = vmatprep.subr.bf16.mxu1 %v15373_v56  ;;  %v15252_v11 = vcombine.low %v1491_v57, %v1495_v58 }
 0x1cc   : > { %v1623_v63 = vld [vmem:[%s16943_s17 + $0x24a0] sm:$0xff]  ;;  %11534 = vmatpush1.bf16.msra.mxu0 %v15244_v1  ;;  %11575 = vmatpush1.bf16.msra.mxu1 %v15372_v2 }
 0x1cd   : > { %v15381_v5 = vcombine.high %v1619_v62, %v1623_v63  ;;  %v1499_v6 = vld [vmem:[%s16943_s17 + $0x20c0] sm:$0xff]  ;;  %11535 = vmatprep.subr.bf16.mxu0 %v15253_v4  ;;  %v15380_v12 = vcombine.low %v1619_v62, %v1623_v63 }
 0x1ce   : > { %v1503_v8 = vld [vmem:[%s16943_s17 + $0x20e0] sm:$0xff] }
 0x1cf   : > { %v1627_v9 = vld [vmem:[%s16943_s17 + $0x24c0] sm:$0xff]  ;;  %v15261_v13 = vcombine.high %v1499_v6, %v1503_v8  ;;  %11576 = vmatprep.subr.bf16.mxu1 %v15381_v5  ;;  %v15260_v23 = vcombine.low %v1499_v6, %v1503_v8 }
 0x1d0   : > { %v1631_v10 = vld [vmem:[%s16943_s17 + $0x24e0] sm:$0xff]  ;;  %11536 = vmatpush1.bf16.msra.mxu0 %v15252_v11  ;;  %11577 = vmatpush1.bf16.msra.mxu1 %v15380_v12 }
 0x1d1   : > { %v15389_v14 = vcombine.high %v1627_v9, %v1631_v10  ;;  %v1507_v16 = vld [vmem:[%s16943_s17 + $0x2100] sm:$0xff]  ;;  %11537 = vmatprep.subr.bf16.mxu0 %v15261_v13  ;;  %v15388_v24 = vcombine.low %v1627_v9, %v1631_v10 }
 0x1d2   : > { %v1511_v18 = vld [vmem:[%s16943_s17 + $0x2120] sm:$0xff] }
 0x1d3   : > { %v1635_v20 = vld [vmem:[%s16943_s17 + $0x2500] sm:$0xff]  ;;  %v15269_v25 = vcombine.high %v1507_v16, %v1511_v18  ;;  %11578 = vmatprep.subr.bf16.mxu1 %v15389_v14  ;;  %v15268_v33 = vcombine.low %v1507_v16, %v1511_v18 }
 0x1d4   : > { %v1639_v22 = vld [vmem:[%s16943_s17 + $0x2520] sm:$0xff]  ;;  %11538 = vmatpush1.bf16.msra.mxu0 %v15260_v23  ;;  %11579 = vmatpush1.bf16.msra.mxu1 %v15388_v24 }
 0x1d5   : > { %v15397_v26 = vcombine.high %v1635_v20, %v1639_v22  ;;  %v1515_v27 = vld [vmem:[%s16943_s17 + $0x2140] sm:$0xff]  ;;  %11539 = vmatprep.subr.bf16.mxu0 %v15269_v25  ;;  %v15396_v34 = vcombine.low %v1635_v20, %v1639_v22 }
 0x1d6   : > { %v1519_v28 = vld [vmem:[%s16943_s17 + $0x2160] sm:$0xff]  ;;  %v11278_v54 = vpop.f32.mrb[0].mxu1 }
 0x1d7   : > { %v1643_v30 = vld [vmem:[%s16943_s17 + $0x2540] sm:$0xff]  ;;  %v15277_v35 = vcombine.high %v1515_v27, %v1519_v28  ;;  %11580 = vmatprep.subr.bf16.mxu1 %v15397_v26  ;;  %v15276_v43 = vcombine.low %v1515_v27, %v1519_v28  ;;  %v11237_v47 = vpop.f32.mrb[0].mxu0  ;;  %v11280_v62 = vpop.f32.mrb[1].mxu1 }
 0x1d8   : > { %v1647_v31 = vld [vmem:[%s16943_s17 + $0x2560] sm:$0xff]  ;;  %11540 = vmatpush1.bf16.msra.mxu0 %v15268_v33  ;;  %11581 = vmatpush1.bf16.msra.mxu1 %v15396_v34  ;;  %v11239_v55 = vpop.f32.mrb[1].mxu0  ;;  %v17329_v58 = vadd.f32 %v11278_v54, %v11237_v47  ;;  %v11282_v4 = vpop.f32.mrb[2].mxu1 }
 0x1d9   : > { %v15405_v36 = vcombine.high %v1643_v30, %v1647_v31  ;;  %v1523_v38 = vld [vmem:[%s16943_s17 + $0x2180] sm:$0xff]  ;;  %11541 = vmatprep.subr.bf16.mxu0 %v15277_v35  ;;  %v15404_v44 = vcombine.low %v1643_v30, %v1647_v31  ;;  %v11241_v63 = vpop.f32.mrb[2].mxu0  ;;  %v17331_v2 = vadd.f32 %v11280_v62, %v11239_v55  ;;  %v11283_v9 = vpop.f32.mrb[3].mxu1 }
 0x1da   : > { %v1527_v39 = vld [vmem:[%s16943_s17 + $0x21a0] sm:$0xff]  ;;  %v11242_v5 = vpop.f32.mrb[3].mxu0 }
 0x1db   : > { %v1651_v40 = vld [vmem:[%s16943_s17 + $0x2580] sm:$0xff]  ;;  %v15285_v46 = vcombine.high %v1523_v38, %v1527_v39  ;;  %11582 = vmatprep.subr.bf16.mxu1 %v15405_v36  ;;  %v15284_v1 = vcombine.low %v1523_v38, %v1527_v39 }
 0x1dc   : > { %v1655_v42 = vld [vmem:[%s16943_s17 + $0x25a0] sm:$0xff]  ;;  %11542 = vmatpush1.bf16.msra.mxu0 %v15276_v43  ;;  %11583 = vmatpush1.bf16.msra.mxu1 %v15404_v44 }
 0x1dd   : > { %v15413_v48 = vcombine.high %v1651_v40, %v1655_v42  ;;  %v1531_v51 = vld [vmem:[%s16943_s17 + $0x21c0] sm:$0xff]  ;;  %11543 = vmatprep.subr.bf16.mxu0 %v15285_v46  ;;  %v15412_v6 = vcombine.low %v1651_v40, %v1655_v42 }
 0x1de   : > { %v1535_v53 = vld [vmem:[%s16943_s17 + $0x21e0] sm:$0xff] }
 0x1df   : > { %v1659_v56 = vld [vmem:[%s16943_s17 + $0x25c0] sm:$0xff]  ;;  %v15293_v8 = vcombine.high %v1531_v51, %v1535_v53  ;;  %11584 = vmatprep.subr.bf16.mxu1 %v15413_v48  ;;  %v15292_v16 = vcombine.low %v1531_v51, %v1535_v53 }
 0x1e0   : > { %v1663_v57 = vld [vmem:[%s16943_s17 + $0x25e0] sm:$0xff]  ;;  %11544 = vmatpush1.bf16.msra.mxu0 %v15284_v1  ;;  %11585 = vmatpush1.bf16.msra.mxu1 %v15412_v6 }
 0x1e1   : > { %v15421_v10 = vcombine.high %v1659_v56, %v1663_v57  ;;  %v1539_v11 = vld [vmem:[%s16943_s17 + $0x2200] sm:$0xff]  ;;  %11545 = vmatprep.subr.bf16.mxu0 %v15293_v8  ;;  %v15420_v18 = vcombine.low %v1659_v56, %v1663_v57 }
 0x1e2   : > { %v1543_v12 = vld [vmem:[%s16943_s17 + $0x2220] sm:$0xff] }
 0x1e3   : > { %v1667_v13 = vld [vmem:[%s16943_s17 + $0x2600] sm:$0xff]  ;;  %v15301_v20 = vcombine.high %v1539_v11, %v1543_v12  ;;  %11586 = vmatprep.subr.bf16.mxu1 %v15421_v10  ;;  %v15300_v27 = vcombine.low %v1539_v11, %v1543_v12 }
 0x1e4   : > { %v1671_v14 = vld [vmem:[%s16943_s17 + $0x2620] sm:$0xff]  ;;  %11546 = vmatpush1.bf16.msra.mxu0 %v15292_v16  ;;  %11587 = vmatpush1.bf16.msra.mxu1 %v15420_v18 }
 0x1e5   : > { %v15429_v22 = vcombine.high %v1667_v13, %v1671_v14  ;;  %v1547_v23 = vld [vmem:[%s16943_s17 + $0x2240] sm:$0xff]  ;;  %11547 = vmatprep.subr.bf16.mxu0 %v15301_v20  ;;  %v15428_v28 = vcombine.low %v1667_v13, %v1671_v14 }
 0x1e6   : > { %v1551_v24 = vld [vmem:[%s16943_s17 + $0x2260] sm:$0xff] }
 0x1e7   : > { %v1675_v25 = vld [vmem:[%s16943_s17 + $0x2640] sm:$0xff]  ;;  %v15309_v30 = vcombine.high %v1547_v23, %v1551_v24  ;;  %11588 = vmatprep.subr.bf16.mxu1 %v15429_v22  ;;  %v15308_v38 = vcombine.low %v1547_v23, %v1551_v24 }
 0x1e8   : > { %v1679_v26 = vld [vmem:[%s16943_s17 + $0x2660] sm:$0xff]  ;;  %11548 = vmatpush1.bf16.msra.mxu0 %v15300_v27  ;;  %11589 = vmatpush1.bf16.msra.mxu1 %v15428_v28 }
 0x1e9   : > { %v15437_v31 = vcombine.high %v1675_v25, %v1679_v26  ;;  %v1555_v33 = vld [vmem:[%s16943_s17 + $0x2280] sm:$0xff]  ;;  %11549 = vmatprep.subr.bf16.mxu0 %v15309_v30  ;;  %v15436_v39 = vcombine.low %v1675_v25, %v1679_v26 }
 0x1ea   : > { %v1559_v34 = vld [vmem:[%s16943_s17 + $0x22a0] sm:$0xff] }
 0x1eb   : > { %v1683_v35 = vld [vmem:[%s16943_s17 + $0x2680] sm:$0xff]  ;;  %v15317_v40 = vcombine.high %v1555_v33, %v1559_v34  ;;  %11590 = vmatprep.subr.bf16.mxu1 %v15437_v31  ;;  %v15316_v48 = vcombine.low %v1555_v33, %v1559_v34 }
 0x1ec   : > { %v1687_v36 = vld [vmem:[%s16943_s17 + $0x26a0] sm:$0xff]  ;;  %11550 = vmatpush1.bf16.msra.mxu0 %v15308_v38  ;;  %11591 = vmatpush1.bf16.msra.mxu1 %v15436_v39 }
 0x1ed   : > { %v15445_v42 = vcombine.high %v1683_v35, %v1687_v36  ;;  %v1563_v43 = vld [vmem:[%s16943_s17 + $0x22c0] sm:$0xff]  ;;  %11551 = vmatprep.subr.bf16.mxu0 %v15317_v40  ;;  %v15444_v51 = vcombine.low %v1683_v35, %v1687_v36 }
 0x1ee   : > { %v1567_v44 = vld [vmem:[%s16943_s17 + $0x22e0] sm:$0xff] }
 0x1ef   : > { %v1691_v46 = vld [vmem:[%s16943_s17 + $0x26c0] sm:$0xff]  ;;  %v15325_v53 = vcombine.high %v1563_v43, %v1567_v44  ;;  %11592 = vmatprep.subr.bf16.mxu1 %v15445_v42  ;;  %v15324_v63 = vcombine.low %v1563_v43, %v1567_v44 }
 0x1f0   : > { %v1695_v47 = vld [vmem:[%s16943_s17 + $0x26e0] sm:$0xff]  ;;  %11552 = vmatpush1.bf16.msra.mxu0 %v15316_v48  ;;  %11593 = vmatpush1.bf16.msra.mxu1 %v15444_v51 }
 0x1f1   : > { %v15453_v54 = vcombine.high %v1691_v46, %v1695_v47  ;;  %v1571_v55 = vld [vmem:[%s16943_s17 + $0x2300] sm:$0xff]  ;;  %11553 = vmatprep.subr.bf16.mxu0 %v15325_v53  ;;  %v15452_v1 = vcombine.low %v1691_v46, %v1695_v47  ;;  %v413_v47 = vld [vmem:[%s16965_s14 + $0x90] sm:$0xff] }
 0x1f2   : > { %v1575_v56 = vld [vmem:[%s16943_s17 + $0x2320] sm:$0xff] }
 0x1f3   : > { %v1699_v57 = vld [vmem:[%s16943_s17 + $0x2700] sm:$0xff]  ;;  %v15333_v4 = vcombine.high %v1571_v55, %v1575_v56  ;;  %11594 = vmatprep.subr.bf16.mxu1 %v15453_v54  ;;  %v15332_v11 = vcombine.low %v1571_v55, %v1575_v56 }
 0x1f4   : > { %v1703_v62 = vld [vmem:[%s16943_s17 + $0x2720] sm:$0xff]  ;;  %11554 = vmatpush1.bf16.msra.mxu0 %v15324_v63  ;;  %11595 = vmatpush1.bf16.msra.mxu1 %v15452_v1  ;;  %v17378_v63 = vpack.c.bf16 %v413_v47, %v413_v47 }
 0x1f5   : > { %v15461_v5 = vcombine.high %v1699_v57, %v1703_v62  ;;  %v1579_v6 = vld [vmem:[%s16943_s17 + $0x2340] sm:$0xff]  ;;  %11555 = vmatprep.subr.bf16.mxu0 %v15333_v4  ;;  %v15460_v12 = vcombine.low %v1699_v57, %v1703_v62  ;;  %v416_v62 = vld [vmem:[%s16965_s14 + $0xa8] sm:$0xff]  ;;  %v418_v4 = vld [vmem:[%s16965_s14 + $0xb8] sm:$0xff] }
 0x1f6   : > { %v1583_v8 = vld [vmem:[%s16943_s17 + $0x2360] sm:$0xff] }
 0x1f7   : > { %v1707_v9 = vld [vmem:[%s16943_s17 + $0x2740] sm:$0xff]  ;;  %v15341_v13 = vcombine.high %v1579_v6, %v1583_v8  ;;  %11596 = vmatprep.subr.bf16.mxu1 %v15461_v5  ;;  %v15340_v23 = vcombine.low %v1579_v6, %v1583_v8 }
 0x1f8   : > { %v1711_v10 = vld [vmem:[%s16943_s17 + $0x2760] sm:$0xff]  ;;  %11556 = vmatpush1.bf16.msra.mxu0 %v15332_v11  ;;  %11597 = vmatpush1.bf16.msra.mxu1 %v15460_v12  ;;  %v17383_v11 = vpack.c.bf16 %v416_v62, %v416_v62 }
 0x1f9   : > { %v15469_v14 = vcombine.high %v1707_v9, %v1711_v10  ;;  %v1587_v16 = vld [vmem:[%s16943_s17 + $0x2380] sm:$0xff]  ;;  %11557 = vmatprep.subr.bf16.mxu0 %v15341_v13  ;;  %v15468_v24 = vcombine.low %v1707_v9, %v1711_v10 }
 0x1fa   : > { %v1591_v18 = vld [vmem:[%s16943_s17 + $0x23a0] sm:$0xff] }
 0x1fb   : > { %v1715_v20 = vld [vmem:[%s16943_s17 + $0x2780] sm:$0xff]  ;;  %v15349_v25 = vcombine.high %v1587_v16, %v1591_v18  ;;  %11598 = vmatprep.subr.bf16.mxu1 %v15469_v14  ;;  %v15348_v33 = vcombine.low %v1587_v16, %v1591_v18  ;;  %v17388_v14 = vpack.c.bf16 %v418_v4, %v418_v4 }
 0x1fc   : > { %v1719_v22 = vld [vmem:[%s16943_s17 + $0x27a0] sm:$0xff]  ;;  %11558 = vmatpush1.bf16.msra.mxu0 %v15340_v23  ;;  %11599 = vmatpush1.bf16.msra.mxu1 %v15468_v24 }
 0x1fd   : > { %v15477_v26 = vcombine.high %v1715_v20, %v1719_v22  ;;  %v1595_v27 = vld [vmem:[%s16943_s17 + $0x23c0] sm:$0xff]  ;;  %11559 = vmatprep.subr.bf16.mxu0 %v15349_v25  ;;  %v15476_v34 = vcombine.low %v1715_v20, %v1719_v22 }
 0x1fe   : > { %v1599_v28 = vld [vmem:[%s16943_s17 + $0x23e0] sm:$0xff] }
 0x1ff   : > { %v1723_v30 = vld [vmem:[%s16943_s17 + $0x27c0] sm:$0xff]  ;;  %v15357_v35 = vcombine.high %v1595_v27, %v1599_v28  ;;  %11600 = vmatprep.subr.bf16.mxu1 %v15477_v26  ;;  %v15356_v43 = vcombine.low %v1595_v27, %v1599_v28 }
 0x200   : > { %v1727_v31 = vld [vmem:[%s16943_s17 + $0x27e0] sm:$0xff]  ;;  %11560 = vmatpush1.bf16.msra.mxu0 %v15348_v33  ;;  %11601 = vmatpush1.bf16.msra.mxu1 %v15476_v34 }
 0x201   : > { %v15485_v36 = vcombine.high %v1723_v30, %v1727_v31  ;;  %v1731_v38 = vld [vmem:[%s16943_s17 + $0x2800] sm:$0xff]  ;;  %11561 = vmatprep.subr.bf16.mxu0 %v15357_v35  ;;  %v15484_v46 = vcombine.low %v1723_v30, %v1727_v31 }
 0x202   : > { %v1735_v39 = vld [vmem:[%s16943_s17 + $0x2820] sm:$0xff] }
 0x203   : > { %v1859_v40 = vld [vmem:[%s16943_s17 + $0x2c00] sm:$0xff]  ;;  %v15493_v48 = vcombine.high %v1731_v38, %v1735_v39  ;;  %11602 = vmatprep.subr.bf16.mxu1 %v15485_v36  ;;  %v15492_v1 = vcombine.low %v1731_v38, %v1735_v39 }
 0x204   : > { %v1863_v42 = vld [vmem:[%s16943_s17 + $0x2c20] sm:$0xff]  ;;  %11562 = vmatpush1.bf16.msra.mxu0 %v15356_v43  ;;  %11603 = vmatpush1.bf16.msra.mxu1 %v15484_v46 }
 0x205   : > { %v411_v44 = vld [vmem:[%s16965_s14 + $0x80] sm:$0xff]  ;;  %v15621_v51 = vcombine.high %v1859_v40, %v1863_v42  ;;  %11613 = vmatprep.subr.bf16.mxu0 %v15493_v48  ;;  %v15620_v5 = vcombine.low %v1859_v40, %v1863_v42 }
 0x206   : > { %v1739_v53 = vld [vmem:[%s16943_s17 + $0x2840] sm:$0xff]  ;;  %v17373_v55 = vpack.c.bf16 %v411_v44, %v411_v44 }
 0x207   : > { %v1743_v54 = vld [vmem:[%s16943_s17 + $0x2860] sm:$0xff]  ;;  %11654 = vmatprep.subr.bf16.mxu1 %v15621_v51  ;;  %11605 = vmatmul.mubr.bf16.vlgmr.msra.gmra.mrb[16].mxu1 %v17378_v63 }
 0x208   : > { %v1867_v56 = vld [vmem:[%s16943_s17 + $0x2c40] sm:$0xff]  ;;  %v15501_v6 = vcombine.high %v1739_v53, %v1743_v54  ;;  %11564 = vmatmul.mubr.bf16.vlgmr.msra.gmra.mrb[16].mxu0 %v17373_v55  ;;  %v15500_v16 = vcombine.low %v1739_v53, %v1743_v54  ;;  %11655 = vmatpush1.bf16.msra.mxu1 %v15620_v5 }
 0x209   : > { %v1871_v57 = vld [vmem:[%s16943_s17 + $0x2c60] sm:$0xff]  ;;  %11614 = vmatpush1.bf16.msra.mxu0 %v15492_v1  ;;  %11645 = vmatprep.mubr.bf16.mxu0 %v17383_v11 }
 0x20a   : > { %v15629_v8 = vcombine.high %v1867_v56, %v1871_v57  ;;  %v1747_v9 = vld [vmem:[%s16943_s17 + $0x2880] sm:$0xff]  ;;  %11615 = vmatprep.subr.bf16.mxu0 %v15501_v6  ;;  %v15628_v18 = vcombine.low %v1867_v56, %v1871_v57  ;;  %11686 = vmatprep.mubr.bf16.mxu1 %v17388_v14 }
 0x20b   : > { %v1751_v10 = vld [vmem:[%s16943_s17 + $0x28a0] sm:$0xff] }
 0x20c   : > { %v1875_v12 = vld [vmem:[%s16943_s17 + $0x2c80] sm:$0xff]  ;;  %v15509_v20 = vcombine.high %v1747_v9, %v1751_v10  ;;  %11656 = vmatprep.subr.bf16.mxu1 %v15629_v8  ;;  %v15508_v27 = vcombine.low %v1747_v9, %v1751_v10 }
 0x20d   : > { %v1879_v13 = vld [vmem:[%s16943_s17 + $0x2ca0] sm:$0xff]  ;;  %11616 = vmatpush1.bf16.msra.mxu0 %v15500_v16  ;;  %11657 = vmatpush1.bf16.msra.mxu1 %v15628_v18 }
 0x20e   : > { %v15637_v22 = vcombine.high %v1875_v12, %v1879_v13  ;;  %v1755_v23 = vld [vmem:[%s16943_s17 + $0x28c0] sm:$0xff]  ;;  %11617 = vmatprep.subr.bf16.mxu0 %v15509_v20  ;;  %v15636_v28 = vcombine.low %v1875_v12, %v1879_v13 }
 0x20f   : > { %v1759_v24 = vld [vmem:[%s16943_s17 + $0x28e0] sm:$0xff] }
 0x210   : > { %v1883_v25 = vld [vmem:[%s16943_s17 + $0x2cc0] sm:$0xff]  ;;  %v15517_v30 = vcombine.high %v1755_v23, %v1759_v24  ;;  %11658 = vmatprep.subr.bf16.mxu1 %v15637_v22  ;;  %v15516_v38 = vcombine.low %v1755_v23, %v1759_v24 }
 0x211   : > { %v1887_v26 = vld [vmem:[%s16943_s17 + $0x2ce0] sm:$0xff]  ;;  %11618 = vmatpush1.bf16.msra.mxu0 %v15508_v27  ;;  %11659 = vmatpush1.bf16.msra.mxu1 %v15636_v28 }
 0x212   : > { %v15645_v31 = vcombine.high %v1883_v25, %v1887_v26  ;;  %v1763_v33 = vld [vmem:[%s16943_s17 + $0x2900] sm:$0xff]  ;;  %11619 = vmatprep.subr.bf16.mxu0 %v15517_v30  ;;  %v15644_v39 = vcombine.low %v1883_v25, %v1887_v26 }
 0x213   : > { %v1767_v34 = vld [vmem:[%s16943_s17 + $0x2920] sm:$0xff] }
 0x214   : > { %v1891_v35 = vld [vmem:[%s16943_s17 + $0x2d00] sm:$0xff]  ;;  %v15525_v40 = vcombine.high %v1763_v33, %v1767_v34  ;;  %11660 = vmatprep.subr.bf16.mxu1 %v15645_v31  ;;  %v15524_v48 = vcombine.low %v1763_v33, %v1767_v34 }
 0x215   : > { %v1895_v36 = vld [vmem:[%s16943_s17 + $0x2d20] sm:$0xff]  ;;  %11620 = vmatpush1.bf16.msra.mxu0 %v15516_v38  ;;  %11661 = vmatpush1.bf16.msra.mxu1 %v15644_v39 }
 0x216   : > { %v15653_v42 = vcombine.high %v1891_v35, %v1895_v36  ;;  %v1771_v43 = vld [vmem:[%s16943_s17 + $0x2940] sm:$0xff]  ;;  %11621 = vmatprep.subr.bf16.mxu0 %v15525_v40  ;;  %v15652_v51 = vcombine.low %v1891_v35, %v1895_v36 }
 0x217   : > { %v1775_v44 = vld [vmem:[%s16943_s17 + $0x2960] sm:$0xff]  ;;  %v11360_v16 = vpop.f32.mrb[4].mxu1 }
 0x218   : > { %v1899_v46 = vld [vmem:[%s16943_s17 + $0x2d40] sm:$0xff]  ;;  %v15533_v53 = vcombine.high %v1771_v43, %v1775_v44  ;;  %11662 = vmatprep.subr.bf16.mxu1 %v15653_v42  ;;  %v15532_v4 = vcombine.low %v1771_v43, %v1775_v44  ;;  %v11319_v8 = vpop.f32.mrb[4].mxu0  ;;  %v11362_v24 = vpop.f32.mrb[5].mxu1 }
 0x219   : > { %v1903_v47 = vld [vmem:[%s16943_s17 + $0x2d60] sm:$0xff]  ;;  %11622 = vmatpush1.bf16.msra.mxu0 %v15524_v48  ;;  %11663 = vmatpush1.bf16.msra.mxu1 %v15652_v51  ;;  %v11320_v13 = vadd.f32 %v11319_v8, %v17329_v58  ;;  %v11321_v18 = vpop.f32.mrb[5].mxu0  ;;  %v11364_v28 = vpop.f32.mrb[6].mxu1 }
 0x21a   : > { %v15661_v54 = vcombine.high %v1899_v46, %v1903_v47  ;;  %v1779_v56 = vld [vmem:[%s16943_s17 + $0x2980] sm:$0xff]  ;;  %11623 = vmatprep.subr.bf16.mxu0 %v15533_v53  ;;  %v15660_v5 = vcombine.low %v1899_v46, %v1903_v47  ;;  %v11322_v23 = vadd.f32 %v11321_v18, %v17331_v2  ;;  %v11323_v25 = vpop.f32.mrb[6].mxu0  ;;  %v11365_v2 = vpop.f32.mrb[7].mxu1 }
 0x21b   : > { %v1783_v57 = vld [vmem:[%s16943_s17 + $0x29a0] sm:$0xff]  ;;  %v17415_v27 = vadd.f32 %v11360_v16, %v11320_v13  ;;  %v11324_v30 = vpop.f32.mrb[7].mxu0 }
 0x21c   : > { %v1907_v62 = vld [vmem:[%s16943_s17 + $0x2d80] sm:$0xff]  ;;  %v15541_v6 = vcombine.high %v1779_v56, %v1783_v57  ;;  %11664 = vmatprep.subr.bf16.mxu1 %v15661_v54  ;;  %v15540_v26 = vcombine.low %v1779_v56, %v1783_v57  ;;  %v17417_v33 = vadd.f32 %v11362_v24, %v11322_v23 }
 0x21d   : > { %v1911_v1 = vld [vmem:[%s16943_s17 + $0x2da0] sm:$0xff]  ;;  %11624 = vmatpush1.bf16.msra.mxu0 %v15532_v4  ;;  %11665 = vmatpush1.bf16.msra.mxu1 %v15660_v5 }
 0x21e   : > { %v15669_v9 = vcombine.high %v1907_v62, %v1911_v1  ;;  %v1787_v10 = vld [vmem:[%s16943_s17 + $0x29c0] sm:$0xff]  ;;  %11625 = vmatprep.subr.bf16.mxu0 %v15541_v6  ;;  %v15668_v58 = vcombine.low %v1907_v62, %v1911_v1 }
 0x21f   : > { %v1791_v12 = vld [vmem:[%s16943_s17 + $0x29e0] sm:$0xff] }
 0x220   : > { %v1915_v20 = vld [vmem:[%s16943_s17 + $0x2dc0] sm:$0xff]  ;;  %v15549_v31 = vcombine.high %v1787_v10, %v1791_v12  ;;  %11666 = vmatprep.subr.bf16.mxu1 %v15669_v9  ;;  %v15548_v40 = vcombine.low %v1787_v10, %v1791_v12 }
 0x221   : > { %v1919_v22 = vld [vmem:[%s16943_s17 + $0x2de0] sm:$0xff]  ;;  %11626 = vmatpush1.bf16.msra.mxu0 %v15540_v26  ;;  %11667 = vmatpush1.bf16.msra.mxu1 %v15668_v58 }
 0x222   : > { %v15677_v34 = vcombine.high %v1915_v20, %v1919_v22  ;;  %v1795_v35 = vld [vmem:[%s16943_s17 + $0x2a00] sm:$0xff]  ;;  %11627 = vmatprep.subr.bf16.mxu0 %v15549_v31  ;;  %v15676_v42 = vcombine.low %v1915_v20, %v1919_v22 }
 0x223   : > { %v1799_v36 = vld [vmem:[%s16943_s17 + $0x2a20] sm:$0xff] }
 0x224   : > { %v1923_v38 = vld [vmem:[%s16943_s17 + $0x2e00] sm:$0xff]  ;;  %v15557_v43 = vcombine.high %v1795_v35, %v1799_v36  ;;  %11668 = vmatprep.subr.bf16.mxu1 %v15677_v34  ;;  %v15556_v53 = vcombine.low %v1795_v35, %v1799_v36 }
 0x225   : > { %v1927_v39 = vld [vmem:[%s16943_s17 + $0x2e20] sm:$0xff]  ;;  %11628 = vmatpush1.bf16.msra.mxu0 %v15548_v40  ;;  %11669 = vmatpush1.bf16.msra.mxu1 %v15676_v42 }
 0x226   : > { %v15685_v44 = vcombine.high %v1923_v38, %v1927_v39  ;;  %v1803_v46 = vld [vmem:[%s16943_s17 + $0x2a40] sm:$0xff]  ;;  %11629 = vmatprep.subr.bf16.mxu0 %v15557_v43  ;;  %v15684_v54 = vcombine.low %v1923_v38, %v1927_v39 }
 0x227   : > { %v1807_v47 = vld [vmem:[%s16943_s17 + $0x2a60] sm:$0xff] }
 0x228   : > { %v1931_v48 = vld [vmem:[%s16943_s17 + $0x2e40] sm:$0xff]  ;;  %v15565_v56 = vcombine.high %v1803_v46, %v1807_v47  ;;  %11670 = vmatprep.subr.bf16.mxu1 %v15685_v44  ;;  %v15564_v6 = vcombine.low %v1803_v46, %v1807_v47 }
 0x229   : > { %v1935_v51 = vld [vmem:[%s16943_s17 + $0x2e60] sm:$0xff]  ;;  %11630 = vmatpush1.bf16.msra.mxu0 %v15556_v53  ;;  %11671 = vmatpush1.bf16.msra.mxu1 %v15684_v54 }
 0x22a   : > { %v15693_v57 = vcombine.high %v1931_v48, %v1935_v51  ;;  %v1811_v62 = vld [vmem:[%s16943_s17 + $0x2a80] sm:$0xff]  ;;  %11631 = vmatprep.subr.bf16.mxu0 %v15565_v56  ;;  %v15692_v8 = vcombine.low %v1931_v48, %v1935_v51 }
 0x22b   : > { %v1815_v1 = vld [vmem:[%s16943_s17 + $0x2aa0] sm:$0xff] }
 0x22c   : > { %v1939_v4 = vld [vmem:[%s16943_s17 + $0x2e80] sm:$0xff]  ;;  %v15573_v9 = vcombine.high %v1811_v62, %v1815_v1  ;;  %11672 = vmatprep.subr.bf16.mxu1 %v15693_v57  ;;  %v15572_v20 = vcombine.low %v1811_v62, %v1815_v1 }
 0x22d   : > { %v1943_v5 = vld [vmem:[%s16943_s17 + $0x2ea0] sm:$0xff]  ;;  %11632 = vmatpush1.bf16.msra.mxu0 %v15564_v6  ;;  %11673 = vmatpush1.bf16.msra.mxu1 %v15692_v8 }
 0x22e   : > { %v15701_v10 = vcombine.high %v1939_v4, %v1943_v5  ;;  %v1819_v12 = vld [vmem:[%s16943_s17 + $0x2ac0] sm:$0xff]  ;;  %11633 = vmatprep.subr.bf16.mxu0 %v15573_v9  ;;  %v15700_v22 = vcombine.low %v1939_v4, %v1943_v5 }
 0x22f   : > { %v1823_v13 = vld [vmem:[%s16943_s17 + $0x2ae0] sm:$0xff] }
 0x230   : > { %v1947_v16 = vld [vmem:[%s16943_s17 + $0x2ec0] sm:$0xff]  ;;  %v15581_v23 = vcombine.high %v1819_v12, %v1823_v13  ;;  %11674 = vmatprep.subr.bf16.mxu1 %v15701_v10  ;;  %v15580_v58 = vcombine.low %v1819_v12, %v1823_v13 }
 0x231   : > { %v1951_v18 = vld [vmem:[%s16943_s17 + $0x2ee0] sm:$0xff]  ;;  %11634 = vmatpush1.bf16.msra.mxu0 %v15572_v20  ;;  %11675 = vmatpush1.bf16.msra.mxu1 %v15700_v22 }
 0x232   : > { %v15709_v24 = vcombine.high %v1947_v16, %v1951_v18  ;;  %v1827_v25 = vld [vmem:[%s16943_s17 + $0x2b00] sm:$0xff]  ;;  %11635 = vmatprep.subr.bf16.mxu0 %v15581_v23  ;;  %v15708_v31 = vcombine.low %v1947_v16, %v1951_v18 }
 0x233   : > { %v1831_v26 = vld [vmem:[%s16943_s17 + $0x2b20] sm:$0xff] }
 0x234   : > { %v1955_v28 = vld [vmem:[%s16943_s17 + $0x2f00] sm:$0xff]  ;;  %v15589_v2 = vcombine.high %v1827_v25, %v1831_v26  ;;  %11676 = vmatprep.subr.bf16.mxu1 %v15709_v24  ;;  %v15588_v40 = vcombine.low %v1827_v25, %v1831_v26  ;;  %v417_v24 = vld [vmem:[%s16965_s14 + $0xb0] sm:$0xff] }
 0x235   : > { %v1959_v30 = vld [vmem:[%s16943_s17 + $0x2f20] sm:$0xff]  ;;  %11636 = vmatpush1.bf16.msra.mxu0 %v15580_v58  ;;  %11677 = vmatpush1.bf16.msra.mxu1 %v15708_v31 }
 0x236   : > { %v15717_v34 = vcombine.high %v1955_v28, %v1959_v30  ;;  %v1835_v35 = vld [vmem:[%s16943_s17 + $0x2b40] sm:$0xff]  ;;  %11637 = vmatprep.subr.bf16.mxu0 %v15589_v2  ;;  %v15716_v42 = vcombine.low %v1955_v28, %v1959_v30 }
 0x237   : > { %v1839_v36 = vld [vmem:[%s16943_s17 + $0x2b60] sm:$0xff] }
 0x238   : > { %v1963_v38 = vld [vmem:[%s16943_s17 + $0x2f40] sm:$0xff]  ;;  %v15597_v43 = vcombine.high %v1835_v35, %v1839_v36  ;;  %11678 = vmatprep.subr.bf16.mxu1 %v15717_v34  ;;  %v15596_v53 = vcombine.low %v1835_v35, %v1839_v36  ;;  %v420_v34 = vld [vmem:[%s16965_s14 + $0xc8] sm:$0xff]  ;;  %v17464_v35 = vpack.c.bf16 %v417_v24, %v417_v24 }
 0x239   : > { %v1967_v39 = vld [vmem:[%s16943_s17 + $0x2f60] sm:$0xff]  ;;  %11638 = vmatpush1.bf16.msra.mxu0 %v15588_v40  ;;  %11679 = vmatpush1.bf16.msra.mxu1 %v15716_v42 }
 0x23a   : > { %v15725_v44 = vcombine.high %v1963_v38, %v1967_v39  ;;  %v1843_v46 = vld [vmem:[%s16943_s17 + $0x2b80] sm:$0xff]  ;;  %11639 = vmatprep.subr.bf16.mxu0 %v15597_v43  ;;  %v15724_v54 = vcombine.low %v1963_v38, %v1967_v39  ;;  %v422_v38 = vld [vmem:[%s16965_s14 + $0xd8] sm:$0xff] }
 0x23b   : > { %v1847_v47 = vld [vmem:[%s16943_s17 + $0x2ba0] sm:$0xff] }
 0x23c   : > { %v1971_v48 = vld [vmem:[%s16943_s17 + $0x2f80] sm:$0xff]  ;;  %v15605_v56 = vcombine.high %v1843_v46, %v1847_v47  ;;  %11680 = vmatprep.subr.bf16.mxu1 %v15725_v44  ;;  %v15604_v6 = vcombine.low %v1843_v46, %v1847_v47  ;;  %v17469_v46 = vpack.c.bf16 %v420_v34, %v420_v34 }
 0x23d   : > { %v1975_v51 = vld [vmem:[%s16943_s17 + $0x2fa0] sm:$0xff]  ;;  %11640 = vmatpush1.bf16.msra.mxu0 %v15596_v53  ;;  %11681 = vmatpush1.bf16.msra.mxu1 %v15724_v54 }
 0x23e   : > { %v15733_v57 = vcombine.high %v1971_v48, %v1975_v51  ;;  %v1851_v62 = vld [vmem:[%s16943_s17 + $0x2bc0] sm:$0xff]  ;;  %11641 = vmatprep.subr.bf16.mxu0 %v15605_v56  ;;  %v15732_v8 = vcombine.low %v1971_v48, %v1975_v51  ;;  %v17474_v51 = vpack.c.bf16 %v422_v38, %v422_v38 }
 0x23f   : > { %v1855_v1 = vld [vmem:[%s16943_s17 + $0x2be0] sm:$0xff] }
 0x240   : > { %v1979_v4 = vld [vmem:[%s16943_s17 + $0x2fc0] sm:$0xff]  ;;  %v15613_v9 = vcombine.high %v1851_v62, %v1855_v1  ;;  %11682 = vmatprep.subr.bf16.mxu1 %v15733_v57  ;;  %v15612_v20 = vcombine.low %v1851_v62, %v1855_v1 }
 0x241   : > { %v1983_v5 = vld [vmem:[%s16943_s17 + $0x2fe0] sm:$0xff]  ;;  %11642 = vmatpush1.bf16.msra.mxu0 %v15604_v6  ;;  %11683 = vmatpush1.bf16.msra.mxu1 %v15732_v8 }
 0x242   : > { %v15741_v10 = vcombine.high %v1979_v4, %v1983_v5  ;;  %v1987_v12 = vld [vmem:[%s16943_s17 + $0x3000] sm:$0xff]  ;;  %11643 = vmatprep.subr.bf16.mxu0 %v15613_v9  ;;  %v15740_v23 = vcombine.low %v1979_v4, %v1983_v5 }
 0x243   : > { %v1991_v13 = vld [vmem:[%s16943_s17 + $0x3020] sm:$0xff] }
 0x244   : > { %v2115_v16 = vld [vmem:[%s16943_s17 + $0x3400] sm:$0xff]  ;;  %v15749_v25 = vcombine.high %v1987_v12, %v1991_v13  ;;  %11684 = vmatprep.subr.bf16.mxu1 %v15741_v10  ;;  %v15748_v36 = vcombine.low %v1987_v12, %v1991_v13 }
 0x245   : > { %v2119_v18 = vld [vmem:[%s16943_s17 + $0x3420] sm:$0xff]  ;;  %11644 = vmatpush1.bf16.msra.mxu0 %v15612_v20  ;;  %11685 = vmatpush1.bf16.msra.mxu1 %v15740_v23 }
 0x246   : > { %v415_v22 = vld [vmem:[%s16965_s14 + $0xa0] sm:$0xff]  ;;  %v15877_v26 = vcombine.high %v2115_v16, %v2119_v18  ;;  %11695 = vmatprep.subr.bf16.mxu0 %v15749_v25  ;;  %v15876_v39 = vcombine.low %v2115_v16, %v2119_v18 }
 0x247   : > { %v1995_v28 = vld [vmem:[%s16943_s17 + $0x3040] sm:$0xff]  ;;  %v17459_v58 = vpack.c.bf16 %v415_v22, %v415_v22 }
 0x248   : > { %v1999_v30 = vld [vmem:[%s16943_s17 + $0x3060] sm:$0xff]  ;;  %11736 = vmatprep.subr.bf16.mxu1 %v15877_v26  ;;  %11687 = vmatmul.mubr.bf16.vlgmr.msra.gmra.mrb[20].mxu1 %v17464_v35 }
 0x249   : > { %v2123_v31 = vld [vmem:[%s16943_s17 + $0x3440] sm:$0xff]  ;;  %v15757_v40 = vcombine.high %v1995_v28, %v1999_v30  ;;  %11646 = vmatmul.mubr.bf16.vlgmr.msra.gmra.mrb[20].mxu0 %v17459_v58  ;;  %v15756_v53 = vcombine.low %v1995_v28, %v1999_v30  ;;  %11737 = vmatpush1.bf16.msra.mxu1 %v15876_v39 }
 0x24a   : > { %v2127_v2 = vld [vmem:[%s16943_s17 + $0x3460] sm:$0xff]  ;;  %11696 = vmatpush1.bf16.msra.mxu0 %v15748_v36  ;;  %11727 = vmatprep.mubr.bf16.mxu0 %v17469_v46 }
 0x24b   : > { %v15885_v42 = vcombine.high %v2123_v31, %v2127_v2  ;;  %v2003_v43 = vld [vmem:[%s16943_s17 + $0x3080] sm:$0xff]  ;;  %11697 = vmatprep.subr.bf16.mxu0 %v15757_v40  ;;  %v15884_v54 = vcombine.low %v2123_v31, %v2127_v2  ;;  %11768 = vmatprep.mubr.bf16.mxu1 %v17474_v51 }
 0x24c   : > { %v2007_v44 = vld [vmem:[%s16943_s17 + $0x30a0] sm:$0xff] }
 0x24d   : > { %v2131_v47 = vld [vmem:[%s16943_s17 + $0x3480] sm:$0xff]  ;;  %v15765_v56 = vcombine.high %v2003_v43, %v2007_v44  ;;  %11738 = vmatprep.subr.bf16.mxu1 %v15885_v42  ;;  %v15764_v6 = vcombine.low %v2003_v43, %v2007_v44 }
 0x24e   : > { %v2135_v48 = vld [vmem:[%s16943_s17 + $0x34a0] sm:$0xff]  ;;  %11698 = vmatpush1.bf16.msra.mxu0 %v15756_v53  ;;  %11739 = vmatpush1.bf16.msra.mxu1 %v15884_v54 }
 0x24f   : > { %v15893_v57 = vcombine.high %v2131_v47, %v2135_v48  ;;  %v2011_v62 = vld [vmem:[%s16943_s17 + $0x30c0] sm:$0xff]  ;;  %11699 = vmatprep.subr.bf16.mxu0 %v15765_v56  ;;  %v15892_v8 = vcombine.low %v2131_v47, %v2135_v48 }
 0x250   : > { %v2015_v1 = vld [vmem:[%s16943_s17 + $0x30e0] sm:$0xff] }
 0x251   : > { %v2139_v4 = vld [vmem:[%s16943_s17 + $0x34c0] sm:$0xff]  ;;  %v15773_v9 = vcombine.high %v2011_v62, %v2015_v1  ;;  %11740 = vmatprep.subr.bf16.mxu1 %v15893_v57  ;;  %v15772_v20 = vcombine.low %v2011_v62, %v2015_v1 }
 0x252   : > { %v2143_v5 = vld [vmem:[%s16943_s17 + $0x34e0] sm:$0xff]  ;;  %11700 = vmatpush1.bf16.msra.mxu0 %v15764_v6  ;;  %11741 = vmatpush1.bf16.msra.mxu1 %v15892_v8 }
 0x253   : > { %v15901_v10 = vcombine.high %v2139_v4, %v2143_v5  ;;  %v2019_v12 = vld [vmem:[%s16943_s17 + $0x3100] sm:$0xff]  ;;  %11701 = vmatprep.subr.bf16.mxu0 %v15773_v9  ;;  %v15900_v22 = vcombine.low %v2139_v4, %v2143_v5 }
 0x254   : > { %v2023_v13 = vld [vmem:[%s16943_s17 + $0x3120] sm:$0xff] }
 0x255   : > { %v2147_v16 = vld [vmem:[%s16943_s17 + $0x3500] sm:$0xff]  ;;  %v15781_v23 = vcombine.high %v2019_v12, %v2023_v13  ;;  %11742 = vmatprep.subr.bf16.mxu1 %v15901_v10  ;;  %v15780_v31 = vcombine.low %v2019_v12, %v2023_v13 }
 0x256   : > { %v2151_v18 = vld [vmem:[%s16943_s17 + $0x3520] sm:$0xff]  ;;  %11702 = vmatpush1.bf16.msra.mxu0 %v15772_v20  ;;  %11743 = vmatpush1.bf16.msra.mxu1 %v15900_v22 }
 0x257   : > { %v15909_v24 = vcombine.high %v2147_v16, %v2151_v18  ;;  %v2027_v25 = vld [vmem:[%s16943_s17 + $0x3140] sm:$0xff]  ;;  %11703 = vmatprep.subr.bf16.mxu0 %v15781_v23  ;;  %v15908_v2 = vcombine.low %v2147_v16, %v2151_v18 }
 0x258   : > { %v2031_v26 = vld [vmem:[%s16943_s17 + $0x3160] sm:$0xff]  ;;  %v11442_v62 = vpop.f32.mrb[8].mxu1 }
 0x259   : > { %v2155_v28 = vld [vmem:[%s16943_s17 + $0x3540] sm:$0xff]  ;;  %v15789_v34 = vcombine.high %v2027_v25, %v2031_v26  ;;  %11744 = vmatprep.subr.bf16.mxu1 %v15909_v24  ;;  %v15788_v43 = vcombine.low %v2027_v25, %v2031_v26  ;;  %v11401_v48 = vpop.f32.mrb[8].mxu0  ;;  %v11444_v8 = vpop.f32.mrb[9].mxu1 }
 0x25a   : > { %v2159_v30 = vld [vmem:[%s16943_s17 + $0x3560] sm:$0xff]  ;;  %11704 = vmatpush1.bf16.msra.mxu0 %v15780_v31  ;;  %11745 = vmatpush1.bf16.msra.mxu1 %v15908_v2  ;;  %v11402_v57 = vadd.f32 %v11401_v48, %v17415_v27  ;;  %v11403_v1 = vpop.f32.mrb[9].mxu0  ;;  %v11446_v13 = vpop.f32.mrb[10].mxu1 }
 0x25b   : > { %v15917_v36 = vcombine.high %v2155_v28, %v2159_v30  ;;  %v2035_v38 = vld [vmem:[%s16943_s17 + $0x3180] sm:$0xff]  ;;  %11705 = vmatprep.subr.bf16.mxu0 %v15789_v34  ;;  %v15916_v44 = vcombine.low %v2155_v28, %v2159_v30  ;;  %v11404_v6 = vadd.f32 %v11403_v1, %v17417_v33  ;;  %v11405_v9 = vpop.f32.mrb[10].mxu0  ;;  %v11447_v33 = vpop.f32.mrb[11].mxu1 }
 0x25c   : > { %v2039_v39 = vld [vmem:[%s16943_s17 + $0x31a0] sm:$0xff]  ;;  %v17501_v12 = vadd.f32 %v11442_v62, %v11402_v57  ;;  %v11406_v16 = vpop.f32.mrb[11].mxu0 }
 0x25d   : > { %v2163_v40 = vld [vmem:[%s16943_s17 + $0x3580] sm:$0xff]  ;;  %v15797_v47 = vcombine.high %v2035_v38, %v2039_v39  ;;  %11746 = vmatprep.subr.bf16.mxu1 %v15917_v36  ;;  %v15796_v10 = vcombine.low %v2035_v38, %v2039_v39  ;;  %v17503_v20 = vadd.f32 %v11444_v8, %v11404_v6 }
 0x25e   : > { %v2167_v42 = vld [vmem:[%s16943_s17 + $0x35a0] sm:$0xff]  ;;  %11706 = vmatpush1.bf16.msra.mxu0 %v15788_v43  ;;  %11747 = vmatpush1.bf16.msra.mxu1 %v15916_v44 }
 0x25f   : > { %v15925_v53 = vcombine.high %v2163_v40, %v2167_v42  ;;  %v2043_v54 = vld [vmem:[%s16943_s17 + $0x31c0] sm:$0xff]  ;;  %11707 = vmatprep.subr.bf16.mxu0 %v15797_v47  ;;  %v15924_v27 = vcombine.low %v2163_v40, %v2167_v42 }
 0x260   : > { %v2047_v56 = vld [vmem:[%s16943_s17 + $0x31e0] sm:$0xff] }
 0x261   : > { %v2171_v4 = vld [vmem:[%s16943_s17 + $0x35c0] sm:$0xff]  ;;  %v15805_v18 = vcombine.high %v2043_v54, %v2047_v56  ;;  %11748 = vmatprep.subr.bf16.mxu1 %v15925_v53  ;;  %v15804_v28 = vcombine.low %v2043_v54, %v2047_v56 }
 0x262   : > { %v2175_v5 = vld [vmem:[%s16943_s17 + $0x35e0] sm:$0xff]  ;;  %11708 = vmatpush1.bf16.msra.mxu0 %v15796_v10  ;;  %11749 = vmatpush1.bf16.msra.mxu1 %v15924_v27 }
 0x263   : > { %v15933_v22 = vcombine.high %v2171_v4, %v2175_v5  ;;  %v2051_v23 = vld [vmem:[%s16943_s17 + $0x3200] sm:$0xff]  ;;  %11709 = vmatprep.subr.bf16.mxu0 %v15805_v18  ;;  %v15932_v30 = vcombine.low %v2171_v4, %v2175_v5 }
 0x264   : > { %v2055_v24 = vld [vmem:[%s16943_s17 + $0x3220] sm:$0xff] }
 0x265   : > { %v2179_v25 = vld [vmem:[%s16943_s17 + $0x3600] sm:$0xff]  ;;  %v15813_v31 = vcombine.high %v2051_v23, %v2055_v24  ;;  %11750 = vmatprep.subr.bf16.mxu1 %v15933_v22  ;;  %v15812_v40 = vcombine.low %v2051_v23, %v2055_v24 }
 0x266   : > { %v2183_v26 = vld [vmem:[%s16943_s17 + $0x3620] sm:$0xff]  ;;  %11710 = vmatpush1.bf16.msra.mxu0 %v15804_v28  ;;  %11751 = vmatpush1.bf16.msra.mxu1 %v15932_v30 }
 0x267   : > { %v15941_v2 = vcombine.high %v2179_v25, %v2183_v26  ;;  %v2059_v34 = vld [vmem:[%s16943_s17 + $0x3240] sm:$0xff]  ;;  %11711 = vmatprep.subr.bf16.mxu0 %v15813_v31  ;;  %v15940_v42 = vcombine.low %v2179_v25, %v2183_v26 }
 0x268   : > { %v2063_v36 = vld [vmem:[%s16943_s17 + $0x3260] sm:$0xff] }
 0x269   : > { %v2187_v38 = vld [vmem:[%s16943_s17 + $0x3640] sm:$0xff]  ;;  %v15821_v43 = vcombine.high %v2059_v34, %v2063_v36  ;;  %11752 = vmatprep.subr.bf16.mxu1 %v15941_v2  ;;  %v15820_v56 = vcombine.low %v2059_v34, %v2063_v36 }
 0x26a   : > { %v2191_v39 = vld [vmem:[%s16943_s17 + $0x3660] sm:$0xff]  ;;  %11712 = vmatpush1.bf16.msra.mxu0 %v15812_v40  ;;  %11753 = vmatpush1.bf16.msra.mxu1 %v15940_v42 }
 0x26b   : > { %v15949_v44 = vcombine.high %v2187_v38, %v2191_v39  ;;  %v2067_v47 = vld [vmem:[%s16943_s17 + $0x3280] sm:$0xff]  ;;  %11713 = vmatprep.subr.bf16.mxu0 %v15821_v43  ;;  %v15948_v57 = vcombine.low %v2187_v38, %v2191_v39 }
 0x26c   : > { %v2071_v48 = vld [vmem:[%s16943_s17 + $0x32a0] sm:$0xff] }
 0x26d   : > { %v2195_v53 = vld [vmem:[%s16943_s17 + $0x3680] sm:$0xff]  ;;  %v15829_v62 = vcombine.high %v2067_v47, %v2071_v48  ;;  %11754 = vmatprep.subr.bf16.mxu1 %v15949_v44  ;;  %v15828_v9 = vcombine.low %v2067_v47, %v2071_v48 }
 0x26e   : > { %v2199_v54 = vld [vmem:[%s16943_s17 + $0x36a0] sm:$0xff]  ;;  %11714 = vmatpush1.bf16.msra.mxu0 %v15820_v56  ;;  %11755 = vmatpush1.bf16.msra.mxu1 %v15948_v57 }
 0x26f   : > { %v15957_v1 = vcombine.high %v2195_v53, %v2199_v54  ;;  %v2075_v4 = vld [vmem:[%s16943_s17 + $0x32c0] sm:$0xff]  ;;  %11715 = vmatprep.subr.bf16.mxu0 %v15829_v62  ;;  %v15956_v10 = vcombine.low %v2195_v53, %v2199_v54 }
 0x270   : > { %v2079_v5 = vld [vmem:[%s16943_s17 + $0x32e0] sm:$0xff] }
 0x271   : > { %v2203_v6 = vld [vmem:[%s16943_s17 + $0x36c0] sm:$0xff]  ;;  %v15837_v13 = vcombine.high %v2075_v4, %v2079_v5  ;;  %11756 = vmatprep.subr.bf16.mxu1 %v15957_v1  ;;  %v15836_v23 = vcombine.low %v2075_v4, %v2079_v5 }
 0x272   : > { %v2207_v8 = vld [vmem:[%s16943_s17 + $0x36e0] sm:$0xff]  ;;  %11716 = vmatpush1.bf16.msra.mxu0 %v15828_v9  ;;  %11757 = vmatpush1.bf16.msra.mxu1 %v15956_v10  ;;  %v452_v9 = vld [vmem:[%s16943_s17 + $0x8] sm:$0xff] }
 0x273   : > { %v15965_v16 = vcombine.high %v2203_v6, %v2207_v8  ;;  %v2083_v27 = vld [vmem:[%s16943_s17 + $0x3300] sm:$0xff]  ;;  %11717 = vmatprep.subr.bf16.mxu0 %v15837_v13  ;;  %v15964_v24 = vcombine.low %v2203_v6, %v2207_v8  ;;  %v456_v10 = vld [vmem:[%s16943_s17 + $0x28] sm:$0xff] }
 0x274   : > { %v2087_v18 = vld [vmem:[%s16943_s17 + $0x3320] sm:$0xff]  ;;  %v580_v13 = vld [vmem:[%s16943_s17 + $0x408] sm:$0xff] }
 0x275   : > { %v2211_v33 = vld [vmem:[%s16943_s17 + $0x3700] sm:$0xff]  ;;  %v15845_v25 = vcombine.high %v2083_v27, %v2087_v18  ;;  %11758 = vmatprep.subr.bf16.mxu1 %v15965_v16  ;;  %v15844_v34 = vcombine.low %v2083_v27, %v2087_v18  ;;  %v584_v16 = vld [vmem:[%s16943_s17 + $0x428] sm:$0xff] }
 0x276   : > { %v2215_v22 = vld [vmem:[%s16943_s17 + $0x3720] sm:$0xff]  ;;  %11718 = vmatpush1.bf16.msra.mxu0 %v15836_v23  ;;  %11759 = vmatpush1.bf16.msra.mxu1 %v15964_v24  ;;  %v14215_v23 = vcombine.high %v452_v9, %v456_v10  ;;  %v14343_v24 = vcombine.high %v580_v13, %v584_v16 }
 0x277   : > { %v15973_v26 = vcombine.high %v2211_v33, %v2215_v22  ;;  %v2091_v28 = vld [vmem:[%s16943_s17 + $0x3340] sm:$0xff]  ;;  %11719 = vmatprep.subr.bf16.mxu0 %v15845_v25  ;;  %v15972_v36 = vcombine.low %v2211_v33, %v2215_v22  ;;  %v421_v22 = vld [vmem:[%s16965_s14 + $0xd0] sm:$0xff]  ;;  %v460_v25 = vld [vmem:[%s16943_s17 + $0x48] sm:$0xff] }
 0x278   : > { %v2095_v30 = vld [vmem:[%s16943_s17 + $0x3360] sm:$0xff] }
 0x279   : > { %v2219_v31 = vld [vmem:[%s16943_s17 + $0x3740] sm:$0xff]  ;;  %v15853_v38 = vcombine.high %v2091_v28, %v2095_v30  ;;  %11760 = vmatprep.subr.bf16.mxu1 %v15973_v26  ;;  %v15852_v47 = vcombine.low %v2091_v28, %v2095_v30  ;;  %v464_v26 = vld [vmem:[%s16943_s17 + $0x68] sm:$0xff] }
 0x27a   : > { %v2223_v2 = vld [vmem:[%s16943_s17 + $0x3760] sm:$0xff]  ;;  %11720 = vmatpush1.bf16.msra.mxu0 %v15844_v34  ;;  %11761 = vmatpush1.bf16.msra.mxu1 %v15972_v36  ;;  %v588_v30 = vld [vmem:[%s16943_s17 + $0x448] sm:$0xff]  ;;  %v14214_v34 = vcombine.low %v452_v9, %v456_v10  ;;  %v14342_v36 = vcombine.low %v580_v13, %v584_v16 }
 0x27b   : > { %v15981_v39 = vcombine.high %v2219_v31, %v2223_v2  ;;  %v2099_v40 = vld [vmem:[%s16943_s17 + $0x3380] sm:$0xff]  ;;  %11721 = vmatprep.subr.bf16.mxu0 %v15853_v38  ;;  %v15980_v48 = vcombine.low %v2219_v31, %v2223_v2  ;;  %v592_v31 = vld [vmem:[%s16943_s17 + $0x468] sm:$0xff]  ;;  %v17549_v2 = vpack.c.bf16 %v421_v22, %v421_v22  ;;  %v14223_v38 = vcombine.high %v460_v25, %v464_v26 }
 0x27c   : > { %v2103_v42 = vld [vmem:[%s16943_s17 + $0x33a0] sm:$0xff]  ;;  %v484_v9 = vld [vmem:[%s16943_s17 + $0x108] sm:$0xff] }
 0x27d   : > { %v2227_v43 = vld [vmem:[%s16943_s17 + $0x3780] sm:$0xff]  ;;  %v15861_v53 = vcombine.high %v2099_v40, %v2103_v42  ;;  %11762 = vmatprep.subr.bf16.mxu1 %v15981_v39  ;;  %v15860_v4 = vcombine.low %v2099_v40, %v2103_v42  ;;  %v14351_v39 = vcombine.high %v588_v30, %v592_v31  ;;  %v468_v40 = vld [vmem:[%s16943_s17 + $0x88] sm:$0xff] }
 0x27e   : > { %v2231_v44 = vld [vmem:[%s16943_s17 + $0x37a0] sm:$0xff]  ;;  %11722 = vmatpush1.bf16.msra.mxu0 %v15852_v47  ;;  %11763 = vmatpush1.bf16.msra.mxu1 %v15980_v48  ;;  %v472_v42 = vld [vmem:[%s16943_s17 + $0xa8] sm:$0xff]  ;;  %v14222_v47 = vcombine.low %v460_v25, %v464_v26  ;;  %v14350_v48 = vcombine.low %v588_v30, %v592_v31 }
 0x27f   : > { %v15989_v54 = vcombine.high %v2227_v43, %v2231_v44  ;;  %v2107_v56 = vld [vmem:[%s16943_s17 + $0x33c0] sm:$0xff]  ;;  %11723 = vmatprep.subr.bf16.mxu0 %v15861_v53  ;;  %v15988_v5 = vcombine.low %v2227_v43, %v2231_v44  ;;  %v596_v43 = vld [vmem:[%s16943_s17 + $0x488] sm:$0xff]  ;;  %v14231_v53 = vcombine.high %v468_v40, %v472_v42 }
 0x280   : > { %v2111_v57 = vld [vmem:[%s16943_s17 + $0x33e0] sm:$0xff]  ;;  %v600_v44 = vld [vmem:[%s16943_s17 + $0x4a8] sm:$0xff] }
 0x281   : > { %v2235_v62 = vld [vmem:[%s16943_s17 + $0x37c0] sm:$0xff]  ;;  %v15869_v6 = vcombine.high %v2107_v56, %v2111_v57  ;;  %11764 = vmatprep.subr.bf16.mxu1 %v15989_v54  ;;  %v15868_v27 = vcombine.low %v2107_v56, %v2111_v57  ;;  %v14359_v54 = vcombine.high %v596_v43, %v600_v44  ;;  %v476_v56 = vld [vmem:[%s16943_s17 + $0xc8] sm:$0xff] }
 0x282   : > { %v2239_v1 = vld [vmem:[%s16943_s17 + $0x37e0] sm:$0xff]  ;;  %11724 = vmatpush1.bf16.msra.mxu0 %v15860_v4  ;;  %11765 = vmatpush1.bf16.msra.mxu1 %v15988_v5  ;;  %v480_v57 = vld [vmem:[%s16943_s17 + $0xe8] sm:$0xff]  ;;  %v14230_v4 = vcombine.low %v468_v40, %v472_v42  ;;  %v14358_v5 = vcombine.low %v596_v43, %v600_v44 }
 0x283   : > { %v15997_v8 = vcombine.high %v2235_v62, %v2239_v1  ;;  %v419_v18 = vld [vmem:[%s16965_s14 + $0xc0] sm:$0xff]  ;;  %11725 = vmatprep.subr.bf16.mxu0 %v15869_v6  ;;  %v15996_v33 = vcombine.low %v2235_v62, %v2239_v1  ;;  %v604_v62 = vld [vmem:[%s16943_s17 + $0x4c8] sm:$0xff]  ;;  %v14239_v6 = vcombine.high %v476_v56, %v480_v57 }
 0x284   : > { %v17545_v28 = vpack.c.bf16 %v419_v18, %v419_v18  ;;  %v608_v1 = vld [vmem:[%s16943_s17 + $0x4e8] sm:$0xff] }
 0x285   : > { %11766 = vmatprep.subr.bf16.mxu1 %v15997_v8  ;;  %v14367_v8 = vcombine.high %v604_v62, %v608_v1  ;;  %v488_v10 = vld [vmem:[%s16943_s17 + $0x128] sm:$0xff]  ;;  %v14366_v18 = vcombine.low %v604_v62, %v608_v1 }
 0x286   : > { %11726 = vmatpush1.bf16.msra.mxu0 %v15868_v27  ;;  %11767 = vmatpush1.bf16.msra.mxu1 %v15996_v33  ;;  %v612_v13 = vld [vmem:[%s16943_s17 + $0x508] sm:$0xff]  ;;  %v14238_v27 = vcombine.low %v476_v56, %v480_v57  ;;  %v14247_v33 = vcombine.high %v484_v9, %v488_v10  ;;  %v14246_v30 = vcombine.low %v484_v9, %v488_v10 }
 0x287   : > { %11777 = vmatprep.subr.bf16.mxu0 %v14215_v23  ;;  %11818 = vmatprep.subr.bf16.mxu1 %v14343_v24  ;;  %v616_v16 = vld [vmem:[%s16943_s17 + $0x528] sm:$0xff] }
 0x288   : > { %v14375_v22 = vcombine.high %v612_v13, %v616_v16  ;;  %v492_v23 = vld [vmem:[%s16943_s17 + $0x148] sm:$0xff]  ;;  %v14374_v31 = vcombine.low %v612_v13, %v616_v16 }
 0x289   : > { %11728 = vmatmul.mubr.bf16.vlgmr.msra.gmra.mrb[24].mxu0 %v17545_v28  ;;  %11769 = vmatmul.mubr.bf16.vlgmr.msra.gmra.mrb[24].mxu1 %v17549_v2  ;;  %v496_v24 = vld [vmem:[%s16943_s17 + $0x168] sm:$0xff] }
 0x28a   : > { %11778 = vmatpush1.bf16.msra.mxu0 %v14214_v34  ;;  %11819 = vmatpush1.bf16.msra.mxu1 %v14342_v36  ;;  %v620_v25 = vld [vmem:[%s16943_s17 + $0x548] sm:$0xff]  ;;  %v14255_v34 = vcombine.high %v492_v23, %v496_v24  ;;  %v14254_v43 = vcombine.low %v492_v23, %v496_v24 }
 0x28b   : > { %11779 = vmatprep.subr.bf16.mxu0 %v14223_v38  ;;  %11820 = vmatprep.subr.bf16.mxu1 %v14351_v39  ;;  %v624_v26 = vld [vmem:[%s16943_s17 + $0x568] sm:$0xff] }
 0x28c   : > { %11809 = vmatprep.mubr.bf16.mxu0 %v17001_v59  ;;  %11850 = vmatprep.mubr.bf16.mxu1 %v17003_v60  ;;  %v14383_v36 = vcombine.high %v620_v25, %v624_v26  ;;  %v500_v38 = vld [vmem:[%s16943_s17 + $0x188] sm:$0xff]  ;;  %v14382_v44 = vcombine.low %v620_v25, %v624_v26 }
 0x28d   : > { %v504_v39 = vld [vmem:[%s16943_s17 + $0x1a8] sm:$0xff] }
 0x28e   : > { %11780 = vmatpush1.bf16.msra.mxu0 %v14222_v47  ;;  %11821 = vmatpush1.bf16.msra.mxu1 %v14350_v48  ;;  %v628_v40 = vld [vmem:[%s16943_s17 + $0x588] sm:$0xff]  ;;  %v14263_v47 = vcombine.high %v500_v38, %v504_v39  ;;  %v14262_v10 = vcombine.low %v500_v38, %v504_v39 }
 0x28f   : > { %11781 = vmatprep.subr.bf16.mxu0 %v14231_v53  ;;  %11822 = vmatprep.subr.bf16.mxu1 %v14359_v54  ;;  %v632_v42 = vld [vmem:[%s16943_s17 + $0x5a8] sm:$0xff] }
 0x290   : > { %v14391_v53 = vcombine.high %v628_v40, %v632_v42  ;;  %v508_v54 = vld [vmem:[%s16943_s17 + $0x1c8] sm:$0xff] }
 0x291   : > { %v512_v56 = vld [vmem:[%s16943_s17 + $0x1e8] sm:$0xff] }
 0x292   : > { %11782 = vmatpush1.bf16.msra.mxu0 %v14230_v4  ;;  %11823 = vmatpush1.bf16.msra.mxu1 %v14358_v5  ;;  %v636_v4 = vld [vmem:[%s16943_s17 + $0x5c8] sm:$0xff] }
 0x293   : > { %11783 = vmatprep.subr.bf16.mxu0 %v14239_v6  ;;  %11824 = vmatprep.subr.bf16.mxu1 %v14367_v8  ;;  %v640_v5 = vld [vmem:[%s16943_s17 + $0x5e8] sm:$0xff] }
 0x294   : > { %v516_v23 = vld [vmem:[%s16943_s17 + $0x208] sm:$0xff] }
 0x295   : > { %v520_v24 = vld [vmem:[%s16943_s17 + $0x228] sm:$0xff] }
 0x296   : > { %11784 = vmatpush1.bf16.msra.mxu0 %v14238_v27  ;;  %11825 = vmatpush1.bf16.msra.mxu1 %v14366_v18  ;;  %v14271_v18 = vcombine.high %v508_v54, %v512_v56  ;;  %v644_v25 = vld [vmem:[%s16943_s17 + $0x608] sm:$0xff] }
 0x297   : > { %11785 = vmatprep.subr.bf16.mxu0 %v14247_v33  ;;  %11826 = vmatprep.subr.bf16.mxu1 %v14375_v22  ;;  %v14399_v22 = vcombine.high %v636_v4, %v640_v5  ;;  %v648_v26 = vld [vmem:[%s16943_s17 + $0x628] sm:$0xff] }
 0x298   : > { %v524_v38 = vld [vmem:[%s16943_s17 + $0x248] sm:$0xff] }
 0x299   : > { %v11524_v62 = vpop.f32.mrb[12].mxu1  ;;  %v528_v39 = vld [vmem:[%s16943_s17 + $0x268] sm:$0xff] }
 0x29a   : > { %11786 = vmatpush1.bf16.msra.mxu0 %v14246_v30  ;;  %11827 = vmatpush1.bf16.msra.mxu1 %v14374_v31  ;;  %v11483_v48 = vpop.f32.mrb[12].mxu0  ;;  %v11526_v8 = vpop.f32.mrb[13].mxu1  ;;  %v14270_v30 = vcombine.low %v508_v54, %v512_v56  ;;  %v14398_v31 = vcombine.low %v636_v4, %v640_v5  ;;  %v536_v54 = vld [vmem:[%s16943_s17 + $0x2a8] sm:$0xff] }
 0x29b   : > { %11787 = vmatprep.subr.bf16.mxu0 %v14255_v34  ;;  %11828 = vmatprep.subr.bf16.mxu1 %v14383_v36  ;;  %v11484_v57 = vadd.f32 %v11483_v48, %v17501_v12  ;;  %v11485_v1 = vpop.f32.mrb[13].mxu0  ;;  %v11528_v16 = vpop.f32.mrb[14].mxu1  ;;  %v14390_v12 = vcombine.low %v628_v40, %v632_v42  ;;  %v14279_v34 = vcombine.high %v516_v23, %v520_v24  ;;  %v652_v40 = vld [vmem:[%s16943_s17 + $0x648] sm:$0xff] }
 0x29c   : > { %v11486_v6 = vadd.f32 %v11485_v1, %v17503_v20  ;;  %v11487_v9 = vpop.f32.mrb[14].mxu0  ;;  %v11529_v20 = vpop.f32.mrb[15].mxu1  ;;  %v14407_v36 = vcombine.high %v644_v25, %v648_v26  ;;  %v656_v42 = vld [vmem:[%s16943_s17 + $0x668] sm:$0xff] }
 0x29d   : > { %v17581_v13 = vadd.f32 %v11524_v62, %v11484_v57  ;;  %v11488_v27 = vpop.f32.mrb[15].mxu0  ;;  %v14415_v48 = vcombine.high %v652_v40, %v656_v42  ;;  %v660_v56 = vld [vmem:[%s16943_s17 + $0x688] sm:$0xff]  ;;  %v14286_v62 = vcombine.low %v524_v38, %v528_v39  ;;  %v14414_v1 = vcombine.low %v652_v40, %v656_v42 }
 0x29e   : > { %11788 = vmatpush1.bf16.msra.mxu0 %v14254_v43  ;;  %11829 = vmatpush1.bf16.msra.mxu1 %v14382_v44  ;;  %v17583_v33 = vadd.f32 %v11526_v8, %v11486_v6  ;;  %v14278_v43 = vcombine.low %v516_v23, %v520_v24  ;;  %v14406_v44 = vcombine.low %v644_v25, %v648_v26  ;;  %v664_v57 = vld [vmem:[%s16943_s17 + $0x6a8] sm:$0xff] }
 0x29f   : > { %11789 = vmatprep.subr.bf16.mxu0 %v14263_v47  ;;  %11830 = vmatprep.subr.bf16.mxu1 %v14391_v53  ;;  %v14287_v47 = vcombine.high %v524_v38, %v528_v39  ;;  %v532_v53 = vld [vmem:[%s16943_s17 + $0x288] sm:$0xff]  ;;  %v14423_v5 = vcombine.high %v660_v56, %v664_v57  ;;  %v14422_v27 = vcombine.low %v660_v56, %v664_v57 }
 0x2a0   : > { %v14295_v4 = vcombine.high %v532_v53, %v536_v54  ;;  %v540_v6 = vld [vmem:[%s16943_s17 + $0x2c8] sm:$0xff]  ;;  %v14294_v16 = vcombine.low %v532_v53, %v536_v54 }
 0x2a1   : > { %v544_v8 = vld [vmem:[%s16943_s17 + $0x2e8] sm:$0xff] }
 0x2a2   : > { %11790 = vmatpush1.bf16.msra.mxu0 %v14262_v10  ;;  %11831 = vmatpush1.bf16.msra.mxu1 %v14390_v12  ;;  %v668_v9 = vld [vmem:[%s16943_s17 + $0x6c8] sm:$0xff]  ;;  %v14303_v12 = vcombine.high %v540_v6, %v544_v8  ;;  %v14302_v25 = vcombine.low %v540_v6, %v544_v8 }
 0x2a3   : > { %11791 = vmatprep.subr.bf16.mxu0 %v14271_v18  ;;  %11832 = vmatprep.subr.bf16.mxu1 %v14399_v22  ;;  %v672_v10 = vld [vmem:[%s16943_s17 + $0x6e8] sm:$0xff] }
 0x2a4   : > { %v14431_v18 = vcombine.high %v668_v9, %v672_v10  ;;  %v548_v20 = vld [vmem:[%s16943_s17 + $0x308] sm:$0xff]  ;;  %v14430_v26 = vcombine.low %v668_v9, %v672_v10 }
 0x2a5   : > { %v552_v22 = vld [vmem:[%s16943_s17 + $0x328] sm:$0xff] }
 0x2a6   : > { %11792 = vmatpush1.bf16.msra.mxu0 %v14270_v30  ;;  %11833 = vmatpush1.bf16.msra.mxu1 %v14398_v31  ;;  %v676_v23 = vld [vmem:[%s16943_s17 + $0x708] sm:$0xff]  ;;  %v14311_v30 = vcombine.high %v548_v20, %v552_v22  ;;  %v14310_v40 = vcombine.low %v548_v20, %v552_v22 }
 0x2a7   : > { %11793 = vmatprep.subr.bf16.mxu0 %v14279_v34  ;;  %11834 = vmatprep.subr.bf16.mxu1 %v14407_v36  ;;  %v680_v24 = vld [vmem:[%s16943_s17 + $0x728] sm:$0xff] }
 0x2a8   : > { %v14439_v31 = vcombine.high %v676_v23, %v680_v24  ;;  %v556_v34 = vld [vmem:[%s16943_s17 + $0x348] sm:$0xff]  ;;  %v14438_v42 = vcombine.low %v676_v23, %v680_v24 }
 0x2a9   : > { %v560_v36 = vld [vmem:[%s16943_s17 + $0x368] sm:$0xff] }
 0x2aa   : > { %11794 = vmatpush1.bf16.msra.mxu0 %v14278_v43  ;;  %11835 = vmatpush1.bf16.msra.mxu1 %v14406_v44  ;;  %v684_v38 = vld [vmem:[%s16943_s17 + $0x748] sm:$0xff]  ;;  %v14319_v43 = vcombine.high %v556_v34, %v560_v36  ;;  %v14318_v56 = vcombine.low %v556_v34, %v560_v36 }
 0x2ab   : > { %11795 = vmatprep.subr.bf16.mxu0 %v14287_v47  ;;  %11836 = vmatprep.subr.bf16.mxu1 %v14415_v48  ;;  %v688_v39 = vld [vmem:[%s16943_s17 + $0x768] sm:$0xff] }
 0x2ac   : > { %v14447_v44 = vcombine.high %v684_v38, %v688_v39  ;;  %v564_v47 = vld [vmem:[%s16943_s17 + $0x388] sm:$0xff]  ;;  %v14446_v57 = vcombine.low %v684_v38, %v688_v39 }
 0x2ad   : > { %v568_v48 = vld [vmem:[%s16943_s17 + $0x3a8] sm:$0xff] }
 0x2ae   : > { %11796 = vmatpush1.bf16.msra.mxu0 %v14286_v62  ;;  %11837 = vmatpush1.bf16.msra.mxu1 %v14414_v1  ;;  %v692_v53 = vld [vmem:[%s16943_s17 + $0x788] sm:$0xff]  ;;  %v14327_v62 = vcombine.high %v564_v47, %v568_v48  ;;  %v14326_v9 = vcombine.low %v564_v47, %v568_v48 }
 0x2af   : > { %11797 = vmatprep.subr.bf16.mxu0 %v14295_v4  ;;  %11838 = vmatprep.subr.bf16.mxu1 %v14423_v5  ;;  %v696_v54 = vld [vmem:[%s16943_s17 + $0x7a8] sm:$0xff] }
 0x2b0   : > { %v14455_v1 = vcombine.high %v692_v53, %v696_v54  ;;  %v572_v4 = vld [vmem:[%s16943_s17 + $0x3c8] sm:$0xff]  ;;  %v14454_v10 = vcombine.low %v692_v53, %v696_v54 }
 0x2b1   : > { %v576_v5 = vld [vmem:[%s16943_s17 + $0x3e8] sm:$0xff] }
 0x2b2   : > { %11798 = vmatpush1.bf16.msra.mxu0 %v14294_v16  ;;  %11839 = vmatpush1.bf16.msra.mxu1 %v14422_v27  ;;  %v700_v6 = vld [vmem:[%s16943_s17 + $0x7c8] sm:$0xff]  ;;  %v14335_v16 = vcombine.high %v572_v4, %v576_v5  ;;  %v14334_v23 = vcombine.low %v572_v4, %v576_v5 }
 0x2b3   : > { %11799 = vmatprep.subr.bf16.mxu0 %v14303_v12  ;;  %11840 = vmatprep.subr.bf16.mxu1 %v14431_v18  ;;  %v704_v8 = vld [vmem:[%s16943_s17 + $0x7e8] sm:$0xff] }
 0x2b4   : > { %v14463_v27 = vcombine.high %v700_v6, %v704_v8  ;;  %v708_v12 = vld [vmem:[%s16943_s17 + $0x808] sm:$0xff]  ;;  %v14462_v24 = vcombine.low %v700_v6, %v704_v8 }
 0x2b5   : > { %v712_v18 = vld [vmem:[%s16943_s17 + $0x828] sm:$0xff] }
 0x2b6   : > { %11800 = vmatpush1.bf16.msra.mxu0 %v14302_v25  ;;  %11841 = vmatpush1.bf16.msra.mxu1 %v14430_v26  ;;  %v836_v20 = vld [vmem:[%s16943_s17 + $0xc08] sm:$0xff]  ;;  %v14471_v25 = vcombine.high %v708_v12, %v712_v18  ;;  %v14470_v38 = vcombine.low %v708_v12, %v712_v18 }
 0x2b7   : > { %11801 = vmatprep.subr.bf16.mxu0 %v14311_v30  ;;  %11842 = vmatprep.subr.bf16.mxu1 %v14439_v31  ;;  %v840_v22 = vld [vmem:[%s16943_s17 + $0xc28] sm:$0xff] }
 0x2b8   : > { %v14599_v26 = vcombine.high %v836_v20, %v840_v22  ;;  %v716_v30 = vld [vmem:[%s16943_s17 + $0x848] sm:$0xff]  ;;  %v14598_v39 = vcombine.low %v836_v20, %v840_v22 }
 0x2b9   : > { %v720_v31 = vld [vmem:[%s16943_s17 + $0x868] sm:$0xff] }
 0x2ba   : > { %11802 = vmatpush1.bf16.msra.mxu0 %v14310_v40  ;;  %11843 = vmatpush1.bf16.msra.mxu1 %v14438_v42  ;;  %v844_v34 = vld [vmem:[%s16943_s17 + $0xc48] sm:$0xff]  ;;  %v14479_v40 = vcombine.high %v716_v30, %v720_v31  ;;  %v14478_v53 = vcombine.low %v716_v30, %v720_v31 }
 0x2bb   : > { %11803 = vmatprep.subr.bf16.mxu0 %v14319_v43  ;;  %11844 = vmatprep.subr.bf16.mxu1 %v14447_v44  ;;  %v848_v36 = vld [vmem:[%s16943_s17 + $0xc68] sm:$0xff] }
 0x2bc   : > { %v14607_v42 = vcombine.high %v844_v34, %v848_v36  ;;  %v724_v43 = vld [vmem:[%s16943_s17 + $0x888] sm:$0xff]  ;;  %v14606_v54 = vcombine.low %v844_v34, %v848_v36 }
 0x2bd   : > { %v728_v44 = vld [vmem:[%s16943_s17 + $0x8a8] sm:$0xff] }
 0x2be   : > { %11804 = vmatpush1.bf16.msra.mxu0 %v14318_v56  ;;  %11845 = vmatpush1.bf16.msra.mxu1 %v14446_v57  ;;  %v852_v47 = vld [vmem:[%s16943_s17 + $0xc88] sm:$0xff]  ;;  %v14487_v56 = vcombine.high %v724_v43, %v728_v44  ;;  %v14486_v6 = vcombine.low %v724_v43, %v728_v44 }
 0x2bf   : > { %11805 = vmatprep.subr.bf16.mxu0 %v14327_v62  ;;  %11846 = vmatprep.subr.bf16.mxu1 %v14455_v1  ;;  %v856_v48 = vld [vmem:[%s16943_s17 + $0xca8] sm:$0xff] }
 0x2c0   : > { %v14615_v57 = vcombine.high %v852_v47, %v856_v48  ;;  %v732_v62 = vld [vmem:[%s16943_s17 + $0x8c8] sm:$0xff]  ;;  %v14614_v8 = vcombine.low %v852_v47, %v856_v48 }
 0x2c1   : > { %v736_v1 = vld [vmem:[%s16943_s17 + $0x8e8] sm:$0xff] }
 0x2c2   : > { %11806 = vmatpush1.bf16.msra.mxu0 %v14326_v9  ;;  %11847 = vmatpush1.bf16.msra.mxu1 %v14454_v10  ;;  %v860_v4 = vld [vmem:[%s16943_s17 + $0xcc8] sm:$0xff]  ;;  %v14495_v9 = vcombine.high %v732_v62, %v736_v1  ;;  %v14494_v20 = vcombine.low %v732_v62, %v736_v1 }
 0x2c3   : > { %11807 = vmatprep.subr.bf16.mxu0 %v14335_v16  ;;  %11848 = vmatprep.subr.bf16.mxu1 %v14463_v27  ;;  %v864_v5 = vld [vmem:[%s16943_s17 + $0xce8] sm:$0xff] }
 0x2c4   : > { %v14623_v10 = vcombine.high %v860_v4, %v864_v5  ;;  %v740_v16 = vld [vmem:[%s16943_s17 + $0x908] sm:$0xff]  ;;  %v14622_v22 = vcombine.low %v860_v4, %v864_v5 }
 0x2c5   : > { %v744_v27 = vld [vmem:[%s16943_s17 + $0x928] sm:$0xff] }
 0x2c6   : > { %11808 = vmatpush1.bf16.msra.mxu0 %v14334_v23  ;;  %11849 = vmatpush1.bf16.msra.mxu1 %v14462_v24  ;;  %v868_v12 = vld [vmem:[%s16943_s17 + $0xd08] sm:$0xff]  ;;  %v14503_v23 = vcombine.high %v740_v16, %v744_v27  ;;  %v14502_v34 = vcombine.low %v740_v16, %v744_v27 }
 0x2c7   : > { %11859 = vmatprep.subr.bf16.mxu0 %v14471_v25  ;;  %11900 = vmatprep.subr.bf16.mxu1 %v14599_v26  ;;  %v872_v18 = vld [vmem:[%s16943_s17 + $0xd28] sm:$0xff] }
 0x2c8   : > { %v14631_v24 = vcombine.high %v868_v12, %v872_v18  ;;  %v748_v25 = vld [vmem:[%s16943_s17 + $0x948] sm:$0xff]  ;;  %v14630_v36 = vcombine.low %v868_v12, %v872_v18 }
 0x2c9   : > { %11810 = vmatmul.mubr.bf16.vlgmr.msra.gmra.mrb[28].mxu0 %v17049_v17  ;;  %11851 = vmatmul.mubr.bf16.vlgmr.msra.gmra.mrb[28].mxu1 %v17054_v21  ;;  %v752_v26 = vld [vmem:[%s16943_s17 + $0x968] sm:$0xff] }
 0x2ca   : > { %11860 = vmatpush1.bf16.msra.mxu0 %v14470_v38  ;;  %11901 = vmatpush1.bf16.msra.mxu1 %v14598_v39  ;;  %v876_v30 = vld [vmem:[%s16943_s17 + $0xd48] sm:$0xff]  ;;  %v14511_v38 = vcombine.high %v748_v25, %v752_v26  ;;  %v14510_v47 = vcombine.low %v748_v25, %v752_v26 }
 0x2cb   : > { %11861 = vmatprep.subr.bf16.mxu0 %v14479_v40  ;;  %11902 = vmatprep.subr.bf16.mxu1 %v14607_v42  ;;  %v880_v31 = vld [vmem:[%s16943_s17 + $0xd68] sm:$0xff] }
 0x2cc   : > { %11891 = vmatprep.mubr.bf16.mxu0 %v17059_v29  ;;  %11932 = vmatprep.mubr.bf16.mxu1 %v17064_v32  ;;  %v14639_v39 = vcombine.high %v876_v30, %v880_v31  ;;  %v756_v40 = vld [vmem:[%s16943_s17 + $0x988] sm:$0xff]  ;;  %v14638_v48 = vcombine.low %v876_v30, %v880_v31 }
 0x2cd   : > { %v760_v42 = vld [vmem:[%s16943_s17 + $0x9a8] sm:$0xff] }
 0x2ce   : > { %11862 = vmatpush1.bf16.msra.mxu0 %v14478_v53  ;;  %11903 = vmatpush1.bf16.msra.mxu1 %v14606_v54  ;;  %v884_v43 = vld [vmem:[%s16943_s17 + $0xd88] sm:$0xff]  ;;  %v14519_v53 = vcombine.high %v756_v40, %v760_v42  ;;  %v14518_v27 = vcombine.low %v756_v40, %v760_v42 }
 0x2cf   : > { %11863 = vmatprep.subr.bf16.mxu0 %v14487_v56  ;;  %11904 = vmatprep.subr.bf16.mxu1 %v14615_v57  ;;  %v888_v44 = vld [vmem:[%s16943_s17 + $0xda8] sm:$0xff] }
 0x2d0   : > { %v14647_v56 = vcombine.high %v884_v43, %v888_v44  ;;  %v764_v57 = vld [vmem:[%s16943_s17 + $0x9c8] sm:$0xff] }
 0x2d1   : > { %v768_v62 = vld [vmem:[%s16943_s17 + $0x9e8] sm:$0xff] }
 0x2d2   : > { %11864 = vmatpush1.bf16.msra.mxu0 %v14486_v6  ;;  %11905 = vmatpush1.bf16.msra.mxu1 %v14614_v8  ;;  %v892_v6 = vld [vmem:[%s16943_s17 + $0xdc8] sm:$0xff] }
 0x2d3   : > { %11865 = vmatprep.subr.bf16.mxu0 %v14495_v9  ;;  %11906 = vmatprep.subr.bf16.mxu1 %v14623_v10  ;;  %v896_v8 = vld [vmem:[%s16943_s17 + $0xde8] sm:$0xff] }
 0x2d4   : > { %v772_v25 = vld [vmem:[%s16943_s17 + $0xa08] sm:$0xff] }
 0x2d5   : > { %v776_v26 = vld [vmem:[%s16943_s17 + $0xa28] sm:$0xff] }
 0x2d6   : > { %11866 = vmatpush1.bf16.msra.mxu0 %v14494_v20  ;;  %11907 = vmatpush1.bf16.msra.mxu1 %v14622_v22  ;;  %v14527_v22 = vcombine.high %v764_v57, %v768_v62  ;;  %v900_v30 = vld [vmem:[%s16943_s17 + $0xe08] sm:$0xff] }
 0x2d7   : > { %11867 = vmatprep.subr.bf16.mxu0 %v14503_v23  ;;  %11908 = vmatprep.subr.bf16.mxu1 %v14631_v24  ;;  %v14655_v24 = vcombine.high %v892_v6, %v896_v8  ;;  %v904_v31 = vld [vmem:[%s16943_s17 + $0xe28] sm:$0xff] }
 0x2d8   : > { %v780_v40 = vld [vmem:[%s16943_s17 + $0xa48] sm:$0xff] }
 0x2d9   : > { %v784_v42 = vld [vmem:[%s16943_s17 + $0xa68] sm:$0xff] }
 0x2da   : > { %11868 = vmatpush1.bf16.msra.mxu0 %v14502_v34  ;;  %11909 = vmatpush1.bf16.msra.mxu1 %v14630_v36  ;;  %v11606_v4 = vpop.f32.mrb[16].mxu1  ;;  %v14526_v34 = vcombine.low %v764_v57, %v768_v62  ;;  %v14654_v36 = vcombine.low %v892_v6, %v896_v8  ;;  %v792_v57 = vld [vmem:[%s16943_s17 + $0xaa8] sm:$0xff] }
 0x2db   : > { %11869 = vmatprep.subr.bf16.mxu0 %v14511_v38  ;;  %v11565_v54 = vpop.f32.mrb[16].mxu0  ;;  %11910 = vmatprep.subr.bf16.mxu1 %v14639_v39  ;;  %v11608_v10 = vpop.f32.mrb[17].mxu1  ;;  %v14535_v38 = vcombine.high %v772_v25, %v776_v26  ;;  %v14663_v39 = vcombine.high %v900_v30, %v904_v31  ;;  %v916_v62 = vld [vmem:[%s16943_s17 + $0xe88] sm:$0xff] }
 0x2dc   : > { %v11566_v1 = vadd.f32 %v11565_v54, %v17581_v13  ;;  %v11567_v5 = vpop.f32.mrb[17].mxu0  ;;  %v11610_v18 = vpop.f32.mrb[18].mxu1  ;;  %v14646_v13 = vcombine.low %v884_v43, %v888_v44  ;;  %v908_v43 = vld [vmem:[%s16943_s17 + $0xe48] sm:$0xff] }
 0x2dd   : > { %v11568_v9 = vadd.f32 %v11567_v5, %v17583_v33  ;;  %v11569_v16 = vpop.f32.mrb[18].mxu0  ;;  %v11611_v33 = vpop.f32.mrb[19].mxu1  ;;  %v912_v44 = vld [vmem:[%s16943_s17 + $0xe68] sm:$0xff] }
 0x2de   : > { %11870 = vmatpush1.bf16.msra.mxu0 %v14510_v47  ;;  %v17655_v12 = vadd.f32 %v11606_v4, %v11566_v1  ;;  %11911 = vmatpush1.bf16.msra.mxu1 %v14638_v48  ;;  %v11570_v20 = vpop.f32.mrb[19].mxu0  ;;  %v14534_v47 = vcombine.low %v772_v25, %v776_v26  ;;  %v14662_v48 = vcombine.low %v900_v30, %v904_v31  ;;  %v920_v1 = vld [vmem:[%s16943_s17 + $0xea8] sm:$0xff] }
 0x2df   : > { %11871 = vmatprep.subr.bf16.mxu0 %v14519_v53  ;;  %v17657_v23 = vadd.f32 %v11608_v10, %v11568_v9  ;;  %11912 = vmatprep.subr.bf16.mxu1 %v14647_v56  ;;  %v14543_v53 = vcombine.high %v780_v40, %v784_v42  ;;  %v14671_v54 = vcombine.high %v908_v43, %v912_v44  ;;  %v788_v56 = vld [vmem:[%s16943_s17 + $0xa88] sm:$0xff] }
 0x2e0   : > { %v14542_v4 = vcombine.low %v780_v40, %v784_v42  ;;  %v14670_v5 = vcombine.low %v908_v43, %v912_v44  ;;  %v14551_v6 = vcombine.high %v788_v56, %v792_v57  ;;  %v14679_v8 = vcombine.high %v916_v62, %v920_v1  ;;  %v796_v9 = vld [vmem:[%s16943_s17 + $0xac8] sm:$0xff] }
 0x2e1   : > { %v800_v10 = vld [vmem:[%s16943_s17 + $0xae8] sm:$0xff]  ;;  %v14550_v18 = vcombine.low %v788_v56, %v792_v57  ;;  %v14678_v20 = vcombine.low %v916_v62, %v920_v1 }
 0x2e2   : > { %11872 = vmatpush1.bf16.msra.mxu0 %v14518_v27  ;;  %11913 = vmatpush1.bf16.msra.mxu1 %v14646_v13  ;;  %v924_v16 = vld [vmem:[%s16943_s17 + $0xec8] sm:$0xff]  ;;  %v14559_v13 = vcombine.high %v796_v9, %v800_v10  ;;  %v14558_v30 = vcombine.low %v796_v9, %v800_v10 }
 0x2e3   : > { %11873 = vmatprep.subr.bf16.mxu0 %v14527_v22  ;;  %11914 = vmatprep.subr.bf16.mxu1 %v14655_v24  ;;  %v928_v27 = vld [vmem:[%s16943_s17 + $0xee8] sm:$0xff] }
 0x2e4   : > { %v14687_v22 = vcombine.high %v924_v16, %v928_v27  ;;  %v804_v33 = vld [vmem:[%s16943_s17 + $0xb08] sm:$0xff]  ;;  %v14686_v31 = vcombine.low %v924_v16, %v928_v27 }
 0x2e5   : > { %v808_v24 = vld [vmem:[%s16943_s17 + $0xb28] sm:$0xff] }
 0x2e6   : > { %11874 = vmatpush1.bf16.msra.mxu0 %v14526_v34  ;;  %11915 = vmatpush1.bf16.msra.mxu1 %v14654_v36  ;;  %v932_v25 = vld [vmem:[%s16943_s17 + $0xf08] sm:$0xff]  ;;  %v14567_v34 = vcombine.high %v804_v33, %v808_v24  ;;  %v14566_v43 = vcombine.low %v804_v33, %v808_v24 }
 0x2e7   : > { %11875 = vmatprep.subr.bf16.mxu0 %v14535_v38  ;;  %11916 = vmatprep.subr.bf16.mxu1 %v14663_v39  ;;  %v936_v26 = vld [vmem:[%s16943_s17 + $0xf28] sm:$0xff] }
 0x2e8   : > { %v14695_v36 = vcombine.high %v932_v25, %v936_v26  ;;  %v812_v38 = vld [vmem:[%s16943_s17 + $0xb48] sm:$0xff]  ;;  %v14694_v44 = vcombine.low %v932_v25, %v936_v26 }
 0x2e9   : > { %v816_v39 = vld [vmem:[%s16943_s17 + $0xb68] sm:$0xff] }
 0x2ea   : > { %11876 = vmatpush1.bf16.msra.mxu0 %v14534_v47  ;;  %11917 = vmatpush1.bf16.msra.mxu1 %v14662_v48  ;;  %v940_v40 = vld [vmem:[%s16943_s17 + $0xf48] sm:$0xff]  ;;  %v14575_v47 = vcombine.high %v812_v38, %v816_v39  ;;  %v14574_v62 = vcombine.low %v812_v38, %v816_v39 }
 0x2eb   : > { %11877 = vmatprep.subr.bf16.mxu0 %v14543_v53  ;;  %11918 = vmatprep.subr.bf16.mxu1 %v14671_v54  ;;  %v944_v42 = vld [vmem:[%s16943_s17 + $0xf68] sm:$0xff] }
 0x2ec   : > { %v14703_v48 = vcombine.high %v940_v40, %v944_v42  ;;  %v820_v53 = vld [vmem:[%s16943_s17 + $0xb88] sm:$0xff]  ;;  %v14702_v1 = vcombine.low %v940_v40, %v944_v42 }
 0x2ed   : > { %v824_v54 = vld [vmem:[%s16943_s17 + $0xba8] sm:$0xff] }
 0x2ee   : > { %11878 = vmatpush1.bf16.msra.mxu0 %v14542_v4  ;;  %11919 = vmatpush1.bf16.msra.mxu1 %v14670_v5  ;;  %v948_v56 = vld [vmem:[%s16943_s17 + $0xf88] sm:$0xff]  ;;  %v14583_v4 = vcombine.high %v820_v53, %v824_v54  ;;  %v14582_v16 = vcombine.low %v820_v53, %v824_v54 }
 0x2ef   : > { %11879 = vmatprep.subr.bf16.mxu0 %v14551_v6  ;;  %11920 = vmatprep.subr.bf16.mxu1 %v14679_v8  ;;  %v952_v57 = vld [vmem:[%s16943_s17 + $0xfa8] sm:$0xff] }
 0x2f0   : > { %v14711_v5 = vcombine.high %v948_v56, %v952_v57  ;;  %v828_v6 = vld [vmem:[%s16943_s17 + $0xbc8] sm:$0xff]  ;;  %v14710_v27 = vcombine.low %v948_v56, %v952_v57 }
 0x2f1   : > { %v832_v8 = vld [vmem:[%s16943_s17 + $0xbe8] sm:$0xff] }
 0x2f2   : > { %11880 = vmatpush1.bf16.msra.mxu0 %v14550_v18  ;;  %11921 = vmatpush1.bf16.msra.mxu1 %v14678_v20  ;;  %v956_v9 = vld [vmem:[%s16943_s17 + $0xfc8] sm:$0xff]  ;;  %v14591_v18 = vcombine.high %v828_v6, %v832_v8  ;;  %v14590_v25 = vcombine.low %v828_v6, %v832_v8 }
 0x2f3   : > { %11881 = vmatprep.subr.bf16.mxu0 %v14559_v13  ;;  %11922 = vmatprep.subr.bf16.mxu1 %v14687_v22  ;;  %v960_v10 = vld [vmem:[%s16943_s17 + $0xfe8] sm:$0xff] }
 0x2f4   : > { %v14719_v20 = vcombine.high %v956_v9, %v960_v10  ;;  %v964_v13 = vld [vmem:[%s16943_s17 + $0x1008] sm:$0xff]  ;;  %v14718_v26 = vcombine.low %v956_v9, %v960_v10 }
 0x2f5   : > { %v968_v22 = vld [vmem:[%s16943_s17 + $0x1028] sm:$0xff] }
 0x2f6   : > { %11882 = vmatpush1.bf16.msra.mxu0 %v14558_v30  ;;  %11923 = vmatpush1.bf16.msra.mxu1 %v14686_v31  ;;  %v1092_v33 = vld [vmem:[%s16943_s17 + $0x1408] sm:$0xff]  ;;  %v14727_v30 = vcombine.high %v964_v13, %v968_v22  ;;  %v14726_v40 = vcombine.low %v964_v13, %v968_v22 }
 0x2f7   : > { %11883 = vmatprep.subr.bf16.mxu0 %v14567_v34  ;;  %11924 = vmatprep.subr.bf16.mxu1 %v14695_v36  ;;  %v1096_v24 = vld [vmem:[%s16943_s17 + $0x1428] sm:$0xff] }
 0x2f8   : > { %v14855_v31 = vcombine.high %v1092_v33, %v1096_v24  ;;  %v972_v34 = vld [vmem:[%s16943_s17 + $0x1048] sm:$0xff]  ;;  %v14854_v42 = vcombine.low %v1092_v33, %v1096_v24 }
 0x2f9   : > { %v976_v36 = vld [vmem:[%s16943_s17 + $0x1068] sm:$0xff] }
 0x2fa   : > { %11884 = vmatpush1.bf16.msra.mxu0 %v14566_v43  ;;  %11925 = vmatpush1.bf16.msra.mxu1 %v14694_v44  ;;  %v1100_v38 = vld [vmem:[%s16943_s17 + $0x1448] sm:$0xff]  ;;  %v14735_v43 = vcombine.high %v972_v34, %v976_v36  ;;  %v14734_v56 = vcombine.low %v972_v34, %v976_v36 }
 0x2fb   : > { %11885 = vmatprep.subr.bf16.mxu0 %v14575_v47  ;;  %11926 = vmatprep.subr.bf16.mxu1 %v14703_v48  ;;  %v1104_v39 = vld [vmem:[%s16943_s17 + $0x1468] sm:$0xff] }
 0x2fc   : > { %v14863_v44 = vcombine.high %v1100_v38, %v1104_v39  ;;  %v980_v47 = vld [vmem:[%s16943_s17 + $0x1088] sm:$0xff]  ;;  %v14862_v57 = vcombine.low %v1100_v38, %v1104_v39 }
 0x2fd   : > { %v984_v48 = vld [vmem:[%s16943_s17 + $0x10a8] sm:$0xff] }
 0x2fe   : > { %11886 = vmatpush1.bf16.msra.mxu0 %v14574_v62  ;;  %11927 = vmatpush1.bf16.msra.mxu1 %v14702_v1  ;;  %v1108_v53 = vld [vmem:[%s16943_s17 + $0x1488] sm:$0xff]  ;;  %v14743_v62 = vcombine.high %v980_v47, %v984_v48  ;;  %v14742_v9 = vcombine.low %v980_v47, %v984_v48 }
 0x2ff   : > { %11887 = vmatprep.subr.bf16.mxu0 %v14583_v4  ;;  %11928 = vmatprep.subr.bf16.mxu1 %v14711_v5  ;;  %v1112_v54 = vld [vmem:[%s16943_s17 + $0x14a8] sm:$0xff] }
 0x300   : > { %v14871_v1 = vcombine.high %v1108_v53, %v1112_v54  ;;  %v988_v4 = vld [vmem:[%s16943_s17 + $0x10c8] sm:$0xff]  ;;  %v14870_v10 = vcombine.low %v1108_v53, %v1112_v54 }
 0x301   : > { %v992_v5 = vld [vmem:[%s16943_s17 + $0x10e8] sm:$0xff] }
 0x302   : > { %11888 = vmatpush1.bf16.msra.mxu0 %v14582_v16  ;;  %11929 = vmatpush1.bf16.msra.mxu1 %v14710_v27  ;;  %v1116_v6 = vld [vmem:[%s16943_s17 + $0x14c8] sm:$0xff]  ;;  %v14751_v16 = vcombine.high %v988_v4, %v992_v5  ;;  %v14750_v33 = vcombine.low %v988_v4, %v992_v5 }
 0x303   : > { %11889 = vmatprep.subr.bf16.mxu0 %v14591_v18  ;;  %11930 = vmatprep.subr.bf16.mxu1 %v14719_v20  ;;  %v1120_v8 = vld [vmem:[%s16943_s17 + $0x14e8] sm:$0xff] }
 0x304   : > { %v14879_v27 = vcombine.high %v1116_v6, %v1120_v8  ;;  %v996_v18 = vld [vmem:[%s16943_s17 + $0x1108] sm:$0xff]  ;;  %v14878_v24 = vcombine.low %v1116_v6, %v1120_v8 }
 0x305   : > { %v1000_v20 = vld [vmem:[%s16943_s17 + $0x1128] sm:$0xff] }
 0x306   : > { %11890 = vmatpush1.bf16.msra.mxu0 %v14590_v25  ;;  %11931 = vmatpush1.bf16.msra.mxu1 %v14718_v26  ;;  %v1124_v13 = vld [vmem:[%s16943_s17 + $0x1508] sm:$0xff]  ;;  %v14759_v25 = vcombine.high %v996_v18, %v1000_v20  ;;  %v14758_v38 = vcombine.low %v996_v18, %v1000_v20 }
 0x307   : > { %11941 = vmatprep.subr.bf16.mxu0 %v14727_v30  ;;  %11982 = vmatprep.subr.bf16.mxu1 %v14855_v31  ;;  %v1128_v22 = vld [vmem:[%s16943_s17 + $0x1528] sm:$0xff] }
 0x308   : > { %v14887_v26 = vcombine.high %v1124_v13, %v1128_v22  ;;  %v1004_v30 = vld [vmem:[%s16943_s17 + $0x1148] sm:$0xff]  ;;  %v14886_v39 = vcombine.low %v1124_v13, %v1128_v22 }
 0x309   : > { %11892 = vmatmul.mubr.bf16.vlgmr.msra.gmra.mrb[32].mxu0 %v17129_v37  ;;  %11933 = vmatmul.mubr.bf16.vlgmr.msra.gmra.mrb[32].mxu1 %v17134_v41  ;;  %v1008_v31 = vld [vmem:[%s16943_s17 + $0x1168] sm:$0xff] }
 0x30a   : > { %11942 = vmatpush1.bf16.msra.mxu0 %v14726_v40  ;;  %11983 = vmatpush1.bf16.msra.mxu1 %v14854_v42  ;;  %v1132_v34 = vld [vmem:[%s16943_s17 + $0x1548] sm:$0xff]  ;;  %v14767_v40 = vcombine.high %v1004_v30, %v1008_v31  ;;  %v14766_v53 = vcombine.low %v1004_v30, %v1008_v31 }
 0x30b   : > { %11943 = vmatprep.subr.bf16.mxu0 %v14735_v43  ;;  %11984 = vmatprep.subr.bf16.mxu1 %v14863_v44  ;;  %v1136_v36 = vld [vmem:[%s16943_s17 + $0x1568] sm:$0xff] }
 0x30c   : > { %11973 = vmatprep.mubr.bf16.mxu0 %v17139_v49  ;;  %12014 = vmatprep.mubr.bf16.mxu1 %v17144_v52  ;;  %v14895_v42 = vcombine.high %v1132_v34, %v1136_v36  ;;  %v1012_v43 = vld [vmem:[%s16943_s17 + $0x1188] sm:$0xff]  ;;  %v14894_v54 = vcombine.low %v1132_v34, %v1136_v36 }
 0x30d   : > { %v1016_v44 = vld [vmem:[%s16943_s17 + $0x11a8] sm:$0xff] }
 0x30e   : > { %11944 = vmatpush1.bf16.msra.mxu0 %v14734_v56  ;;  %11985 = vmatpush1.bf16.msra.mxu1 %v14862_v57  ;;  %v1140_v47 = vld [vmem:[%s16943_s17 + $0x1588] sm:$0xff]  ;;  %v14775_v56 = vcombine.high %v1012_v43, %v1016_v44  ;;  %v14774_v20 = vcombine.low %v1012_v43, %v1016_v44 }
 0x30f   : > { %11945 = vmatprep.subr.bf16.mxu0 %v14743_v62  ;;  %11986 = vmatprep.subr.bf16.mxu1 %v14871_v1  ;;  %v1144_v48 = vld [vmem:[%s16943_s17 + $0x15a8] sm:$0xff] }
 0x310   : > { %v14903_v62 = vcombine.high %v1140_v47, %v1144_v48  ;;  %v1020_v1 = vld [vmem:[%s16943_s17 + $0x11c8] sm:$0xff] }
 0x311   : > { %v1024_v4 = vld [vmem:[%s16943_s17 + $0x11e8] sm:$0xff] }
 0x312   : > { %11946 = vmatpush1.bf16.msra.mxu0 %v14742_v9  ;;  %11987 = vmatpush1.bf16.msra.mxu1 %v14870_v10  ;;  %v1148_v9 = vld [vmem:[%s16943_s17 + $0x15c8] sm:$0xff] }
 0x313   : > { %11947 = vmatprep.subr.bf16.mxu0 %v14751_v16  ;;  %11988 = vmatprep.subr.bf16.mxu1 %v14879_v27  ;;  %v1152_v10 = vld [vmem:[%s16943_s17 + $0x15e8] sm:$0xff] }
 0x314   : > { %v1028_v30 = vld [vmem:[%s16943_s17 + $0x1208] sm:$0xff] }
 0x315   : > { %v1032_v31 = vld [vmem:[%s16943_s17 + $0x1228] sm:$0xff] }
 0x316   : > { %11948 = vmatpush1.bf16.msra.mxu0 %v14750_v33  ;;  %11989 = vmatpush1.bf16.msra.mxu1 %v14878_v24  ;;  %v14783_v24 = vcombine.high %v1020_v1, %v1024_v4  ;;  %v1156_v34 = vld [vmem:[%s16943_s17 + $0x1608] sm:$0xff] }
 0x317   : > { %11949 = vmatprep.subr.bf16.mxu0 %v14759_v25  ;;  %11990 = vmatprep.subr.bf16.mxu1 %v14887_v26  ;;  %v14911_v26 = vcombine.high %v1148_v9, %v1152_v10  ;;  %v1160_v36 = vld [vmem:[%s16943_s17 + $0x1628] sm:$0xff] }
 0x318   : > { %v1036_v43 = vld [vmem:[%s16943_s17 + $0x1248] sm:$0xff] }
 0x319   : > { %v1040_v44 = vld [vmem:[%s16943_s17 + $0x1268] sm:$0xff] }
 0x31a   : > { %11950 = vmatpush1.bf16.msra.mxu0 %v14758_v38  ;;  %11991 = vmatpush1.bf16.msra.mxu1 %v14886_v39  ;;  %v14782_v38 = vcombine.low %v1020_v1, %v1024_v4  ;;  %v14910_v39 = vcombine.low %v1148_v9, %v1152_v10  ;;  %v1048_v1 = vld [vmem:[%s16943_s17 + $0x12a8] sm:$0xff] }
 0x31b   : > { %11951 = vmatprep.subr.bf16.mxu0 %v14767_v40  ;;  %11992 = vmatprep.subr.bf16.mxu1 %v14895_v42  ;;  %v11688_v6 = vpop.f32.mrb[20].mxu1  ;;  %v14791_v40 = vcombine.high %v1028_v30, %v1032_v31  ;;  %v14919_v42 = vcombine.high %v1156_v34, %v1160_v36  ;;  %v1172_v4 = vld [vmem:[%s16943_s17 + $0x1688] sm:$0xff] }
 0x31c   : > { %v11647_v57 = vpop.f32.mrb[20].mxu0  ;;  %v11690_v27 = vpop.f32.mrb[21].mxu1 }
 0x31d   : > { %v11648_v5 = vadd.f32 %v11647_v57, %v17655_v12  ;;  %v11649_v8 = vpop.f32.mrb[21].mxu0  ;;  %v11692_v22 = vpop.f32.mrb[22].mxu1  ;;  %v14902_v12 = vcombine.low %v1140_v47, %v1144_v48  ;;  %v1164_v47 = vld [vmem:[%s16943_s17 + $0x1648] sm:$0xff] }
 0x31e   : > { %v11650_v16 = vadd.f32 %v11649_v8, %v17657_v23  ;;  %v11651_v18 = vpop.f32.mrb[22].mxu0  ;;  %11952 = vmatpush1.bf16.msra.mxu0 %v14766_v53  ;;  %11993 = vmatpush1.bf16.msra.mxu1 %v14894_v54  ;;  %v11693_v23 = vpop.f32.mrb[23].mxu1  ;;  %v1168_v48 = vld [vmem:[%s16943_s17 + $0x1668] sm:$0xff]  ;;  %v14790_v53 = vcombine.low %v1028_v30, %v1032_v31  ;;  %v14918_v54 = vcombine.low %v1156_v34, %v1160_v36 }
 0x31f   : > { %v17729_v13 = vadd.f32 %v11688_v6, %v11648_v5  ;;  %v11652_v33 = vpop.f32.mrb[23].mxu0  ;;  %11953 = vmatprep.subr.bf16.mxu0 %v14775_v56  ;;  %11994 = vmatprep.subr.bf16.mxu1 %v14903_v62  ;;  %v14799_v56 = vcombine.high %v1036_v43, %v1040_v44  ;;  %v14927_v57 = vcombine.high %v1164_v47, %v1168_v48  ;;  %v1044_v62 = vld [vmem:[%s16943_s17 + $0x1288] sm:$0xff] }
 0x320   : > { %v17731_v25 = vadd.f32 %v11690_v27, %v11650_v16  ;;  %v1176_v5 = vld [vmem:[%s16943_s17 + $0x16a8] sm:$0xff]  ;;  %v14798_v6 = vcombine.low %v1036_v43, %v1040_v44  ;;  %v14926_v8 = vcombine.low %v1164_v47, %v1168_v48  ;;  %v14807_v9 = vcombine.high %v1044_v62, %v1048_v1 }
 0x321   : > { %v14935_v10 = vcombine.high %v1172_v4, %v1176_v5  ;;  %v1052_v16 = vld [vmem:[%s16943_s17 + $0x12c8] sm:$0xff]  ;;  %v14806_v22 = vcombine.low %v1044_v62, %v1048_v1  ;;  %v14934_v33 = vcombine.low %v1172_v4, %v1176_v5 }
 0x322   : > { %11954 = vmatpush1.bf16.msra.mxu0 %v14774_v20  ;;  %11995 = vmatpush1.bf16.msra.mxu1 %v14902_v12  ;;  %v1056_v27 = vld [vmem:[%s16943_s17 + $0x12e8] sm:$0xff] }
 0x323   : > { %11955 = vmatprep.subr.bf16.mxu0 %v14783_v24  ;;  %11996 = vmatprep.subr.bf16.mxu1 %v14911_v26  ;;  %v1180_v18 = vld [vmem:[%s16943_s17 + $0x16c8] sm:$0xff]  ;;  %v14815_v12 = vcombine.high %v1052_v16, %v1056_v27  ;;  %v14814_v34 = vcombine.low %v1052_v16, %v1056_v27 }
 0x324   : > { %v1184_v20 = vld [vmem:[%s16943_s17 + $0x16e8] sm:$0xff] }
 0x325   : > { %v14943_v24 = vcombine.high %v1180_v18, %v1184_v20  ;;  %v1060_v23 = vld [vmem:[%s16943_s17 + $0x1308] sm:$0xff]  ;;  %v14942_v36 = vcombine.low %v1180_v18, %v1184_v20 }
 0x326   : > { %11956 = vmatpush1.bf16.msra.mxu0 %v14782_v38  ;;  %11997 = vmatpush1.bf16.msra.mxu1 %v14910_v39  ;;  %v1064_v26 = vld [vmem:[%s16943_s17 + $0x1328] sm:$0xff] }
 0x327   : > { %11957 = vmatprep.subr.bf16.mxu0 %v14791_v40  ;;  %11998 = vmatprep.subr.bf16.mxu1 %v14919_v42  ;;  %v1188_v30 = vld [vmem:[%s16943_s17 + $0x1708] sm:$0xff]  ;;  %v14823_v38 = vcombine.high %v1060_v23, %v1064_v26  ;;  %v14822_v47 = vcombine.low %v1060_v23, %v1064_v26 }
 0x328   : > { %v1192_v31 = vld [vmem:[%s16943_s17 + $0x1728] sm:$0xff] }
 0x329   : > { %v14951_v39 = vcombine.high %v1188_v30, %v1192_v31  ;;  %v1068_v40 = vld [vmem:[%s16943_s17 + $0x1348] sm:$0xff]  ;;  %v14950_v48 = vcombine.low %v1188_v30, %v1192_v31 }
 0x32a   : > { %11958 = vmatpush1.bf16.msra.mxu0 %v14790_v53  ;;  %11999 = vmatpush1.bf16.msra.mxu1 %v14918_v54  ;;  %v1072_v42 = vld [vmem:[%s16943_s17 + $0x1368] sm:$0xff] }
 0x32b   : > { %11959 = vmatprep.subr.bf16.mxu0 %v14799_v56  ;;  %12000 = vmatprep.subr.bf16.mxu1 %v14927_v57  ;;  %v1196_v43 = vld [vmem:[%s16943_s17 + $0x1748] sm:$0xff]  ;;  %v14831_v53 = vcombine.high %v1068_v40, %v1072_v42  ;;  %v14830_v4 = vcombine.low %v1068_v40, %v1072_v42 }
 0x32c   : > { %v1200_v44 = vld [vmem:[%s16943_s17 + $0x1768] sm:$0xff] }
 0x32d   : > { %v14959_v54 = vcombine.high %v1196_v43, %v1200_v44  ;;  %v1076_v56 = vld [vmem:[%s16943_s17 + $0x1388] sm:$0xff]  ;;  %v14958_v5 = vcombine.low %v1196_v43, %v1200_v44 }
 0x32e   : > { %11960 = vmatpush1.bf16.msra.mxu0 %v14798_v6  ;;  %12001 = vmatpush1.bf16.msra.mxu1 %v14926_v8  ;;  %v1080_v57 = vld [vmem:[%s16943_s17 + $0x13a8] sm:$0xff] }
 0x32f   : > { %11961 = vmatprep.subr.bf16.mxu0 %v14807_v9  ;;  %12002 = vmatprep.subr.bf16.mxu1 %v14935_v10  ;;  %v1204_v62 = vld [vmem:[%s16943_s17 + $0x1788] sm:$0xff]  ;;  %v14839_v6 = vcombine.high %v1076_v56, %v1080_v57  ;;  %v14838_v18 = vcombine.low %v1076_v56, %v1080_v57 }
 0x330   : > { %v1208_v1 = vld [vmem:[%s16943_s17 + $0x17a8] sm:$0xff] }
 0x331   : > { %v14967_v8 = vcombine.high %v1204_v62, %v1208_v1  ;;  %v1084_v9 = vld [vmem:[%s16943_s17 + $0x13c8] sm:$0xff]  ;;  %v14966_v20 = vcombine.low %v1204_v62, %v1208_v1 }
 0x332   : > { %11962 = vmatpush1.bf16.msra.mxu0 %v14806_v22  ;;  %12003 = vmatpush1.bf16.msra.mxu1 %v14934_v33  ;;  %v1088_v10 = vld [vmem:[%s16943_s17 + $0x13e8] sm:$0xff] }
 0x333   : > { %11963 = vmatprep.subr.bf16.mxu0 %v14815_v12  ;;  %12004 = vmatprep.subr.bf16.mxu1 %v14943_v24  ;;  %v1212_v16 = vld [vmem:[%s16943_s17 + $0x17c8] sm:$0xff]  ;;  %v14847_v22 = vcombine.high %v1084_v9, %v1088_v10  ;;  %v14846_v30 = vcombine.low %v1084_v9, %v1088_v10 }
 0x334   : > { %v1216_v27 = vld [vmem:[%s16943_s17 + $0x17e8] sm:$0xff] }
 0x335   : > { %v14975_v33 = vcombine.high %v1212_v16, %v1216_v27  ;;  %v1220_v12 = vld [vmem:[%s16943_s17 + $0x1808] sm:$0xff]  ;;  %v14974_v31 = vcombine.low %v1212_v16, %v1216_v27 }
 0x336   : > { %11964 = vmatpush1.bf16.msra.mxu0 %v14814_v34  ;;  %12005 = vmatpush1.bf16.msra.mxu1 %v14942_v36  ;;  %v1224_v24 = vld [vmem:[%s16943_s17 + $0x1828] sm:$0xff] }
 0x337   : > { %11965 = vmatprep.subr.bf16.mxu0 %v14823_v38  ;;  %12006 = vmatprep.subr.bf16.mxu1 %v14951_v39  ;;  %v1348_v23 = vld [vmem:[%s16943_s17 + $0x1c08] sm:$0xff]  ;;  %v14983_v34 = vcombine.high %v1220_v12, %v1224_v24  ;;  %v14982_v43 = vcombine.low %v1220_v12, %v1224_v24 }
 0x338   : > { %v1352_v26 = vld [vmem:[%s16943_s17 + $0x1c28] sm:$0xff] }
 0x339   : > { %v15111_v36 = vcombine.high %v1348_v23, %v1352_v26  ;;  %v1228_v38 = vld [vmem:[%s16943_s17 + $0x1848] sm:$0xff]  ;;  %v15110_v44 = vcombine.low %v1348_v23, %v1352_v26 }
 0x33a   : > { %11966 = vmatpush1.bf16.msra.mxu0 %v14822_v47  ;;  %12007 = vmatpush1.bf16.msra.mxu1 %v14950_v48  ;;  %v1232_v39 = vld [vmem:[%s16943_s17 + $0x1868] sm:$0xff] }
 0x33b   : > { %11967 = vmatprep.subr.bf16.mxu0 %v14831_v53  ;;  %12008 = vmatprep.subr.bf16.mxu1 %v14959_v54  ;;  %v1356_v40 = vld [vmem:[%s16943_s17 + $0x1c48] sm:$0xff]  ;;  %v14991_v47 = vcombine.high %v1228_v38, %v1232_v39  ;;  %v14990_v62 = vcombine.low %v1228_v38, %v1232_v39 }
 0x33c   : > { %v1360_v42 = vld [vmem:[%s16943_s17 + $0x1c68] sm:$0xff] }
 0x33d   : > { %v15119_v48 = vcombine.high %v1356_v40, %v1360_v42  ;;  %v1236_v53 = vld [vmem:[%s16943_s17 + $0x1888] sm:$0xff]  ;;  %v15118_v1 = vcombine.low %v1356_v40, %v1360_v42 }
 0x33e   : > { %11968 = vmatpush1.bf16.msra.mxu0 %v14830_v4  ;;  %12009 = vmatpush1.bf16.msra.mxu1 %v14958_v5  ;;  %v1240_v54 = vld [vmem:[%s16943_s17 + $0x18a8] sm:$0xff] }
 0x33f   : > { %11969 = vmatprep.subr.bf16.mxu0 %v14839_v6  ;;  %12010 = vmatprep.subr.bf16.mxu1 %v14967_v8  ;;  %v1364_v56 = vld [vmem:[%s16943_s17 + $0x1c88] sm:$0xff]  ;;  %v14999_v4 = vcombine.high %v1236_v53, %v1240_v54  ;;  %v14998_v16 = vcombine.low %v1236_v53, %v1240_v54 }
 0x340   : > { %v1368_v57 = vld [vmem:[%s16943_s17 + $0x1ca8] sm:$0xff] }
 0x341   : > { %v15127_v5 = vcombine.high %v1364_v56, %v1368_v57  ;;  %v1244_v6 = vld [vmem:[%s16943_s17 + $0x18c8] sm:$0xff]  ;;  %v15126_v27 = vcombine.low %v1364_v56, %v1368_v57 }
 0x342   : > { %11970 = vmatpush1.bf16.msra.mxu0 %v14838_v18  ;;  %12011 = vmatpush1.bf16.msra.mxu1 %v14966_v20  ;;  %v1248_v8 = vld [vmem:[%s16943_s17 + $0x18e8] sm:$0xff] }
 0x343   : > { %11971 = vmatprep.subr.bf16.mxu0 %v14847_v22  ;;  %12012 = vmatprep.subr.bf16.mxu1 %v14975_v33  ;;  %v1372_v9 = vld [vmem:[%s16943_s17 + $0x1cc8] sm:$0xff]  ;;  %v15007_v18 = vcombine.high %v1244_v6, %v1248_v8  ;;  %v15006_v23 = vcombine.low %v1244_v6, %v1248_v8 }
 0x344   : > { %v1376_v10 = vld [vmem:[%s16943_s17 + $0x1ce8] sm:$0xff] }
 0x345   : > { %v15135_v20 = vcombine.high %v1372_v9, %v1376_v10  ;;  %v1252_v22 = vld [vmem:[%s16943_s17 + $0x1908] sm:$0xff]  ;;  %v15134_v26 = vcombine.low %v1372_v9, %v1376_v10 }
 0x346   : > { %11972 = vmatpush1.bf16.msra.mxu0 %v14846_v30  ;;  %12013 = vmatpush1.bf16.msra.mxu1 %v14974_v31  ;;  %v1256_v33 = vld [vmem:[%s16943_s17 + $0x1928] sm:$0xff] }
 0x347   : > { %12023 = vmatprep.subr.bf16.mxu0 %v14983_v34  ;;  %12064 = vmatprep.subr.bf16.mxu1 %v15111_v36  ;;  %v1380_v12 = vld [vmem:[%s16943_s17 + $0x1d08] sm:$0xff]  ;;  %v15015_v30 = vcombine.high %v1252_v22, %v1256_v33  ;;  %v15014_v40 = vcombine.low %v1252_v22, %v1256_v33 }
 0x348   : > { %v1384_v24 = vld [vmem:[%s16943_s17 + $0x1d28] sm:$0xff] }
 0x349   : > { %11974 = vmatmul.mubr.bf16.vlgmr.msra.gmra.mrb[36].mxu0 %v17209_v3  ;;  %12015 = vmatmul.mubr.bf16.vlgmr.msra.gmra.mrb[36].mxu1 %v17214_v7  ;;  %v15143_v31 = vcombine.high %v1380_v12, %v1384_v24  ;;  %v1260_v34 = vld [vmem:[%s16943_s17 + $0x1948] sm:$0xff]  ;;  %v15142_v42 = vcombine.low %v1380_v12, %v1384_v24 }
 0x34a   : > { %12024 = vmatpush1.bf16.msra.mxu0 %v14982_v43  ;;  %12065 = vmatpush1.bf16.msra.mxu1 %v15110_v44  ;;  %v1264_v36 = vld [vmem:[%s16943_s17 + $0x1968] sm:$0xff] }
 0x34b   : > { %12025 = vmatprep.subr.bf16.mxu0 %v14991_v47  ;;  %12066 = vmatprep.subr.bf16.mxu1 %v15119_v48  ;;  %v1388_v38 = vld [vmem:[%s16943_s17 + $0x1d48] sm:$0xff]  ;;  %v15023_v43 = vcombine.high %v1260_v34, %v1264_v36  ;;  %v15022_v56 = vcombine.low %v1260_v34, %v1264_v36 }
 0x34c   : > { %12055 = vmatprep.mubr.bf16.mxu0 %v17219_v15  ;;  %12096 = vmatprep.mubr.bf16.mxu1 %v17224_v19  ;;  %v1392_v39 = vld [vmem:[%s16943_s17 + $0x1d68] sm:$0xff] }
 0x34d   : > { %v15151_v44 = vcombine.high %v1388_v38, %v1392_v39  ;;  %v1268_v47 = vld [vmem:[%s16943_s17 + $0x1988] sm:$0xff]  ;;  %v15150_v57 = vcombine.low %v1388_v38, %v1392_v39 }
 0x34e   : > { %12026 = vmatpush1.bf16.msra.mxu0 %v14990_v62  ;;  %12067 = vmatpush1.bf16.msra.mxu1 %v15118_v1  ;;  %v1272_v48 = vld [vmem:[%s16943_s17 + $0x19a8] sm:$0xff] }
 0x34f   : > { %12027 = vmatprep.subr.bf16.mxu0 %v14999_v4  ;;  %12068 = vmatprep.subr.bf16.mxu1 %v15127_v5  ;;  %v1396_v53 = vld [vmem:[%s16943_s17 + $0x1d88] sm:$0xff]  ;;  %v15031_v62 = vcombine.high %v1268_v47, %v1272_v48  ;;  %v15030_v12 = vcombine.low %v1268_v47, %v1272_v48 }
 0x350   : > { %v1400_v54 = vld [vmem:[%s16943_s17 + $0x1da8] sm:$0xff] }
 0x351   : > { %v15159_v4 = vcombine.high %v1396_v53, %v1400_v54  ;;  %v1276_v5 = vld [vmem:[%s16943_s17 + $0x19c8] sm:$0xff] }
 0x352   : > { %12028 = vmatpush1.bf16.msra.mxu0 %v14998_v16  ;;  %12069 = vmatpush1.bf16.msra.mxu1 %v15126_v27  ;;  %v1280_v6 = vld [vmem:[%s16943_s17 + $0x19e8] sm:$0xff] }
 0x353   : > { %12029 = vmatprep.subr.bf16.mxu0 %v15007_v18  ;;  %12070 = vmatprep.subr.bf16.mxu1 %v15135_v20  ;;  %v1404_v16 = vld [vmem:[%s16943_s17 + $0x1dc8] sm:$0xff]  ;;  %v387_v18 = vld [vmem:[#allocation2] sm:$0xff]  ;;  %v15038_v47 = vcombine.low %v1276_v5, %v1280_v6 }
 0x354   : > { %v1408_v27 = vld [vmem:[%s16943_s17 + $0x1de8] sm:$0xff] }
 0x355   : > { %v1284_v38 = vld [vmem:[%s16943_s17 + $0x1a08] sm:$0xff]  ;;  %v15166_v48 = vcombine.low %v1404_v16, %v1408_v27 }
 0x356   : > { %12030 = vmatpush1.bf16.msra.mxu0 %v15006_v23  ;;  %12071 = vmatpush1.bf16.msra.mxu1 %v15134_v26  ;;  %v388_v23 = vld [vmem:[#allocation2 + $0x8] sm:$0xff] }
 0x357   : > { %12031 = vmatprep.subr.bf16.mxu0 %v15015_v30  ;;  %12072 = vmatprep.subr.bf16.mxu1 %v15143_v31  ;;  %v15158_v30 = vcombine.low %v1396_v53, %v1400_v54  ;;  %v15039_v31 = vcombine.high %v1276_v5, %v1280_v6  ;;  %v1288_v39 = vld [vmem:[%s16943_s17 + $0x1a28] sm:$0xff] }
 0x358   : > { %v15047_v53 = vcombine.high %v1284_v38, %v1288_v39 }
 0x35a   : > { %12032 = vmatpush1.bf16.msra.mxu0 %v15014_v40  ;;  %12073 = vmatpush1.bf16.msra.mxu1 %v15142_v42  ;;  %v1412_v42 = vld [vmem:[%s16943_s17 + $0x1e08] sm:$0xff] }
 0x35b   : > { %12033 = vmatprep.subr.bf16.mxu0 %v15023_v43  ;;  %12074 = vmatprep.subr.bf16.mxu1 %v15151_v44  ;;  %v1416_v43 = vld [vmem:[%s16943_s17 + $0x1e28] sm:$0xff] }
 0x35c   : > { %v11729_v1 = vpop.f32.mrb[24].mxu0  ;;  %v11770_v9 = vpop.f32.mrb[24].mxu1  ;;  %v15175_v54 = vcombine.high %v1412_v42, %v1416_v43  ;;  %v15174_v5 = vcombine.low %v1412_v42, %v1416_v43 }
 0x35d   : > { %v11730_v8 = vadd.f32 %v11729_v1, %v17729_v13  ;;  %v11731_v10 = vpop.f32.mrb[25].mxu0  ;;  %v11772_v22 = vpop.f32.mrb[25].mxu1  ;;  %v1424_v1 = vld [vmem:[%s16943_s17 + $0x1e68] sm:$0xff] }
 0x35e   : > { %v11732_v20 = vadd.f32 %v11731_v10, %v17731_v25  ;;  %v11733_v33 = vpop.f32.mrb[26].mxu0  ;;  %12034 = vmatpush1.bf16.msra.mxu0 %v15022_v56  ;;  %v11774_v26 = vpop.f32.mrb[26].mxu1  ;;  %12075 = vmatpush1.bf16.msra.mxu1 %v15150_v57  ;;  %v15167_v25 = vcombine.high %v1404_v16, %v1408_v27  ;;  %v1292_v56 = vld [vmem:[%s16943_s17 + $0x1a48] sm:$0xff] }
 0x35f   : > { %v11771_v24 = vadd.f32 %v11770_v9, %v11730_v8  ;;  %v11734_v13 = vpop.f32.mrb[27].mxu0  ;;  %12035 = vmatprep.subr.bf16.mxu0 %v15031_v62  ;;  %v11775_v36 = vpop.f32.mrb[27].mxu1  ;;  %12076 = vmatprep.subr.bf16.mxu1 %v15159_v4  ;;  %v1296_v57 = vld [vmem:[%s16943_s17 + $0x1a68] sm:$0xff]  ;;  %v15046_v4 = vcombine.low %v1284_v38, %v1288_v39 }
 0x360   : > { %v11773_v34 = vadd.f32 %v11772_v22, %v11732_v20  ;;  %v1420_v62 = vld [vmem:[%s16943_s17 + $0x1e48] sm:$0xff]  ;;  %v15055_v6 = vcombine.high %v1292_v56, %v1296_v57 }
 0x361   : > { %v13499_v40 = vadd.f32 %v11771_v24, %v387_v18  ;;  %v15183_v8 = vcombine.high %v1420_v62, %v1424_v1  ;;  %v1300_v9 = vld [vmem:[%s16943_s17 + $0x1a88] sm:$0xff]  ;;  %v15054_v18 = vcombine.low %v1292_v56, %v1296_v57  ;;  %v15182_v20 = vcombine.low %v1420_v62, %v1424_v1 }
 0x362   : > { %v13500_v44 = vadd.f32 %v11773_v34, %v388_v23  ;;  %12036 = vmatpush1.bf16.msra.mxu0 %v15030_v12  ;;  %12077 = vmatpush1.bf16.msra.mxu1 %v15158_v30  ;;  %v1304_v10 = vld [vmem:[%s16943_s17 + $0x1aa8] sm:$0xff] }
 0x363   : > { %13507 = vst [vmem:[#allocation2] sm:$0xff] %v13499_v40  ;;  %12037 = vmatprep.subr.bf16.mxu0 %v15039_v31  ;;  %12078 = vmatprep.subr.bf16.mxu1 %v15167_v25  ;;  %v1428_v16 = vld [vmem:[%s16943_s17 + $0x1e88] sm:$0xff]  ;;  %v15063_v22 = vcombine.high %v1300_v9, %v1304_v10  ;;  %v15062_v13 = vcombine.low %v1300_v9, %v1304_v10 }
 0x364   : > { %13508 = vst [vmem:[#allocation2 + $0x8] sm:$0xff] %v13500_v44  ;;  %v1432_v27 = vld [vmem:[%s16943_s17 + $0x1ea8] sm:$0xff] }
 0x365   : > { %v15191_v33 = vcombine.high %v1428_v16, %v1432_v27  ;;  %v1308_v12 = vld [vmem:[%s16943_s17 + $0x1ac8] sm:$0xff]  ;;  %v15190_v30 = vcombine.low %v1428_v16, %v1432_v27 }
 0x366   : > { %12038 = vmatpush1.bf16.msra.mxu0 %v15038_v47  ;;  %12079 = vmatpush1.bf16.msra.mxu1 %v15166_v48  ;;  %v1312_v24 = vld [vmem:[%s16943_s17 + $0x1ae8] sm:$0xff] }
 0x367   : > { %12039 = vmatprep.subr.bf16.mxu0 %v15047_v53  ;;  %12080 = vmatprep.subr.bf16.mxu1 %v15175_v54  ;;  %v1436_v23 = vld [vmem:[%s16943_s17 + $0x1ec8] sm:$0xff]  ;;  %v15071_v31 = vcombine.high %v1308_v12, %v1312_v24  ;;  %v15070_v40 = vcombine.low %v1308_v12, %v1312_v24 }
 0x368   : > { %v1440_v26 = vld [vmem:[%s16943_s17 + $0x1ee8] sm:$0xff] }
 0x369   : > { %v15199_v34 = vcombine.high %v1436_v23, %v1440_v26  ;;  %v1316_v36 = vld [vmem:[%s16943_s17 + $0x1b08] sm:$0xff]  ;;  %v15198_v42 = vcombine.low %v1436_v23, %v1440_v26 }
 0x36a   : > { %12040 = vmatpush1.bf16.msra.mxu0 %v15046_v4  ;;  %12081 = vmatpush1.bf16.msra.mxu1 %v15174_v5  ;;  %v1320_v25 = vld [vmem:[%s16943_s17 + $0x1b28] sm:$0xff] }
 0x36b   : > { %12041 = vmatprep.subr.bf16.mxu0 %v15055_v6  ;;  %12082 = vmatprep.subr.bf16.mxu1 %v15183_v8  ;;  %v1444_v38 = vld [vmem:[%s16943_s17 + $0x1f08] sm:$0xff]  ;;  %v15079_v43 = vcombine.high %v1316_v36, %v1320_v25  ;;  %v15078_v56 = vcombine.low %v1316_v36, %v1320_v25 }
 0x36c   : > { %v1448_v39 = vld [vmem:[%s16943_s17 + $0x1f28] sm:$0xff] }
 0x36d   : > { %v15207_v44 = vcombine.high %v1444_v38, %v1448_v39  ;;  %v1324_v47 = vld [vmem:[%s16943_s17 + $0x1b48] sm:$0xff]  ;;  %v15206_v57 = vcombine.low %v1444_v38, %v1448_v39 }
 0x36e   : > { %12042 = vmatpush1.bf16.msra.mxu0 %v15054_v18  ;;  %12083 = vmatpush1.bf16.msra.mxu1 %v15182_v20  ;;  %v1328_v48 = vld [vmem:[%s16943_s17 + $0x1b68] sm:$0xff] }
 0x36f   : > { %12043 = vmatprep.subr.bf16.mxu0 %v15063_v22  ;;  %12084 = vmatprep.subr.bf16.mxu1 %v15191_v33  ;;  %v1452_v53 = vld [vmem:[%s16943_s17 + $0x1f48] sm:$0xff]  ;;  %v15087_v62 = vcombine.high %v1324_v47, %v1328_v48  ;;  %v15086_v9 = vcombine.low %v1324_v47, %v1328_v48 }
 0x370   : > { %v1456_v54 = vld [vmem:[%s16943_s17 + $0x1f68] sm:$0xff] }
 0x371   : > { %v15215_v1 = vcombine.high %v1452_v53, %v1456_v54  ;;  %v1332_v4 = vld [vmem:[%s16943_s17 + $0x1b88] sm:$0xff]  ;;  %v15214_v10 = vcombine.low %v1452_v53, %v1456_v54 }
 0x372   : > { %12044 = vmatpush1.bf16.msra.mxu0 %v15062_v13  ;;  %12085 = vmatpush1.bf16.msra.mxu1 %v15190_v30  ;;  %v1336_v5 = vld [vmem:[%s16943_s17 + $0x1ba8] sm:$0xff] }
 0x373   : > { %12045 = vmatprep.subr.bf16.mxu0 %v15071_v31  ;;  %12086 = vmatprep.subr.bf16.mxu1 %v15199_v34  ;;  %v1460_v6 = vld [vmem:[%s16943_s17 + $0x1f88] sm:$0xff]  ;;  %v15095_v16 = vcombine.high %v1332_v4, %v1336_v5  ;;  %v15094_v12 = vcombine.low %v1332_v4, %v1336_v5 }
 0x374   : > { %v1464_v8 = vld [vmem:[%s16943_s17 + $0x1fa8] sm:$0xff] }
 0x375   : > { %v15223_v27 = vcombine.high %v1460_v6, %v1464_v8  ;;  %v1340_v18 = vld [vmem:[%s16943_s17 + $0x1bc8] sm:$0xff]  ;;  %v15222_v24 = vcombine.low %v1460_v6, %v1464_v8 }
 0x376   : > { %12046 = vmatpush1.bf16.msra.mxu0 %v15070_v40  ;;  %12087 = vmatpush1.bf16.msra.mxu1 %v15198_v42  ;;  %v1344_v20 = vld [vmem:[%s16943_s17 + $0x1be8] sm:$0xff] }
 0x377   : > { %12047 = vmatprep.subr.bf16.mxu0 %v15079_v43  ;;  %12088 = vmatprep.subr.bf16.mxu1 %v15207_v44  ;;  %v1468_v22 = vld [vmem:[%s16943_s17 + $0x1fc8] sm:$0xff]  ;;  %v15103_v23 = vcombine.high %v1340_v18, %v1344_v20  ;;  %v15102_v36 = vcombine.low %v1340_v18, %v1344_v20 }
 0x378   : > { %v1472_v33 = vld [vmem:[%s16943_s17 + $0x1fe8] sm:$0xff] }
 0x379   : > { %v15231_v26 = vcombine.high %v1468_v22, %v1472_v33  ;;  %v1476_v13 = vld [vmem:[%s16943_s17 + $0x2008] sm:$0xff]  ;;  %v15230_v25 = vcombine.low %v1468_v22, %v1472_v33 }
 0x37a   : > { %12048 = vmatpush1.bf16.msra.mxu0 %v15078_v56  ;;  %12089 = vmatpush1.bf16.msra.mxu1 %v15206_v57  ;;  %v1480_v30 = vld [vmem:[%s16943_s17 + $0x2028] sm:$0xff] }
 0x37b   : > { %12049 = vmatprep.subr.bf16.mxu0 %v15087_v62  ;;  %12090 = vmatprep.subr.bf16.mxu1 %v15215_v1  ;;  %v1604_v31 = vld [vmem:[%s16943_s17 + $0x2408] sm:$0xff]  ;;  %v15239_v38 = vcombine.high %v1476_v13, %v1480_v30  ;;  %v15238_v47 = vcombine.low %v1476_v13, %v1480_v30 }
 0x37c   : > { %v1608_v34 = vld [vmem:[%s16943_s17 + $0x2428] sm:$0xff] }
 0x37d   : > { %v15367_v39 = vcombine.high %v1604_v31, %v1608_v34  ;;  %v1484_v40 = vld [vmem:[%s16943_s17 + $0x2048] sm:$0xff]  ;;  %v15366_v48 = vcombine.low %v1604_v31, %v1608_v34 }
 0x37e   : > { %12050 = vmatpush1.bf16.msra.mxu0 %v15086_v9  ;;  %12091 = vmatpush1.bf16.msra.mxu1 %v15214_v10  ;;  %v1488_v42 = vld [vmem:[%s16943_s17 + $0x2068] sm:$0xff] }
 0x37f   : > { %12051 = vmatprep.subr.bf16.mxu0 %v15095_v16  ;;  %12092 = vmatprep.subr.bf16.mxu1 %v15223_v27  ;;  %v1612_v43 = vld [vmem:[%s16943_s17 + $0x2448] sm:$0xff]  ;;  %v15247_v53 = vcombine.high %v1484_v40, %v1488_v42  ;;  %v15246_v4 = vcombine.low %v1484_v40, %v1488_v42 }
 0x380   : > { %v1616_v44 = vld [vmem:[%s16943_s17 + $0x2468] sm:$0xff] }
 0x381   : > { %v15375_v54 = vcombine.high %v1612_v43, %v1616_v44  ;;  %v1492_v56 = vld [vmem:[%s16943_s17 + $0x2088] sm:$0xff]  ;;  %v15374_v5 = vcombine.low %v1612_v43, %v1616_v44 }
 0x382   : > { %12052 = vmatpush1.bf16.msra.mxu0 %v15094_v12  ;;  %12093 = vmatpush1.bf16.msra.mxu1 %v15222_v24  ;;  %v1496_v57 = vld [vmem:[%s16943_s17 + $0x20a8] sm:$0xff] }
 0x383   : > { %12053 = vmatprep.subr.bf16.mxu0 %v15103_v23  ;;  %12094 = vmatprep.subr.bf16.mxu1 %v15231_v26  ;;  %v1620_v62 = vld [vmem:[%s16943_s17 + $0x2488] sm:$0xff]  ;;  %v15255_v6 = vcombine.high %v1492_v56, %v1496_v57  ;;  %v15254_v18 = vcombine.low %v1492_v56, %v1496_v57 }
 0x384   : > { %v1624_v1 = vld [vmem:[%s16943_s17 + $0x24a8] sm:$0xff] }
 0x385   : > { %v15383_v8 = vcombine.high %v1620_v62, %v1624_v1  ;;  %v1500_v9 = vld [vmem:[%s16943_s17 + $0x20c8] sm:$0xff]  ;;  %v15382_v20 = vcombine.low %v1620_v62, %v1624_v1 }
 0x386   : > { %12054 = vmatpush1.bf16.msra.mxu0 %v15102_v36  ;;  %12095 = vmatpush1.bf16.msra.mxu1 %v15230_v25  ;;  %v1504_v10 = vld [vmem:[%s16943_s17 + $0x20e8] sm:$0xff] }
 0x387   : > { %12105 = vmatprep.subr.bf16.mxu0 %v15239_v38  ;;  %12146 = vmatprep.subr.bf16.mxu1 %v15367_v39  ;;  %v1628_v16 = vld [vmem:[%s16943_s17 + $0x24c8] sm:$0xff]  ;;  %v15263_v22 = vcombine.high %v1500_v9, %v1504_v10  ;;  %v15262_v13 = vcombine.low %v1500_v9, %v1504_v10 }
 0x388   : > { %v1632_v27 = vld [vmem:[%s16943_s17 + $0x24e8] sm:$0xff] }
 0x389   : > { %12056 = vmatmul.mubr.bf16.vlgmr.msra.gmra.mrb[40].mxu0 %v17289_v45  ;;  %12097 = vmatmul.mubr.bf16.vlgmr.msra.gmra.mrb[40].mxu1 %v17294_v50  ;;  %v15391_v33 = vcombine.high %v1628_v16, %v1632_v27  ;;  %v1508_v12 = vld [vmem:[%s16943_s17 + $0x2108] sm:$0xff]  ;;  %v15390_v30 = vcombine.low %v1628_v16, %v1632_v27 }
 0x38a   : > { %12106 = vmatpush1.bf16.msra.mxu0 %v15238_v47  ;;  %12147 = vmatpush1.bf16.msra.mxu1 %v15366_v48  ;;  %v1512_v24 = vld [vmem:[%s16943_s17 + $0x2128] sm:$0xff] }
 0x38b   : > { %12107 = vmatprep.subr.bf16.mxu0 %v15247_v53  ;;  %12148 = vmatprep.subr.bf16.mxu1 %v15375_v54  ;;  %v1636_v23 = vld [vmem:[%s16943_s17 + $0x2508] sm:$0xff]  ;;  %v15271_v31 = vcombine.high %v1508_v12, %v1512_v24  ;;  %v15270_v40 = vcombine.low %v1508_v12, %v1512_v24 }
 0x38c   : > { %12137 = vmatprep.mubr.bf16.mxu0 %v17299_v61  ;;  %12178 = vmatprep.mubr.bf16.mxu1 %v17304_v0  ;;  %v1640_v26 = vld [vmem:[%s16943_s17 + $0x2528] sm:$0xff] }
 0x38d   : > { %v15399_v34 = vcombine.high %v1636_v23, %v1640_v26  ;;  %v1516_v36 = vld [vmem:[%s16943_s17 + $0x2148] sm:$0xff]  ;;  %v15398_v42 = vcombine.low %v1636_v23, %v1640_v26 }
 0x38e   : > { %12108 = vmatpush1.bf16.msra.mxu0 %v15246_v4  ;;  %12149 = vmatpush1.bf16.msra.mxu1 %v15374_v5  ;;  %v1520_v25 = vld [vmem:[%s16943_s17 + $0x2168] sm:$0xff] }
 0x38f   : > { %12109 = vmatprep.subr.bf16.mxu0 %v15255_v6  ;;  %12150 = vmatprep.subr.bf16.mxu1 %v15383_v8  ;;  %v1644_v38 = vld [vmem:[%s16943_s17 + $0x2548] sm:$0xff]  ;;  %v15279_v43 = vcombine.high %v1516_v36, %v1520_v25  ;;  %v15278_v56 = vcombine.low %v1516_v36, %v1520_v25 }
 0x390   : > { %v1648_v39 = vld [vmem:[%s16943_s17 + $0x2568] sm:$0xff] }
 0x391   : > { %v15407_v44 = vcombine.high %v1644_v38, %v1648_v39  ;;  %v1524_v47 = vld [vmem:[%s16943_s17 + $0x2188] sm:$0xff]  ;;  %v15406_v57 = vcombine.low %v1644_v38, %v1648_v39 }
 0x392   : > { %12110 = vmatpush1.bf16.msra.mxu0 %v15254_v18  ;;  %12151 = vmatpush1.bf16.msra.mxu1 %v15382_v20  ;;  %v1528_v48 = vld [vmem:[%s16943_s17 + $0x21a8] sm:$0xff] }
 0x393   : > { %12111 = vmatprep.subr.bf16.mxu0 %v15263_v22  ;;  %12152 = vmatprep.subr.bf16.mxu1 %v15391_v33  ;;  %v1652_v53 = vld [vmem:[%s16943_s17 + $0x2588] sm:$0xff]  ;;  %v15287_v62 = vcombine.high %v1524_v47, %v1528_v48  ;;  %v15286_v22 = vcombine.low %v1524_v47, %v1528_v48 }
 0x394   : > { %v1656_v54 = vld [vmem:[%s16943_s17 + $0x25a8] sm:$0xff] }
 0x395   : > { %v15415_v4 = vcombine.high %v1652_v53, %v1656_v54  ;;  %v1532_v5 = vld [vmem:[%s16943_s17 + $0x21c8] sm:$0xff]  ;;  %v15414_v23 = vcombine.low %v1652_v53, %v1656_v54 }
 0x396   : > { %12112 = vmatpush1.bf16.msra.mxu0 %v15262_v13  ;;  %12153 = vmatpush1.bf16.msra.mxu1 %v15390_v30  ;;  %v1536_v6 = vld [vmem:[%s16943_s17 + $0x21e8] sm:$0xff] }
 0x397   : > { %12113 = vmatprep.subr.bf16.mxu0 %v15271_v31  ;;  %12154 = vmatprep.subr.bf16.mxu1 %v15399_v34  ;;  %v1660_v10 = vld [vmem:[%s16943_s17 + $0x25c8] sm:$0xff]  ;;  %v15295_v26 = vcombine.high %v1532_v5, %v1536_v6  ;;  %v15294_v38 = vcombine.low %v1532_v5, %v1536_v6 }
 0x398   : > { %v1664_v16 = vld [vmem:[%s16943_s17 + $0x25e8] sm:$0xff] }
 0x399   : > { %v15423_v30 = vcombine.high %v1660_v10, %v1664_v16  ;;  %v1540_v31 = vld [vmem:[%s16943_s17 + $0x2208] sm:$0xff]  ;;  %v15422_v39 = vcombine.low %v1660_v10, %v1664_v16 }
 0x39a   : > { %12114 = vmatpush1.bf16.msra.mxu0 %v15270_v40  ;;  %12155 = vmatpush1.bf16.msra.mxu1 %v15398_v42  ;;  %v1544_v34 = vld [vmem:[%s16943_s17 + $0x2228] sm:$0xff] }
 0x39b   : > { %12115 = vmatprep.subr.bf16.mxu0 %v15279_v43  ;;  %12156 = vmatprep.subr.bf16.mxu1 %v15407_v44  ;;  %v1668_v36 = vld [vmem:[%s16943_s17 + $0x2608] sm:$0xff]  ;;  %v15303_v40 = vcombine.high %v1540_v31, %v1544_v34  ;;  %v15302_v53 = vcombine.low %v1540_v31, %v1544_v34 }
 0x39c   : > { %v11811_v1 = vpop.f32.mrb[28].mxu0  ;;  %v11852_v8 = vpop.f32.mrb[28].mxu1  ;;  %v1672_v25 = vld [vmem:[%s16943_s17 + $0x2628] sm:$0xff] }
 0x39d   : > { %v11813_v9 = vpop.f32.mrb[29].mxu0  ;;  %v17871_v27 = vadd.f32 %v11852_v8, %v11811_v1  ;;  %v11854_v18 = vpop.f32.mrb[29].mxu1  ;;  %v15431_v42 = vcombine.high %v1668_v36, %v1672_v25  ;;  %v1548_v43 = vld [vmem:[%s16943_s17 + $0x2248] sm:$0xff]  ;;  %v15430_v54 = vcombine.low %v1668_v36, %v1672_v25 }
 0x39e   : > { %v11815_v20 = vpop.f32.mrb[30].mxu0  ;;  %12116 = vmatpush1.bf16.msra.mxu0 %v15278_v56  ;;  %v17873_v33 = vadd.f32 %v11854_v18, %v11813_v9  ;;  %v11856_v12 = vpop.f32.mrb[30].mxu1  ;;  %12157 = vmatpush1.bf16.msra.mxu1 %v15406_v57  ;;  %v1552_v44 = vld [vmem:[%s16943_s17 + $0x2268] sm:$0xff] }
 0x39f   : > { %v11816_v24 = vpop.f32.mrb[31].mxu0  ;;  %12117 = vmatprep.subr.bf16.mxu0 %v15287_v62  ;;  %v11857_v13 = vpop.f32.mrb[31].mxu1  ;;  %12158 = vmatprep.subr.bf16.mxu1 %v15415_v4  ;;  %v1676_v47 = vld [vmem:[%s16943_s17 + $0x2648] sm:$0xff]  ;;  %v15311_v56 = vcombine.high %v1548_v43, %v1552_v44  ;;  %v15310_v6 = vcombine.low %v1548_v43, %v1552_v44 }
 0x3a0   : > { %v1680_v48 = vld [vmem:[%s16943_s17 + $0x2668] sm:$0xff] }
 0x3a1   : > { %v15439_v57 = vcombine.high %v1676_v47, %v1680_v48  ;;  %v1556_v62 = vld [vmem:[%s16943_s17 + $0x2288] sm:$0xff]  ;;  %v15438_v8 = vcombine.low %v1676_v47, %v1680_v48 }
 0x3a2   : > { %12118 = vmatpush1.bf16.msra.mxu0 %v15286_v22  ;;  %12159 = vmatpush1.bf16.msra.mxu1 %v15414_v23  ;;  %v1560_v1 = vld [vmem:[%s16943_s17 + $0x22a8] sm:$0xff] }
 0x3a3   : > { %12119 = vmatprep.subr.bf16.mxu0 %v15295_v26  ;;  %12160 = vmatprep.subr.bf16.mxu1 %v15423_v30  ;;  %v1684_v4 = vld [vmem:[%s16943_s17 + $0x2688] sm:$0xff]  ;;  %v15319_v9 = vcombine.high %v1556_v62, %v1560_v1  ;;  %v15318_v12 = vcombine.low %v1556_v62, %v1560_v1 }
 0x3a4   : > { %v1688_v5 = vld [vmem:[%s16943_s17 + $0x26a8] sm:$0xff] }
 0x3a5   : > { %v15447_v10 = vcombine.high %v1684_v4, %v1688_v5  ;;  %v1564_v16 = vld [vmem:[%s16943_s17 + $0x22c8] sm:$0xff]  ;;  %v15446_v24 = vcombine.low %v1684_v4, %v1688_v5 }
 0x3a6   : > { %12120 = vmatpush1.bf16.msra.mxu0 %v15294_v38  ;;  %12161 = vmatpush1.bf16.msra.mxu1 %v15422_v39  ;;  %v1568_v18 = vld [vmem:[%s16943_s17 + $0x22e8] sm:$0xff] }
 0x3a7   : > { %12121 = vmatprep.subr.bf16.mxu0 %v15303_v40  ;;  %12162 = vmatprep.subr.bf16.mxu1 %v15431_v42  ;;  %v1692_v20 = vld [vmem:[%s16943_s17 + $0x26c8] sm:$0xff]  ;;  %v15327_v23 = vcombine.high %v1564_v16, %v1568_v18  ;;  %v15326_v36 = vcombine.low %v1564_v16, %v1568_v18 }
 0x3a8   : > { %v1696_v22 = vld [vmem:[%s16943_s17 + $0x26e8] sm:$0xff] }
 0x3a9   : > { %v15455_v26 = vcombine.high %v1692_v20, %v1696_v22  ;;  %v1572_v13 = vld [vmem:[%s16943_s17 + $0x2308] sm:$0xff]  ;;  %v15454_v25 = vcombine.low %v1692_v20, %v1696_v22 }
 0x3aa   : > { %12122 = vmatpush1.bf16.msra.mxu0 %v15302_v53  ;;  %12163 = vmatpush1.bf16.msra.mxu1 %v15430_v54  ;;  %v1576_v30 = vld [vmem:[%s16943_s17 + $0x2328] sm:$0xff] }
 0x3ab   : > { %12123 = vmatprep.subr.bf16.mxu0 %v15311_v56  ;;  %12164 = vmatprep.subr.bf16.mxu1 %v15439_v57  ;;  %v1700_v31 = vld [vmem:[%s16943_s17 + $0x2708] sm:$0xff]  ;;  %v15335_v38 = vcombine.high %v1572_v13, %v1576_v30  ;;  %v15334_v47 = vcombine.low %v1572_v13, %v1576_v30 }
 0x3ac   : > { %v1704_v34 = vld [vmem:[%s16943_s17 + $0x2728] sm:$0xff] }
 0x3ad   : > { %v15463_v39 = vcombine.high %v1700_v31, %v1704_v34  ;;  %v1580_v40 = vld [vmem:[%s16943_s17 + $0x2348] sm:$0xff]  ;;  %v15462_v48 = vcombine.low %v1700_v31, %v1704_v34 }
 0x3ae   : > { %12124 = vmatpush1.bf16.msra.mxu0 %v15310_v6  ;;  %12165 = vmatpush1.bf16.msra.mxu1 %v15438_v8  ;;  %v1584_v42 = vld [vmem:[%s16943_s17 + $0x2368] sm:$0xff] }
 0x3af   : > { %12125 = vmatprep.subr.bf16.mxu0 %v15319_v9  ;;  %12166 = vmatprep.subr.bf16.mxu1 %v15447_v10  ;;  %v1708_v43 = vld [vmem:[%s16943_s17 + $0x2748] sm:$0xff]  ;;  %v15343_v53 = vcombine.high %v1580_v40, %v1584_v42  ;;  %v15342_v4 = vcombine.low %v1580_v40, %v1584_v42 }
 0x3b0   : > { %v1712_v44 = vld [vmem:[%s16943_s17 + $0x2768] sm:$0xff] }
 0x3b1   : > { %v15471_v54 = vcombine.high %v1708_v43, %v1712_v44  ;;  %v1588_v56 = vld [vmem:[%s16943_s17 + $0x2388] sm:$0xff]  ;;  %v15470_v5 = vcombine.low %v1708_v43, %v1712_v44 }
 0x3b2   : > { %12126 = vmatpush1.bf16.msra.mxu0 %v15318_v12  ;;  %12167 = vmatpush1.bf16.msra.mxu1 %v15446_v24  ;;  %v1592_v57 = vld [vmem:[%s16943_s17 + $0x23a8] sm:$0xff] }
 0x3b3   : > { %12127 = vmatprep.subr.bf16.mxu0 %v15327_v23  ;;  %12168 = vmatprep.subr.bf16.mxu1 %v15455_v26  ;;  %v1716_v62 = vld [vmem:[%s16943_s17 + $0x2788] sm:$0xff]  ;;  %v15351_v6 = vcombine.high %v1588_v56, %v1592_v57  ;;  %v15350_v20 = vcombine.low %v1588_v56, %v1592_v57 }
 0x3b4   : > { %v1720_v1 = vld [vmem:[%s16943_s17 + $0x27a8] sm:$0xff] }
 0x3b5   : > { %v15479_v8 = vcombine.high %v1716_v62, %v1720_v1  ;;  %v1596_v9 = vld [vmem:[%s16943_s17 + $0x23c8] sm:$0xff]  ;;  %v15478_v22 = vcombine.low %v1716_v62, %v1720_v1 }
 0x3b6   : > { %12128 = vmatpush1.bf16.msra.mxu0 %v15326_v36  ;;  %12169 = vmatpush1.bf16.msra.mxu1 %v15454_v25  ;;  %v1600_v10 = vld [vmem:[%s16943_s17 + $0x23e8] sm:$0xff] }
 0x3b7   : > { %12129 = vmatprep.subr.bf16.mxu0 %v15335_v38  ;;  %12170 = vmatprep.subr.bf16.mxu1 %v15463_v39  ;;  %v1724_v16 = vld [vmem:[%s16943_s17 + $0x27c8] sm:$0xff]  ;;  %v15359_v12 = vcombine.high %v1596_v9, %v1600_v10  ;;  %v15358_v31 = vcombine.low %v1596_v9, %v1600_v10 }
 0x3b8   : > { %v1728_v18 = vld [vmem:[%s16943_s17 + $0x27e8] sm:$0xff] }
 0x3b9   : > { %v15487_v24 = vcombine.high %v1724_v16, %v1728_v18  ;;  %v1732_v23 = vld [vmem:[%s16943_s17 + $0x2808] sm:$0xff]  ;;  %v15486_v34 = vcombine.low %v1724_v16, %v1728_v18 }
 0x3ba   : > { %12130 = vmatpush1.bf16.msra.mxu0 %v15334_v47  ;;  %12171 = vmatpush1.bf16.msra.mxu1 %v15462_v48  ;;  %v1736_v26 = vld [vmem:[%s16943_s17 + $0x2828] sm:$0xff] }
 0x3bb   : > { %12131 = vmatprep.subr.bf16.mxu0 %v15343_v53  ;;  %12172 = vmatprep.subr.bf16.mxu1 %v15471_v54  ;;  %v1860_v13 = vld [vmem:[%s16943_s17 + $0x2c08] sm:$0xff]  ;;  %v15495_v36 = vcombine.high %v1732_v23, %v1736_v26  ;;  %v15494_v43 = vcombine.low %v1732_v23, %v1736_v26 }
 0x3bc   : > { %v1864_v30 = vld [vmem:[%s16943_s17 + $0x2c28] sm:$0xff] }
 0x3bd   : > { %v15623_v25 = vcombine.high %v1860_v13, %v1864_v30  ;;  %v1740_v38 = vld [vmem:[%s16943_s17 + $0x2848] sm:$0xff]  ;;  %v15622_v44 = vcombine.low %v1860_v13, %v1864_v30 }
 0x3be   : > { %12132 = vmatpush1.bf16.msra.mxu0 %v15342_v4  ;;  %12173 = vmatpush1.bf16.msra.mxu1 %v15470_v5  ;;  %v1744_v39 = vld [vmem:[%s16943_s17 + $0x2868] sm:$0xff] }
 0x3bf   : > { %12133 = vmatprep.subr.bf16.mxu0 %v15351_v6  ;;  %12174 = vmatprep.subr.bf16.mxu1 %v15479_v8  ;;  %v1868_v40 = vld [vmem:[%s16943_s17 + $0x2c48] sm:$0xff]  ;;  %v15503_v47 = vcombine.high %v1740_v38, %v1744_v39  ;;  %v15502_v62 = vcombine.low %v1740_v38, %v1744_v39 }
 0x3c0   : > { %v1872_v42 = vld [vmem:[%s16943_s17 + $0x2c68] sm:$0xff] }
 0x3c1   : > { %v15631_v48 = vcombine.high %v1868_v40, %v1872_v42  ;;  %v1748_v53 = vld [vmem:[%s16943_s17 + $0x2888] sm:$0xff]  ;;  %v15630_v1 = vcombine.low %v1868_v40, %v1872_v42 }
 0x3c2   : > { %12134 = vmatpush1.bf16.msra.mxu0 %v15350_v20  ;;  %12175 = vmatpush1.bf16.msra.mxu1 %v15478_v22  ;;  %v1752_v54 = vld [vmem:[%s16943_s17 + $0x28a8] sm:$0xff] }
 0x3c3   : > { %12135 = vmatprep.subr.bf16.mxu0 %v15359_v12  ;;  %12176 = vmatprep.subr.bf16.mxu1 %v15487_v24  ;;  %v1876_v56 = vld [vmem:[%s16943_s17 + $0x2c88] sm:$0xff]  ;;  %v15511_v4 = vcombine.high %v1748_v53, %v1752_v54  ;;  %v15510_v16 = vcombine.low %v1748_v53, %v1752_v54 }
 0x3c4   : > { %v1880_v57 = vld [vmem:[%s16943_s17 + $0x2ca8] sm:$0xff] }
 0x3c5   : > { %v15639_v5 = vcombine.high %v1876_v56, %v1880_v57  ;;  %v1756_v6 = vld [vmem:[%s16943_s17 + $0x28c8] sm:$0xff]  ;;  %v15638_v18 = vcombine.low %v1876_v56, %v1880_v57 }
 0x3c6   : > { %12136 = vmatpush1.bf16.msra.mxu0 %v15358_v31  ;;  %12177 = vmatpush1.bf16.msra.mxu1 %v15486_v34  ;;  %v1760_v8 = vld [vmem:[%s16943_s17 + $0x28e8] sm:$0xff] }
 0x3c7   : > { %12187 = vmatprep.subr.bf16.mxu0 %v15495_v36  ;;  %12228 = vmatprep.subr.bf16.mxu1 %v15623_v25  ;;  %v1884_v9 = vld [vmem:[%s16943_s17 + $0x2cc8] sm:$0xff]  ;;  %v15519_v20 = vcombine.high %v1756_v6, %v1760_v8  ;;  %v15518_v13 = vcombine.low %v1756_v6, %v1760_v8 }
 0x3c8   : > { %v1888_v10 = vld [vmem:[%s16943_s17 + $0x2ce8] sm:$0xff] }
 0x3c9   : > { %12138 = vmatmul.mubr.bf16.vlgmr.msra.gmra.mrb[44].mxu0 %v17373_v55  ;;  %12179 = vmatmul.mubr.bf16.vlgmr.msra.gmra.mrb[44].mxu1 %v17378_v63  ;;  %v15647_v22 = vcombine.high %v1884_v9, %v1888_v10  ;;  %v1764_v12 = vld [vmem:[%s16943_s17 + $0x2908] sm:$0xff]  ;;  %v15646_v30 = vcombine.low %v1884_v9, %v1888_v10 }
 0x3ca   : > { %12188 = vmatpush1.bf16.msra.mxu0 %v15494_v43  ;;  %12229 = vmatpush1.bf16.msra.mxu1 %v15622_v44  ;;  %v1768_v24 = vld [vmem:[%s16943_s17 + $0x2928] sm:$0xff] }
 0x3cb   : > { %12189 = vmatprep.subr.bf16.mxu0 %v15503_v47  ;;  %12230 = vmatprep.subr.bf16.mxu1 %v15631_v48  ;;  %v1892_v23 = vld [vmem:[%s16943_s17 + $0x2d08] sm:$0xff]  ;;  %v15527_v31 = vcombine.high %v1764_v12, %v1768_v24  ;;  %v15526_v40 = vcombine.low %v1764_v12, %v1768_v24 }
 0x3cc   : > { %12219 = vmatprep.mubr.bf16.mxu0 %v17383_v11  ;;  %12260 = vmatprep.mubr.bf16.mxu1 %v17388_v14  ;;  %v1896_v26 = vld [vmem:[%s16943_s17 + $0x2d28] sm:$0xff] }
 0x3cd   : > { %v15655_v34 = vcombine.high %v1892_v23, %v1896_v26  ;;  %v1772_v36 = vld [vmem:[%s16943_s17 + $0x2948] sm:$0xff]  ;;  %v15654_v42 = vcombine.low %v1892_v23, %v1896_v26 }
 0x3ce   : > { %12190 = vmatpush1.bf16.msra.mxu0 %v15502_v62  ;;  %12231 = vmatpush1.bf16.msra.mxu1 %v15630_v1  ;;  %v1776_v25 = vld [vmem:[%s16943_s17 + $0x2968] sm:$0xff] }
 0x3cf   : > { %12191 = vmatprep.subr.bf16.mxu0 %v15511_v4  ;;  %12232 = vmatprep.subr.bf16.mxu1 %v15639_v5  ;;  %v1900_v38 = vld [vmem:[%s16943_s17 + $0x2d48] sm:$0xff]  ;;  %v15535_v43 = vcombine.high %v1772_v36, %v1776_v25  ;;  %v15534_v56 = vcombine.low %v1772_v36, %v1776_v25 }
 0x3d0   : > { %v1904_v39 = vld [vmem:[%s16943_s17 + $0x2d68] sm:$0xff] }
 0x3d1   : > { %v15663_v44 = vcombine.high %v1900_v38, %v1904_v39  ;;  %v1780_v47 = vld [vmem:[%s16943_s17 + $0x2988] sm:$0xff]  ;;  %v15662_v57 = vcombine.low %v1900_v38, %v1904_v39 }
 0x3d2   : > { %12192 = vmatpush1.bf16.msra.mxu0 %v15510_v16  ;;  %12233 = vmatpush1.bf16.msra.mxu1 %v15638_v18  ;;  %v1784_v48 = vld [vmem:[%s16943_s17 + $0x29a8] sm:$0xff] }
 0x3d3   : > { %12193 = vmatprep.subr.bf16.mxu0 %v15519_v20  ;;  %12234 = vmatprep.subr.bf16.mxu1 %v15647_v22  ;;  %v1908_v53 = vld [vmem:[%s16943_s17 + $0x2d88] sm:$0xff]  ;;  %v15543_v62 = vcombine.high %v1780_v47, %v1784_v48  ;;  %v15542_v24 = vcombine.low %v1780_v47, %v1784_v48 }
 0x3d4   : > { %v1912_v54 = vld [vmem:[%s16943_s17 + $0x2da8] sm:$0xff] }
 0x3d5   : > { %v15671_v4 = vcombine.high %v1908_v53, %v1912_v54  ;;  %v1788_v5 = vld [vmem:[%s16943_s17 + $0x29c8] sm:$0xff] }
 0x3d6   : > { %12194 = vmatpush1.bf16.msra.mxu0 %v15518_v13  ;;  %12235 = vmatpush1.bf16.msra.mxu1 %v15646_v30  ;;  %v1792_v6 = vld [vmem:[%s16943_s17 + $0x29e8] sm:$0xff] }
 0x3d7   : > { %12195 = vmatprep.subr.bf16.mxu0 %v15527_v31  ;;  %12236 = vmatprep.subr.bf16.mxu1 %v15655_v34  ;;  %v1916_v16 = vld [vmem:[%s16943_s17 + $0x2dc8] sm:$0xff]  ;;  %v15551_v30 = vcombine.high %v1788_v5, %v1792_v6 }
 0x3d8   : > { %v1920_v18 = vld [vmem:[%s16943_s17 + $0x2de8] sm:$0xff] }
 0x3d9   : > { %v15679_v34 = vcombine.high %v1916_v16, %v1920_v18  ;;  %v1796_v36 = vld [vmem:[%s16943_s17 + $0x2a08] sm:$0xff] }
 0x3da   : > { %12196 = vmatpush1.bf16.msra.mxu0 %v15526_v40  ;;  %12237 = vmatpush1.bf16.msra.mxu1 %v15654_v42  ;;  %v1800_v25 = vld [vmem:[%s16943_s17 + $0x2a28] sm:$0xff]  ;;  %v15550_v40 = vcombine.low %v1788_v5, %v1792_v6  ;;  %v15678_v42 = vcombine.low %v1916_v16, %v1920_v18 }
 0x3db   : > { %12197 = vmatprep.subr.bf16.mxu0 %v15535_v43  ;;  %12238 = vmatprep.subr.bf16.mxu1 %v15663_v44  ;;  %v1924_v38 = vld [vmem:[%s16943_s17 + $0x2e08] sm:$0xff]  ;;  %v15559_v43 = vcombine.high %v1796_v36, %v1800_v25 }
 0x3dc   : > { %v11893_v1 = vpop.f32.mrb[32].mxu0  ;;  %v11934_v9 = vpop.f32.mrb[32].mxu1  ;;  %v1928_v39 = vld [vmem:[%s16943_s17 + $0x2e28] sm:$0xff] }
 0x3dd   : > { %v11894_v8 = vadd.f32 %v11893_v1, %v17871_v27  ;;  %v11895_v10 = vpop.f32.mrb[33].mxu0  ;;  %v11936_v22 = vpop.f32.mrb[33].mxu1  ;;  %v15670_v27 = vcombine.low %v1908_v53, %v1912_v54  ;;  %v15687_v44 = vcombine.high %v1924_v38, %v1928_v39  ;;  %v1804_v47 = vld [vmem:[%s16943_s17 + $0x2a48] sm:$0xff] }
 0x3de   : > { %v11896_v20 = vadd.f32 %v11895_v10, %v17873_v33  ;;  %v11897_v12 = vpop.f32.mrb[34].mxu0  ;;  %12198 = vmatpush1.bf16.msra.mxu0 %v15534_v56  ;;  %v11938_v26 = vpop.f32.mrb[34].mxu1  ;;  %12239 = vmatpush1.bf16.msra.mxu1 %v15662_v57  ;;  %v1808_v48 = vld [vmem:[%s16943_s17 + $0x2a68] sm:$0xff]  ;;  %v15558_v56 = vcombine.low %v1796_v36, %v1800_v25  ;;  %v15686_v57 = vcombine.low %v1924_v38, %v1928_v39 }
 0x3df   : > { %v17945_v23 = vadd.f32 %v11934_v9, %v11894_v8  ;;  %v11898_v13 = vpop.f32.mrb[35].mxu0  ;;  %12199 = vmatprep.subr.bf16.mxu0 %v15543_v62  ;;  %v11939_v33 = vpop.f32.mrb[35].mxu1  ;;  %12240 = vmatprep.subr.bf16.mxu1 %v15671_v4  ;;  %v1932_v53 = vld [vmem:[%s16943_s17 + $0x2e48] sm:$0xff]  ;;  %v15567_v62 = vcombine.high %v1804_v47, %v1808_v48  ;;  %v15566_v9 = vcombine.low %v1804_v47, %v1808_v48 }
 0x3e0   : > { %v17947_v31 = vadd.f32 %v11936_v22, %v11896_v20  ;;  %v1936_v54 = vld [vmem:[%s16943_s17 + $0x2e68] sm:$0xff] }
 0x3e1   : > { %v15695_v1 = vcombine.high %v1932_v53, %v1936_v54  ;;  %v1812_v4 = vld [vmem:[%s16943_s17 + $0x2a88] sm:$0xff]  ;;  %v15694_v10 = vcombine.low %v1932_v53, %v1936_v54 }
 0x3e2   : > { %12200 = vmatpush1.bf16.msra.mxu0 %v15542_v24  ;;  %12241 = vmatpush1.bf16.msra.mxu1 %v15670_v27  ;;  %v1816_v5 = vld [vmem:[%s16943_s17 + $0x2aa8] sm:$0xff] }
 0x3e3   : > { %12201 = vmatprep.subr.bf16.mxu0 %v15551_v30  ;;  %12242 = vmatprep.subr.bf16.mxu1 %v15679_v34  ;;  %v1940_v6 = vld [vmem:[%s16943_s17 + $0x2e88] sm:$0xff]  ;;  %v15575_v16 = vcombine.high %v1812_v4, %v1816_v5  ;;  %v15574_v26 = vcombine.low %v1812_v4, %v1816_v5 }
 0x3e4   : > { %v1944_v8 = vld [vmem:[%s16943_s17 + $0x2ea8] sm:$0xff] }
 0x3e5   : > { %v15703_v18 = vcombine.high %v1940_v6, %v1944_v8  ;;  %v1820_v20 = vld [vmem:[%s16943_s17 + $0x2ac8] sm:$0xff]  ;;  %v15702_v13 = vcombine.low %v1940_v6, %v1944_v8 }
 0x3e6   : > { %12202 = vmatpush1.bf16.msra.mxu0 %v15550_v40  ;;  %12243 = vmatpush1.bf16.msra.mxu1 %v15678_v42  ;;  %v1824_v22 = vld [vmem:[%s16943_s17 + $0x2ae8] sm:$0xff] }
 0x3e7   : > { %12203 = vmatprep.subr.bf16.mxu0 %v15559_v43  ;;  %12244 = vmatprep.subr.bf16.mxu1 %v15687_v44  ;;  %v1948_v12 = vld [vmem:[%s16943_s17 + $0x2ec8] sm:$0xff]  ;;  %v15583_v27 = vcombine.high %v1820_v20, %v1824_v22  ;;  %v15582_v38 = vcombine.low %v1820_v20, %v1824_v22 }
 0x3e8   : > { %v1952_v24 = vld [vmem:[%s16943_s17 + $0x2ee8] sm:$0xff] }
 0x3e9   : > { %v15711_v30 = vcombine.high %v1948_v12, %v1952_v24  ;;  %v1828_v33 = vld [vmem:[%s16943_s17 + $0x2b08] sm:$0xff]  ;;  %v15710_v39 = vcombine.low %v1948_v12, %v1952_v24 }
 0x3ea   : > { %12204 = vmatpush1.bf16.msra.mxu0 %v15558_v56  ;;  %12245 = vmatpush1.bf16.msra.mxu1 %v15686_v57  ;;  %v1832_v34 = vld [vmem:[%s16943_s17 + $0x2b28] sm:$0xff] }
 0x3eb   : > { %12205 = vmatprep.subr.bf16.mxu0 %v15567_v62  ;;  %12246 = vmatprep.subr.bf16.mxu1 %v15695_v1  ;;  %v1956_v36 = vld [vmem:[%s16943_s17 + $0x2f08] sm:$0xff]  ;;  %v15591_v40 = vcombine.high %v1828_v33, %v1832_v34  ;;  %v15590_v53 = vcombine.low %v1828_v33, %v1832_v34 }
 0x3ec   : > { %v1960_v25 = vld [vmem:[%s16943_s17 + $0x2f28] sm:$0xff] }
 0x3ed   : > { %v15719_v42 = vcombine.high %v1956_v36, %v1960_v25  ;;  %v1836_v43 = vld [vmem:[%s16943_s17 + $0x2b48] sm:$0xff]  ;;  %v15718_v54 = vcombine.low %v1956_v36, %v1960_v25 }
 0x3ee   : > { %12206 = vmatpush1.bf16.msra.mxu0 %v15566_v9  ;;  %12247 = vmatpush1.bf16.msra.mxu1 %v15694_v10  ;;  %v1840_v44 = vld [vmem:[%s16943_s17 + $0x2b68] sm:$0xff] }
 0x3ef   : > { %12207 = vmatprep.subr.bf16.mxu0 %v15575_v16  ;;  %12248 = vmatprep.subr.bf16.mxu1 %v15703_v18  ;;  %v1964_v47 = vld [vmem:[%s16943_s17 + $0x2f48] sm:$0xff]  ;;  %v15599_v56 = vcombine.high %v1836_v43, %v1840_v44  ;;  %v15598_v6 = vcombine.low %v1836_v43, %v1840_v44 }
 0x3f0   : > { %v1968_v48 = vld [vmem:[%s16943_s17 + $0x2f68] sm:$0xff] }
 0x3f1   : > { %v15727_v57 = vcombine.high %v1964_v47, %v1968_v48  ;;  %v1844_v62 = vld [vmem:[%s16943_s17 + $0x2b88] sm:$0xff]  ;;  %v15726_v8 = vcombine.low %v1964_v47, %v1968_v48 }
 0x3f2   : > { %12208 = vmatpush1.bf16.msra.mxu0 %v15574_v26  ;;  %12249 = vmatpush1.bf16.msra.mxu1 %v15702_v13  ;;  %v1848_v1 = vld [vmem:[%s16943_s17 + $0x2ba8] sm:$0xff] }
 0x3f3   : > { %12209 = vmatprep.subr.bf16.mxu0 %v15583_v27  ;;  %12250 = vmatprep.subr.bf16.mxu1 %v15711_v30  ;;  %v1972_v4 = vld [vmem:[%s16943_s17 + $0x2f88] sm:$0xff]  ;;  %v15607_v9 = vcombine.high %v1844_v62, %v1848_v1  ;;  %v15606_v12 = vcombine.low %v1844_v62, %v1848_v1 }
 0x3f4   : > { %v1976_v5 = vld [vmem:[%s16943_s17 + $0x2fa8] sm:$0xff] }
 0x3f5   : > { %v15735_v10 = vcombine.high %v1972_v4, %v1976_v5  ;;  %v1852_v16 = vld [vmem:[%s16943_s17 + $0x2bc8] sm:$0xff]  ;;  %v15734_v24 = vcombine.low %v1972_v4, %v1976_v5 }
 0x3f6   : > { %12210 = vmatpush1.bf16.msra.mxu0 %v15582_v38  ;;  %12251 = vmatpush1.bf16.msra.mxu1 %v15710_v39  ;;  %v1856_v18 = vld [vmem:[%s16943_s17 + $0x2be8] sm:$0xff] }
 0x3f7   : > { %12211 = vmatprep.subr.bf16.mxu0 %v15591_v40  ;;  %12252 = vmatprep.subr.bf16.mxu1 %v15719_v42  ;;  %v1980_v20 = vld [vmem:[%s16943_s17 + $0x2fc8] sm:$0xff]  ;;  %v15615_v26 = vcombine.high %v1852_v16, %v1856_v18  ;;  %v15614_v36 = vcombine.low %v1852_v16, %v1856_v18 }
 0x3f8   : > { %v1984_v22 = vld [vmem:[%s16943_s17 + $0x2fe8] sm:$0xff] }
 0x3f9   : > { %v15743_v13 = vcombine.high %v1980_v20, %v1984_v22  ;;  %v1988_v27 = vld [vmem:[%s16943_s17 + $0x3008] sm:$0xff]  ;;  %v15742_v25 = vcombine.low %v1980_v20, %v1984_v22 }
 0x3fa   : > { %12212 = vmatpush1.bf16.msra.mxu0 %v15590_v53  ;;  %12253 = vmatpush1.bf16.msra.mxu1 %v15718_v54  ;;  %v1992_v30 = vld [vmem:[%s16943_s17 + $0x3028] sm:$0xff] }
 0x3fb   : > { %12213 = vmatprep.subr.bf16.mxu0 %v15599_v56  ;;  %12254 = vmatprep.subr.bf16.mxu1 %v15727_v57  ;;  %v2116_v33 = vld [vmem:[%s16943_s17 + $0x3408] sm:$0xff]  ;;  %v15751_v38 = vcombine.high %v1988_v27, %v1992_v30  ;;  %v15750_v47 = vcombine.low %v1988_v27, %v1992_v30 }
 0x3fc   : > { %v2120_v34 = vld [vmem:[%s16943_s17 + $0x3428] sm:$0xff] }
 0x3fd   : > { %v15879_v39 = vcombine.high %v2116_v33, %v2120_v34  ;;  %v1996_v40 = vld [vmem:[%s16943_s17 + $0x3048] sm:$0xff]  ;;  %v15878_v48 = vcombine.low %v2116_v33, %v2120_v34 }
 0x3fe   : > { %12214 = vmatpush1.bf16.msra.mxu0 %v15598_v6  ;;  %12255 = vmatpush1.bf16.msra.mxu1 %v15726_v8  ;;  %v2000_v42 = vld [vmem:[%s16943_s17 + $0x3068] sm:$0xff] }
 0x3ff   : > { %12215 = vmatprep.subr.bf16.mxu0 %v15607_v9  ;;  %12256 = vmatprep.subr.bf16.mxu1 %v15735_v10  ;;  %v2124_v43 = vld [vmem:[%s16943_s17 + $0x3448] sm:$0xff]  ;;  %v15759_v53 = vcombine.high %v1996_v40, %v2000_v42  ;;  %v15758_v4 = vcombine.low %v1996_v40, %v2000_v42 }
 0x400   : > { %v2128_v44 = vld [vmem:[%s16943_s17 + $0x3468] sm:$0xff] }
 0x401   : > { %v15887_v54 = vcombine.high %v2124_v43, %v2128_v44  ;;  %v2004_v56 = vld [vmem:[%s16943_s17 + $0x3088] sm:$0xff]  ;;  %v15886_v5 = vcombine.low %v2124_v43, %v2128_v44 }
 0x402   : > { %12216 = vmatpush1.bf16.msra.mxu0 %v15606_v12  ;;  %12257 = vmatpush1.bf16.msra.mxu1 %v15734_v24  ;;  %v2008_v57 = vld [vmem:[%s16943_s17 + $0x30a8] sm:$0xff] }
 0x403   : > { %12217 = vmatprep.subr.bf16.mxu0 %v15615_v26  ;;  %12258 = vmatprep.subr.bf16.mxu1 %v15743_v13  ;;  %v2132_v62 = vld [vmem:[%s16943_s17 + $0x3488] sm:$0xff]  ;;  %v15767_v6 = vcombine.high %v2004_v56, %v2008_v57  ;;  %v15766_v20 = vcombine.low %v2004_v56, %v2008_v57 }
 0x404   : > { %v2136_v1 = vld [vmem:[%s16943_s17 + $0x34a8] sm:$0xff] }
 0x405   : > { %v15895_v8 = vcombine.high %v2132_v62, %v2136_v1  ;;  %v2012_v9 = vld [vmem:[%s16943_s17 + $0x30c8] sm:$0xff]  ;;  %v15894_v22 = vcombine.low %v2132_v62, %v2136_v1 }
 0x406   : > { %12218 = vmatpush1.bf16.msra.mxu0 %v15614_v36  ;;  %12259 = vmatpush1.bf16.msra.mxu1 %v15742_v25  ;;  %v2016_v10 = vld [vmem:[%s16943_s17 + $0x30e8] sm:$0xff] }
 0x407   : > { %12269 = vmatprep.subr.bf16.mxu0 %v15751_v38  ;;  %12310 = vmatprep.subr.bf16.mxu1 %v15879_v39  ;;  %v2140_v16 = vld [vmem:[%s16943_s17 + $0x34c8] sm:$0xff]  ;;  %v15775_v12 = vcombine.high %v2012_v9, %v2016_v10  ;;  %v15774_v33 = vcombine.low %v2012_v9, %v2016_v10 }
 0x408   : > { %v2144_v18 = vld [vmem:[%s16943_s17 + $0x34e8] sm:$0xff] }
 0x409   : > { %12220 = vmatmul.mubr.bf16.vlgmr.msra.gmra.mrb[48].mxu0 %v17459_v58  ;;  %12261 = vmatmul.mubr.bf16.vlgmr.msra.gmra.mrb[48].mxu1 %v17464_v35  ;;  %v15903_v24 = vcombine.high %v2140_v16, %v2144_v18  ;;  %v2020_v26 = vld [vmem:[%s16943_s17 + $0x3108] sm:$0xff]  ;;  %v15902_v34 = vcombine.low %v2140_v16, %v2144_v18 }
 0x40a   : > { %12270 = vmatpush1.bf16.msra.mxu0 %v15750_v47  ;;  %12311 = vmatpush1.bf16.msra.mxu1 %v15878_v48  ;;  %v2024_v13 = vld [vmem:[%s16943_s17 + $0x3128] sm:$0xff] }
 0x40b   : > { %12271 = vmatprep.subr.bf16.mxu0 %v15759_v53  ;;  %12312 = vmatprep.subr.bf16.mxu1 %v15887_v54  ;;  %v2148_v27 = vld [vmem:[%s16943_s17 + $0x3508] sm:$0xff]  ;;  %v15783_v36 = vcombine.high %v2020_v26, %v2024_v13  ;;  %v15782_v43 = vcombine.low %v2020_v26, %v2024_v13 }
 0x40c   : > { %12301 = vmatprep.mubr.bf16.mxu0 %v17469_v46  ;;  %12342 = vmatprep.mubr.bf16.mxu1 %v17474_v51  ;;  %v2152_v30 = vld [vmem:[%s16943_s17 + $0x3528] sm:$0xff] }
 0x40d   : > { %v15911_v25 = vcombine.high %v2148_v27, %v2152_v30  ;;  %v2028_v38 = vld [vmem:[%s16943_s17 + $0x3148] sm:$0xff]  ;;  %v15910_v44 = vcombine.low %v2148_v27, %v2152_v30 }
 0x40e   : > { %12272 = vmatpush1.bf16.msra.mxu0 %v15758_v4  ;;  %12313 = vmatpush1.bf16.msra.mxu1 %v15886_v5  ;;  %v2032_v39 = vld [vmem:[%s16943_s17 + $0x3168] sm:$0xff] }
 0x40f   : > { %12273 = vmatprep.subr.bf16.mxu0 %v15767_v6  ;;  %12314 = vmatprep.subr.bf16.mxu1 %v15895_v8  ;;  %v2156_v40 = vld [vmem:[%s16943_s17 + $0x3548] sm:$0xff]  ;;  %v15791_v47 = vcombine.high %v2028_v38, %v2032_v39  ;;  %v15790_v62 = vcombine.low %v2028_v38, %v2032_v39 }
 0x410   : > { %v2160_v42 = vld [vmem:[%s16943_s17 + $0x3568] sm:$0xff] }
 0x411   : > { %v15919_v48 = vcombine.high %v2156_v40, %v2160_v42  ;;  %v2036_v53 = vld [vmem:[%s16943_s17 + $0x3188] sm:$0xff]  ;;  %v15918_v1 = vcombine.low %v2156_v40, %v2160_v42 }
 0x412   : > { %12274 = vmatpush1.bf16.msra.mxu0 %v15766_v20  ;;  %12315 = vmatpush1.bf16.msra.mxu1 %v15894_v22  ;;  %v2040_v54 = vld [vmem:[%s16943_s17 + $0x31a8] sm:$0xff] }
 0x413   : > { %12275 = vmatprep.subr.bf16.mxu0 %v15775_v12  ;;  %12316 = vmatprep.subr.bf16.mxu1 %v15903_v24  ;;  %v2164_v56 = vld [vmem:[%s16943_s17 + $0x3588] sm:$0xff]  ;;  %v15799_v4 = vcombine.high %v2036_v53, %v2040_v54  ;;  %v15798_v13 = vcombine.low %v2036_v53, %v2040_v54 }
 0x414   : > { %v2168_v57 = vld [vmem:[%s16943_s17 + $0x35a8] sm:$0xff] }
 0x415   : > { %v15927_v6 = vcombine.high %v2164_v56, %v2168_v57  ;;  %v2044_v8 = vld [vmem:[%s16943_s17 + $0x31c8] sm:$0xff] }
 0x416   : > { %12276 = vmatpush1.bf16.msra.mxu0 %v15774_v33  ;;  %12317 = vmatpush1.bf16.msra.mxu1 %v15902_v34  ;;  %v2048_v9 = vld [vmem:[%s16943_s17 + $0x31e8] sm:$0xff] }
 0x417   : > { %12277 = vmatprep.subr.bf16.mxu0 %v15783_v36  ;;  %12318 = vmatprep.subr.bf16.mxu1 %v15911_v25  ;;  %v2172_v20 = vld [vmem:[%s16943_s17 + $0x35c8] sm:$0xff]  ;;  %v15807_v34 = vcombine.high %v2044_v8, %v2048_v9 }
 0x418   : > { %v2176_v22 = vld [vmem:[%s16943_s17 + $0x35e8] sm:$0xff] }
 0x419   : > { %v15935_v25 = vcombine.high %v2172_v20, %v2176_v22  ;;  %v2052_v38 = vld [vmem:[%s16943_s17 + $0x3208] sm:$0xff] }
 0x41a   : > { %12278 = vmatpush1.bf16.msra.mxu0 %v15782_v43  ;;  %12319 = vmatpush1.bf16.msra.mxu1 %v15910_v44  ;;  %v2056_v39 = vld [vmem:[%s16943_s17 + $0x3228] sm:$0xff]  ;;  %v15806_v43 = vcombine.low %v2044_v8, %v2048_v9  ;;  %v15934_v44 = vcombine.low %v2172_v20, %v2176_v22 }
 0x41b   : > { %12279 = vmatprep.subr.bf16.mxu0 %v15791_v47  ;;  %12320 = vmatprep.subr.bf16.mxu1 %v15919_v48  ;;  %v2180_v40 = vld [vmem:[%s16943_s17 + $0x3608] sm:$0xff]  ;;  %v15815_v47 = vcombine.high %v2052_v38, %v2056_v39 }
 0x41c   : > { %v11975_v5 = vpop.f32.mrb[36].mxu0  ;;  %v12016_v16 = vpop.f32.mrb[36].mxu1  ;;  %v2184_v42 = vld [vmem:[%s16943_s17 + $0x3628] sm:$0xff] }
 0x41d   : > { %v11976_v10 = vadd.f32 %v11975_v5, %v17945_v23  ;;  %v11977_v18 = vpop.f32.mrb[37].mxu0  ;;  %v12018_v24 = vpop.f32.mrb[37].mxu1  ;;  %v15926_v23 = vcombine.low %v2164_v56, %v2168_v57  ;;  %v15943_v48 = vcombine.high %v2180_v40, %v2184_v42  ;;  %v2060_v53 = vld [vmem:[%s16943_s17 + $0x3248] sm:$0xff] }
 0x41e   : > { %v11978_v12 = vadd.f32 %v11977_v18, %v17947_v31  ;;  %v11979_v26 = vpop.f32.mrb[38].mxu0  ;;  %12280 = vmatpush1.bf16.msra.mxu0 %v15790_v62  ;;  %v12020_v30 = vpop.f32.mrb[38].mxu1  ;;  %12321 = vmatpush1.bf16.msra.mxu1 %v15918_v1  ;;  %v2064_v54 = vld [vmem:[%s16943_s17 + $0x3268] sm:$0xff]  ;;  %v15814_v62 = vcombine.low %v2052_v38, %v2056_v39  ;;  %v15942_v1 = vcombine.low %v2180_v40, %v2184_v42 }
 0x41f   : > { %v18019_v27 = vadd.f32 %v12016_v16, %v11976_v10  ;;  %v11980_v33 = vpop.f32.mrb[39].mxu0  ;;  %12281 = vmatprep.subr.bf16.mxu0 %v15799_v4  ;;  %v12021_v31 = vpop.f32.mrb[39].mxu1  ;;  %12322 = vmatprep.subr.bf16.mxu1 %v15927_v6  ;;  %v2188_v56 = vld [vmem:[%s16943_s17 + $0x3648] sm:$0xff]  ;;  %v15823_v4 = vcombine.high %v2060_v53, %v2064_v54  ;;  %v15822_v16 = vcombine.low %v2060_v53, %v2064_v54 }
 0x420   : > { %v18021_v36 = vadd.f32 %v12018_v24, %v11978_v12  ;;  %v2192_v57 = vld [vmem:[%s16943_s17 + $0x3668] sm:$0xff] }
 0x421   : > { %v15951_v5 = vcombine.high %v2188_v56, %v2192_v57  ;;  %v2068_v6 = vld [vmem:[%s16943_s17 + $0x3288] sm:$0xff]  ;;  %v15950_v18 = vcombine.low %v2188_v56, %v2192_v57 }
 0x422   : > { %12282 = vmatpush1.bf16.msra.mxu0 %v15798_v13  ;;  %12323 = vmatpush1.bf16.msra.mxu1 %v15926_v23  ;;  %v2072_v8 = vld [vmem:[%s16943_s17 + $0x32a8] sm:$0xff] }
 0x423   : > { %12283 = vmatprep.subr.bf16.mxu0 %v15807_v34  ;;  %12324 = vmatprep.subr.bf16.mxu1 %v15935_v25  ;;  %v2196_v9 = vld [vmem:[%s16943_s17 + $0x3688] sm:$0xff]  ;;  %v15831_v20 = vcombine.high %v2068_v6, %v2072_v8  ;;  %v15830_v30 = vcombine.low %v2068_v6, %v2072_v8 }
 0x424   : > { %v2200_v10 = vld [vmem:[%s16943_s17 + $0x36a8] sm:$0xff] }
 0x425   : > { %v15959_v22 = vcombine.high %v2196_v9, %v2200_v10  ;;  %v2076_v12 = vld [vmem:[%s16943_s17 + $0x32c8] sm:$0xff]  ;;  %v15958_v33 = vcombine.low %v2196_v9, %v2200_v10 }
 0x426   : > { %12284 = vmatpush1.bf16.msra.mxu0 %v15806_v43  ;;  %12325 = vmatpush1.bf16.msra.mxu1 %v15934_v44  ;;  %v2080_v24 = vld [vmem:[%s16943_s17 + $0x32e8] sm:$0xff] }
 0x427   : > { %12285 = vmatprep.subr.bf16.mxu0 %v15815_v47  ;;  %12326 = vmatprep.subr.bf16.mxu1 %v15943_v48  ;;  %v2204_v26 = vld [vmem:[%s16943_s17 + $0x36c8] sm:$0xff]  ;;  %v15839_v23 = vcombine.high %v2076_v12, %v2080_v24  ;;  %v15838_v40 = vcombine.low %v2076_v12, %v2080_v24 }
 0x428   : > { %v2208_v13 = vld [vmem:[%s16943_s17 + $0x36e8] sm:$0xff] }
 0x429   : > { %v15967_v34 = vcombine.high %v2204_v26, %v2208_v13  ;;  %v2084_v31 = vld [vmem:[%s16943_s17 + $0x3308] sm:$0xff]  ;;  %v15966_v42 = vcombine.low %v2204_v26, %v2208_v13 }
 0x42a   : > { %12286 = vmatpush1.bf16.msra.mxu0 %v15814_v62  ;;  %12327 = vmatpush1.bf16.msra.mxu1 %v15942_v1  ;;  %v2088_v25 = vld [vmem:[%s16943_s17 + $0x3328] sm:$0xff] }
 0x42b   : > { %12287 = vmatprep.subr.bf16.mxu0 %v15823_v4  ;;  %12328 = vmatprep.subr.bf16.mxu1 %v15951_v5  ;;  %v2212_v38 = vld [vmem:[%s16943_s17 + $0x3708] sm:$0xff]  ;;  %v15847_v43 = vcombine.high %v2084_v31, %v2088_v25  ;;  %v15846_v56 = vcombine.low %v2084_v31, %v2088_v25  ;;  %v581_v31 = vld [vmem:[%s16943_s17 + $0x410] sm:$0xff] }
 0x42c   : > { %v2216_v39 = vld [vmem:[%s16943_s17 + $0x3728] sm:$0xff]  ;;  %v585_v25 = vld [vmem:[%s16943_s17 + $0x430] sm:$0xff] }
 0x42d   : > { %v15975_v44 = vcombine.high %v2212_v38, %v2216_v39  ;;  %v2092_v47 = vld [vmem:[%s16943_s17 + $0x3348] sm:$0xff]  ;;  %v15974_v57 = vcombine.low %v2212_v38, %v2216_v39 }
 0x42e   : > { %12288 = vmatpush1.bf16.msra.mxu0 %v15822_v16  ;;  %12329 = vmatpush1.bf16.msra.mxu1 %v15950_v18  ;;  %v2096_v48 = vld [vmem:[%s16943_s17 + $0x3368] sm:$0xff] }
 0x42f   : > { %12289 = vmatprep.subr.bf16.mxu0 %v15831_v20  ;;  %12330 = vmatprep.subr.bf16.mxu1 %v15959_v22  ;;  %v2220_v53 = vld [vmem:[%s16943_s17 + $0x3748] sm:$0xff]  ;;  %v15855_v62 = vcombine.high %v2092_v47, %v2096_v48  ;;  %v15854_v9 = vcombine.low %v2092_v47, %v2096_v48  ;;  %v589_v47 = vld [vmem:[%s16943_s17 + $0x450] sm:$0xff] }
 0x430   : > { %v2224_v54 = vld [vmem:[%s16943_s17 + $0x3768] sm:$0xff]  ;;  %v593_v48 = vld [vmem:[%s16943_s17 + $0x470] sm:$0xff] }
 0x431   : > { %v15983_v1 = vcombine.high %v2220_v53, %v2224_v54  ;;  %v2100_v4 = vld [vmem:[%s16943_s17 + $0x3388] sm:$0xff]  ;;  %v15982_v10 = vcombine.low %v2220_v53, %v2224_v54  ;;  %v14344_v54 = vcombine.low %v581_v31, %v585_v25 }
 0x432   : > { %12290 = vmatpush1.bf16.msra.mxu0 %v15830_v30  ;;  %12331 = vmatpush1.bf16.msra.mxu1 %v15958_v33  ;;  %v2104_v5 = vld [vmem:[%s16943_s17 + $0x33a8] sm:$0xff] }
 0x433   : > { %12291 = vmatprep.subr.bf16.mxu0 %v15839_v23  ;;  %12332 = vmatprep.subr.bf16.mxu1 %v15967_v34  ;;  %v2228_v6 = vld [vmem:[%s16943_s17 + $0x3788] sm:$0xff]  ;;  %v15863_v16 = vcombine.high %v2100_v4, %v2104_v5  ;;  %v15862_v26 = vcombine.low %v2100_v4, %v2104_v5  ;;  %v453_v23 = vld [vmem:[%s16943_s17 + $0x10] sm:$0xff] }
 0x434   : > { %v2232_v8 = vld [vmem:[%s16943_s17 + $0x37a8] sm:$0xff]  ;;  %v457_v34 = vld [vmem:[%s16943_s17 + $0x30] sm:$0xff] }
 0x435   : > { %v15991_v18 = vcombine.high %v2228_v6, %v2232_v8  ;;  %v2108_v20 = vld [vmem:[%s16943_s17 + $0x33c8] sm:$0xff]  ;;  %v15990_v13 = vcombine.low %v2228_v6, %v2232_v8  ;;  %v14216_v53 = vcombine.low %v453_v23, %v457_v34  ;;  %v597_v4 = vld [vmem:[%s16943_s17 + $0x490] sm:$0xff]  ;;  %v14352_v8 = vcombine.low %v589_v47, %v593_v48 }
 0x436   : > { %12292 = vmatpush1.bf16.msra.mxu0 %v15838_v40  ;;  %12333 = vmatpush1.bf16.msra.mxu1 %v15966_v42  ;;  %v2112_v22 = vld [vmem:[%s16943_s17 + $0x33e8] sm:$0xff]  ;;  %v14217_v40 = vcombine.high %v453_v23, %v457_v34  ;;  %v14345_v42 = vcombine.high %v581_v31, %v585_v25  ;;  %v601_v5 = vld [vmem:[%s16943_s17 + $0x4b0] sm:$0xff] }
 0x437   : > { %12293 = vmatprep.subr.bf16.mxu0 %v15847_v43  ;;  %12334 = vmatprep.subr.bf16.mxu1 %v15975_v44  ;;  %v2236_v12 = vld [vmem:[%s16943_s17 + $0x37c8] sm:$0xff]  ;;  %v15871_v30 = vcombine.high %v2108_v20, %v2112_v22  ;;  %v15870_v38 = vcombine.low %v2108_v20, %v2112_v22  ;;  %v461_v43 = vld [vmem:[%s16943_s17 + $0x50] sm:$0xff] }
 0x438   : > { %v2240_v24 = vld [vmem:[%s16943_s17 + $0x37e8] sm:$0xff]  ;;  %v465_v44 = vld [vmem:[%s16943_s17 + $0x70] sm:$0xff] }
 0x439   : > { %v15999_v33 = vcombine.high %v2236_v12, %v2240_v24  ;;  %v15998_v39 = vcombine.low %v2236_v12, %v2240_v24  ;;  %v14224_v6 = vcombine.low %v461_v43, %v465_v44  ;;  %v605_v20 = vld [vmem:[%s16943_s17 + $0x4d0] sm:$0xff]  ;;  %v14360_v24 = vcombine.low %v597_v4, %v601_v5 }
 0x43a   : > { %12294 = vmatpush1.bf16.msra.mxu0 %v15846_v56  ;;  %12335 = vmatpush1.bf16.msra.mxu1 %v15974_v57  ;;  %v14225_v56 = vcombine.high %v461_v43, %v465_v44  ;;  %v14353_v57 = vcombine.high %v589_v47, %v593_v48  ;;  %v609_v22 = vld [vmem:[%s16943_s17 + $0x4f0] sm:$0xff] }
 0x43b   : > { %12295 = vmatprep.subr.bf16.mxu0 %v15855_v62  ;;  %12336 = vmatprep.subr.bf16.mxu1 %v15983_v1  ;;  %v469_v62 = vld [vmem:[%s16943_s17 + $0x90] sm:$0xff]  ;;  %v14368_v25 = vcombine.low %v605_v20, %v609_v22 }
 0x43c   : > { %v473_v1 = vld [vmem:[%s16943_s17 + $0xb0] sm:$0xff] }
 0x43d   : > { %v14232_v12 = vcombine.low %v469_v62, %v473_v1  ;;  %v613_v23 = vld [vmem:[%s16943_s17 + $0x510] sm:$0xff] }
 0x43e   : > { %12296 = vmatpush1.bf16.msra.mxu0 %v15854_v9  ;;  %12337 = vmatpush1.bf16.msra.mxu1 %v15982_v10  ;;  %v14233_v9 = vcombine.high %v469_v62, %v473_v1  ;;  %v14361_v10 = vcombine.high %v597_v4, %v601_v5  ;;  %v617_v34 = vld [vmem:[%s16943_s17 + $0x530] sm:$0xff] }
 0x43f   : > { %12297 = vmatprep.subr.bf16.mxu0 %v15863_v16  ;;  %12338 = vmatprep.subr.bf16.mxu1 %v15991_v18  ;;  %v477_v16 = vld [vmem:[%s16943_s17 + $0xd0] sm:$0xff]  ;;  %v14376_v48 = vcombine.low %v613_v23, %v617_v34 }
 0x440   : > { %v481_v18 = vld [vmem:[%s16943_s17 + $0xf0] sm:$0xff] }
 0x441   : > { %v14240_v31 = vcombine.low %v477_v16, %v481_v18  ;;  %v621_v43 = vld [vmem:[%s16943_s17 + $0x550] sm:$0xff] }
 0x442   : > { %12298 = vmatpush1.bf16.msra.mxu0 %v15862_v26  ;;  %12339 = vmatpush1.bf16.msra.mxu1 %v15990_v13  ;;  %v14241_v26 = vcombine.high %v477_v16, %v481_v18  ;;  %v14369_v13 = vcombine.high %v605_v20, %v609_v22  ;;  %v625_v44 = vld [vmem:[%s16943_s17 + $0x570] sm:$0xff] }
 0x443   : > { %12299 = vmatprep.subr.bf16.mxu0 %v15871_v30  ;;  %12340 = vmatprep.subr.bf16.mxu1 %v15999_v33  ;;  %v485_v30 = vld [vmem:[%s16943_s17 + $0x110] sm:$0xff]  ;;  %v14384_v5 = vcombine.low %v621_v43, %v625_v44 }
 0x444   : > { %v489_v33 = vld [vmem:[%s16943_s17 + $0x130] sm:$0xff] }
 0x445   : > { %v14248_v47 = vcombine.low %v485_v30, %v489_v33  ;;  %v629_v62 = vld [vmem:[%s16943_s17 + $0x590] sm:$0xff] }
 0x446   : > { %12300 = vmatpush1.bf16.msra.mxu0 %v15870_v38  ;;  %12341 = vmatpush1.bf16.msra.mxu1 %v15998_v39  ;;  %v14249_v38 = vcombine.high %v485_v30, %v489_v33  ;;  %v14377_v39 = vcombine.high %v613_v23, %v617_v34  ;;  %v633_v1 = vld [vmem:[%s16943_s17 + $0x5b0] sm:$0xff] }
 0x447   : > { %12351 = vmatprep.subr.bf16.mxu0 %v14217_v40  ;;  %12392 = vmatprep.subr.bf16.mxu1 %v14345_v42  ;;  %v493_v40 = vld [vmem:[%s16943_s17 + $0x150] sm:$0xff] }
 0x448   : > { %v497_v42 = vld [vmem:[%s16943_s17 + $0x170] sm:$0xff] }
 0x449   : > { %12302 = vmatmul.mubr.bf16.vlgmr.msra.gmra.mrb[52].mxu0 %v17545_v28  ;;  %12343 = vmatmul.mubr.bf16.vlgmr.msra.gmra.mrb[52].mxu1 %v17549_v2  ;;  %v14256_v4 = vcombine.low %v493_v40, %v497_v42  ;;  %v513_v16 = vld [vmem:[%s16943_s17 + $0x1f0] sm:$0xff] }
 0x44a   : > { %12352 = vmatpush1.bf16.msra.mxu0 %v14216_v53  ;;  %12393 = vmatpush1.bf16.msra.mxu1 %v14344_v54  ;;  %v14257_v53 = vcombine.high %v493_v40, %v497_v42  ;;  %v14385_v54 = vcombine.high %v621_v43, %v625_v44  ;;  %v517_v40 = vld [vmem:[%s16943_s17 + $0x210] sm:$0xff] }
 0x44b   : > { %12353 = vmatprep.subr.bf16.mxu0 %v14225_v56  ;;  %12394 = vmatprep.subr.bf16.mxu1 %v14353_v57  ;;  %v501_v56 = vld [vmem:[%s16943_s17 + $0x190] sm:$0xff] }
 0x44c   : > { %12383 = vmatprep.mubr.bf16.mxu0 %v17001_v59  ;;  %12424 = vmatprep.mubr.bf16.mxu1 %v17003_v60  ;;  %v505_v57 = vld [vmem:[%s16943_s17 + $0x1b0] sm:$0xff] }
 0x44d   : > { %v14264_v33 = vcombine.low %v501_v56, %v505_v57  ;;  %v521_v42 = vld [vmem:[%s16943_s17 + $0x230] sm:$0xff] }
 0x44e   : > { %12354 = vmatpush1.bf16.msra.mxu0 %v14224_v6  ;;  %12395 = vmatpush1.bf16.msra.mxu1 %v14352_v8  ;;  %v14265_v6 = vcombine.high %v501_v56, %v505_v57  ;;  %v645_v43 = vld [vmem:[%s16943_s17 + $0x610] sm:$0xff] }
 0x44f   : > { %12355 = vmatprep.subr.bf16.mxu0 %v14233_v9  ;;  %12396 = vmatprep.subr.bf16.mxu1 %v14361_v10  ;;  %v14393_v9 = vcombine.high %v629_v62, %v633_v1  ;;  %v509_v10 = vld [vmem:[%s16943_s17 + $0x1d0] sm:$0xff] }
 0x450   : > { %v649_v44 = vld [vmem:[%s16943_s17 + $0x630] sm:$0xff] }
 0x451   : > { %v525_v56 = vld [vmem:[%s16943_s17 + $0x250] sm:$0xff] }
 0x452   : > { %12356 = vmatpush1.bf16.msra.mxu0 %v14232_v12  ;;  %12397 = vmatpush1.bf16.msra.mxu1 %v14360_v24  ;;  %v637_v12 = vld [vmem:[%s16943_s17 + $0x5d0] sm:$0xff] }
 0x453   : > { %12357 = vmatprep.subr.bf16.mxu0 %v14241_v26  ;;  %12398 = vmatprep.subr.bf16.mxu1 %v14369_v13  ;;  %v641_v24 = vld [vmem:[%s16943_s17 + $0x5f0] sm:$0xff] }
 0x454   : > { %v529_v57 = vld [vmem:[%s16943_s17 + $0x270] sm:$0xff] }
 0x456   : > { %12358 = vmatpush1.bf16.msra.mxu0 %v14240_v31  ;;  %12399 = vmatpush1.bf16.msra.mxu1 %v14368_v25  ;;  %v14273_v25 = vcombine.high %v509_v10, %v513_v16 }
 0x457   : > { %12359 = vmatprep.subr.bf16.mxu0 %v14249_v38  ;;  %12400 = vmatprep.subr.bf16.mxu1 %v14377_v39  ;;  %v14401_v39 = vcombine.high %v637_v12, %v641_v24 }
 0x45a   : > { %12360 = vmatpush1.bf16.msra.mxu0 %v14248_v47  ;;  %12401 = vmatpush1.bf16.msra.mxu1 %v14376_v48  ;;  %v14272_v47 = vcombine.low %v509_v10, %v513_v16  ;;  %v14400_v48 = vcombine.low %v637_v12, %v641_v24  ;;  %v537_v10 = vld [vmem:[%s16943_s17 + $0x2b0] sm:$0xff] }
 0x45b   : > { %12361 = vmatprep.subr.bf16.mxu0 %v14257_v53  ;;  %12402 = vmatprep.subr.bf16.mxu1 %v14385_v54  ;;  %v14281_v53 = vcombine.high %v517_v40, %v521_v42  ;;  %v14409_v54 = vcombine.high %v645_v43, %v649_v44  ;;  %v661_v16 = vld [vmem:[%s16943_s17 + $0x690] sm:$0xff] }
 0x45c   : > { %v12057_v8 = vpop.f32.mrb[40].mxu0  ;;  %v12098_v20 = vpop.f32.mrb[40].mxu1 }
 0x45d   : > { %v12058_v18 = vadd.f32 %v12057_v8, %v18019_v27  ;;  %v12059_v22 = vpop.f32.mrb[41].mxu0  ;;  %v12100_v13 = vpop.f32.mrb[41].mxu1  ;;  %v14392_v27 = vcombine.low %v629_v62, %v633_v1  ;;  %v653_v62 = vld [vmem:[%s16943_s17 + $0x650] sm:$0xff] }
 0x45e   : > { %v12060_v26 = vadd.f32 %v12059_v22, %v18021_v36  ;;  %v12061_v30 = vpop.f32.mrb[42].mxu0  ;;  %12362 = vmatpush1.bf16.msra.mxu0 %v14256_v4  ;;  %v12102_v34 = vpop.f32.mrb[42].mxu1  ;;  %12403 = vmatpush1.bf16.msra.mxu1 %v14384_v5  ;;  %v657_v1 = vld [vmem:[%s16943_s17 + $0x670] sm:$0xff]  ;;  %v14280_v4 = vcombine.low %v517_v40, %v521_v42  ;;  %v14408_v5 = vcombine.low %v645_v43, %v649_v44 }
 0x45f   : > { %v18093_v23 = vadd.f32 %v12098_v20, %v12058_v18  ;;  %v12062_v31 = vpop.f32.mrb[43].mxu0  ;;  %12363 = vmatprep.subr.bf16.mxu0 %v14265_v6  ;;  %v12103_v36 = vpop.f32.mrb[43].mxu1  ;;  %12404 = vmatprep.subr.bf16.mxu1 %v14393_v9  ;;  %v14289_v6 = vcombine.high %v525_v56, %v529_v57  ;;  %v14417_v8 = vcombine.high %v653_v62, %v657_v1  ;;  %v533_v9 = vld [vmem:[%s16943_s17 + $0x290] sm:$0xff] }
 0x460   : > { %v18095_v38 = vadd.f32 %v12100_v13, %v12060_v26  ;;  %v665_v18 = vld [vmem:[%s16943_s17 + $0x6b0] sm:$0xff]  ;;  %v14288_v20 = vcombine.low %v525_v56, %v529_v57  ;;  %v14416_v22 = vcombine.low %v653_v62, %v657_v1  ;;  %v14297_v12 = vcombine.high %v533_v9, %v537_v10 }
 0x461   : > { %v14425_v24 = vcombine.high %v661_v16, %v665_v18  ;;  %v541_v26 = vld [vmem:[%s16943_s17 + $0x2d0] sm:$0xff]  ;;  %v14296_v34 = vcombine.low %v533_v9, %v537_v10  ;;  %v14424_v31 = vcombine.low %v661_v16, %v665_v18 }
 0x462   : > { %12364 = vmatpush1.bf16.msra.mxu0 %v14264_v33  ;;  %12405 = vmatpush1.bf16.msra.mxu1 %v14392_v27  ;;  %v545_v13 = vld [vmem:[%s16943_s17 + $0x2f0] sm:$0xff] }
 0x463   : > { %12365 = vmatprep.subr.bf16.mxu0 %v14273_v25  ;;  %12406 = vmatprep.subr.bf16.mxu1 %v14401_v39  ;;  %v669_v30 = vld [vmem:[%s16943_s17 + $0x6d0] sm:$0xff]  ;;  %v14305_v27 = vcombine.high %v541_v26, %v545_v13  ;;  %v14304_v43 = vcombine.low %v541_v26, %v545_v13 }
 0x464   : > { %v673_v33 = vld [vmem:[%s16943_s17 + $0x6f0] sm:$0xff] }
 0x465   : > { %v14433_v25 = vcombine.high %v669_v30, %v673_v33  ;;  %v549_v36 = vld [vmem:[%s16943_s17 + $0x310] sm:$0xff]  ;;  %v14432_v44 = vcombine.low %v669_v30, %v673_v33 }
 0x466   : > { %12366 = vmatpush1.bf16.msra.mxu0 %v14272_v47  ;;  %12407 = vmatpush1.bf16.msra.mxu1 %v14400_v48  ;;  %v553_v39 = vld [vmem:[%s16943_s17 + $0x330] sm:$0xff] }
 0x467   : > { %12367 = vmatprep.subr.bf16.mxu0 %v14281_v53  ;;  %12408 = vmatprep.subr.bf16.mxu1 %v14409_v54  ;;  %v677_v40 = vld [vmem:[%s16943_s17 + $0x710] sm:$0xff]  ;;  %v14313_v47 = vcombine.high %v549_v36, %v553_v39  ;;  %v14312_v62 = vcombine.low %v549_v36, %v553_v39 }
 0x468   : > { %v681_v42 = vld [vmem:[%s16943_s17 + $0x730] sm:$0xff] }
 0x469   : > { %v14441_v48 = vcombine.high %v677_v40, %v681_v42  ;;  %v557_v53 = vld [vmem:[%s16943_s17 + $0x350] sm:$0xff]  ;;  %v14440_v1 = vcombine.low %v677_v40, %v681_v42 }
 0x46a   : > { %12368 = vmatpush1.bf16.msra.mxu0 %v14280_v4  ;;  %12409 = vmatpush1.bf16.msra.mxu1 %v14408_v5  ;;  %v561_v54 = vld [vmem:[%s16943_s17 + $0x370] sm:$0xff] }
 0x46b   : > { %12369 = vmatprep.subr.bf16.mxu0 %v14289_v6  ;;  %12410 = vmatprep.subr.bf16.mxu1 %v14417_v8  ;;  %v685_v56 = vld [vmem:[%s16943_s17 + $0x750] sm:$0xff]  ;;  %v14321_v4 = vcombine.high %v557_v53, %v561_v54  ;;  %v14320_v16 = vcombine.low %v557_v53, %v561_v54 }
 0x46c   : > { %v689_v57 = vld [vmem:[%s16943_s17 + $0x770] sm:$0xff] }
 0x46d   : > { %v14449_v5 = vcombine.high %v685_v56, %v689_v57  ;;  %v565_v6 = vld [vmem:[%s16943_s17 + $0x390] sm:$0xff]  ;;  %v14448_v18 = vcombine.low %v685_v56, %v689_v57 }
 0x46e   : > { %12370 = vmatpush1.bf16.msra.mxu0 %v14288_v20  ;;  %12411 = vmatpush1.bf16.msra.mxu1 %v14416_v22  ;;  %v569_v8 = vld [vmem:[%s16943_s17 + $0x3b0] sm:$0xff] }
 0x46f   : > { %12371 = vmatprep.subr.bf16.mxu0 %v14297_v12  ;;  %12412 = vmatprep.subr.bf16.mxu1 %v14425_v24  ;;  %v693_v9 = vld [vmem:[%s16943_s17 + $0x790] sm:$0xff]  ;;  %v14329_v20 = vcombine.high %v565_v6, %v569_v8  ;;  %v14328_v30 = vcombine.low %v565_v6, %v569_v8 }
 0x470   : > { %v697_v10 = vld [vmem:[%s16943_s17 + $0x7b0] sm:$0xff] }
 0x471   : > { %v14457_v22 = vcombine.high %v693_v9, %v697_v10  ;;  %v573_v12 = vld [vmem:[%s16943_s17 + $0x3d0] sm:$0xff]  ;;  %v14456_v33 = vcombine.low %v693_v9, %v697_v10 }
 0x472   : > { %12372 = vmatpush1.bf16.msra.mxu0 %v14296_v34  ;;  %12413 = vmatpush1.bf16.msra.mxu1 %v14424_v31  ;;  %v577_v24 = vld [vmem:[%s16943_s17 + $0x3f0] sm:$0xff] }
 0x473   : > { %12373 = vmatprep.subr.bf16.mxu0 %v14305_v27  ;;  %12414 = vmatprep.subr.bf16.mxu1 %v14433_v25  ;;  %v701_v26 = vld [vmem:[%s16943_s17 + $0x7d0] sm:$0xff]  ;;  %v14337_v34 = vcombine.high %v573_v12, %v577_v24  ;;  %v14336_v40 = vcombine.low %v573_v12, %v577_v24 }
 0x474   : > { %v705_v13 = vld [vmem:[%s16943_s17 + $0x7f0] sm:$0xff] }
 0x475   : > { %v14465_v31 = vcombine.high %v701_v26, %v705_v13  ;;  %v709_v27 = vld [vmem:[%s16943_s17 + $0x810] sm:$0xff]  ;;  %v14464_v42 = vcombine.low %v701_v26, %v705_v13 }
 0x476   : > { %12374 = vmatpush1.bf16.msra.mxu0 %v14304_v43  ;;  %12415 = vmatpush1.bf16.msra.mxu1 %v14432_v44  ;;  %v713_v25 = vld [vmem:[%s16943_s17 + $0x830] sm:$0xff] }
 0x477   : > { %12375 = vmatprep.subr.bf16.mxu0 %v14313_v47  ;;  %12416 = vmatprep.subr.bf16.mxu1 %v14441_v48  ;;  %v837_v36 = vld [vmem:[%s16943_s17 + $0xc10] sm:$0xff]  ;;  %v14473_v43 = vcombine.high %v709_v27, %v713_v25  ;;  %v14472_v56 = vcombine.low %v709_v27, %v713_v25 }
 0x478   : > { %v841_v39 = vld [vmem:[%s16943_s17 + $0xc30] sm:$0xff] }
 0x479   : > { %v14601_v44 = vcombine.high %v837_v36, %v841_v39  ;;  %v717_v47 = vld [vmem:[%s16943_s17 + $0x850] sm:$0xff]  ;;  %v14600_v57 = vcombine.low %v837_v36, %v841_v39 }
 0x47a   : > { %12376 = vmatpush1.bf16.msra.mxu0 %v14312_v62  ;;  %12417 = vmatpush1.bf16.msra.mxu1 %v14440_v1  ;;  %v721_v48 = vld [vmem:[%s16943_s17 + $0x870] sm:$0xff] }
 0x47b   : > { %12377 = vmatprep.subr.bf16.mxu0 %v14321_v4  ;;  %12418 = vmatprep.subr.bf16.mxu1 %v14449_v5  ;;  %v845_v53 = vld [vmem:[%s16943_s17 + $0xc50] sm:$0xff]  ;;  %v14481_v62 = vcombine.high %v717_v47, %v721_v48  ;;  %v14480_v9 = vcombine.low %v717_v47, %v721_v48 }
 0x47c   : > { %v849_v54 = vld [vmem:[%s16943_s17 + $0xc70] sm:$0xff] }
 0x47d   : > { %v14609_v1 = vcombine.high %v845_v53, %v849_v54  ;;  %v725_v4 = vld [vmem:[%s16943_s17 + $0x890] sm:$0xff]  ;;  %v14608_v10 = vcombine.low %v845_v53, %v849_v54 }
 0x47e   : > { %12378 = vmatpush1.bf16.msra.mxu0 %v14320_v16  ;;  %12419 = vmatpush1.bf16.msra.mxu1 %v14448_v18  ;;  %v729_v5 = vld [vmem:[%s16943_s17 + $0x8b0] sm:$0xff] }
 0x47f   : > { %12379 = vmatprep.subr.bf16.mxu0 %v14329_v20  ;;  %12420 = vmatprep.subr.bf16.mxu1 %v14457_v22  ;;  %v853_v6 = vld [vmem:[%s16943_s17 + $0xc90] sm:$0xff]  ;;  %v14489_v16 = vcombine.high %v725_v4, %v729_v5  ;;  %v14488_v26 = vcombine.low %v725_v4, %v729_v5 }
 0x480   : > { %v857_v8 = vld [vmem:[%s16943_s17 + $0xcb0] sm:$0xff] }
 0x481   : > { %v14617_v18 = vcombine.high %v853_v6, %v857_v8  ;;  %v733_v20 = vld [vmem:[%s16943_s17 + $0x8d0] sm:$0xff]  ;;  %v14616_v13 = vcombine.low %v853_v6, %v857_v8 }
 0x482   : > { %12380 = vmatpush1.bf16.msra.mxu0 %v14328_v30  ;;  %12421 = vmatpush1.bf16.msra.mxu1 %v14456_v33  ;;  %v737_v22 = vld [vmem:[%s16943_s17 + $0x8f0] sm:$0xff] }
 0x483   : > { %12381 = vmatprep.subr.bf16.mxu0 %v14337_v34  ;;  %12422 = vmatprep.subr.bf16.mxu1 %v14465_v31  ;;  %v861_v12 = vld [vmem:[%s16943_s17 + $0xcd0] sm:$0xff]  ;;  %v14497_v30 = vcombine.high %v733_v20, %v737_v22  ;;  %v14496_v36 = vcombine.low %v733_v20, %v737_v22 }
 0x484   : > { %v865_v24 = vld [vmem:[%s16943_s17 + $0xcf0] sm:$0xff] }
 0x485   : > { %v14625_v33 = vcombine.high %v861_v12, %v865_v24  ;;  %v741_v34 = vld [vmem:[%s16943_s17 + $0x910] sm:$0xff]  ;;  %v14624_v39 = vcombine.low %v861_v12, %v865_v24 }
 0x486   : > { %12382 = vmatpush1.bf16.msra.mxu0 %v14336_v40  ;;  %12423 = vmatpush1.bf16.msra.mxu1 %v14464_v42  ;;  %v745_v31 = vld [vmem:[%s16943_s17 + $0x930] sm:$0xff] }
 0x487   : > { %12433 = vmatprep.subr.bf16.mxu0 %v14473_v43  ;;  %12474 = vmatprep.subr.bf16.mxu1 %v14601_v44  ;;  %v869_v27 = vld [vmem:[%s16943_s17 + $0xd10] sm:$0xff]  ;;  %v14505_v40 = vcombine.high %v741_v34, %v745_v31  ;;  %v14504_v53 = vcombine.low %v741_v34, %v745_v31 }
 0x488   : > { %v873_v25 = vld [vmem:[%s16943_s17 + $0xd30] sm:$0xff] }
 0x489   : > { %12384 = vmatmul.mubr.bf16.vlgmr.msra.gmra.mrb[56].mxu0 %v17049_v17  ;;  %12425 = vmatmul.mubr.bf16.vlgmr.msra.gmra.mrb[56].mxu1 %v17054_v21  ;;  %v14633_v42 = vcombine.high %v869_v27, %v873_v25  ;;  %v749_v43 = vld [vmem:[%s16943_s17 + $0x950] sm:$0xff]  ;;  %v14632_v54 = vcombine.low %v869_v27, %v873_v25 }
 0x48a   : > { %12434 = vmatpush1.bf16.msra.mxu0 %v14472_v56  ;;  %12475 = vmatpush1.bf16.msra.mxu1 %v14600_v57  ;;  %v753_v44 = vld [vmem:[%s16943_s17 + $0x970] sm:$0xff] }
 0x48b   : > { %12435 = vmatprep.subr.bf16.mxu0 %v14481_v62  ;;  %12476 = vmatprep.subr.bf16.mxu1 %v14609_v1  ;;  %v877_v47 = vld [vmem:[%s16943_s17 + $0xd50] sm:$0xff]  ;;  %v14513_v56 = vcombine.high %v749_v43, %v753_v44  ;;  %v14512_v6 = vcombine.low %v749_v43, %v753_v44 }
 0x48c   : > { %12465 = vmatprep.mubr.bf16.mxu0 %v17059_v29  ;;  %12506 = vmatprep.mubr.bf16.mxu1 %v17064_v32  ;;  %v881_v48 = vld [vmem:[%s16943_s17 + $0xd70] sm:$0xff] }
 0x48d   : > { %v14641_v57 = vcombine.high %v877_v47, %v881_v48  ;;  %v757_v62 = vld [vmem:[%s16943_s17 + $0x990] sm:$0xff]  ;;  %v14640_v8 = vcombine.low %v877_v47, %v881_v48 }
 0x48e   : > { %12436 = vmatpush1.bf16.msra.mxu0 %v14480_v9  ;;  %12477 = vmatpush1.bf16.msra.mxu1 %v14608_v10  ;;  %v761_v1 = vld [vmem:[%s16943_s17 + $0x9b0] sm:$0xff] }
 0x48f   : > { %12437 = vmatprep.subr.bf16.mxu0 %v14489_v16  ;;  %12478 = vmatprep.subr.bf16.mxu1 %v14617_v18  ;;  %v885_v4 = vld [vmem:[%s16943_s17 + $0xd90] sm:$0xff]  ;;  %v14521_v9 = vcombine.high %v757_v62, %v761_v1  ;;  %v14520_v31 = vcombine.low %v757_v62, %v761_v1 }
 0x490   : > { %v889_v5 = vld [vmem:[%s16943_s17 + $0xdb0] sm:$0xff] }
 0x491   : > { %v14649_v16 = vcombine.high %v885_v4, %v889_v5  ;;  %v765_v18 = vld [vmem:[%s16943_s17 + $0x9d0] sm:$0xff] }
 0x492   : > { %12438 = vmatpush1.bf16.msra.mxu0 %v14488_v26  ;;  %12479 = vmatpush1.bf16.msra.mxu1 %v14616_v13  ;;  %v769_v20 = vld [vmem:[%s16943_s17 + $0x9f0] sm:$0xff] }
 0x493   : > { %12439 = vmatprep.subr.bf16.mxu0 %v14497_v30  ;;  %12480 = vmatprep.subr.bf16.mxu1 %v14625_v33  ;;  %v893_v26 = vld [vmem:[%s16943_s17 + $0xdd0] sm:$0xff] }
 0x494   : > { %v897_v13 = vld [vmem:[%s16943_s17 + $0xdf0] sm:$0xff] }
 0x495   : > { %v773_v43 = vld [vmem:[%s16943_s17 + $0xa10] sm:$0xff] }
 0x496   : > { %12440 = vmatpush1.bf16.msra.mxu0 %v14496_v36  ;;  %12481 = vmatpush1.bf16.msra.mxu1 %v14624_v39  ;;  %v14529_v39 = vcombine.high %v765_v18, %v769_v20  ;;  %v777_v44 = vld [vmem:[%s16943_s17 + $0xa30] sm:$0xff] }
 0x497   : > { %12441 = vmatprep.subr.bf16.mxu0 %v14505_v40  ;;  %12482 = vmatprep.subr.bf16.mxu1 %v14633_v42  ;;  %v14657_v42 = vcombine.high %v893_v26, %v897_v13  ;;  %v901_v47 = vld [vmem:[%s16943_s17 + $0xe10] sm:$0xff] }
 0x498   : > { %v905_v48 = vld [vmem:[%s16943_s17 + $0xe30] sm:$0xff] }
 0x499   : > { %v781_v62 = vld [vmem:[%s16943_s17 + $0xa50] sm:$0xff] }
 0x49a   : > { %12442 = vmatpush1.bf16.msra.mxu0 %v14504_v53  ;;  %12483 = vmatpush1.bf16.msra.mxu1 %v14632_v54  ;;  %v14528_v53 = vcombine.low %v765_v18, %v769_v20  ;;  %v14656_v54 = vcombine.low %v893_v26, %v897_v13  ;;  %v785_v1 = vld [vmem:[%s16943_s17 + $0xa70] sm:$0xff] }
 0x49b   : > { %12443 = vmatprep.subr.bf16.mxu0 %v14513_v56  ;;  %12484 = vmatprep.subr.bf16.mxu1 %v14641_v57  ;;  %v14537_v56 = vcombine.high %v773_v43, %v777_v44  ;;  %v14665_v57 = vcombine.high %v901_v47, %v905_v48  ;;  %v793_v18 = vld [vmem:[%s16943_s17 + $0xab0] sm:$0xff] }
 0x49c   : > { %v12139_v10 = vpop.f32.mrb[44].mxu0  ;;  %v12180_v12 = vpop.f32.mrb[44].mxu1  ;;  %v917_v20 = vld [vmem:[%s16943_s17 + $0xe90] sm:$0xff] }
 0x49d   : > { %v12140_v22 = vadd.f32 %v12139_v10, %v18093_v23  ;;  %v12141_v24 = vpop.f32.mrb[45].mxu0  ;;  %v12182_v33 = vpop.f32.mrb[45].mxu1  ;;  %v14648_v23 = vcombine.low %v885_v4, %v889_v5  ;;  %v909_v4 = vld [vmem:[%s16943_s17 + $0xe50] sm:$0xff] }
 0x49e   : > { %v12142_v30 = vadd.f32 %v12141_v24, %v18095_v38  ;;  %v12143_v34 = vpop.f32.mrb[46].mxu0  ;;  %12444 = vmatpush1.bf16.msra.mxu0 %v14512_v6  ;;  %v12184_v25 = vpop.f32.mrb[46].mxu1  ;;  %12485 = vmatpush1.bf16.msra.mxu1 %v14640_v8  ;;  %v913_v5 = vld [vmem:[%s16943_s17 + $0xe70] sm:$0xff]  ;;  %v14536_v6 = vcombine.low %v773_v43, %v777_v44  ;;  %v14664_v8 = vcombine.low %v901_v47, %v905_v48 }
 0x49f   : > { %v18167_v27 = vadd.f32 %v12180_v12, %v12140_v22  ;;  %v12144_v36 = vpop.f32.mrb[47].mxu0  ;;  %12445 = vmatprep.subr.bf16.mxu0 %v14521_v9  ;;  %v12185_v38 = vpop.f32.mrb[47].mxu1  ;;  %12486 = vmatprep.subr.bf16.mxu1 %v14649_v16  ;;  %v14545_v9 = vcombine.high %v781_v62, %v785_v1  ;;  %v14673_v10 = vcombine.high %v909_v4, %v913_v5  ;;  %v789_v16 = vld [vmem:[%s16943_s17 + $0xa90] sm:$0xff] }
 0x4a0   : > { %v18169_v40 = vadd.f32 %v12182_v33, %v12142_v30  ;;  %v921_v22 = vld [vmem:[%s16943_s17 + $0xeb0] sm:$0xff]  ;;  %v14544_v12 = vcombine.low %v781_v62, %v785_v1  ;;  %v14672_v24 = vcombine.low %v909_v4, %v913_v5  ;;  %v14553_v26 = vcombine.high %v789_v16, %v793_v18 }
 0x4a1   : > { %v14681_v13 = vcombine.high %v917_v20, %v921_v22  ;;  %v797_v30 = vld [vmem:[%s16943_s17 + $0xad0] sm:$0xff]  ;;  %v14552_v25 = vcombine.low %v789_v16, %v793_v18  ;;  %v14680_v36 = vcombine.low %v917_v20, %v921_v22 }
 0x4a2   : > { %12446 = vmatpush1.bf16.msra.mxu0 %v14520_v31  ;;  %12487 = vmatpush1.bf16.msra.mxu1 %v14648_v23  ;;  %v801_v33 = vld [vmem:[%s16943_s17 + $0xaf0] sm:$0xff] }
 0x4a3   : > { %12447 = vmatprep.subr.bf16.mxu0 %v14529_v39  ;;  %12488 = vmatprep.subr.bf16.mxu1 %v14657_v42  ;;  %v925_v34 = vld [vmem:[%s16943_s17 + $0xed0] sm:$0xff]  ;;  %v14561_v23 = vcombine.high %v797_v30, %v801_v33  ;;  %v14560_v47 = vcombine.low %v797_v30, %v801_v33 }
 0x4a4   : > { %v929_v31 = vld [vmem:[%s16943_s17 + $0xef0] sm:$0xff] }
 0x4a5   : > { %v14689_v39 = vcombine.high %v925_v34, %v929_v31  ;;  %v805_v38 = vld [vmem:[%s16943_s17 + $0xb10] sm:$0xff]  ;;  %v14688_v48 = vcombine.low %v925_v34, %v929_v31 }
 0x4a6   : > { %12448 = vmatpush1.bf16.msra.mxu0 %v14528_v53  ;;  %12489 = vmatpush1.bf16.msra.mxu1 %v14656_v54  ;;  %v809_v42 = vld [vmem:[%s16943_s17 + $0xb30] sm:$0xff] }
 0x4a7   : > { %12449 = vmatprep.subr.bf16.mxu0 %v14537_v56  ;;  %12490 = vmatprep.subr.bf16.mxu1 %v14665_v57  ;;  %v933_v43 = vld [vmem:[%s16943_s17 + $0xf10] sm:$0xff]  ;;  %v14569_v53 = vcombine.high %v805_v38, %v809_v42  ;;  %v14568_v4 = vcombine.low %v805_v38, %v809_v42 }
 0x4a8   : > { %v937_v44 = vld [vmem:[%s16943_s17 + $0xf30] sm:$0xff] }
 0x4a9   : > { %v14697_v54 = vcombine.high %v933_v43, %v937_v44  ;;  %v813_v56 = vld [vmem:[%s16943_s17 + $0xb50] sm:$0xff]  ;;  %v14696_v5 = vcombine.low %v933_v43, %v937_v44 }
 0x4aa   : > { %12450 = vmatpush1.bf16.msra.mxu0 %v14536_v6  ;;  %12491 = vmatpush1.bf16.msra.mxu1 %v14664_v8  ;;  %v817_v57 = vld [vmem:[%s16943_s17 + $0xb70] sm:$0xff] }
 0x4ab   : > { %12451 = vmatprep.subr.bf16.mxu0 %v14545_v9  ;;  %12492 = vmatprep.subr.bf16.mxu1 %v14673_v10  ;;  %v941_v62 = vld [vmem:[%s16943_s17 + $0xf50] sm:$0xff]  ;;  %v14577_v6 = vcombine.high %v813_v56, %v817_v57  ;;  %v14576_v20 = vcombine.low %v813_v56, %v817_v57 }
 0x4ac   : > { %v945_v1 = vld [vmem:[%s16943_s17 + $0xf70] sm:$0xff] }
 0x4ad   : > { %v14705_v8 = vcombine.high %v941_v62, %v945_v1  ;;  %v821_v9 = vld [vmem:[%s16943_s17 + $0xb90] sm:$0xff]  ;;  %v14704_v22 = vcombine.low %v941_v62, %v945_v1 }
 0x4ae   : > { %12452 = vmatpush1.bf16.msra.mxu0 %v14544_v12  ;;  %12493 = vmatpush1.bf16.msra.mxu1 %v14672_v24  ;;  %v825_v10 = vld [vmem:[%s16943_s17 + $0xbb0] sm:$0xff] }
 0x4af   : > { %12453 = vmatprep.subr.bf16.mxu0 %v14553_v26  ;;  %12494 = vmatprep.subr.bf16.mxu1 %v14681_v13  ;;  %v949_v16 = vld [vmem:[%s16943_s17 + $0xf90] sm:$0xff]  ;;  %v14585_v12 = vcombine.high %v821_v9, %v825_v10  ;;  %v14584_v34 = vcombine.low %v821_v9, %v825_v10 }
 0x4b0   : > { %v953_v18 = vld [vmem:[%s16943_s17 + $0xfb0] sm:$0xff] }
 0x4b1   : > { %v14713_v24 = vcombine.high %v949_v16, %v953_v18  ;;  %v829_v26 = vld [vmem:[%s16943_s17 + $0xbd0] sm:$0xff]  ;;  %v14712_v31 = vcombine.low %v949_v16, %v953_v18 }
 0x4b2   : > { %12454 = vmatpush1.bf16.msra.mxu0 %v14552_v25  ;;  %12495 = vmatpush1.bf16.msra.mxu1 %v14680_v36  ;;  %v833_v13 = vld [vmem:[%s16943_s17 + $0xbf0] sm:$0xff] }
 0x4b3   : > { %12455 = vmatprep.subr.bf16.mxu0 %v14561_v23  ;;  %12496 = vmatprep.subr.bf16.mxu1 %v14689_v39  ;;  %v957_v30 = vld [vmem:[%s16943_s17 + $0xfd0] sm:$0xff]  ;;  %v14593_v25 = vcombine.high %v829_v26, %v833_v13  ;;  %v14592_v43 = vcombine.low %v829_v26, %v833_v13 }
 0x4b4   : > { %v961_v33 = vld [vmem:[%s16943_s17 + $0xff0] sm:$0xff] }
 0x4b5   : > { %v14721_v36 = vcombine.high %v957_v30, %v961_v33  ;;  %v965_v23 = vld [vmem:[%s16943_s17 + $0x1010] sm:$0xff]  ;;  %v14720_v44 = vcombine.low %v957_v30, %v961_v33 }
 0x4b6   : > { %12456 = vmatpush1.bf16.msra.mxu0 %v14560_v47  ;;  %12497 = vmatpush1.bf16.msra.mxu1 %v14688_v48  ;;  %v969_v39 = vld [vmem:[%s16943_s17 + $0x1030] sm:$0xff] }
 0x4b7   : > { %12457 = vmatprep.subr.bf16.mxu0 %v14569_v53  ;;  %12498 = vmatprep.subr.bf16.mxu1 %v14697_v54  ;;  %v1093_v38 = vld [vmem:[%s16943_s17 + $0x1410] sm:$0xff]  ;;  %v14729_v47 = vcombine.high %v965_v23, %v969_v39  ;;  %v14728_v62 = vcombine.low %v965_v23, %v969_v39 }
 0x4b8   : > { %v1097_v42 = vld [vmem:[%s16943_s17 + $0x1430] sm:$0xff] }
 0x4b9   : > { %v14857_v48 = vcombine.high %v1093_v38, %v1097_v42  ;;  %v973_v53 = vld [vmem:[%s16943_s17 + $0x1050] sm:$0xff]  ;;  %v14856_v1 = vcombine.low %v1093_v38, %v1097_v42 }
 0x4ba   : > { %12458 = vmatpush1.bf16.msra.mxu0 %v14568_v4  ;;  %12499 = vmatpush1.bf16.msra.mxu1 %v14696_v5  ;;  %v977_v54 = vld [vmem:[%s16943_s17 + $0x1070] sm:$0xff] }
 0x4bb   : > { %12459 = vmatprep.subr.bf16.mxu0 %v14577_v6  ;;  %12500 = vmatprep.subr.bf16.mxu1 %v14705_v8  ;;  %v1101_v56 = vld [vmem:[%s16943_s17 + $0x1450] sm:$0xff]  ;;  %v14737_v4 = vcombine.high %v973_v53, %v977_v54  ;;  %v14736_v16 = vcombine.low %v973_v53, %v977_v54 }
 0x4bc   : > { %v1105_v57 = vld [vmem:[%s16943_s17 + $0x1470] sm:$0xff] }
 0x4bd   : > { %v14865_v5 = vcombine.high %v1101_v56, %v1105_v57  ;;  %v981_v6 = vld [vmem:[%s16943_s17 + $0x1090] sm:$0xff]  ;;  %v14864_v18 = vcombine.low %v1101_v56, %v1105_v57 }
 0x4be   : > { %12460 = vmatpush1.bf16.msra.mxu0 %v14576_v20  ;;  %12501 = vmatpush1.bf16.msra.mxu1 %v14704_v22  ;;  %v985_v8 = vld [vmem:[%s16943_s17 + $0x10b0] sm:$0xff] }
 0x4bf   : > { %12461 = vmatprep.subr.bf16.mxu0 %v14585_v12  ;;  %12502 = vmatprep.subr.bf16.mxu1 %v14713_v24  ;;  %v1109_v9 = vld [vmem:[%s16943_s17 + $0x1490] sm:$0xff]  ;;  %v14745_v20 = vcombine.high %v981_v6, %v985_v8  ;;  %v14744_v30 = vcombine.low %v981_v6, %v985_v8 }
 0x4c0   : > { %v1113_v10 = vld [vmem:[%s16943_s17 + $0x14b0] sm:$0xff] }
 0x4c1   : > { %v14873_v22 = vcombine.high %v1109_v9, %v1113_v10  ;;  %v989_v12 = vld [vmem:[%s16943_s17 + $0x10d0] sm:$0xff]  ;;  %v14872_v33 = vcombine.low %v1109_v9, %v1113_v10 }
 0x4c2   : > { %12462 = vmatpush1.bf16.msra.mxu0 %v14584_v34  ;;  %12503 = vmatpush1.bf16.msra.mxu1 %v14712_v31  ;;  %v993_v24 = vld [vmem:[%s16943_s17 + $0x10f0] sm:$0xff] }
 0x4c3   : > { %12463 = vmatprep.subr.bf16.mxu0 %v14593_v25  ;;  %12504 = vmatprep.subr.bf16.mxu1 %v14721_v36  ;;  %v1117_v26 = vld [vmem:[%s16943_s17 + $0x14d0] sm:$0xff]  ;;  %v14753_v34 = vcombine.high %v989_v12, %v993_v24  ;;  %v14752_v38 = vcombine.low %v989_v12, %v993_v24 }
 0x4c4   : > { %v1121_v13 = vld [vmem:[%s16943_s17 + $0x14f0] sm:$0xff] }
 0x4c5   : > { %v14881_v31 = vcombine.high %v1117_v26, %v1121_v13  ;;  %v997_v25 = vld [vmem:[%s16943_s17 + $0x1110] sm:$0xff]  ;;  %v14880_v42 = vcombine.low %v1117_v26, %v1121_v13 }
 0x4c6   : > { %12464 = vmatpush1.bf16.msra.mxu0 %v14592_v43  ;;  %12505 = vmatpush1.bf16.msra.mxu1 %v14720_v44  ;;  %v1001_v36 = vld [vmem:[%s16943_s17 + $0x1130] sm:$0xff] }
 0x4c7   : > { %12515 = vmatprep.subr.bf16.mxu0 %v14729_v47  ;;  %12556 = vmatprep.subr.bf16.mxu1 %v14857_v48  ;;  %v1125_v23 = vld [vmem:[%s16943_s17 + $0x1510] sm:$0xff]  ;;  %v14761_v43 = vcombine.high %v997_v25, %v1001_v36  ;;  %v14760_v56 = vcombine.low %v997_v25, %v1001_v36 }
 0x4c8   : > { %v1129_v39 = vld [vmem:[%s16943_s17 + $0x1530] sm:$0xff] }
 0x4c9   : > { %12466 = vmatmul.mubr.bf16.vlgmr.msra.gmra.mrb[60].mxu0 %v17129_v37  ;;  %12507 = vmatmul.mubr.bf16.vlgmr.msra.gmra.mrb[60].mxu1 %v17134_v41  ;;  %v14889_v44 = vcombine.high %v1125_v23, %v1129_v39  ;;  %v1005_v47 = vld [vmem:[%s16943_s17 + $0x1150] sm:$0xff]  ;;  %v14888_v57 = vcombine.low %v1125_v23, %v1129_v39 }
 0x4ca   : > { %12516 = vmatpush1.bf16.msra.mxu0 %v14728_v62  ;;  %12557 = vmatpush1.bf16.msra.mxu1 %v14856_v1  ;;  %v1009_v48 = vld [vmem:[%s16943_s17 + $0x1170] sm:$0xff] }
 0x4cb   : > { %12517 = vmatprep.subr.bf16.mxu0 %v14737_v4  ;;  %12558 = vmatprep.subr.bf16.mxu1 %v14865_v5  ;;  %v1133_v53 = vld [vmem:[%s16943_s17 + $0x1550] sm:$0xff]  ;;  %v14769_v62 = vcombine.high %v1005_v47, %v1009_v48  ;;  %v14768_v9 = vcombine.low %v1005_v47, %v1009_v48 }
 0x4cc   : > { %12547 = vmatprep.mubr.bf16.mxu0 %v17139_v49  ;;  %12588 = vmatprep.mubr.bf16.mxu1 %v17144_v52  ;;  %v1137_v54 = vld [vmem:[%s16943_s17 + $0x1570] sm:$0xff] }
 0x4cd   : > { %v14897_v1 = vcombine.high %v1133_v53, %v1137_v54  ;;  %v1013_v4 = vld [vmem:[%s16943_s17 + $0x1190] sm:$0xff]  ;;  %v14896_v10 = vcombine.low %v1133_v53, %v1137_v54 }
 0x4ce   : > { %12518 = vmatpush1.bf16.msra.mxu0 %v14736_v16  ;;  %12559 = vmatpush1.bf16.msra.mxu1 %v14864_v18  ;;  %v1017_v5 = vld [vmem:[%s16943_s17 + $0x11b0] sm:$0xff] }
 0x4cf   : > { %12519 = vmatprep.subr.bf16.mxu0 %v14745_v20  ;;  %12560 = vmatprep.subr.bf16.mxu1 %v14873_v22  ;;  %v1141_v6 = vld [vmem:[%s16943_s17 + $0x1590] sm:$0xff]  ;;  %v14777_v16 = vcombine.high %v1013_v4, %v1017_v5  ;;  %v14776_v36 = vcombine.low %v1013_v4, %v1017_v5 }
 0x4d0   : > { %v1145_v8 = vld [vmem:[%s16943_s17 + $0x15b0] sm:$0xff] }
 0x4d1   : > { %v14905_v20 = vcombine.high %v1141_v6, %v1145_v8  ;;  %v1021_v22 = vld [vmem:[%s16943_s17 + $0x11d0] sm:$0xff] }
 0x4d2   : > { %12520 = vmatpush1.bf16.msra.mxu0 %v14744_v30  ;;  %12561 = vmatpush1.bf16.msra.mxu1 %v14872_v33  ;;  %v1025_v12 = vld [vmem:[%s16943_s17 + $0x11f0] sm:$0xff] }
 0x4d3   : > { %12521 = vmatprep.subr.bf16.mxu0 %v14753_v34  ;;  %12562 = vmatprep.subr.bf16.mxu1 %v14881_v31  ;;  %v1149_v30 = vld [vmem:[%s16943_s17 + $0x15d0] sm:$0xff] }
 0x4d4   : > { %v1153_v33 = vld [vmem:[%s16943_s17 + $0x15f0] sm:$0xff] }
 0x4d5   : > { %v1029_v47 = vld [vmem:[%s16943_s17 + $0x1210] sm:$0xff] }
 0x4d6   : > { %12522 = vmatpush1.bf16.msra.mxu0 %v14752_v38  ;;  %12563 = vmatpush1.bf16.msra.mxu1 %v14880_v42  ;;  %v14785_v42 = vcombine.high %v1021_v22, %v1025_v12  ;;  %v1033_v48 = vld [vmem:[%s16943_s17 + $0x1230] sm:$0xff] }
 0x4d7   : > { %12523 = vmatprep.subr.bf16.mxu0 %v14761_v43  ;;  %12564 = vmatprep.subr.bf16.mxu1 %v14889_v44  ;;  %v14913_v44 = vcombine.high %v1149_v30, %v1153_v33  ;;  %v1157_v53 = vld [vmem:[%s16943_s17 + $0x1610] sm:$0xff] }
 0x4d8   : > { %v1161_v54 = vld [vmem:[%s16943_s17 + $0x1630] sm:$0xff] }
 0x4d9   : > { %v1037_v4 = vld [vmem:[%s16943_s17 + $0x1250] sm:$0xff] }
 0x4da   : > { %12524 = vmatpush1.bf16.msra.mxu0 %v14760_v56  ;;  %12565 = vmatpush1.bf16.msra.mxu1 %v14888_v57  ;;  %v14784_v56 = vcombine.low %v1021_v22, %v1025_v12  ;;  %v14912_v57 = vcombine.low %v1149_v30, %v1153_v33  ;;  %v1041_v5 = vld [vmem:[%s16943_s17 + $0x1270] sm:$0xff] }
 0x4db   : > { %12525 = vmatprep.subr.bf16.mxu0 %v14769_v62  ;;  %12566 = vmatprep.subr.bf16.mxu1 %v14897_v1  ;;  %v14793_v62 = vcombine.high %v1029_v47, %v1033_v48  ;;  %v14921_v1 = vcombine.high %v1157_v53, %v1161_v54  ;;  %v1049_v22 = vld [vmem:[%s16943_s17 + $0x12b0] sm:$0xff] }
 0x4dc   : > { %v12221_v18 = vpop.f32.mrb[48].mxu0  ;;  %v12262_v26 = vpop.f32.mrb[48].mxu1  ;;  %v1173_v12 = vld [vmem:[%s16943_s17 + $0x1690] sm:$0xff] }
 0x4dd   : > { %v12222_v24 = vadd.f32 %v12221_v18, %v18167_v27  ;;  %v12223_v13 = vpop.f32.mrb[49].mxu0  ;;  %v12264_v31 = vpop.f32.mrb[49].mxu1  ;;  %v14904_v27 = vcombine.low %v1141_v6, %v1145_v8  ;;  %v1165_v6 = vld [vmem:[%s16943_s17 + $0x1650] sm:$0xff] }
 0x4de   : > { %v12224_v34 = vadd.f32 %v12223_v13, %v18169_v40  ;;  %v12225_v25 = vpop.f32.mrb[50].mxu0  ;;  %12526 = vmatpush1.bf16.msra.mxu0 %v14768_v9  ;;  %v12266_v39 = vpop.f32.mrb[50].mxu1  ;;  %12567 = vmatpush1.bf16.msra.mxu1 %v14896_v10  ;;  %v1169_v8 = vld [vmem:[%s16943_s17 + $0x1670] sm:$0xff]  ;;  %v14792_v9 = vcombine.low %v1029_v47, %v1033_v48  ;;  %v14920_v10 = vcombine.low %v1157_v53, %v1161_v54 }
 0x4df   : > { %v18241_v23 = vadd.f32 %v12262_v26, %v12222_v24  ;;  %v12226_v38 = vpop.f32.mrb[51].mxu0  ;;  %12527 = vmatprep.subr.bf16.mxu0 %v14777_v16  ;;  %v12267_v40 = vpop.f32.mrb[51].mxu1  ;;  %12568 = vmatprep.subr.bf16.mxu1 %v14905_v20  ;;  %v14801_v16 = vcombine.high %v1037_v4, %v1041_v5  ;;  %v14929_v18 = vcombine.high %v1165_v6, %v1169_v8  ;;  %v1045_v20 = vld [vmem:[%s16943_s17 + $0x1290] sm:$0xff] }
 0x4e0   : > { %v18243_v43 = vadd.f32 %v12264_v31, %v12224_v34  ;;  %v1177_v24 = vld [vmem:[%s16943_s17 + $0x16b0] sm:$0xff]  ;;  %v14800_v26 = vcombine.low %v1037_v4, %v1041_v5  ;;  %v14928_v13 = vcombine.low %v1165_v6, %v1169_v8  ;;  %v14809_v30 = vcombine.high %v1045_v20, %v1049_v22 }
 0x4e1   : > { %v14937_v33 = vcombine.high %v1173_v12, %v1177_v24  ;;  %v1053_v34 = vld [vmem:[%s16943_s17 + $0x12d0] sm:$0xff]  ;;  %v14808_v39 = vcombine.low %v1045_v20, %v1049_v22  ;;  %v14936_v38 = vcombine.low %v1173_v12, %v1177_v24 }
 0x4e2   : > { %12528 = vmatpush1.bf16.msra.mxu0 %v14776_v36  ;;  %12569 = vmatpush1.bf16.msra.mxu1 %v14904_v27  ;;  %v1057_v31 = vld [vmem:[%s16943_s17 + $0x12f0] sm:$0xff] }
 0x4e3   : > { %12529 = vmatprep.subr.bf16.mxu0 %v14785_v42  ;;  %12570 = vmatprep.subr.bf16.mxu1 %v14913_v44  ;;  %v1181_v25 = vld [vmem:[%s16943_s17 + $0x16d0] sm:$0xff]  ;;  %v14817_v27 = vcombine.high %v1053_v34, %v1057_v31  ;;  %v14816_v53 = vcombine.low %v1053_v34, %v1057_v31 }
 0x4e4   : > { %v1185_v36 = vld [vmem:[%s16943_s17 + $0x16f0] sm:$0xff] }
 0x4e5   : > { %v14945_v42 = vcombine.high %v1181_v25, %v1185_v36  ;;  %v1061_v40 = vld [vmem:[%s16943_s17 + $0x1310] sm:$0xff]  ;;  %v14944_v54 = vcombine.low %v1181_v25, %v1185_v36 }
 0x4e6   : > { %12530 = vmatpush1.bf16.msra.mxu0 %v14784_v56  ;;  %12571 = vmatpush1.bf16.msra.mxu1 %v14912_v57  ;;  %v1065_v44 = vld [vmem:[%s16943_s17 + $0x1330] sm:$0xff] }
 0x4e7   : > { %12531 = vmatprep.subr.bf16.mxu0 %v14793_v62  ;;  %12572 = vmatprep.subr.bf16.mxu1 %v14921_v1  ;;  %v1189_v47 = vld [vmem:[%s16943_s17 + $0x1710] sm:$0xff]  ;;  %v14825_v56 = vcombine.high %v1061_v40, %v1065_v44  ;;  %v14824_v6 = vcombine.low %v1061_v40, %v1065_v44 }
 0x4e8   : > { %v1193_v48 = vld [vmem:[%s16943_s17 + $0x1730] sm:$0xff] }
 0x4e9   : > { %v14953_v57 = vcombine.high %v1189_v47, %v1193_v48  ;;  %v1069_v62 = vld [vmem:[%s16943_s17 + $0x1350] sm:$0xff]  ;;  %v14952_v8 = vcombine.low %v1189_v47, %v1193_v48 }
 0x4ea   : > { %12532 = vmatpush1.bf16.msra.mxu0 %v14792_v9  ;;  %12573 = vmatpush1.bf16.msra.mxu1 %v14920_v10  ;;  %v1073_v1 = vld [vmem:[%s16943_s17 + $0x1370] sm:$0xff] }
 0x4eb   : > { %12533 = vmatprep.subr.bf16.mxu0 %v14801_v16  ;;  %12574 = vmatprep.subr.bf16.mxu1 %v14929_v18  ;;  %v1197_v4 = vld [vmem:[%s16943_s17 + $0x1750] sm:$0xff]  ;;  %v14833_v9 = vcombine.high %v1069_v62, %v1073_v1  ;;  %v14832_v12 = vcombine.low %v1069_v62, %v1073_v1 }
 0x4ec   : > { %v1201_v5 = vld [vmem:[%s16943_s17 + $0x1770] sm:$0xff] }
 0x4ed   : > { %v14961_v10 = vcombine.high %v1197_v4, %v1201_v5  ;;  %v1077_v16 = vld [vmem:[%s16943_s17 + $0x1390] sm:$0xff]  ;;  %v14960_v24 = vcombine.low %v1197_v4, %v1201_v5 }
 0x4ee   : > { %12534 = vmatpush1.bf16.msra.mxu0 %v14800_v26  ;;  %12575 = vmatpush1.bf16.msra.mxu1 %v14928_v13  ;;  %v1081_v18 = vld [vmem:[%s16943_s17 + $0x13b0] sm:$0xff] }
 0x4ef   : > { %12535 = vmatprep.subr.bf16.mxu0 %v14809_v30  ;;  %12576 = vmatprep.subr.bf16.mxu1 %v14937_v33  ;;  %v1205_v20 = vld [vmem:[%s16943_s17 + $0x1790] sm:$0xff]  ;;  %v14841_v26 = vcombine.high %v1077_v16, %v1081_v18  ;;  %v14840_v25 = vcombine.low %v1077_v16, %v1081_v18 }
 0x4f0   : > { %v1209_v22 = vld [vmem:[%s16943_s17 + $0x17b0] sm:$0xff] }
 0x4f1   : > { %v14969_v13 = vcombine.high %v1205_v20, %v1209_v22  ;;  %v1085_v30 = vld [vmem:[%s16943_s17 + $0x13d0] sm:$0xff]  ;;  %v14968_v36 = vcombine.low %v1205_v20, %v1209_v22 }
 0x4f2   : > { %12536 = vmatpush1.bf16.msra.mxu0 %v14808_v39  ;;  %12577 = vmatpush1.bf16.msra.mxu1 %v14936_v38  ;;  %v1089_v33 = vld [vmem:[%s16943_s17 + $0x13f0] sm:$0xff] }
 0x4f3   : > { %12537 = vmatprep.subr.bf16.mxu0 %v14817_v27  ;;  %12578 = vmatprep.subr.bf16.mxu1 %v14945_v42  ;;  %v1213_v34 = vld [vmem:[%s16943_s17 + $0x17d0] sm:$0xff]  ;;  %v14849_v39 = vcombine.high %v1085_v30, %v1089_v33  ;;  %v14848_v47 = vcombine.low %v1085_v30, %v1089_v33 }
 0x4f4   : > { %v1217_v31 = vld [vmem:[%s16943_s17 + $0x17f0] sm:$0xff] }
 0x4f5   : > { %v14977_v38 = vcombine.high %v1213_v34, %v1217_v31  ;;  %v1221_v27 = vld [vmem:[%s16943_s17 + $0x1810] sm:$0xff]  ;;  %v14976_v48 = vcombine.low %v1213_v34, %v1217_v31 }
 0x4f6   : > { %12538 = vmatpush1.bf16.msra.mxu0 %v14816_v53  ;;  %12579 = vmatpush1.bf16.msra.mxu1 %v14944_v54  ;;  %v1225_v42 = vld [vmem:[%s16943_s17 + $0x1830] sm:$0xff] }
 0x4f7   : > { %12539 = vmatprep.subr.bf16.mxu0 %v14825_v56  ;;  %12580 = vmatprep.subr.bf16.mxu1 %v14953_v57  ;;  %v1349_v40 = vld [vmem:[%s16943_s17 + $0x1c10] sm:$0xff]  ;;  %v14985_v53 = vcombine.high %v1221_v27, %v1225_v42  ;;  %v14984_v4 = vcombine.low %v1221_v27, %v1225_v42 }
 0x4f8   : > { %v1353_v44 = vld [vmem:[%s16943_s17 + $0x1c30] sm:$0xff] }
 0x4f9   : > { %v15113_v54 = vcombine.high %v1349_v40, %v1353_v44  ;;  %v1229_v56 = vld [vmem:[%s16943_s17 + $0x1850] sm:$0xff]  ;;  %v15112_v5 = vcombine.low %v1349_v40, %v1353_v44 }
 0x4fa   : > { %12540 = vmatpush1.bf16.msra.mxu0 %v14824_v6  ;;  %12581 = vmatpush1.bf16.msra.mxu1 %v14952_v8  ;;  %v1233_v57 = vld [vmem:[%s16943_s17 + $0x1870] sm:$0xff] }
 0x4fb   : > { %12541 = vmatprep.subr.bf16.mxu0 %v14833_v9  ;;  %12582 = vmatprep.subr.bf16.mxu1 %v14961_v10  ;;  %v1357_v62 = vld [vmem:[%s16943_s17 + $0x1c50] sm:$0xff]  ;;  %v14993_v6 = vcombine.high %v1229_v56, %v1233_v57  ;;  %v14992_v20 = vcombine.low %v1229_v56, %v1233_v57 }
 0x4fc   : > { %v1361_v1 = vld [vmem:[%s16943_s17 + $0x1c70] sm:$0xff] }
 0x4fd   : > { %v15121_v8 = vcombine.high %v1357_v62, %v1361_v1  ;;  %v1237_v9 = vld [vmem:[%s16943_s17 + $0x1890] sm:$0xff]  ;;  %v15120_v22 = vcombine.low %v1357_v62, %v1361_v1 }
 0x4fe   : > { %12542 = vmatpush1.bf16.msra.mxu0 %v14832_v12  ;;  %12583 = vmatpush1.bf16.msra.mxu1 %v14960_v24  ;;  %v1241_v10 = vld [vmem:[%s16943_s17 + $0x18b0] sm:$0xff] }
 0x4ff   : > { %12543 = vmatprep.subr.bf16.mxu0 %v14841_v26  ;;  %12584 = vmatprep.subr.bf16.mxu1 %v14969_v13  ;;  %v1365_v16 = vld [vmem:[%s16943_s17 + $0x1c90] sm:$0xff]  ;;  %v15001_v12 = vcombine.high %v1237_v9, %v1241_v10  ;;  %v15000_v34 = vcombine.low %v1237_v9, %v1241_v10 }
 0x500   : > { %v1369_v18 = vld [vmem:[%s16943_s17 + $0x1cb0] sm:$0xff] }
 0x501   : > { %v15129_v24 = vcombine.high %v1365_v16, %v1369_v18  ;;  %v1245_v26 = vld [vmem:[%s16943_s17 + $0x18d0] sm:$0xff]  ;;  %v15128_v31 = vcombine.low %v1365_v16, %v1369_v18 }
 0x502   : > { %12544 = vmatpush1.bf16.msra.mxu0 %v14840_v25  ;;  %12585 = vmatpush1.bf16.msra.mxu1 %v14968_v36  ;;  %v1249_v13 = vld [vmem:[%s16943_s17 + $0x18f0] sm:$0xff] }
 0x503   : > { %12545 = vmatprep.subr.bf16.mxu0 %v14849_v39  ;;  %12586 = vmatprep.subr.bf16.mxu1 %v14977_v38  ;;  %v1373_v30 = vld [vmem:[%s16943_s17 + $0x1cd0] sm:$0xff]  ;;  %v15009_v25 = vcombine.high %v1245_v26, %v1249_v13  ;;  %v15008_v40 = vcombine.low %v1245_v26, %v1249_v13 }
 0x504   : > { %v1377_v33 = vld [vmem:[%s16943_s17 + $0x1cf0] sm:$0xff] }
 0x505   : > { %v15137_v36 = vcombine.high %v1373_v30, %v1377_v33  ;;  %v1253_v39 = vld [vmem:[%s16943_s17 + $0x1910] sm:$0xff]  ;;  %v15136_v44 = vcombine.low %v1373_v30, %v1377_v33 }
 0x506   : > { %12546 = vmatpush1.bf16.msra.mxu0 %v14848_v47  ;;  %12587 = vmatpush1.bf16.msra.mxu1 %v14976_v48  ;;  %v1257_v38 = vld [vmem:[%s16943_s17 + $0x1930] sm:$0xff] }
 0x507   : > { %12597 = vmatprep.subr.bf16.mxu0 %v14985_v53  ;;  %12638 = vmatprep.subr.bf16.mxu1 %v15113_v54  ;;  %v1381_v27 = vld [vmem:[%s16943_s17 + $0x1d10] sm:$0xff]  ;;  %v15017_v47 = vcombine.high %v1253_v39, %v1257_v38  ;;  %v15016_v62 = vcombine.low %v1253_v39, %v1257_v38 }
 0x508   : > { %v1385_v42 = vld [vmem:[%s16943_s17 + $0x1d30] sm:$0xff] }
 0x509   : > { %12548 = vmatmul.mubr.bf16.vlgmr.msra.gmra.mrb[64].mxu0 %v17209_v3  ;;  %12589 = vmatmul.mubr.bf16.vlgmr.msra.gmra.mrb[64].mxu1 %v17214_v7  ;;  %v15145_v48 = vcombine.high %v1381_v27, %v1385_v42  ;;  %v1261_v53 = vld [vmem:[%s16943_s17 + $0x1950] sm:$0xff]  ;;  %v15144_v1 = vcombine.low %v1381_v27, %v1385_v42 }
 0x50a   : > { %12598 = vmatpush1.bf16.msra.mxu0 %v14984_v4  ;;  %12639 = vmatpush1.bf16.msra.mxu1 %v15112_v5  ;;  %v1265_v54 = vld [vmem:[%s16943_s17 + $0x1970] sm:$0xff] }
 0x50b   : > { %12599 = vmatprep.subr.bf16.mxu0 %v14993_v6  ;;  %12640 = vmatprep.subr.bf16.mxu1 %v15121_v8  ;;  %v1389_v56 = vld [vmem:[%s16943_s17 + $0x1d50] sm:$0xff]  ;;  %v15025_v4 = vcombine.high %v1261_v53, %v1265_v54  ;;  %v15024_v16 = vcombine.low %v1261_v53, %v1265_v54 }
 0x50c   : > { %12629 = vmatprep.mubr.bf16.mxu0 %v17219_v15  ;;  %12670 = vmatprep.mubr.bf16.mxu1 %v17224_v19  ;;  %v1393_v57 = vld [vmem:[%s16943_s17 + $0x1d70] sm:$0xff] }
 0x50d   : > { %v15153_v5 = vcombine.high %v1389_v56, %v1393_v57  ;;  %v1269_v6 = vld [vmem:[%s16943_s17 + $0x1990] sm:$0xff]  ;;  %v15152_v18 = vcombine.low %v1389_v56, %v1393_v57 }
 0x50e   : > { %12600 = vmatpush1.bf16.msra.mxu0 %v14992_v20  ;;  %12641 = vmatpush1.bf16.msra.mxu1 %v15120_v22  ;;  %v1273_v8 = vld [vmem:[%s16943_s17 + $0x19b0] sm:$0xff] }
 0x50f   : > { %12601 = vmatprep.subr.bf16.mxu0 %v15001_v12  ;;  %12642 = vmatprep.subr.bf16.mxu1 %v15129_v24  ;;  %v1397_v9 = vld [vmem:[%s16943_s17 + $0x1d90] sm:$0xff]  ;;  %v15033_v20 = vcombine.high %v1269_v6, %v1273_v8  ;;  %v15032_v27 = vcombine.low %v1269_v6, %v1273_v8 }
 0x510   : > { %v1401_v10 = vld [vmem:[%s16943_s17 + $0x1db0] sm:$0xff] }
 0x511   : > { %v15161_v12 = vcombine.high %v1397_v9, %v1401_v10  ;;  %v1277_v24 = vld [vmem:[%s16943_s17 + $0x19d0] sm:$0xff] }
 0x512   : > { %12602 = vmatpush1.bf16.msra.mxu0 %v15000_v34  ;;  %12643 = vmatpush1.bf16.msra.mxu1 %v15128_v31  ;;  %v1281_v26 = vld [vmem:[%s16943_s17 + $0x19f0] sm:$0xff] }
 0x513   : > { %12603 = vmatprep.subr.bf16.mxu0 %v15009_v25  ;;  %12644 = vmatprep.subr.bf16.mxu1 %v15137_v36  ;;  %v1405_v34 = vld [vmem:[%s16943_s17 + $0x1dd0] sm:$0xff]  ;;  %v15040_v6 = vcombine.low %v1277_v24, %v1281_v26 }
 0x514   : > { %v1409_v31 = vld [vmem:[%s16943_s17 + $0x1df0] sm:$0xff] }
 0x515   : > { %v389_v25 = vld [vmem:[#allocation2 + $0x10] sm:$0xff]  ;;  %v15168_v8 = vcombine.low %v1405_v34, %v1409_v31 }
 0x516   : > { %12604 = vmatpush1.bf16.msra.mxu0 %v15008_v40  ;;  %12645 = vmatpush1.bf16.msra.mxu1 %v15136_v44  ;;  %v390_v40 = vld [vmem:[#allocation2 + $0x18] sm:$0xff]  ;;  %v1285_v56 = vld [vmem:[%s16943_s17 + $0x1a10] sm:$0xff] }
 0x517   : > { %12605 = vmatprep.subr.bf16.mxu0 %v15017_v47  ;;  %12646 = vmatprep.subr.bf16.mxu1 %v15145_v48  ;;  %v15160_v47 = vcombine.low %v1397_v9, %v1401_v10  ;;  %v15041_v48 = vcombine.high %v1277_v24, %v1281_v26  ;;  %v1289_v57 = vld [vmem:[%s16943_s17 + $0x1a30] sm:$0xff] }
 0x518   : > { %v15049_v9 = vcombine.high %v1285_v56, %v1289_v57 }
 0x51a   : > { %12606 = vmatpush1.bf16.msra.mxu0 %v15016_v62  ;;  %12647 = vmatpush1.bf16.msra.mxu1 %v15144_v1  ;;  %v1413_v1 = vld [vmem:[%s16943_s17 + $0x1e10] sm:$0xff] }
 0x51b   : > { %12607 = vmatprep.subr.bf16.mxu0 %v15025_v4  ;;  %12648 = vmatprep.subr.bf16.mxu1 %v15153_v5  ;;  %v1417_v4 = vld [vmem:[%s16943_s17 + $0x1e30] sm:$0xff] }
 0x51c   : > { %v12303_v22 = vpop.f32.mrb[52].mxu0  ;;  %v12344_v30 = vpop.f32.mrb[52].mxu1  ;;  %v15177_v10 = vcombine.high %v1413_v1, %v1417_v4  ;;  %v15176_v24 = vcombine.low %v1413_v1, %v1417_v4 }
 0x51d   : > { %v12304_v13 = vadd.f32 %v12303_v22, %v18241_v23  ;;  %v12305_v33 = vpop.f32.mrb[53].mxu0  ;;  %v12346_v39 = vpop.f32.mrb[53].mxu1  ;;  %v1425_v22 = vld [vmem:[%s16943_s17 + $0x1e70] sm:$0xff] }
 0x51e   : > { %v12306_v36 = vadd.f32 %v12305_v33, %v18243_v43  ;;  %v12307_v38 = vpop.f32.mrb[54].mxu0  ;;  %12608 = vmatpush1.bf16.msra.mxu0 %v15024_v16  ;;  %v12348_v44 = vpop.f32.mrb[54].mxu1  ;;  %12649 = vmatpush1.bf16.msra.mxu1 %v15152_v18  ;;  %v15169_v43 = vcombine.high %v1405_v34, %v1409_v31  ;;  %v1293_v16 = vld [vmem:[%s16943_s17 + $0x1a50] sm:$0xff] }
 0x51f   : > { %v12345_v42 = vadd.f32 %v12344_v30, %v12304_v13  ;;  %v12308_v23 = vpop.f32.mrb[55].mxu0  ;;  %12609 = vmatprep.subr.bf16.mxu0 %v15033_v20  ;;  %v12349_v54 = vpop.f32.mrb[55].mxu1  ;;  %12650 = vmatprep.subr.bf16.mxu1 %v15161_v12  ;;  %v1297_v18 = vld [vmem:[%s16943_s17 + $0x1a70] sm:$0xff]  ;;  %v15048_v12 = vcombine.low %v1285_v56, %v1289_v57 }
 0x520   : > { %v12347_v53 = vadd.f32 %v12346_v39, %v12306_v36  ;;  %v1421_v20 = vld [vmem:[%s16943_s17 + $0x1e50] sm:$0xff]  ;;  %v15057_v26 = vcombine.high %v1293_v16, %v1297_v18 }
 0x521   : > { %v13501_v62 = vadd.f32 %v12345_v42, %v389_v25  ;;  %v15185_v13 = vcombine.high %v1421_v20, %v1425_v22  ;;  %v1301_v30 = vld [vmem:[%s16943_s17 + $0x1a90] sm:$0xff]  ;;  %v15056_v25 = vcombine.low %v1293_v16, %v1297_v18  ;;  %v15184_v36 = vcombine.low %v1421_v20, %v1425_v22 }
 0x522   : > { %v13502_v5 = vadd.f32 %v12347_v53, %v390_v40  ;;  %12610 = vmatpush1.bf16.msra.mxu0 %v15032_v27  ;;  %12651 = vmatpush1.bf16.msra.mxu1 %v15160_v47  ;;  %v1305_v33 = vld [vmem:[%s16943_s17 + $0x1ab0] sm:$0xff] }
 0x523   : > { %13509 = vst [vmem:[#allocation2 + $0x10] sm:$0xff] %v13501_v62  ;;  %12611 = vmatprep.subr.bf16.mxu0 %v15041_v48  ;;  %12652 = vmatprep.subr.bf16.mxu1 %v15169_v43  ;;  %v1429_v34 = vld [vmem:[%s16943_s17 + $0x1e90] sm:$0xff]  ;;  %v15065_v39 = vcombine.high %v1301_v30, %v1305_v33  ;;  %v15064_v23 = vcombine.low %v1301_v30, %v1305_v33 }
 0x524   : > { %13510 = vst [vmem:[#allocation2 + $0x18] sm:$0xff] %v13502_v5  ;;  %v1433_v31 = vld [vmem:[%s16943_s17 + $0x1eb0] sm:$0xff] }
 0x525   : > { %v15193_v38 = vcombine.high %v1429_v34, %v1433_v31  ;;  %v1309_v27 = vld [vmem:[%s16943_s17 + $0x1ad0] sm:$0xff]  ;;  %v15192_v47 = vcombine.low %v1429_v34, %v1433_v31 }
 0x526   : > { %12612 = vmatpush1.bf16.msra.mxu0 %v15040_v6  ;;  %12653 = vmatpush1.bf16.msra.mxu1 %v15168_v8  ;;  %v1313_v42 = vld [vmem:[%s16943_s17 + $0x1af0] sm:$0xff] }
 0x527   : > { %12613 = vmatprep.subr.bf16.mxu0 %v15049_v9  ;;  %12654 = vmatprep.subr.bf16.mxu1 %v15177_v10  ;;  %v1437_v40 = vld [vmem:[%s16943_s17 + $0x1ed0] sm:$0xff]  ;;  %v15073_v48 = vcombine.high %v1309_v27, %v1313_v42  ;;  %v15072_v62 = vcombine.low %v1309_v27, %v1313_v42 }
 0x528   : > { %v1441_v44 = vld [vmem:[%s16943_s17 + $0x1ef0] sm:$0xff] }
 0x529   : > { %v15201_v53 = vcombine.high %v1437_v40, %v1441_v44  ;;  %v1317_v54 = vld [vmem:[%s16943_s17 + $0x1b10] sm:$0xff]  ;;  %v15200_v1 = vcombine.low %v1437_v40, %v1441_v44 }
 0x52a   : > { %12614 = vmatpush1.bf16.msra.mxu0 %v15048_v12  ;;  %12655 = vmatpush1.bf16.msra.mxu1 %v15176_v24  ;;  %v1321_v43 = vld [vmem:[%s16943_s17 + $0x1b30] sm:$0xff] }
 0x52b   : > { %12615 = vmatprep.subr.bf16.mxu0 %v15057_v26  ;;  %12656 = vmatprep.subr.bf16.mxu1 %v15185_v13  ;;  %v1445_v56 = vld [vmem:[%s16943_s17 + $0x1f10] sm:$0xff]  ;;  %v15081_v4 = vcombine.high %v1317_v54, %v1321_v43  ;;  %v15080_v16 = vcombine.low %v1317_v54, %v1321_v43 }
 0x52c   : > { %v1449_v57 = vld [vmem:[%s16943_s17 + $0x1f30] sm:$0xff] }
 0x52d   : > { %v15209_v5 = vcombine.high %v1445_v56, %v1449_v57  ;;  %v1325_v6 = vld [vmem:[%s16943_s17 + $0x1b50] sm:$0xff]  ;;  %v15208_v18 = vcombine.low %v1445_v56, %v1449_v57 }
 0x52e   : > { %12616 = vmatpush1.bf16.msra.mxu0 %v15056_v25  ;;  %12657 = vmatpush1.bf16.msra.mxu1 %v15184_v36  ;;  %v1329_v8 = vld [vmem:[%s16943_s17 + $0x1b70] sm:$0xff] }
 0x52f   : > { %12617 = vmatprep.subr.bf16.mxu0 %v15065_v39  ;;  %12658 = vmatprep.subr.bf16.mxu1 %v15193_v38  ;;  %v1453_v9 = vld [vmem:[%s16943_s17 + $0x1f50] sm:$0xff]  ;;  %v15089_v20 = vcombine.high %v1325_v6, %v1329_v8  ;;  %v15088_v30 = vcombine.low %v1325_v6, %v1329_v8 }
 0x530   : > { %v1457_v10 = vld [vmem:[%s16943_s17 + $0x1f70] sm:$0xff] }
 0x531   : > { %v15217_v22 = vcombine.high %v1453_v9, %v1457_v10  ;;  %v1333_v12 = vld [vmem:[%s16943_s17 + $0x1b90] sm:$0xff]  ;;  %v15216_v33 = vcombine.low %v1453_v9, %v1457_v10 }
 0x532   : > { %12618 = vmatpush1.bf16.msra.mxu0 %v15064_v23  ;;  %12659 = vmatpush1.bf16.msra.mxu1 %v15192_v47  ;;  %v1337_v24 = vld [vmem:[%s16943_s17 + $0x1bb0] sm:$0xff] }
 0x533   : > { %12619 = vmatprep.subr.bf16.mxu0 %v15073_v48  ;;  %12660 = vmatprep.subr.bf16.mxu1 %v15201_v53  ;;  %v1461_v26 = vld [vmem:[%s16943_s17 + $0x1f90] sm:$0xff]  ;;  %v15097_v34 = vcombine.high %v1333_v12, %v1337_v24  ;;  %v15096_v27 = vcombine.low %v1333_v12, %v1337_v24 }
 0x534   : > { %v1465_v13 = vld [vmem:[%s16943_s17 + $0x1fb0] sm:$0xff] }
 0x535   : > { %v15225_v31 = vcombine.high %v1461_v26, %v1465_v13  ;;  %v1341_v25 = vld [vmem:[%s16943_s17 + $0x1bd0] sm:$0xff]  ;;  %v15224_v42 = vcombine.low %v1461_v26, %v1465_v13 }
 0x536   : > { %12620 = vmatpush1.bf16.msra.mxu0 %v15072_v62  ;;  %12661 = vmatpush1.bf16.msra.mxu1 %v15200_v1  ;;  %v1345_v36 = vld [vmem:[%s16943_s17 + $0x1bf0] sm:$0xff] }
 0x537   : > { %12621 = vmatprep.subr.bf16.mxu0 %v15081_v4  ;;  %12662 = vmatprep.subr.bf16.mxu1 %v15209_v5  ;;  %v1469_v39 = vld [vmem:[%s16943_s17 + $0x1fd0] sm:$0xff]  ;;  %v15105_v40 = vcombine.high %v1341_v25, %v1345_v36  ;;  %v15104_v54 = vcombine.low %v1341_v25, %v1345_v36 }
 0x538   : > { %v1473_v38 = vld [vmem:[%s16943_s17 + $0x1ff0] sm:$0xff] }
 0x539   : > { %v15233_v44 = vcombine.high %v1469_v39, %v1473_v38  ;;  %v1477_v23 = vld [vmem:[%s16943_s17 + $0x2010] sm:$0xff]  ;;  %v15232_v43 = vcombine.low %v1469_v39, %v1473_v38 }
 0x53a   : > { %12622 = vmatpush1.bf16.msra.mxu0 %v15080_v16  ;;  %12663 = vmatpush1.bf16.msra.mxu1 %v15208_v18  ;;  %v1481_v47 = vld [vmem:[%s16943_s17 + $0x2030] sm:$0xff] }
 0x53b   : > { %12623 = vmatprep.subr.bf16.mxu0 %v15089_v20  ;;  %12664 = vmatprep.subr.bf16.mxu1 %v15217_v22  ;;  %v1605_v48 = vld [vmem:[%s16943_s17 + $0x2410] sm:$0xff]  ;;  %v15241_v56 = vcombine.high %v1477_v23, %v1481_v47  ;;  %v15240_v6 = vcombine.low %v1477_v23, %v1481_v47 }
 0x53c   : > { %v1609_v53 = vld [vmem:[%s16943_s17 + $0x2430] sm:$0xff] }
 0x53d   : > { %v15369_v57 = vcombine.high %v1605_v48, %v1609_v53  ;;  %v1485_v62 = vld [vmem:[%s16943_s17 + $0x2050] sm:$0xff]  ;;  %v15368_v8 = vcombine.low %v1605_v48, %v1609_v53 }
 0x53e   : > { %12624 = vmatpush1.bf16.msra.mxu0 %v15088_v30  ;;  %12665 = vmatpush1.bf16.msra.mxu1 %v15216_v33  ;;  %v1489_v1 = vld [vmem:[%s16943_s17 + $0x2070] sm:$0xff] }
 0x53f   : > { %12625 = vmatprep.subr.bf16.mxu0 %v15097_v34  ;;  %12666 = vmatprep.subr.bf16.mxu1 %v15225_v31  ;;  %v1613_v4 = vld [vmem:[%s16943_s17 + $0x2450] sm:$0xff]  ;;  %v15249_v9 = vcombine.high %v1485_v62, %v1489_v1  ;;  %v15248_v12 = vcombine.low %v1485_v62, %v1489_v1 }
 0x540   : > { %v1617_v5 = vld [vmem:[%s16943_s17 + $0x2470] sm:$0xff] }
 0x541   : > { %v15377_v10 = vcombine.high %v1613_v4, %v1617_v5  ;;  %v1493_v16 = vld [vmem:[%s16943_s17 + $0x2090] sm:$0xff]  ;;  %v15376_v24 = vcombine.low %v1613_v4, %v1617_v5 }
 0x542   : > { %12626 = vmatpush1.bf16.msra.mxu0 %v15096_v27  ;;  %12667 = vmatpush1.bf16.msra.mxu1 %v15224_v42  ;;  %v1497_v18 = vld [vmem:[%s16943_s17 + $0x20b0] sm:$0xff] }
 0x543   : > { %12627 = vmatprep.subr.bf16.mxu0 %v15105_v40  ;;  %12668 = vmatprep.subr.bf16.mxu1 %v15233_v44  ;;  %v1621_v20 = vld [vmem:[%s16943_s17 + $0x2490] sm:$0xff]  ;;  %v15257_v26 = vcombine.high %v1493_v16, %v1497_v18  ;;  %v15256_v25 = vcombine.low %v1493_v16, %v1497_v18 }
 0x544   : > { %v1625_v22 = vld [vmem:[%s16943_s17 + $0x24b0] sm:$0xff] }
 0x545   : > { %v15385_v13 = vcombine.high %v1621_v20, %v1625_v22  ;;  %v1501_v30 = vld [vmem:[%s16943_s17 + $0x20d0] sm:$0xff]  ;;  %v15384_v36 = vcombine.low %v1621_v20, %v1625_v22 }
 0x546   : > { %12628 = vmatpush1.bf16.msra.mxu0 %v15104_v54  ;;  %12669 = vmatpush1.bf16.msra.mxu1 %v15232_v43  ;;  %v1505_v33 = vld [vmem:[%s16943_s17 + $0x20f0] sm:$0xff] }
 0x547   : > { %12679 = vmatprep.subr.bf16.mxu0 %v15241_v56  ;;  %12720 = vmatprep.subr.bf16.mxu1 %v15369_v57  ;;  %v1629_v34 = vld [vmem:[%s16943_s17 + $0x24d0] sm:$0xff]  ;;  %v15265_v39 = vcombine.high %v1501_v30, %v1505_v33  ;;  %v15264_v23 = vcombine.low %v1501_v30, %v1505_v33 }
 0x548   : > { %v1633_v31 = vld [vmem:[%s16943_s17 + $0x24f0] sm:$0xff] }
 0x549   : > { %12630 = vmatmul.mubr.bf16.vlgmr.msra.gmra.mrb[68].mxu0 %v17289_v45  ;;  %12671 = vmatmul.mubr.bf16.vlgmr.msra.gmra.mrb[68].mxu1 %v17294_v50  ;;  %v15393_v38 = vcombine.high %v1629_v34, %v1633_v31  ;;  %v1509_v27 = vld [vmem:[%s16943_s17 + $0x2110] sm:$0xff]  ;;  %v15392_v47 = vcombine.low %v1629_v34, %v1633_v31 }
 0x54a   : > { %12680 = vmatpush1.bf16.msra.mxu0 %v15240_v6  ;;  %12721 = vmatpush1.bf16.msra.mxu1 %v15368_v8  ;;  %v1513_v42 = vld [vmem:[%s16943_s17 + $0x2130] sm:$0xff] }
 0x54b   : > { %12681 = vmatprep.subr.bf16.mxu0 %v15249_v9  ;;  %12722 = vmatprep.subr.bf16.mxu1 %v15377_v10  ;;  %v1637_v40 = vld [vmem:[%s16943_s17 + $0x2510] sm:$0xff]  ;;  %v15273_v48 = vcombine.high %v1509_v27, %v1513_v42  ;;  %v15272_v62 = vcombine.low %v1509_v27, %v1513_v42 }
 0x54c   : > { %12711 = vmatprep.mubr.bf16.mxu0 %v17299_v61  ;;  %12752 = vmatprep.mubr.bf16.mxu1 %v17304_v0  ;;  %v1641_v44 = vld [vmem:[%s16943_s17 + $0x2530] sm:$0xff] }
 0x54d   : > { %v15401_v53 = vcombine.high %v1637_v40, %v1641_v44  ;;  %v1517_v54 = vld [vmem:[%s16943_s17 + $0x2150] sm:$0xff]  ;;  %v15400_v1 = vcombine.low %v1637_v40, %v1641_v44 }
 0x54e   : > { %12682 = vmatpush1.bf16.msra.mxu0 %v15248_v12  ;;  %12723 = vmatpush1.bf16.msra.mxu1 %v15376_v24  ;;  %v1521_v43 = vld [vmem:[%s16943_s17 + $0x2170] sm:$0xff] }
 0x54f   : > { %12683 = vmatprep.subr.bf16.mxu0 %v15257_v26  ;;  %12724 = vmatprep.subr.bf16.mxu1 %v15385_v13  ;;  %v1645_v56 = vld [vmem:[%s16943_s17 + $0x2550] sm:$0xff]  ;;  %v15281_v4 = vcombine.high %v1517_v54, %v1521_v43  ;;  %v15280_v16 = vcombine.low %v1517_v54, %v1521_v43 }
 0x550   : > { %v1649_v57 = vld [vmem:[%s16943_s17 + $0x2570] sm:$0xff] }
 0x551   : > { %v15409_v5 = vcombine.high %v1645_v56, %v1649_v57  ;;  %v1525_v6 = vld [vmem:[%s16943_s17 + $0x2190] sm:$0xff]  ;;  %v15408_v18 = vcombine.low %v1645_v56, %v1649_v57 }
 0x552   : > { %12684 = vmatpush1.bf16.msra.mxu0 %v15256_v25  ;;  %12725 = vmatpush1.bf16.msra.mxu1 %v15384_v36  ;;  %v1529_v8 = vld [vmem:[%s16943_s17 + $0x21b0] sm:$0xff] }
 0x553   : > { %12685 = vmatprep.subr.bf16.mxu0 %v15265_v39  ;;  %12726 = vmatprep.subr.bf16.mxu1 %v15393_v38  ;;  %v1653_v9 = vld [vmem:[%s16943_s17 + $0x2590] sm:$0xff]  ;;  %v15289_v20 = vcombine.high %v1525_v6, %v1529_v8  ;;  %v15288_v39 = vcombine.low %v1525_v6, %v1529_v8 }
 0x554   : > { %v1657_v10 = vld [vmem:[%s16943_s17 + $0x25b0] sm:$0xff] }
 0x555   : > { %v15417_v12 = vcombine.high %v1653_v9, %v1657_v10  ;;  %v1533_v24 = vld [vmem:[%s16943_s17 + $0x21d0] sm:$0xff]  ;;  %v15416_v40 = vcombine.low %v1653_v9, %v1657_v10 }
 0x556   : > { %12686 = vmatpush1.bf16.msra.mxu0 %v15264_v23  ;;  %12727 = vmatpush1.bf16.msra.mxu1 %v15392_v47  ;;  %v1537_v26 = vld [vmem:[%s16943_s17 + $0x21f0] sm:$0xff] }
 0x557   : > { %12687 = vmatprep.subr.bf16.mxu0 %v15273_v48  ;;  %12728 = vmatprep.subr.bf16.mxu1 %v15401_v53  ;;  %v1661_v33 = vld [vmem:[%s16943_s17 + $0x25d0] sm:$0xff]  ;;  %v15297_v44 = vcombine.high %v1533_v24, %v1537_v26  ;;  %v15296_v56 = vcombine.low %v1533_v24, %v1537_v26 }
 0x558   : > { %v1665_v34 = vld [vmem:[%s16943_s17 + $0x25f0] sm:$0xff] }
 0x559   : > { %v15425_v47 = vcombine.high %v1661_v33, %v1665_v34  ;;  %v1541_v48 = vld [vmem:[%s16943_s17 + $0x2210] sm:$0xff]  ;;  %v15424_v57 = vcombine.low %v1661_v33, %v1665_v34 }
 0x55a   : > { %12688 = vmatpush1.bf16.msra.mxu0 %v15272_v62  ;;  %12729 = vmatpush1.bf16.msra.mxu1 %v15400_v1  ;;  %v1545_v53 = vld [vmem:[%s16943_s17 + $0x2230] sm:$0xff] }
 0x55b   : > { %12689 = vmatprep.subr.bf16.mxu0 %v15281_v4  ;;  %12730 = vmatprep.subr.bf16.mxu1 %v15409_v5  ;;  %v1669_v54 = vld [vmem:[%s16943_s17 + $0x2610] sm:$0xff]  ;;  %v15305_v62 = vcombine.high %v1541_v48, %v1545_v53  ;;  %v15304_v9 = vcombine.low %v1541_v48, %v1545_v53 }
 0x55c   : > { %v12385_v22 = vpop.f32.mrb[56].mxu0  ;;  %v12426_v13 = vpop.f32.mrb[56].mxu1  ;;  %v1673_v43 = vld [vmem:[%s16943_s17 + $0x2630] sm:$0xff] }
 0x55d   : > { %v12387_v30 = vpop.f32.mrb[57].mxu0  ;;  %v18383_v31 = vadd.f32 %v12426_v13, %v12385_v22  ;;  %v12428_v25 = vpop.f32.mrb[57].mxu1  ;;  %v15433_v1 = vcombine.high %v1669_v54, %v1673_v43  ;;  %v1549_v4 = vld [vmem:[%s16943_s17 + $0x2250] sm:$0xff]  ;;  %v15432_v10 = vcombine.low %v1669_v54, %v1673_v43 }
 0x55e   : > { %v12389_v36 = vpop.f32.mrb[58].mxu0  ;;  %12690 = vmatpush1.bf16.msra.mxu0 %v15280_v16  ;;  %v18385_v38 = vadd.f32 %v12428_v25, %v12387_v30  ;;  %v12430_v27 = vpop.f32.mrb[58].mxu1  ;;  %12731 = vmatpush1.bf16.msra.mxu1 %v15408_v18  ;;  %v1553_v5 = vld [vmem:[%s16943_s17 + $0x2270] sm:$0xff] }
 0x55f   : > { %v12390_v42 = vpop.f32.mrb[59].mxu0  ;;  %12691 = vmatprep.subr.bf16.mxu0 %v15289_v20  ;;  %v12431_v23 = vpop.f32.mrb[59].mxu1  ;;  %12732 = vmatprep.subr.bf16.mxu1 %v15417_v12  ;;  %v1677_v6 = vld [vmem:[%s16943_s17 + $0x2650] sm:$0xff]  ;;  %v15313_v16 = vcombine.high %v1549_v4, %v1553_v5  ;;  %v15312_v26 = vcombine.low %v1549_v4, %v1553_v5 }
 0x560   : > { %v1681_v8 = vld [vmem:[%s16943_s17 + $0x2670] sm:$0xff] }
 0x561   : > { %v15441_v18 = vcombine.high %v1677_v6, %v1681_v8  ;;  %v1557_v20 = vld [vmem:[%s16943_s17 + $0x2290] sm:$0xff]  ;;  %v15440_v13 = vcombine.low %v1677_v6, %v1681_v8 }
 0x562   : > { %12692 = vmatpush1.bf16.msra.mxu0 %v15288_v39  ;;  %12733 = vmatpush1.bf16.msra.mxu1 %v15416_v40  ;;  %v1561_v22 = vld [vmem:[%s16943_s17 + $0x22b0] sm:$0xff] }
 0x563   : > { %12693 = vmatprep.subr.bf16.mxu0 %v15297_v44  ;;  %12734 = vmatprep.subr.bf16.mxu1 %v15425_v47  ;;  %v1685_v12 = vld [vmem:[%s16943_s17 + $0x2690] sm:$0xff]  ;;  %v15321_v30 = vcombine.high %v1557_v20, %v1561_v22  ;;  %v15320_v27 = vcombine.low %v1557_v20, %v1561_v22 }
 0x564   : > { %v1689_v24 = vld [vmem:[%s16943_s17 + $0x26b0] sm:$0xff] }
 0x565   : > { %v15449_v33 = vcombine.high %v1685_v12, %v1689_v24  ;;  %v1565_v34 = vld [vmem:[%s16943_s17 + $0x22d0] sm:$0xff]  ;;  %v15448_v42 = vcombine.low %v1685_v12, %v1689_v24 }
 0x566   : > { %12694 = vmatpush1.bf16.msra.mxu0 %v15296_v56  ;;  %12735 = vmatpush1.bf16.msra.mxu1 %v15424_v57  ;;  %v1569_v25 = vld [vmem:[%s16943_s17 + $0x22f0] sm:$0xff] }
 0x567   : > { %12695 = vmatprep.subr.bf16.mxu0 %v15305_v62  ;;  %12736 = vmatprep.subr.bf16.mxu1 %v15433_v1  ;;  %v1693_v36 = vld [vmem:[%s16943_s17 + $0x26d0] sm:$0xff]  ;;  %v15329_v40 = vcombine.high %v1565_v34, %v1569_v25  ;;  %v15328_v54 = vcombine.low %v1565_v34, %v1569_v25 }
 0x568   : > { %v1697_v39 = vld [vmem:[%s16943_s17 + $0x26f0] sm:$0xff] }
 0x569   : > { %v15457_v44 = vcombine.high %v1693_v36, %v1697_v39  ;;  %v1573_v23 = vld [vmem:[%s16943_s17 + $0x2310] sm:$0xff]  ;;  %v15456_v43 = vcombine.low %v1693_v36, %v1697_v39 }
 0x56a   : > { %12696 = vmatpush1.bf16.msra.mxu0 %v15304_v9  ;;  %12737 = vmatpush1.bf16.msra.mxu1 %v15432_v10  ;;  %v1577_v47 = vld [vmem:[%s16943_s17 + $0x2330] sm:$0xff] }
 0x56b   : > { %12697 = vmatprep.subr.bf16.mxu0 %v15313_v16  ;;  %12738 = vmatprep.subr.bf16.mxu1 %v15441_v18  ;;  %v1701_v48 = vld [vmem:[%s16943_s17 + $0x2710] sm:$0xff]  ;;  %v15337_v56 = vcombine.high %v1573_v23, %v1577_v47  ;;  %v15336_v6 = vcombine.low %v1573_v23, %v1577_v47 }
 0x56c   : > { %v1705_v53 = vld [vmem:[%s16943_s17 + $0x2730] sm:$0xff] }
 0x56d   : > { %v15465_v57 = vcombine.high %v1701_v48, %v1705_v53  ;;  %v1581_v62 = vld [vmem:[%s16943_s17 + $0x2350] sm:$0xff]  ;;  %v15464_v8 = vcombine.low %v1701_v48, %v1705_v53 }
 0x56e   : > { %12698 = vmatpush1.bf16.msra.mxu0 %v15312_v26  ;;  %12739 = vmatpush1.bf16.msra.mxu1 %v15440_v13  ;;  %v1585_v1 = vld [vmem:[%s16943_s17 + $0x2370] sm:$0xff] }
 0x56f   : > { %12699 = vmatprep.subr.bf16.mxu0 %v15321_v30  ;;  %12740 = vmatprep.subr.bf16.mxu1 %v15449_v33  ;;  %v1709_v4 = vld [vmem:[%s16943_s17 + $0x2750] sm:$0xff]  ;;  %v15345_v9 = vcombine.high %v1581_v62, %v1585_v1  ;;  %v15344_v12 = vcombine.low %v1581_v62, %v1585_v1 }
 0x570   : > { %v1713_v5 = vld [vmem:[%s16943_s17 + $0x2770] sm:$0xff] }
 0x571   : > { %v15473_v10 = vcombine.high %v1709_v4, %v1713_v5  ;;  %v1589_v16 = vld [vmem:[%s16943_s17 + $0x2390] sm:$0xff]  ;;  %v15472_v24 = vcombine.low %v1709_v4, %v1713_v5 }
 0x572   : > { %12700 = vmatpush1.bf16.msra.mxu0 %v15320_v27  ;;  %12741 = vmatpush1.bf16.msra.mxu1 %v15448_v42  ;;  %v1593_v18 = vld [vmem:[%s16943_s17 + $0x23b0] sm:$0xff] }
 0x573   : > { %12701 = vmatprep.subr.bf16.mxu0 %v15329_v40  ;;  %12742 = vmatprep.subr.bf16.mxu1 %v15457_v44  ;;  %v1717_v20 = vld [vmem:[%s16943_s17 + $0x2790] sm:$0xff]  ;;  %v15353_v26 = vcombine.high %v1589_v16, %v1593_v18  ;;  %v15352_v36 = vcombine.low %v1589_v16, %v1593_v18 }
 0x574   : > { %v1721_v22 = vld [vmem:[%s16943_s17 + $0x27b0] sm:$0xff] }
 0x575   : > { %v15481_v13 = vcombine.high %v1717_v20, %v1721_v22  ;;  %v1597_v30 = vld [vmem:[%s16943_s17 + $0x23d0] sm:$0xff]  ;;  %v15480_v39 = vcombine.low %v1717_v20, %v1721_v22 }
 0x576   : > { %12702 = vmatpush1.bf16.msra.mxu0 %v15328_v54  ;;  %12743 = vmatpush1.bf16.msra.mxu1 %v15456_v43  ;;  %v1601_v33 = vld [vmem:[%s16943_s17 + $0x23f0] sm:$0xff] }
 0x577   : > { %12703 = vmatprep.subr.bf16.mxu0 %v15337_v56  ;;  %12744 = vmatprep.subr.bf16.mxu1 %v15465_v57  ;;  %v1725_v34 = vld [vmem:[%s16943_s17 + $0x27d0] sm:$0xff]  ;;  %v15361_v27 = vcombine.high %v1597_v30, %v1601_v33  ;;  %v15360_v48 = vcombine.low %v1597_v30, %v1601_v33 }
 0x578   : > { %v1729_v25 = vld [vmem:[%s16943_s17 + $0x27f0] sm:$0xff] }
 0x579   : > { %v15489_v42 = vcombine.high %v1725_v34, %v1729_v25  ;;  %v1733_v40 = vld [vmem:[%s16943_s17 + $0x2810] sm:$0xff]  ;;  %v15488_v53 = vcombine.low %v1725_v34, %v1729_v25 }
 0x57a   : > { %12704 = vmatpush1.bf16.msra.mxu0 %v15336_v6  ;;  %12745 = vmatpush1.bf16.msra.mxu1 %v15464_v8  ;;  %v1737_v44 = vld [vmem:[%s16943_s17 + $0x2830] sm:$0xff] }
 0x57b   : > { %12705 = vmatprep.subr.bf16.mxu0 %v15345_v9  ;;  %12746 = vmatprep.subr.bf16.mxu1 %v15473_v10  ;;  %v1861_v23 = vld [vmem:[%s16943_s17 + $0x2c10] sm:$0xff]  ;;  %v15497_v54 = vcombine.high %v1733_v40, %v1737_v44  ;;  %v15496_v4 = vcombine.low %v1733_v40, %v1737_v44 }
 0x57c   : > { %v1865_v47 = vld [vmem:[%s16943_s17 + $0x2c30] sm:$0xff] }
 0x57d   : > { %v15625_v43 = vcombine.high %v1861_v23, %v1865_v47  ;;  %v1741_v56 = vld [vmem:[%s16943_s17 + $0x2850] sm:$0xff]  ;;  %v15624_v5 = vcombine.low %v1861_v23, %v1865_v47 }
 0x57e   : > { %12706 = vmatpush1.bf16.msra.mxu0 %v15344_v12  ;;  %12747 = vmatpush1.bf16.msra.mxu1 %v15472_v24  ;;  %v1745_v57 = vld [vmem:[%s16943_s17 + $0x2870] sm:$0xff] }
 0x57f   : > { %12707 = vmatprep.subr.bf16.mxu0 %v15353_v26  ;;  %12748 = vmatprep.subr.bf16.mxu1 %v15481_v13  ;;  %v1869_v62 = vld [vmem:[%s16943_s17 + $0x2c50] sm:$0xff]  ;;  %v15505_v6 = vcombine.high %v1741_v56, %v1745_v57  ;;  %v15504_v20 = vcombine.low %v1741_v56, %v1745_v57 }
 0x580   : > { %v1873_v1 = vld [vmem:[%s16943_s17 + $0x2c70] sm:$0xff] }
 0x581   : > { %v15633_v8 = vcombine.high %v1869_v62, %v1873_v1  ;;  %v1749_v9 = vld [vmem:[%s16943_s17 + $0x2890] sm:$0xff]  ;;  %v15632_v22 = vcombine.low %v1869_v62, %v1873_v1 }
 0x582   : > { %12708 = vmatpush1.bf16.msra.mxu0 %v15352_v36  ;;  %12749 = vmatpush1.bf16.msra.mxu1 %v15480_v39  ;;  %v1753_v10 = vld [vmem:[%s16943_s17 + $0x28b0] sm:$0xff] }
 0x583   : > { %12709 = vmatprep.subr.bf16.mxu0 %v15361_v27  ;;  %12750 = vmatprep.subr.bf16.mxu1 %v15489_v42  ;;  %v1877_v16 = vld [vmem:[%s16943_s17 + $0x2c90] sm:$0xff]  ;;  %v15513_v12 = vcombine.high %v1749_v9, %v1753_v10  ;;  %v15512_v34 = vcombine.low %v1749_v9, %v1753_v10 }
 0x584   : > { %v1881_v18 = vld [vmem:[%s16943_s17 + $0x2cb0] sm:$0xff] }
 0x585   : > { %v15641_v24 = vcombine.high %v1877_v16, %v1881_v18  ;;  %v1757_v26 = vld [vmem:[%s16943_s17 + $0x28d0] sm:$0xff]  ;;  %v15640_v25 = vcombine.low %v1877_v16, %v1881_v18 }
 0x586   : > { %12710 = vmatpush1.bf16.msra.mxu0 %v15360_v48  ;;  %12751 = vmatpush1.bf16.msra.mxu1 %v15488_v53  ;;  %v1761_v13 = vld [vmem:[%s16943_s17 + $0x28f0] sm:$0xff] }
 0x587   : > { %12761 = vmatprep.subr.bf16.mxu0 %v15497_v54  ;;  %12802 = vmatprep.subr.bf16.mxu1 %v15625_v43  ;;  %v1885_v30 = vld [vmem:[%s16943_s17 + $0x2cd0] sm:$0xff]  ;;  %v15521_v36 = vcombine.high %v1757_v26, %v1761_v13  ;;  %v15520_v23 = vcombine.low %v1757_v26, %v1761_v13 }
 0x588   : > { %v1889_v33 = vld [vmem:[%s16943_s17 + $0x2cf0] sm:$0xff] }
 0x589   : > { %12712 = vmatmul.mubr.bf16.vlgmr.msra.gmra.mrb[72].mxu0 %v17373_v55  ;;  %12753 = vmatmul.mubr.bf16.vlgmr.msra.gmra.mrb[72].mxu1 %v17378_v63  ;;  %v15649_v39 = vcombine.high %v1885_v30, %v1889_v33  ;;  %v1765_v27 = vld [vmem:[%s16943_s17 + $0x2910] sm:$0xff]  ;;  %v15648_v47 = vcombine.low %v1885_v30, %v1889_v33 }
 0x58a   : > { %12762 = vmatpush1.bf16.msra.mxu0 %v15496_v4  ;;  %12803 = vmatpush1.bf16.msra.mxu1 %v15624_v5  ;;  %v1769_v42 = vld [vmem:[%s16943_s17 + $0x2930] sm:$0xff] }
 0x58b   : > { %12763 = vmatprep.subr.bf16.mxu0 %v15505_v6  ;;  %12804 = vmatprep.subr.bf16.mxu1 %v15633_v8  ;;  %v1893_v40 = vld [vmem:[%s16943_s17 + $0x2d10] sm:$0xff]  ;;  %v15529_v48 = vcombine.high %v1765_v27, %v1769_v42  ;;  %v15528_v62 = vcombine.low %v1765_v27, %v1769_v42 }
 0x58c   : > { %12793 = vmatprep.mubr.bf16.mxu0 %v17383_v11  ;;  %12834 = vmatprep.mubr.bf16.mxu1 %v17388_v14  ;;  %v1897_v44 = vld [vmem:[%s16943_s17 + $0x2d30] sm:$0xff] }
 0x58d   : > { %v15657_v53 = vcombine.high %v1893_v40, %v1897_v44  ;;  %v1773_v54 = vld [vmem:[%s16943_s17 + $0x2950] sm:$0xff]  ;;  %v15656_v1 = vcombine.low %v1893_v40, %v1897_v44 }
 0x58e   : > { %12764 = vmatpush1.bf16.msra.mxu0 %v15504_v20  ;;  %12805 = vmatpush1.bf16.msra.mxu1 %v15632_v22  ;;  %v1777_v43 = vld [vmem:[%s16943_s17 + $0x2970] sm:$0xff] }
 0x58f   : > { %12765 = vmatprep.subr.bf16.mxu0 %v15513_v12  ;;  %12806 = vmatprep.subr.bf16.mxu1 %v15641_v24  ;;  %v1901_v56 = vld [vmem:[%s16943_s17 + $0x2d50] sm:$0xff]  ;;  %v15537_v4 = vcombine.high %v1773_v54, %v1777_v43  ;;  %v15536_v16 = vcombine.low %v1773_v54, %v1777_v43 }
 0x590   : > { %v1905_v57 = vld [vmem:[%s16943_s17 + $0x2d70] sm:$0xff] }
 0x591   : > { %v15665_v5 = vcombine.high %v1901_v56, %v1905_v57  ;;  %v1781_v6 = vld [vmem:[%s16943_s17 + $0x2990] sm:$0xff]  ;;  %v15664_v18 = vcombine.low %v1901_v56, %v1905_v57 }
 0x592   : > { %12766 = vmatpush1.bf16.msra.mxu0 %v15512_v34  ;;  %12807 = vmatpush1.bf16.msra.mxu1 %v15640_v25  ;;  %v1785_v8 = vld [vmem:[%s16943_s17 + $0x29b0] sm:$0xff] }
 0x593   : > { %12767 = vmatprep.subr.bf16.mxu0 %v15521_v36  ;;  %12808 = vmatprep.subr.bf16.mxu1 %v15649_v39  ;;  %v1909_v9 = vld [vmem:[%s16943_s17 + $0x2d90] sm:$0xff]  ;;  %v15545_v20 = vcombine.high %v1781_v6, %v1785_v8  ;;  %v15544_v42 = vcombine.low %v1781_v6, %v1785_v8 }
 0x594   : > { %v1913_v10 = vld [vmem:[%s16943_s17 + $0x2db0] sm:$0xff] }
 0x595   : > { %v15673_v12 = vcombine.high %v1909_v9, %v1913_v10  ;;  %v1789_v24 = vld [vmem:[%s16943_s17 + $0x29d0] sm:$0xff] }
 0x596   : > { %12768 = vmatpush1.bf16.msra.mxu0 %v15520_v23  ;;  %12809 = vmatpush1.bf16.msra.mxu1 %v15648_v47  ;;  %v1793_v26 = vld [vmem:[%s16943_s17 + $0x29f0] sm:$0xff] }
 0x597   : > { %12769 = vmatprep.subr.bf16.mxu0 %v15529_v48  ;;  %12810 = vmatprep.subr.bf16.mxu1 %v15657_v53  ;;  %v1917_v34 = vld [vmem:[%s16943_s17 + $0x2dd0] sm:$0xff]  ;;  %v15553_v47 = vcombine.high %v1789_v24, %v1793_v26 }
 0x598   : > { %v1921_v25 = vld [vmem:[%s16943_s17 + $0x2df0] sm:$0xff] }
 0x599   : > { %v15681_v53 = vcombine.high %v1917_v34, %v1921_v25  ;;  %v1797_v54 = vld [vmem:[%s16943_s17 + $0x2a10] sm:$0xff] }
 0x59a   : > { %12770 = vmatpush1.bf16.msra.mxu0 %v15528_v62  ;;  %12811 = vmatpush1.bf16.msra.mxu1 %v15656_v1  ;;  %v1801_v43 = vld [vmem:[%s16943_s17 + $0x2a30] sm:$0xff]  ;;  %v15552_v62 = vcombine.low %v1789_v24, %v1793_v26  ;;  %v15680_v1 = vcombine.low %v1917_v34, %v1921_v25 }
 0x59b   : > { %12771 = vmatprep.subr.bf16.mxu0 %v15537_v4  ;;  %12812 = vmatprep.subr.bf16.mxu1 %v15665_v5  ;;  %v1925_v56 = vld [vmem:[%s16943_s17 + $0x2e10] sm:$0xff]  ;;  %v15561_v4 = vcombine.high %v1797_v54, %v1801_v43 }
 0x59c   : > { %v12467_v22 = vpop.f32.mrb[60].mxu0  ;;  %v12508_v30 = vpop.f32.mrb[60].mxu1  ;;  %v1929_v57 = vld [vmem:[%s16943_s17 + $0x2e30] sm:$0xff] }
 0x59d   : > { %v12468_v13 = vadd.f32 %v12467_v22, %v18383_v31  ;;  %v12469_v33 = vpop.f32.mrb[61].mxu0  ;;  %v12510_v39 = vpop.f32.mrb[61].mxu1  ;;  %v15672_v31 = vcombine.low %v1909_v9, %v1913_v10  ;;  %v15689_v5 = vcombine.high %v1925_v56, %v1929_v57  ;;  %v1805_v6 = vld [vmem:[%s16943_s17 + $0x2a50] sm:$0xff] }
 0x59e   : > { %v12470_v36 = vadd.f32 %v12469_v33, %v18385_v38  ;;  %v12471_v27 = vpop.f32.mrb[62].mxu0  ;;  %12772 = vmatpush1.bf16.msra.mxu0 %v15536_v16  ;;  %v12512_v44 = vpop.f32.mrb[62].mxu1  ;;  %12813 = vmatpush1.bf16.msra.mxu1 %v15664_v18  ;;  %v1809_v8 = vld [vmem:[%s16943_s17 + $0x2a70] sm:$0xff]  ;;  %v15560_v16 = vcombine.low %v1797_v54, %v1801_v43  ;;  %v15688_v18 = vcombine.low %v1925_v56, %v1929_v57 }
 0x59f   : > { %v18457_v40 = vadd.f32 %v12508_v30, %v12468_v13  ;;  %v12472_v23 = vpop.f32.mrb[63].mxu0  ;;  %12773 = vmatprep.subr.bf16.mxu0 %v15545_v20  ;;  %v12513_v38 = vpop.f32.mrb[63].mxu1  ;;  %12814 = vmatprep.subr.bf16.mxu1 %v15673_v12  ;;  %v1933_v9 = vld [vmem:[%s16943_s17 + $0x2e50] sm:$0xff]  ;;  %v15569_v20 = vcombine.high %v1805_v6, %v1809_v8  ;;  %v15568_v30 = vcombine.low %v1805_v6, %v1809_v8 }
 0x5a0   : > { %v18459_v48 = vadd.f32 %v12510_v39, %v12470_v36  ;;  %v1937_v10 = vld [vmem:[%s16943_s17 + $0x2e70] sm:$0xff] }
 0x5a1   : > { %v15697_v22 = vcombine.high %v1933_v9, %v1937_v10  ;;  %v1813_v12 = vld [vmem:[%s16943_s17 + $0x2a90] sm:$0xff]  ;;  %v15696_v33 = vcombine.low %v1933_v9, %v1937_v10 }
 0x5a2   : > { %12774 = vmatpush1.bf16.msra.mxu0 %v15544_v42  ;;  %12815 = vmatpush1.bf16.msra.mxu1 %v15672_v31  ;;  %v1817_v24 = vld [vmem:[%s16943_s17 + $0x2ab0] sm:$0xff] }
 0x5a3   : > { %12775 = vmatprep.subr.bf16.mxu0 %v15553_v47  ;;  %12816 = vmatprep.subr.bf16.mxu1 %v15681_v53  ;;  %v1941_v26 = vld [vmem:[%s16943_s17 + $0x2e90] sm:$0xff]  ;;  %v15577_v34 = vcombine.high %v1813_v12, %v1817_v24  ;;  %v15576_v44 = vcombine.low %v1813_v12, %v1817_v24 }
 0x5a4   : > { %v1945_v13 = vld [vmem:[%s16943_s17 + $0x2eb0] sm:$0xff] }
 0x5a5   : > { %v15705_v25 = vcombine.high %v1941_v26, %v1945_v13  ;;  %v1821_v36 = vld [vmem:[%s16943_s17 + $0x2ad0] sm:$0xff]  ;;  %v15704_v23 = vcombine.low %v1941_v26, %v1945_v13 }
 0x5a6   : > { %12776 = vmatpush1.bf16.msra.mxu0 %v15552_v62  ;;  %12817 = vmatpush1.bf16.msra.mxu1 %v15680_v1  ;;  %v1825_v39 = vld [vmem:[%s16943_s17 + $0x2af0] sm:$0xff] }
 0x5a7   : > { %12777 = vmatprep.subr.bf16.mxu0 %v15561_v4  ;;  %12818 = vmatprep.subr.bf16.mxu1 %v15689_v5  ;;  %v1949_v27 = vld [vmem:[%s16943_s17 + $0x2ed0] sm:$0xff]  ;;  %v15585_v31 = vcombine.high %v1821_v36, %v1825_v39  ;;  %v15584_v56 = vcombine.low %v1821_v36, %v1825_v39 }
 0x5a8   : > { %v1953_v42 = vld [vmem:[%s16943_s17 + $0x2ef0] sm:$0xff] }
 0x5a9   : > { %v15713_v47 = vcombine.high %v1949_v27, %v1953_v42  ;;  %v1829_v38 = vld [vmem:[%s16943_s17 + $0x2b10] sm:$0xff]  ;;  %v15712_v57 = vcombine.low %v1949_v27, %v1953_v42 }
 0x5aa   : > { %12778 = vmatpush1.bf16.msra.mxu0 %v15560_v16  ;;  %12819 = vmatpush1.bf16.msra.mxu1 %v15688_v18  ;;  %v1833_v53 = vld [vmem:[%s16943_s17 + $0x2b30] sm:$0xff] }
 0x5ab   : > { %12779 = vmatprep.subr.bf16.mxu0 %v15569_v20  ;;  %12820 = vmatprep.subr.bf16.mxu1 %v15697_v22  ;;  %v1957_v54 = vld [vmem:[%s16943_s17 + $0x2f10] sm:$0xff]  ;;  %v15593_v62 = vcombine.high %v1829_v38, %v1833_v53  ;;  %v15592_v9 = vcombine.low %v1829_v38, %v1833_v53 }
 0x5ac   : > { %v1961_v43 = vld [vmem:[%s16943_s17 + $0x2f30] sm:$0xff] }
 0x5ad   : > { %v15721_v1 = vcombine.high %v1957_v54, %v1961_v43  ;;  %v1837_v4 = vld [vmem:[%s16943_s17 + $0x2b50] sm:$0xff]  ;;  %v15720_v10 = vcombine.low %v1957_v54, %v1961_v43 }
 0x5ae   : > { %12780 = vmatpush1.bf16.msra.mxu0 %v15568_v30  ;;  %12821 = vmatpush1.bf16.msra.mxu1 %v15696_v33  ;;  %v1841_v5 = vld [vmem:[%s16943_s17 + $0x2b70] sm:$0xff] }
 0x5af   : > { %12781 = vmatprep.subr.bf16.mxu0 %v15577_v34  ;;  %12822 = vmatprep.subr.bf16.mxu1 %v15705_v25  ;;  %v1965_v6 = vld [vmem:[%s16943_s17 + $0x2f50] sm:$0xff]  ;;  %v15601_v16 = vcombine.high %v1837_v4, %v1841_v5  ;;  %v15600_v26 = vcombine.low %v1837_v4, %v1841_v5 }
 0x5b0   : > { %v1969_v8 = vld [vmem:[%s16943_s17 + $0x2f70] sm:$0xff] }
 0x5b1   : > { %v15729_v18 = vcombine.high %v1965_v6, %v1969_v8  ;;  %v1845_v20 = vld [vmem:[%s16943_s17 + $0x2b90] sm:$0xff]  ;;  %v15728_v13 = vcombine.low %v1965_v6, %v1969_v8 }
 0x5b2   : > { %12782 = vmatpush1.bf16.msra.mxu0 %v15576_v44  ;;  %12823 = vmatpush1.bf16.msra.mxu1 %v15704_v23  ;;  %v1849_v22 = vld [vmem:[%s16943_s17 + $0x2bb0] sm:$0xff] }
 0x5b3   : > { %12783 = vmatprep.subr.bf16.mxu0 %v15585_v31  ;;  %12824 = vmatprep.subr.bf16.mxu1 %v15713_v47  ;;  %v1973_v12 = vld [vmem:[%s16943_s17 + $0x2f90] sm:$0xff]  ;;  %v15609_v30 = vcombine.high %v1845_v20, %v1849_v22  ;;  %v15608_v27 = vcombine.low %v1845_v20, %v1849_v22 }
 0x5b4   : > { %v1977_v24 = vld [vmem:[%s16943_s17 + $0x2fb0] sm:$0xff] }
 0x5b5   : > { %v15737_v33 = vcombine.high %v1973_v12, %v1977_v24  ;;  %v1853_v34 = vld [vmem:[%s16943_s17 + $0x2bd0] sm:$0xff]  ;;  %v15736_v42 = vcombine.low %v1973_v12, %v1977_v24 }
 0x5b6   : > { %12784 = vmatpush1.bf16.msra.mxu0 %v15584_v56  ;;  %12825 = vmatpush1.bf16.msra.mxu1 %v15712_v57  ;;  %v1857_v25 = vld [vmem:[%s16943_s17 + $0x2bf0] sm:$0xff] }
 0x5b7   : > { %12785 = vmatprep.subr.bf16.mxu0 %v15593_v62  ;;  %12826 = vmatprep.subr.bf16.mxu1 %v15721_v1  ;;  %v1981_v36 = vld [vmem:[%s16943_s17 + $0x2fd0] sm:$0xff]  ;;  %v15617_v44 = vcombine.high %v1853_v34, %v1857_v25  ;;  %v15616_v54 = vcombine.low %v1853_v34, %v1857_v25 }
 0x5b8   : > { %v1985_v39 = vld [vmem:[%s16943_s17 + $0x2ff0] sm:$0xff] }
 0x5b9   : > { %v15745_v23 = vcombine.high %v1981_v36, %v1985_v39  ;;  %v1989_v31 = vld [vmem:[%s16943_s17 + $0x3010] sm:$0xff]  ;;  %v15744_v43 = vcombine.low %v1981_v36, %v1985_v39 }
 0x5ba   : > { %12786 = vmatpush1.bf16.msra.mxu0 %v15592_v9  ;;  %12827 = vmatpush1.bf16.msra.mxu1 %v15720_v10  ;;  %v1993_v47 = vld [vmem:[%s16943_s17 + $0x3030] sm:$0xff] }
 0x5bb   : > { %12787 = vmatprep.subr.bf16.mxu0 %v15601_v16  ;;  %12828 = vmatprep.subr.bf16.mxu1 %v15729_v18  ;;  %v2117_v38 = vld [vmem:[%s16943_s17 + $0x3410] sm:$0xff]  ;;  %v15753_v56 = vcombine.high %v1989_v31, %v1993_v47  ;;  %v15752_v6 = vcombine.low %v1989_v31, %v1993_v47 }
 0x5bc   : > { %v2121_v53 = vld [vmem:[%s16943_s17 + $0x3430] sm:$0xff] }
 0x5bd   : > { %v15881_v57 = vcombine.high %v2117_v38, %v2121_v53  ;;  %v1997_v62 = vld [vmem:[%s16943_s17 + $0x3050] sm:$0xff]  ;;  %v15880_v8 = vcombine.low %v2117_v38, %v2121_v53 }
 0x5be   : > { %12788 = vmatpush1.bf16.msra.mxu0 %v15600_v26  ;;  %12829 = vmatpush1.bf16.msra.mxu1 %v15728_v13  ;;  %v2001_v1 = vld [vmem:[%s16943_s17 + $0x3070] sm:$0xff] }
 0x5bf   : > { %12789 = vmatprep.subr.bf16.mxu0 %v15609_v30  ;;  %12830 = vmatprep.subr.bf16.mxu1 %v15737_v33  ;;  %v2125_v4 = vld [vmem:[%s16943_s17 + $0x3450] sm:$0xff]  ;;  %v15761_v9 = vcombine.high %v1997_v62, %v2001_v1  ;;  %v15760_v12 = vcombine.low %v1997_v62, %v2001_v1 }
 0x5c0   : > { %v2129_v5 = vld [vmem:[%s16943_s17 + $0x3470] sm:$0xff] }
 0x5c1   : > { %v15889_v10 = vcombine.high %v2125_v4, %v2129_v5  ;;  %v2005_v16 = vld [vmem:[%s16943_s17 + $0x3090] sm:$0xff]  ;;  %v15888_v24 = vcombine.low %v2125_v4, %v2129_v5 }
 0x5c2   : > { %12790 = vmatpush1.bf16.msra.mxu0 %v15608_v27  ;;  %12831 = vmatpush1.bf16.msra.mxu1 %v15736_v42  ;;  %v2009_v18 = vld [vmem:[%s16943_s17 + $0x30b0] sm:$0xff] }
 0x5c3   : > { %12791 = vmatprep.subr.bf16.mxu0 %v15617_v44  ;;  %12832 = vmatprep.subr.bf16.mxu1 %v15745_v23  ;;  %v2133_v20 = vld [vmem:[%s16943_s17 + $0x3490] sm:$0xff]  ;;  %v15769_v26 = vcombine.high %v2005_v16, %v2009_v18  ;;  %v15768_v36 = vcombine.low %v2005_v16, %v2009_v18 }
 0x5c4   : > { %v2137_v22 = vld [vmem:[%s16943_s17 + $0x34b0] sm:$0xff] }
 0x5c5   : > { %v15897_v13 = vcombine.high %v2133_v20, %v2137_v22  ;;  %v2013_v30 = vld [vmem:[%s16943_s17 + $0x30d0] sm:$0xff]  ;;  %v15896_v39 = vcombine.low %v2133_v20, %v2137_v22 }
 0x5c6   : > { %12792 = vmatpush1.bf16.msra.mxu0 %v15616_v54  ;;  %12833 = vmatpush1.bf16.msra.mxu1 %v15744_v43  ;;  %v2017_v33 = vld [vmem:[%s16943_s17 + $0x30f0] sm:$0xff] }
 0x5c7   : > { %12843 = vmatprep.subr.bf16.mxu0 %v15753_v56  ;;  %12884 = vmatprep.subr.bf16.mxu1 %v15881_v57  ;;  %v2141_v34 = vld [vmem:[%s16943_s17 + $0x34d0] sm:$0xff]  ;;  %v15777_v27 = vcombine.high %v2013_v30, %v2017_v33  ;;  %v15776_v38 = vcombine.low %v2013_v30, %v2017_v33 }
 0x5c8   : > { %v2145_v25 = vld [vmem:[%s16943_s17 + $0x34f0] sm:$0xff] }
 0x5c9   : > { %12794 = vmatmul.mubr.bf16.vlgmr.msra.gmra.mrb[76].mxu0 %v17459_v58  ;;  %12835 = vmatmul.mubr.bf16.vlgmr.msra.gmra.mrb[76].mxu1 %v17464_v35  ;;  %v15905_v42 = vcombine.high %v2141_v34, %v2145_v25  ;;  %v2021_v44 = vld [vmem:[%s16943_s17 + $0x3110] sm:$0xff]  ;;  %v15904_v53 = vcombine.low %v2141_v34, %v2145_v25 }
 0x5ca   : > { %12844 = vmatpush1.bf16.msra.mxu0 %v15752_v6  ;;  %12885 = vmatpush1.bf16.msra.mxu1 %v15880_v8  ;;  %v2025_v23 = vld [vmem:[%s16943_s17 + $0x3130] sm:$0xff] }
 0x5cb   : > { %12845 = vmatprep.subr.bf16.mxu0 %v15761_v9  ;;  %12886 = vmatprep.subr.bf16.mxu1 %v15889_v10  ;;  %v2149_v31 = vld [vmem:[%s16943_s17 + $0x3510] sm:$0xff]  ;;  %v15785_v54 = vcombine.high %v2021_v44, %v2025_v23  ;;  %v15784_v4 = vcombine.low %v2021_v44, %v2025_v23 }
 0x5cc   : > { %12875 = vmatprep.mubr.bf16.mxu0 %v17469_v46  ;;  %12916 = vmatprep.mubr.bf16.mxu1 %v17474_v51  ;;  %v2153_v47 = vld [vmem:[%s16943_s17 + $0x3530] sm:$0xff] }
 0x5cd   : > { %v15913_v43 = vcombine.high %v2149_v31, %v2153_v47  ;;  %v2029_v56 = vld [vmem:[%s16943_s17 + $0x3150] sm:$0xff]  ;;  %v15912_v5 = vcombine.low %v2149_v31, %v2153_v47 }
 0x5ce   : > { %12846 = vmatpush1.bf16.msra.mxu0 %v15760_v12  ;;  %12887 = vmatpush1.bf16.msra.mxu1 %v15888_v24  ;;  %v2033_v57 = vld [vmem:[%s16943_s17 + $0x3170] sm:$0xff] }
 0x5cf   : > { %12847 = vmatprep.subr.bf16.mxu0 %v15769_v26  ;;  %12888 = vmatprep.subr.bf16.mxu1 %v15897_v13  ;;  %v2157_v62 = vld [vmem:[%s16943_s17 + $0x3550] sm:$0xff]  ;;  %v15793_v6 = vcombine.high %v2029_v56, %v2033_v57  ;;  %v15792_v20 = vcombine.low %v2029_v56, %v2033_v57 }
 0x5d0   : > { %v2161_v1 = vld [vmem:[%s16943_s17 + $0x3570] sm:$0xff] }
 0x5d1   : > { %v15921_v8 = vcombine.high %v2157_v62, %v2161_v1  ;;  %v2037_v9 = vld [vmem:[%s16943_s17 + $0x3190] sm:$0xff]  ;;  %v15920_v22 = vcombine.low %v2157_v62, %v2161_v1 }
 0x5d2   : > { %12848 = vmatpush1.bf16.msra.mxu0 %v15768_v36  ;;  %12889 = vmatpush1.bf16.msra.mxu1 %v15896_v39  ;;  %v2041_v10 = vld [vmem:[%s16943_s17 + $0x31b0] sm:$0xff] }
 0x5d3   : > { %12849 = vmatprep.subr.bf16.mxu0 %v15777_v27  ;;  %12890 = vmatprep.subr.bf16.mxu1 %v15905_v42  ;;  %v2165_v16 = vld [vmem:[%s16943_s17 + $0x3590] sm:$0xff]  ;;  %v15801_v12 = vcombine.high %v2037_v9, %v2041_v10  ;;  %v15800_v23 = vcombine.low %v2037_v9, %v2041_v10 }
 0x5d4   : > { %v2169_v18 = vld [vmem:[%s16943_s17 + $0x35b0] sm:$0xff] }
 0x5d5   : > { %v15929_v26 = vcombine.high %v2165_v16, %v2169_v18  ;;  %v2045_v13 = vld [vmem:[%s16943_s17 + $0x31d0] sm:$0xff] }
 0x5d6   : > { %12850 = vmatpush1.bf16.msra.mxu0 %v15776_v38  ;;  %12891 = vmatpush1.bf16.msra.mxu1 %v15904_v53  ;;  %v2049_v30 = vld [vmem:[%s16943_s17 + $0x31f0] sm:$0xff] }
 0x5d7   : > { %12851 = vmatprep.subr.bf16.mxu0 %v15785_v54  ;;  %12892 = vmatprep.subr.bf16.mxu1 %v15913_v43  ;;  %v2173_v36 = vld [vmem:[%s16943_s17 + $0x35d0] sm:$0xff]  ;;  %v15809_v53 = vcombine.high %v2045_v13, %v2049_v30 }
 0x5d8   : > { %v2177_v39 = vld [vmem:[%s16943_s17 + $0x35f0] sm:$0xff] }
 0x5d9   : > { %v15937_v43 = vcombine.high %v2173_v36, %v2177_v39  ;;  %v2053_v56 = vld [vmem:[%s16943_s17 + $0x3210] sm:$0xff] }
 0x5da   : > { %12852 = vmatpush1.bf16.msra.mxu0 %v15784_v4  ;;  %12893 = vmatpush1.bf16.msra.mxu1 %v15912_v5  ;;  %v2057_v57 = vld [vmem:[%s16943_s17 + $0x3230] sm:$0xff]  ;;  %v15808_v4 = vcombine.low %v2045_v13, %v2049_v30  ;;  %v15936_v5 = vcombine.low %v2173_v36, %v2177_v39 }
 0x5db   : > { %12853 = vmatprep.subr.bf16.mxu0 %v15793_v6  ;;  %12894 = vmatprep.subr.bf16.mxu1 %v15921_v8  ;;  %v2181_v62 = vld [vmem:[%s16943_s17 + $0x3610] sm:$0xff]  ;;  %v15817_v6 = vcombine.high %v2053_v56, %v2057_v57 }
 0x5dc   : > { %v12549_v24 = vpop.f32.mrb[64].mxu0  ;;  %v12590_v34 = vpop.f32.mrb[64].mxu1  ;;  %v2185_v1 = vld [vmem:[%s16943_s17 + $0x3630] sm:$0xff] }
 0x5dd   : > { %v12550_v33 = vadd.f32 %v12549_v24, %v18457_v40  ;;  %v12551_v25 = vpop.f32.mrb[65].mxu0  ;;  %v12592_v42 = vpop.f32.mrb[65].mxu1  ;;  %v15928_v40 = vcombine.low %v2165_v16, %v2169_v18  ;;  %v15945_v8 = vcombine.high %v2181_v62, %v2185_v1  ;;  %v2061_v9 = vld [vmem:[%s16943_s17 + $0x3250] sm:$0xff] }
 0x5de   : > { %v12552_v27 = vadd.f32 %v12551_v25, %v18459_v48  ;;  %v12553_v44 = vpop.f32.mrb[66].mxu0  ;;  %12854 = vmatpush1.bf16.msra.mxu0 %v15792_v20  ;;  %v12594_v47 = vpop.f32.mrb[66].mxu1  ;;  %12895 = vmatpush1.bf16.msra.mxu1 %v15920_v22  ;;  %v2065_v10 = vld [vmem:[%s16943_s17 + $0x3270] sm:$0xff]  ;;  %v15816_v20 = vcombine.low %v2053_v56, %v2057_v57  ;;  %v15944_v22 = vcombine.low %v2181_v62, %v2185_v1 }
 0x5df   : > { %v18531_v31 = vadd.f32 %v12590_v34, %v12550_v33  ;;  %v12554_v38 = vpop.f32.mrb[67].mxu0  ;;  %12855 = vmatprep.subr.bf16.mxu0 %v15801_v12  ;;  %v12595_v48 = vpop.f32.mrb[67].mxu1  ;;  %12896 = vmatprep.subr.bf16.mxu1 %v15929_v26  ;;  %v2189_v16 = vld [vmem:[%s16943_s17 + $0x3650] sm:$0xff]  ;;  %v15825_v12 = vcombine.high %v2061_v9, %v2065_v10  ;;  %v15824_v34 = vcombine.low %v2061_v9, %v2065_v10 }
 0x5e0   : > { %v18533_v54 = vadd.f32 %v12592_v42, %v12552_v27  ;;  %v2193_v18 = vld [vmem:[%s16943_s17 + $0x3670] sm:$0xff] }
 0x5e1   : > { %v15953_v24 = vcombine.high %v2189_v16, %v2193_v18  ;;  %v2069_v26 = vld [vmem:[%s16943_s17 + $0x3290] sm:$0xff]  ;;  %v15952_v25 = vcombine.low %v2189_v16, %v2193_v18 }
 0x5e2   : > { %12856 = vmatpush1.bf16.msra.mxu0 %v15800_v23  ;;  %12897 = vmatpush1.bf16.msra.mxu1 %v15928_v40  ;;  %v2073_v13 = vld [vmem:[%s16943_s17 + $0x32b0] sm:$0xff] }
 0x5e3   : > { %12857 = vmatprep.subr.bf16.mxu0 %v15809_v53  ;;  %12898 = vmatprep.subr.bf16.mxu1 %v15937_v43  ;;  %v2197_v30 = vld [vmem:[%s16943_s17 + $0x3690] sm:$0xff]  ;;  %v15833_v36 = vcombine.high %v2069_v26, %v2073_v13  ;;  %v15832_v47 = vcombine.low %v2069_v26, %v2073_v13 }
 0x5e4   : > { %v2201_v33 = vld [vmem:[%s16943_s17 + $0x36b0] sm:$0xff] }
 0x5e5   : > { %v15961_v39 = vcombine.high %v2197_v30, %v2201_v33  ;;  %v2077_v27 = vld [vmem:[%s16943_s17 + $0x32d0] sm:$0xff]  ;;  %v15960_v38 = vcombine.low %v2197_v30, %v2201_v33 }
 0x5e6   : > { %12858 = vmatpush1.bf16.msra.mxu0 %v15808_v4  ;;  %12899 = vmatpush1.bf16.msra.mxu1 %v15936_v5  ;;  %v2081_v42 = vld [vmem:[%s16943_s17 + $0x32f0] sm:$0xff] }
 0x5e7   : > { %12859 = vmatprep.subr.bf16.mxu0 %v15817_v6  ;;  %12900 = vmatprep.subr.bf16.mxu1 %v15945_v8  ;;  %v2205_v44 = vld [vmem:[%s16943_s17 + $0x36d0] sm:$0xff]  ;;  %v15841_v40 = vcombine.high %v2077_v27, %v2081_v42  ;;  %v15840_v62 = vcombine.low %v2077_v27, %v2081_v42 }
 0x5e8   : > { %v2209_v23 = vld [vmem:[%s16943_s17 + $0x36f0] sm:$0xff] }
 0x5e9   : > { %v15969_v53 = vcombine.high %v2205_v44, %v2209_v23  ;;  %v2085_v48 = vld [vmem:[%s16943_s17 + $0x3310] sm:$0xff]  ;;  %v15968_v1 = vcombine.low %v2205_v44, %v2209_v23 }
 0x5ea   : > { %12860 = vmatpush1.bf16.msra.mxu0 %v15816_v20  ;;  %12901 = vmatpush1.bf16.msra.mxu1 %v15944_v22  ;;  %v2089_v43 = vld [vmem:[%s16943_s17 + $0x3330] sm:$0xff] }
 0x5eb   : > { %12861 = vmatprep.subr.bf16.mxu0 %v15825_v12  ;;  %12902 = vmatprep.subr.bf16.mxu1 %v15953_v24  ;;  %v2213_v56 = vld [vmem:[%s16943_s17 + $0x3710] sm:$0xff]  ;;  %v15849_v4 = vcombine.high %v2085_v48, %v2089_v43  ;;  %v15848_v16 = vcombine.low %v2085_v48, %v2089_v43  ;;  %v582_v48 = vld [vmem:[%s16943_s17 + $0x418] sm:$0xff] }
 0x5ec   : > { %v2217_v57 = vld [vmem:[%s16943_s17 + $0x3730] sm:$0xff]  ;;  %v586_v43 = vld [vmem:[%s16943_s17 + $0x438] sm:$0xff] }
 0x5ed   : > { %v15977_v5 = vcombine.high %v2213_v56, %v2217_v57  ;;  %v2093_v6 = vld [vmem:[%s16943_s17 + $0x3350] sm:$0xff]  ;;  %v15976_v18 = vcombine.low %v2213_v56, %v2217_v57 }
 0x5ee   : > { %12862 = vmatpush1.bf16.msra.mxu0 %v15824_v34  ;;  %12903 = vmatpush1.bf16.msra.mxu1 %v15952_v25  ;;  %v2097_v8 = vld [vmem:[%s16943_s17 + $0x3370] sm:$0xff] }
 0x5ef   : > { %12863 = vmatprep.subr.bf16.mxu0 %v15833_v36  ;;  %12904 = vmatprep.subr.bf16.mxu1 %v15961_v39  ;;  %v2221_v9 = vld [vmem:[%s16943_s17 + $0x3750] sm:$0xff]  ;;  %v15857_v20 = vcombine.high %v2093_v6, %v2097_v8  ;;  %v15856_v30 = vcombine.low %v2093_v6, %v2097_v8  ;;  %v590_v6 = vld [vmem:[%s16943_s17 + $0x458] sm:$0xff] }
 0x5f0   : > { %v2225_v10 = vld [vmem:[%s16943_s17 + $0x3770] sm:$0xff]  ;;  %v594_v8 = vld [vmem:[%s16943_s17 + $0x478] sm:$0xff] }
 0x5f1   : > { %v15985_v22 = vcombine.high %v2221_v9, %v2225_v10  ;;  %v2101_v12 = vld [vmem:[%s16943_s17 + $0x3390] sm:$0xff]  ;;  %v15984_v33 = vcombine.low %v2221_v9, %v2225_v10  ;;  %v14346_v10 = vcombine.low %v582_v48, %v586_v43 }
 0x5f2   : > { %12864 = vmatpush1.bf16.msra.mxu0 %v15832_v47  ;;  %12905 = vmatpush1.bf16.msra.mxu1 %v15960_v38  ;;  %v2105_v24 = vld [vmem:[%s16943_s17 + $0x33b0] sm:$0xff] }
 0x5f3   : > { %12865 = vmatprep.subr.bf16.mxu0 %v15841_v40  ;;  %12906 = vmatprep.subr.bf16.mxu1 %v15969_v53  ;;  %v2229_v26 = vld [vmem:[%s16943_s17 + $0x3790] sm:$0xff]  ;;  %v15865_v34 = vcombine.high %v2101_v12, %v2105_v24  ;;  %v15864_v44 = vcombine.low %v2101_v12, %v2105_v24  ;;  %v454_v40 = vld [vmem:[%s16943_s17 + $0x18] sm:$0xff] }
 0x5f4   : > { %v2233_v13 = vld [vmem:[%s16943_s17 + $0x37b0] sm:$0xff]  ;;  %v458_v53 = vld [vmem:[%s16943_s17 + $0x38] sm:$0xff] }
 0x5f5   : > { %v15993_v25 = vcombine.high %v2229_v26, %v2233_v13  ;;  %v2109_v36 = vld [vmem:[%s16943_s17 + $0x33d0] sm:$0xff]  ;;  %v15992_v23 = vcombine.low %v2229_v26, %v2233_v13  ;;  %v14218_v9 = vcombine.low %v454_v40, %v458_v53  ;;  %v598_v12 = vld [vmem:[%s16943_s17 + $0x498] sm:$0xff]  ;;  %v14354_v13 = vcombine.low %v590_v6, %v594_v8 }
 0x5f6   : > { %12866 = vmatpush1.bf16.msra.mxu0 %v15840_v62  ;;  %12907 = vmatpush1.bf16.msra.mxu1 %v15968_v1  ;;  %v2113_v39 = vld [vmem:[%s16943_s17 + $0x33f0] sm:$0xff]  ;;  %v14219_v62 = vcombine.high %v454_v40, %v458_v53  ;;  %v14347_v1 = vcombine.high %v582_v48, %v586_v43  ;;  %v602_v24 = vld [vmem:[%s16943_s17 + $0x4b8] sm:$0xff] }
 0x5f7   : > { %12867 = vmatprep.subr.bf16.mxu0 %v15849_v4  ;;  %12908 = vmatprep.subr.bf16.mxu1 %v15977_v5  ;;  %v2237_v27 = vld [vmem:[%s16943_s17 + $0x37d0] sm:$0xff]  ;;  %v15873_v47 = vcombine.high %v2109_v36, %v2113_v39  ;;  %v15872_v56 = vcombine.low %v2109_v36, %v2113_v39  ;;  %v462_v4 = vld [vmem:[%s16943_s17 + $0x58] sm:$0xff] }
 0x5f8   : > { %v2241_v42 = vld [vmem:[%s16943_s17 + $0x37f0] sm:$0xff]  ;;  %v466_v5 = vld [vmem:[%s16943_s17 + $0x78] sm:$0xff] }
 0x5f9   : > { %v16001_v38 = vcombine.high %v2237_v27, %v2241_v42  ;;  %v16000_v57 = vcombine.low %v2237_v27, %v2241_v42  ;;  %v14226_v26 = vcombine.low %v462_v4, %v466_v5  ;;  %v606_v36 = vld [vmem:[%s16943_s17 + $0x4d8] sm:$0xff]  ;;  %v14362_v42 = vcombine.low %v598_v12, %v602_v24 }
 0x5fa   : > { %12868 = vmatpush1.bf16.msra.mxu0 %v15848_v16  ;;  %12909 = vmatpush1.bf16.msra.mxu1 %v15976_v18  ;;  %v14227_v16 = vcombine.high %v462_v4, %v466_v5  ;;  %v14355_v18 = vcombine.high %v590_v6, %v594_v8  ;;  %v610_v39 = vld [vmem:[%s16943_s17 + $0x4f8] sm:$0xff] }
 0x5fb   : > { %12869 = vmatprep.subr.bf16.mxu0 %v15857_v20  ;;  %12910 = vmatprep.subr.bf16.mxu1 %v15985_v22  ;;  %v470_v20 = vld [vmem:[%s16943_s17 + $0x98] sm:$0xff] }
 0x5fc   : > { %v474_v22 = vld [vmem:[%s16943_s17 + $0xb8] sm:$0xff] }
 0x5fd   : > { %v14234_v27 = vcombine.low %v470_v20, %v474_v22  ;;  %v614_v40 = vld [vmem:[%s16943_s17 + $0x518] sm:$0xff] }
 0x5fe   : > { %12870 = vmatpush1.bf16.msra.mxu0 %v15856_v30  ;;  %12911 = vmatpush1.bf16.msra.mxu1 %v15984_v33  ;;  %v14235_v30 = vcombine.high %v470_v20, %v474_v22  ;;  %v14363_v33 = vcombine.high %v598_v12, %v602_v24 }
 0x5ff   : > { %12871 = vmatprep.subr.bf16.mxu0 %v15865_v34  ;;  %12912 = vmatprep.subr.bf16.mxu1 %v15993_v25  ;;  %v478_v34 = vld [vmem:[%s16943_s17 + $0xd8] sm:$0xff] }
 0x600   : > { %v482_v25 = vld [vmem:[%s16943_s17 + $0xf8] sm:$0xff] }
 0x601   : > { %v14242_v53 = vcombine.low %v478_v34, %v482_v25 }
 0x602   : > { %12872 = vmatpush1.bf16.msra.mxu0 %v15864_v44  ;;  %12913 = vmatpush1.bf16.msra.mxu1 %v15992_v23  ;;  %v14243_v44 = vcombine.high %v478_v34, %v482_v25  ;;  %v14371_v23 = vcombine.high %v606_v36, %v610_v39 }
 0x603   : > { %12873 = vmatprep.subr.bf16.mxu0 %v15873_v47  ;;  %12914 = vmatprep.subr.bf16.mxu1 %v16001_v38  ;;  %v486_v47 = vld [vmem:[%s16943_s17 + $0x118] sm:$0xff] }
 0x604   : > { %v490_v38 = vld [vmem:[%s16943_s17 + $0x138] sm:$0xff] }
 0x605   : > { %v14251_v48 = vcombine.high %v486_v47, %v490_v38  ;;  %v14250_v4 = vcombine.low %v486_v47, %v490_v38 }
 0x606   : > { %12874 = vmatpush1.bf16.msra.mxu0 %v15872_v56  ;;  %12915 = vmatpush1.bf16.msra.mxu1 %v16000_v57  ;;  %v494_v56 = vld [vmem:[%s16943_s17 + $0x158] sm:$0xff] }
 0x607   : > { %12925 = vmatprep.subr.bf16.mxu0 %v14219_v62  ;;  %12966 = vmatprep.subr.bf16.mxu1 %v14347_v1  ;;  %v498_v57 = vld [vmem:[%s16943_s17 + $0x178] sm:$0xff] }
 0x608   : > { %v622_v62 = vld [vmem:[%s16943_s17 + $0x558] sm:$0xff]  ;;  %v14259_v6 = vcombine.high %v494_v56, %v498_v57  ;;  %v14258_v20 = vcombine.low %v494_v56, %v498_v57 }
 0x609   : > { %12876 = vmatmul.mubr.bf16.vlgmr.msra.gmra.mrb[80].mxu0 %v17545_v28  ;;  %12917 = vmatmul.mubr.bf16.vlgmr.msra.gmra.mrb[80].mxu1 %v17549_v2  ;;  %v626_v1 = vld [vmem:[%s16943_s17 + $0x578] sm:$0xff] }
 0x60a   : > { %12926 = vmatpush1.bf16.msra.mxu0 %v14218_v9  ;;  %12967 = vmatpush1.bf16.msra.mxu1 %v14346_v10  ;;  %v14387_v8 = vcombine.high %v622_v62, %v626_v1  ;;  %v502_v9 = vld [vmem:[%s16943_s17 + $0x198] sm:$0xff]  ;;  %v14386_v22 = vcombine.low %v622_v62, %v626_v1 }
 0x60b   : > { %12927 = vmatprep.subr.bf16.mxu0 %v14227_v16  ;;  %12968 = vmatprep.subr.bf16.mxu1 %v14355_v18  ;;  %v506_v10 = vld [vmem:[%s16943_s17 + $0x1b8] sm:$0xff] }
 0x60c   : > { %12957 = vmatprep.mubr.bf16.mxu0 %v17001_v59  ;;  %12998 = vmatprep.mubr.bf16.mxu1 %v17003_v60  ;;  %v618_v59 = vld [vmem:[%s16943_s17 + $0x538] sm:$0xff]  ;;  %v14370_v60 = vcombine.low %v606_v36, %v610_v39  ;;  %v14267_v12 = vcombine.high %v502_v9, %v506_v10 }
 0x60d   : > { %v14379_v43 = vcombine.high %v614_v40, %v618_v59  ;;  %v14378_v5 = vcombine.low %v614_v40, %v618_v59  ;;  %v630_v16 = vld [vmem:[%s16943_s17 + $0x598] sm:$0xff] }
 0x60e   : > { %12928 = vmatpush1.bf16.msra.mxu0 %v14226_v26  ;;  %12969 = vmatpush1.bf16.msra.mxu1 %v14354_v13  ;;  %v634_v18 = vld [vmem:[%s16943_s17 + $0x5b8] sm:$0xff] }
 0x60f   : > { %12929 = vmatprep.subr.bf16.mxu0 %v14235_v30  ;;  %12970 = vmatprep.subr.bf16.mxu1 %v14363_v33  ;;  %v14395_v26 = vcombine.high %v630_v16, %v634_v18  ;;  %v510_v13 = vld [vmem:[%s16943_s17 + $0x1d8] sm:$0xff] }
 0x610   : > { %v514_v30 = vld [vmem:[%s16943_s17 + $0x1f8] sm:$0xff] }
 0x611   : > { %v638_v36 = vld [vmem:[%s16943_s17 + $0x5d8] sm:$0xff]  ;;  %v14275_v59 = vcombine.high %v510_v13, %v514_v30  ;;  %v14274_v62 = vcombine.low %v510_v13, %v514_v30 }
 0x612   : > { %12930 = vmatpush1.bf16.msra.mxu0 %v14234_v27  ;;  %12971 = vmatpush1.bf16.msra.mxu1 %v14362_v42  ;;  %v642_v39 = vld [vmem:[%s16943_s17 + $0x5f8] sm:$0xff] }
 0x613   : > { %12931 = vmatprep.subr.bf16.mxu0 %v14243_v44  ;;  %12972 = vmatprep.subr.bf16.mxu1 %v14371_v23  ;;  %v14266_v23 = vcombine.low %v502_v9, %v506_v10  ;;  %v646_v56 = vld [vmem:[%s16943_s17 + $0x618] sm:$0xff]  ;;  %v14402_v1 = vcombine.low %v638_v36, %v642_v39 }
 0x614   : > { %v650_v57 = vld [vmem:[%s16943_s17 + $0x638] sm:$0xff] }
 0x615   : > { %v654_v9 = vld [vmem:[%s16943_s17 + $0x658] sm:$0xff] }
 0x616   : > { %12932 = vmatpush1.bf16.msra.mxu0 %v14242_v53  ;;  %12973 = vmatpush1.bf16.msra.mxu1 %v14370_v60  ;;  %v14403_v60 = vcombine.high %v638_v36, %v642_v39  ;;  %v658_v10 = vld [vmem:[%s16943_s17 + $0x678] sm:$0xff] }
 0x617   : > { %12933 = vmatprep.subr.bf16.mxu0 %v14251_v48  ;;  %12974 = vmatprep.subr.bf16.mxu1 %v14379_v43  ;;  %v518_v48 = vld [vmem:[%s16943_s17 + $0x218] sm:$0xff] }
 0x618   : > { %v522_v43 = vld [vmem:[%s16943_s17 + $0x238] sm:$0xff] }
 0x619   : > { %v666_v13 = vld [vmem:[%s16943_s17 + $0x6b8] sm:$0xff] }
 0x61a   : > { %12934 = vmatpush1.bf16.msra.mxu0 %v14250_v4  ;;  %12975 = vmatpush1.bf16.msra.mxu1 %v14378_v5  ;;  %v14283_v4 = vcombine.high %v518_v48, %v522_v43  ;;  %v14411_v5 = vcombine.high %v646_v56, %v650_v57  ;;  %v542_v36 = vld [vmem:[%s16943_s17 + $0x2d8] sm:$0xff] }
 0x61b   : > { %12935 = vmatprep.subr.bf16.mxu0 %v14259_v6  ;;  %12976 = vmatprep.subr.bf16.mxu1 %v14387_v8  ;;  %v526_v6 = vld [vmem:[%s16943_s17 + $0x258] sm:$0xff] }
 0x61c   : > { %v12631_v24 = vpop.f32.mrb[68].mxu0  ;;  %v12672_v34 = vpop.f32.mrb[68].mxu1  ;;  %v530_v8 = vld [vmem:[%s16943_s17 + $0x278] sm:$0xff] }
 0x61d   : > { %v12632_v33 = vadd.f32 %v12631_v24, %v18531_v31  ;;  %v12633_v25 = vpop.f32.mrb[69].mxu0  ;;  %v12674_v42 = vpop.f32.mrb[69].mxu1  ;;  %v14394_v31 = vcombine.low %v630_v16, %v634_v18  ;;  %v14282_v16 = vcombine.low %v518_v48, %v522_v43  ;;  %v14410_v18 = vcombine.low %v646_v56, %v650_v57  ;;  %v538_v24 = vld [vmem:[%s16943_s17 + $0x2b8] sm:$0xff] }
 0x61e   : > { %v12634_v27 = vadd.f32 %v12633_v25, %v18533_v54  ;;  %v12635_v44 = vpop.f32.mrb[70].mxu0  ;;  %12936 = vmatpush1.bf16.msra.mxu0 %v14258_v20  ;;  %v12676_v38 = vpop.f32.mrb[70].mxu1  ;;  %12977 = vmatpush1.bf16.msra.mxu1 %v14386_v22  ;;  %v14291_v20 = vcombine.high %v526_v6, %v530_v8  ;;  %v14419_v22 = vcombine.high %v654_v9, %v658_v10  ;;  %v546_v39 = vld [vmem:[%s16943_s17 + $0x2f8] sm:$0xff] }
 0x61f   : > { %v18605_v47 = vadd.f32 %v12672_v34, %v12632_v33  ;;  %v12636_v40 = vpop.f32.mrb[71].mxu0  ;;  %12937 = vmatprep.subr.bf16.mxu0 %v14267_v12  ;;  %v12677_v54 = vpop.f32.mrb[71].mxu1  ;;  %12978 = vmatprep.subr.bf16.mxu1 %v14395_v26  ;;  %v534_v12 = vld [vmem:[%s16943_s17 + $0x298] sm:$0xff]  ;;  %v14290_v30 = vcombine.low %v526_v6, %v530_v8  ;;  %v14418_v33 = vcombine.low %v654_v9, %v658_v10 }
 0x620   : > { %v18607_v53 = vadd.f32 %v12674_v42, %v12634_v27  ;;  %v662_v26 = vld [vmem:[%s16943_s17 + $0x698] sm:$0xff]  ;;  %v14299_v34 = vcombine.high %v534_v12, %v538_v24  ;;  %v14298_v44 = vcombine.low %v534_v12, %v538_v24  ;;  %v14307_v38 = vcombine.high %v542_v36, %v546_v39 }
 0x621   : > { %v14427_v25 = vcombine.high %v662_v26, %v666_v13  ;;  %v670_v27 = vld [vmem:[%s16943_s17 + $0x6d8] sm:$0xff]  ;;  %v14306_v48 = vcombine.low %v542_v36, %v546_v39 }
 0x622   : > { %12938 = vmatpush1.bf16.msra.mxu0 %v14266_v23  ;;  %12979 = vmatpush1.bf16.msra.mxu1 %v14394_v31  ;;  %v674_v42 = vld [vmem:[%s16943_s17 + $0x6f8] sm:$0xff]  ;;  %v14426_v23 = vcombine.low %v662_v26, %v666_v13 }
 0x623   : > { %12939 = vmatprep.subr.bf16.mxu0 %v14275_v59  ;;  %12980 = vmatprep.subr.bf16.mxu1 %v14403_v60  ;;  %v14435_v40 = vcombine.high %v670_v27, %v674_v42  ;;  %v550_v31 = vld [vmem:[%s16943_s17 + $0x318] sm:$0xff]  ;;  %v14434_v43 = vcombine.low %v670_v27, %v674_v42 }
 0x624   : > { %v554_v59 = vld [vmem:[%s16943_s17 + $0x338] sm:$0xff] }
 0x625   : > { %v678_v54 = vld [vmem:[%s16943_s17 + $0x718] sm:$0xff]  ;;  %v14315_v56 = vcombine.high %v550_v31, %v554_v59  ;;  %v14314_v6 = vcombine.low %v550_v31, %v554_v59 }
 0x626   : > { %12940 = vmatpush1.bf16.msra.mxu0 %v14274_v62  ;;  %12981 = vmatpush1.bf16.msra.mxu1 %v14402_v1  ;;  %v682_v60 = vld [vmem:[%s16943_s17 + $0x738] sm:$0xff] }
 0x627   : > { %12941 = vmatprep.subr.bf16.mxu0 %v14283_v4  ;;  %12982 = vmatprep.subr.bf16.mxu1 %v14411_v5  ;;  %v14443_v57 = vcombine.high %v678_v54, %v682_v60  ;;  %v558_v62 = vld [vmem:[%s16943_s17 + $0x358] sm:$0xff]  ;;  %v14442_v8 = vcombine.low %v678_v54, %v682_v60 }
 0x628   : > { %v562_v1 = vld [vmem:[%s16943_s17 + $0x378] sm:$0xff] }
 0x629   : > { %v686_v4 = vld [vmem:[%s16943_s17 + $0x758] sm:$0xff]  ;;  %v14323_v9 = vcombine.high %v558_v62, %v562_v1  ;;  %v14322_v12 = vcombine.low %v558_v62, %v562_v1 }
 0x62a   : > { %12942 = vmatpush1.bf16.msra.mxu0 %v14282_v16  ;;  %12983 = vmatpush1.bf16.msra.mxu1 %v14410_v18  ;;  %v690_v5 = vld [vmem:[%s16943_s17 + $0x778] sm:$0xff] }
 0x62b   : > { %12943 = vmatprep.subr.bf16.mxu0 %v14291_v20  ;;  %12984 = vmatprep.subr.bf16.mxu1 %v14419_v22  ;;  %v14451_v10 = vcombine.high %v686_v4, %v690_v5  ;;  %v566_v16 = vld [vmem:[%s16943_s17 + $0x398] sm:$0xff]  ;;  %v14450_v24 = vcombine.low %v686_v4, %v690_v5 }
 0x62c   : > { %v570_v18 = vld [vmem:[%s16943_s17 + $0x3b8] sm:$0xff] }
 0x62d   : > { %v694_v20 = vld [vmem:[%s16943_s17 + $0x798] sm:$0xff]  ;;  %v14331_v26 = vcombine.high %v566_v16, %v570_v18  ;;  %v14330_v36 = vcombine.low %v566_v16, %v570_v18 }
 0x62e   : > { %12944 = vmatpush1.bf16.msra.mxu0 %v14290_v30  ;;  %12985 = vmatpush1.bf16.msra.mxu1 %v14418_v33  ;;  %v698_v22 = vld [vmem:[%s16943_s17 + $0x7b8] sm:$0xff] }
 0x62f   : > { %12945 = vmatprep.subr.bf16.mxu0 %v14299_v34  ;;  %12986 = vmatprep.subr.bf16.mxu1 %v14427_v25  ;;  %v14459_v13 = vcombine.high %v694_v20, %v698_v22  ;;  %v574_v30 = vld [vmem:[%s16943_s17 + $0x3d8] sm:$0xff]  ;;  %v14458_v39 = vcombine.low %v694_v20, %v698_v22 }
 0x630   : > { %v578_v33 = vld [vmem:[%s16943_s17 + $0x3f8] sm:$0xff] }
 0x631   : > { %v702_v34 = vld [vmem:[%s16943_s17 + $0x7d8] sm:$0xff]  ;;  %v14339_v27 = vcombine.high %v574_v30, %v578_v33  ;;  %v14338_v31 = vcombine.low %v574_v30, %v578_v33 }
 0x632   : > { %12946 = vmatpush1.bf16.msra.mxu0 %v14298_v44  ;;  %12987 = vmatpush1.bf16.msra.mxu1 %v14426_v23  ;;  %v706_v25 = vld [vmem:[%s16943_s17 + $0x7f8] sm:$0xff] }
 0x633   : > { %12947 = vmatprep.subr.bf16.mxu0 %v14307_v38  ;;  %12988 = vmatprep.subr.bf16.mxu1 %v14435_v40  ;;  %v14467_v42 = vcombine.high %v702_v34, %v706_v25  ;;  %v710_v44 = vld [vmem:[%s16943_s17 + $0x818] sm:$0xff]  ;;  %v14466_v59 = vcombine.low %v702_v34, %v706_v25 }
 0x634   : > { %v714_v23 = vld [vmem:[%s16943_s17 + $0x838] sm:$0xff] }
 0x635   : > { %v838_v38 = vld [vmem:[%s16943_s17 + $0xc18] sm:$0xff]  ;;  %v14475_v54 = vcombine.high %v710_v44, %v714_v23  ;;  %v14474_v62 = vcombine.low %v710_v44, %v714_v23 }
 0x636   : > { %12948 = vmatpush1.bf16.msra.mxu0 %v14306_v48  ;;  %12989 = vmatpush1.bf16.msra.mxu1 %v14434_v43  ;;  %v842_v40 = vld [vmem:[%s16943_s17 + $0xc38] sm:$0xff] }
 0x637   : > { %12949 = vmatprep.subr.bf16.mxu0 %v14315_v56  ;;  %12990 = vmatprep.subr.bf16.mxu1 %v14443_v57  ;;  %v14603_v60 = vcombine.high %v838_v38, %v842_v40  ;;  %v718_v48 = vld [vmem:[%s16943_s17 + $0x858] sm:$0xff]  ;;  %v14602_v1 = vcombine.low %v838_v38, %v842_v40 }
 0x638   : > { %v722_v43 = vld [vmem:[%s16943_s17 + $0x878] sm:$0xff] }
 0x639   : > { %v846_v56 = vld [vmem:[%s16943_s17 + $0xc58] sm:$0xff]  ;;  %v14483_v4 = vcombine.high %v718_v48, %v722_v43  ;;  %v14482_v16 = vcombine.low %v718_v48, %v722_v43 }
 0x63a   : > { %12950 = vmatpush1.bf16.msra.mxu0 %v14314_v6  ;;  %12991 = vmatpush1.bf16.msra.mxu1 %v14442_v8  ;;  %v850_v57 = vld [vmem:[%s16943_s17 + $0xc78] sm:$0xff] }
 0x63b   : > { %12951 = vmatprep.subr.bf16.mxu0 %v14323_v9  ;;  %12992 = vmatprep.subr.bf16.mxu1 %v14451_v10  ;;  %v14611_v5 = vcombine.high %v846_v56, %v850_v57  ;;  %v726_v6 = vld [vmem:[%s16943_s17 + $0x898] sm:$0xff]  ;;  %v14610_v18 = vcombine.low %v846_v56, %v850_v57 }
 0x63c   : > { %v730_v8 = vld [vmem:[%s16943_s17 + $0x8b8] sm:$0xff] }
 0x63d   : > { %v854_v9 = vld [vmem:[%s16943_s17 + $0xc98] sm:$0xff]  ;;  %v14491_v20 = vcombine.high %v726_v6, %v730_v8 }
 0x63e   : > { %12952 = vmatpush1.bf16.msra.mxu0 %v14322_v12  ;;  %12993 = vmatpush1.bf16.msra.mxu1 %v14450_v24  ;;  %v858_v10 = vld [vmem:[%s16943_s17 + $0xcb8] sm:$0xff] }
 0x63f   : > { %12953 = vmatprep.subr.bf16.mxu0 %v14331_v26  ;;  %12994 = vmatprep.subr.bf16.mxu1 %v14459_v13  ;;  %v14619_v22 = vcombine.high %v854_v9, %v858_v10  ;;  %v734_v12 = vld [vmem:[%s16943_s17 + $0x8d8] sm:$0xff]  ;;  %v14618_v13 = vcombine.low %v854_v9, %v858_v10 }
 0x640   : > { %v738_v24 = vld [vmem:[%s16943_s17 + $0x8f8] sm:$0xff] }
 0x641   : > { %v866_v26 = vld [vmem:[%s16943_s17 + $0xcf8] sm:$0xff]  ;;  %v14499_v30 = vcombine.high %v734_v12, %v738_v24 }
 0x642   : > { %12954 = vmatpush1.bf16.msra.mxu0 %v14330_v36  ;;  %12995 = vmatpush1.bf16.msra.mxu1 %v14458_v39  ;;  %v742_v34 = vld [vmem:[%s16943_s17 + $0x918] sm:$0xff]  ;;  %v14498_v39 = vcombine.low %v734_v12, %v738_v24 }
 0x643   : > { %12955 = vmatprep.subr.bf16.mxu0 %v14339_v27  ;;  %12996 = vmatprep.subr.bf16.mxu1 %v14467_v42  ;;  %v746_v25 = vld [vmem:[%s16943_s17 + $0x938] sm:$0xff] }
 0x644   : > { %v870_v36 = vld [vmem:[%s16943_s17 + $0xd18] sm:$0xff]  ;;  %v14507_v27 = vcombine.high %v742_v34, %v746_v25 }
 0x645   : > { %v750_v44 = vld [vmem:[%s16943_s17 + $0x958] sm:$0xff] }
 0x646   : > { %12956 = vmatpush1.bf16.msra.mxu0 %v14338_v31  ;;  %12997 = vmatpush1.bf16.msra.mxu1 %v14466_v59  ;;  %v754_v23 = vld [vmem:[%s16943_s17 + $0x978] sm:$0xff]  ;;  %v14506_v31 = vcombine.low %v742_v34, %v746_v25 }
 0x647   : > { %13007 = vmatprep.subr.bf16.mxu0 %v14475_v54  ;;  %13048 = vmatprep.subr.bf16.mxu1 %v14603_v60  ;;  %v878_v38 = vld [vmem:[%s16943_s17 + $0xd58] sm:$0xff]  ;;  %v14515_v54 = vcombine.high %v750_v44, %v754_v23 }
 0x648   : > { %v882_v40 = vld [vmem:[%s16943_s17 + $0xd78] sm:$0xff] }
 0x649   : > { %12958 = vmatmul.mubr.bf16.vlgmr.msra.gmra.mrb[84].mxu0 %v17049_v17  ;;  %12999 = vmatmul.mubr.bf16.vlgmr.msra.gmra.mrb[84].mxu1 %v17054_v21  ;;  %v862_v17 = vld [vmem:[%s16943_s17 + $0xcd8] sm:$0xff]  ;;  %v14490_v21 = vcombine.low %v726_v6, %v730_v8  ;;  %v14643_v60 = vcombine.high %v878_v38, %v882_v40 }
 0x64a   : > { %13008 = vmatpush1.bf16.msra.mxu0 %v14474_v62  ;;  %13049 = vmatpush1.bf16.msra.mxu1 %v14602_v1  ;;  %v14627_v33 = vcombine.high %v862_v17, %v866_v26  ;;  %v758_v48 = vld [vmem:[%s16943_s17 + $0x998] sm:$0xff]  ;;  %v14514_v62 = vcombine.low %v750_v44, %v754_v23  ;;  %v14642_v1 = vcombine.low %v878_v38, %v882_v40 }
 0x64b   : > { %13009 = vmatprep.subr.bf16.mxu0 %v14483_v4  ;;  %13050 = vmatprep.subr.bf16.mxu1 %v14611_v5  ;;  %v762_v43 = vld [vmem:[%s16943_s17 + $0x9b8] sm:$0xff] }
 0x64c   : > { %13039 = vmatprep.mubr.bf16.mxu0 %v17059_v29  ;;  %13080 = vmatprep.mubr.bf16.mxu1 %v17064_v32  ;;  %v874_v29 = vld [vmem:[%s16943_s17 + $0xd38] sm:$0xff]  ;;  %v14626_v32 = vcombine.low %v862_v17, %v866_v26  ;;  %v14523_v4 = vcombine.high %v758_v48, %v762_v43  ;;  %v14522_v26 = vcombine.low %v758_v48, %v762_v43 }
 0x64d   : > { %v14635_v42 = vcombine.high %v870_v36, %v874_v29  ;;  %v14634_v59 = vcombine.low %v870_v36, %v874_v29  ;;  %v886_v56 = vld [vmem:[%s16943_s17 + $0xd98] sm:$0xff] }
 0x64e   : > { %13010 = vmatpush1.bf16.msra.mxu0 %v14482_v16  ;;  %13051 = vmatpush1.bf16.msra.mxu1 %v14610_v18  ;;  %v890_v57 = vld [vmem:[%s16943_s17 + $0xdb8] sm:$0xff] }
 0x64f   : > { %13011 = vmatprep.subr.bf16.mxu0 %v14491_v20  ;;  %13052 = vmatprep.subr.bf16.mxu1 %v14619_v22  ;;  %v14651_v6 = vcombine.high %v886_v56, %v890_v57  ;;  %v766_v8 = vld [vmem:[%s16943_s17 + $0x9d8] sm:$0xff] }
 0x650   : > { %v770_v9 = vld [vmem:[%s16943_s17 + $0x9f8] sm:$0xff] }
 0x651   : > { %v894_v20 = vld [vmem:[%s16943_s17 + $0xdd8] sm:$0xff] }
 0x652   : > { %13012 = vmatpush1.bf16.msra.mxu0 %v14490_v21  ;;  %13053 = vmatpush1.bf16.msra.mxu1 %v14618_v13  ;;  %v898_v22 = vld [vmem:[%s16943_s17 + $0xdf8] sm:$0xff] }
 0x653   : > { %13013 = vmatprep.subr.bf16.mxu0 %v14499_v30  ;;  %13054 = vmatprep.subr.bf16.mxu1 %v14627_v33  ;;  %v14531_v33 = vcombine.high %v766_v8, %v770_v9  ;;  %v14659_v25 = vcombine.high %v894_v20, %v898_v22  ;;  %v774_v36 = vld [vmem:[%s16943_s17 + $0xa18] sm:$0xff] }
 0x654   : > { %v778_v29 = vld [vmem:[%s16943_s17 + $0xa38] sm:$0xff] }
 0x655   : > { %v14539_v44 = vcombine.high %v774_v36, %v778_v29  ;;  %v782_v38 = vld [vmem:[%s16943_s17 + $0xa58] sm:$0xff] }
 0x656   : > { %13014 = vmatpush1.bf16.msra.mxu0 %v14498_v39  ;;  %13055 = vmatpush1.bf16.msra.mxu1 %v14626_v32  ;;  %v902_v39 = vld [vmem:[%s16943_s17 + $0xe18] sm:$0xff] }
 0x657   : > { %13015 = vmatprep.subr.bf16.mxu0 %v14507_v27  ;;  %13056 = vmatprep.subr.bf16.mxu1 %v14635_v42  ;;  %v906_v32 = vld [vmem:[%s16943_s17 + $0xe38] sm:$0xff]  ;;  %v14530_v27 = vcombine.low %v766_v8, %v770_v9  ;;  %v14658_v42 = vcombine.low %v894_v20, %v898_v22 }
 0x658   : > { %v14667_v23 = vcombine.high %v902_v39, %v906_v32  ;;  %v786_v40 = vld [vmem:[%s16943_s17 + $0xa78] sm:$0xff] }
 0x659   : > { %v14547_v48 = vcombine.high %v782_v38, %v786_v40  ;;  %v798_v9 = vld [vmem:[%s16943_s17 + $0xad8] sm:$0xff] }
 0x65a   : > { %13016 = vmatpush1.bf16.msra.mxu0 %v14506_v31  ;;  %13057 = vmatpush1.bf16.msra.mxu1 %v14634_v59  ;;  %v910_v31 = vld [vmem:[%s16943_s17 + $0xe58] sm:$0xff] }
 0x65b   : > { %13017 = vmatprep.subr.bf16.mxu0 %v14515_v54  ;;  %13058 = vmatprep.subr.bf16.mxu1 %v14643_v60  ;;  %v914_v59 = vld [vmem:[%s16943_s17 + $0xe78] sm:$0xff]  ;;  %v14538_v54 = vcombine.low %v774_v36, %v778_v29  ;;  %v14666_v60 = vcombine.low %v902_v39, %v906_v32 }
 0x65c   : > { %v12713_v5 = vpop.f32.mrb[72].mxu0  ;;  %v12754_v16 = vpop.f32.mrb[72].mxu1  ;;  %v14675_v43 = vcombine.high %v910_v31, %v914_v59  ;;  %v814_v36 = vld [vmem:[%s16943_s17 + $0xb58] sm:$0xff] }
 0x65d   : > { %v12714_v10 = vadd.f32 %v12713_v5, %v18605_v47  ;;  %v12715_v18 = vpop.f32.mrb[73].mxu0  ;;  %v12756_v24 = vpop.f32.mrb[73].mxu1  ;;  %v14650_v47 = vcombine.low %v886_v56, %v890_v57  ;;  %v790_v56 = vld [vmem:[%s16943_s17 + $0xa98] sm:$0xff]  ;;  %v14674_v5 = vcombine.low %v910_v31, %v914_v59 }
 0x65e   : > { %v12716_v12 = vadd.f32 %v12715_v18, %v18607_v53  ;;  %v12717_v17 = vpop.f32.mrb[74].mxu0  ;;  %13018 = vmatpush1.bf16.msra.mxu0 %v14514_v62  ;;  %v12758_v13 = vpop.f32.mrb[74].mxu1  ;;  %13059 = vmatpush1.bf16.msra.mxu1 %v14642_v1  ;;  %v794_v57 = vld [vmem:[%s16943_s17 + $0xab8] sm:$0xff] }
 0x65f   : > { %v18679_v21 = vadd.f32 %v12754_v16, %v12714_v10  ;;  %v12718_v30 = vpop.f32.mrb[75].mxu0  ;;  %13019 = vmatprep.subr.bf16.mxu0 %v14523_v4  ;;  %v12759_v53 = vpop.f32.mrb[75].mxu1  ;;  %13060 = vmatprep.subr.bf16.mxu1 %v14651_v6  ;;  %v918_v62 = vld [vmem:[%s16943_s17 + $0xe98] sm:$0xff]  ;;  %v14546_v4 = vcombine.low %v782_v38, %v786_v40  ;;  %v14555_v6 = vcombine.high %v790_v56, %v794_v57 }
 0x660   : > { %v18681_v34 = vadd.f32 %v12756_v24, %v12716_v12  ;;  %v922_v1 = vld [vmem:[%s16943_s17 + $0xeb8] sm:$0xff]  ;;  %v14554_v20 = vcombine.low %v790_v56, %v794_v57 }
 0x661   : > { %v14683_v8 = vcombine.high %v918_v62, %v922_v1  ;;  %v802_v10 = vld [vmem:[%s16943_s17 + $0xaf8] sm:$0xff]  ;;  %v14682_v22 = vcombine.low %v918_v62, %v922_v1 }
 0x662   : > { %13020 = vmatpush1.bf16.msra.mxu0 %v14522_v26  ;;  %13061 = vmatpush1.bf16.msra.mxu1 %v14650_v47  ;;  %v926_v16 = vld [vmem:[%s16943_s17 + $0xed8] sm:$0xff]  ;;  %v14563_v12 = vcombine.high %v798_v9, %v802_v10  ;;  %v14562_v47 = vcombine.low %v798_v9, %v802_v10 }
 0x663   : > { %13021 = vmatprep.subr.bf16.mxu0 %v14531_v33  ;;  %13062 = vmatprep.subr.bf16.mxu1 %v14659_v25  ;;  %v930_v18 = vld [vmem:[%s16943_s17 + $0xef8] sm:$0xff] }
 0x664   : > { %v14691_v24 = vcombine.high %v926_v16, %v930_v18  ;;  %v806_v17 = vld [vmem:[%s16943_s17 + $0xb18] sm:$0xff]  ;;  %v14690_v33 = vcombine.low %v926_v16, %v930_v18 }
 0x665   : > { %v810_v26 = vld [vmem:[%s16943_s17 + $0xb38] sm:$0xff] }
 0x666   : > { %13022 = vmatpush1.bf16.msra.mxu0 %v14530_v27  ;;  %13063 = vmatpush1.bf16.msra.mxu1 %v14658_v42  ;;  %v934_v13 = vld [vmem:[%s16943_s17 + $0xf18] sm:$0xff]  ;;  %v14571_v53 = vcombine.high %v806_v17, %v810_v26  ;;  %v14570_v27 = vcombine.low %v806_v17, %v810_v26 }
 0x667   : > { %13023 = vmatprep.subr.bf16.mxu0 %v14539_v44  ;;  %13064 = vmatprep.subr.bf16.mxu1 %v14667_v23  ;;  %v938_v30 = vld [vmem:[%s16943_s17 + $0xf38] sm:$0xff] }
 0x668   : > { %v14699_v25 = vcombine.high %v934_v13, %v938_v30  ;;  %v818_v29 = vld [vmem:[%s16943_s17 + $0xb78] sm:$0xff]  ;;  %v14698_v42 = vcombine.low %v934_v13, %v938_v30 }
 0x669   : > { %v942_v39 = vld [vmem:[%s16943_s17 + $0xf58] sm:$0xff]  ;;  %v14579_v44 = vcombine.high %v814_v36, %v818_v29 }
 0x66a   : > { %13024 = vmatpush1.bf16.msra.mxu0 %v14538_v54  ;;  %13065 = vmatpush1.bf16.msra.mxu1 %v14666_v60  ;;  %v946_v32 = vld [vmem:[%s16943_s17 + $0xf78] sm:$0xff]  ;;  %v14578_v54 = vcombine.low %v814_v36, %v818_v29 }
 0x66b   : > { %13025 = vmatprep.subr.bf16.mxu0 %v14547_v48  ;;  %13066 = vmatprep.subr.bf16.mxu1 %v14675_v43  ;;  %v14707_v23 = vcombine.high %v942_v39, %v946_v32  ;;  %v822_v38 = vld [vmem:[%s16943_s17 + $0xb98] sm:$0xff]  ;;  %v14706_v60 = vcombine.low %v942_v39, %v946_v32 }
 0x66c   : > { %v826_v40 = vld [vmem:[%s16943_s17 + $0xbb8] sm:$0xff] }
 0x66d   : > { %v950_v31 = vld [vmem:[%s16943_s17 + $0xf98] sm:$0xff]  ;;  %v14587_v48 = vcombine.high %v822_v38, %v826_v40 }
 0x66e   : > { %13026 = vmatpush1.bf16.msra.mxu0 %v14546_v4  ;;  %13067 = vmatpush1.bf16.msra.mxu1 %v14674_v5  ;;  %v954_v59 = vld [vmem:[%s16943_s17 + $0xfb8] sm:$0xff]  ;;  %v14586_v4 = vcombine.low %v822_v38, %v826_v40 }
 0x66f   : > { %13027 = vmatprep.subr.bf16.mxu0 %v14555_v6  ;;  %13068 = vmatprep.subr.bf16.mxu1 %v14683_v8  ;;  %v14715_v43 = vcombine.high %v950_v31, %v954_v59  ;;  %v830_v56 = vld [vmem:[%s16943_s17 + $0xbd8] sm:$0xff]  ;;  %v14714_v5 = vcombine.low %v950_v31, %v954_v59 }
 0x670   : > { %v834_v57 = vld [vmem:[%s16943_s17 + $0xbf8] sm:$0xff] }
 0x671   : > { %v958_v62 = vld [vmem:[%s16943_s17 + $0xfd8] sm:$0xff]  ;;  %v14595_v6 = vcombine.high %v830_v56, %v834_v57 }
 0x672   : > { %13028 = vmatpush1.bf16.msra.mxu0 %v14554_v20  ;;  %13069 = vmatpush1.bf16.msra.mxu1 %v14682_v22  ;;  %v962_v1 = vld [vmem:[%s16943_s17 + $0xff8] sm:$0xff]  ;;  %v14594_v20 = vcombine.low %v830_v56, %v834_v57 }
 0x673   : > { %13029 = vmatprep.subr.bf16.mxu0 %v14563_v12  ;;  %13070 = vmatprep.subr.bf16.mxu1 %v14691_v24  ;;  %v14723_v8 = vcombine.high %v958_v62, %v962_v1  ;;  %v966_v9 = vld [vmem:[%s16943_s17 + $0x1018] sm:$0xff]  ;;  %v14722_v22 = vcombine.low %v958_v62, %v962_v1 }
 0x674   : > { %v970_v10 = vld [vmem:[%s16943_s17 + $0x1038] sm:$0xff] }
 0x675   : > { %v1094_v16 = vld [vmem:[%s16943_s17 + $0x1418] sm:$0xff]  ;;  %v14731_v12 = vcombine.high %v966_v9, %v970_v10 }
 0x676   : > { %13030 = vmatpush1.bf16.msra.mxu0 %v14562_v47  ;;  %13071 = vmatpush1.bf16.msra.mxu1 %v14690_v33  ;;  %v1098_v18 = vld [vmem:[%s16943_s17 + $0x1438] sm:$0xff]  ;;  %v14730_v47 = vcombine.low %v966_v9, %v970_v10 }
 0x677   : > { %13031 = vmatprep.subr.bf16.mxu0 %v14571_v53  ;;  %13072 = vmatprep.subr.bf16.mxu1 %v14699_v25  ;;  %v14859_v24 = vcombine.high %v1094_v16, %v1098_v18  ;;  %v974_v17 = vld [vmem:[%s16943_s17 + $0x1058] sm:$0xff]  ;;  %v14858_v33 = vcombine.low %v1094_v16, %v1098_v18 }
 0x678   : > { %v978_v26 = vld [vmem:[%s16943_s17 + $0x1078] sm:$0xff] }
 0x679   : > { %v1102_v13 = vld [vmem:[%s16943_s17 + $0x1458] sm:$0xff]  ;;  %v14739_v53 = vcombine.high %v974_v17, %v978_v26 }
 0x67a   : > { %13032 = vmatpush1.bf16.msra.mxu0 %v14570_v27  ;;  %13073 = vmatpush1.bf16.msra.mxu1 %v14698_v42  ;;  %v1106_v30 = vld [vmem:[%s16943_s17 + $0x1478] sm:$0xff]  ;;  %v14738_v27 = vcombine.low %v974_v17, %v978_v26 }
 0x67b   : > { %13033 = vmatprep.subr.bf16.mxu0 %v14579_v44  ;;  %13074 = vmatprep.subr.bf16.mxu1 %v14707_v23  ;;  %v14867_v25 = vcombine.high %v1102_v13, %v1106_v30  ;;  %v982_v36 = vld [vmem:[%s16943_s17 + $0x1098] sm:$0xff]  ;;  %v14866_v42 = vcombine.low %v1102_v13, %v1106_v30 }
 0x67c   : > { %v986_v29 = vld [vmem:[%s16943_s17 + $0x10b8] sm:$0xff] }
 0x67d   : > { %v1110_v39 = vld [vmem:[%s16943_s17 + $0x1498] sm:$0xff]  ;;  %v14747_v44 = vcombine.high %v982_v36, %v986_v29 }
 0x67e   : > { %13034 = vmatpush1.bf16.msra.mxu0 %v14578_v54  ;;  %13075 = vmatpush1.bf16.msra.mxu1 %v14706_v60  ;;  %v1114_v32 = vld [vmem:[%s16943_s17 + $0x14b8] sm:$0xff] }
 0x67f   : > { %13035 = vmatprep.subr.bf16.mxu0 %v14587_v48  ;;  %13076 = vmatprep.subr.bf16.mxu1 %v14715_v43  ;;  %v14875_v23 = vcombine.high %v1110_v39, %v1114_v32  ;;  %v990_v38 = vld [vmem:[%s16943_s17 + $0x10d8] sm:$0xff]  ;;  %v14874_v59 = vcombine.low %v1110_v39, %v1114_v32 }
 0x680   : > { %v994_v40 = vld [vmem:[%s16943_s17 + $0x10f8] sm:$0xff] }
 0x681   : > { %v1122_v31 = vld [vmem:[%s16943_s17 + $0x14f8] sm:$0xff]  ;;  %v14755_v54 = vcombine.high %v990_v38, %v994_v40  ;;  %v14754_v57 = vcombine.low %v990_v38, %v994_v40 }
 0x682   : > { %13036 = vmatpush1.bf16.msra.mxu0 %v14586_v4  ;;  %13077 = vmatpush1.bf16.msra.mxu1 %v14714_v5  ;;  %v998_v48 = vld [vmem:[%s16943_s17 + $0x1118] sm:$0xff] }
 0x683   : > { %13037 = vmatprep.subr.bf16.mxu0 %v14595_v6  ;;  %13078 = vmatprep.subr.bf16.mxu1 %v14723_v8  ;;  %v1002_v43 = vld [vmem:[%s16943_s17 + $0x1138] sm:$0xff] }
 0x684   : > { %v1126_v56 = vld [vmem:[%s16943_s17 + $0x1518] sm:$0xff]  ;;  %v14763_v62 = vcombine.high %v998_v48, %v1002_v43  ;;  %v14762_v9 = vcombine.low %v998_v48, %v1002_v43 }
 0x685   : > { %v1006_v4 = vld [vmem:[%s16943_s17 + $0x1158] sm:$0xff] }
 0x686   : > { %13038 = vmatpush1.bf16.msra.mxu0 %v14594_v20  ;;  %13079 = vmatpush1.bf16.msra.mxu1 %v14722_v22  ;;  %v1010_v5 = vld [vmem:[%s16943_s17 + $0x1178] sm:$0xff] }
 0x687   : > { %13089 = vmatprep.subr.bf16.mxu0 %v14731_v12  ;;  %13130 = vmatprep.subr.bf16.mxu1 %v14859_v24  ;;  %v1134_v6 = vld [vmem:[%s16943_s17 + $0x1558] sm:$0xff]  ;;  %v14771_v16 = vcombine.high %v1006_v4, %v1010_v5  ;;  %v14770_v17 = vcombine.low %v1006_v4, %v1010_v5 }
 0x688   : > { %v1138_v8 = vld [vmem:[%s16943_s17 + $0x1578] sm:$0xff] }
 0x689   : > { %13040 = vmatmul.mubr.bf16.vlgmr.msra.gmra.mrb[88].mxu0 %v17129_v37  ;;  %13081 = vmatmul.mubr.bf16.vlgmr.msra.gmra.mrb[88].mxu1 %v17134_v41  ;;  %v1118_v37 = vld [vmem:[%s16943_s17 + $0x14d8] sm:$0xff]  ;;  %v14746_v41 = vcombine.low %v982_v36, %v986_v29  ;;  %v14899_v18 = vcombine.high %v1134_v6, %v1138_v8  ;;  %v14898_v26 = vcombine.low %v1134_v6, %v1138_v8 }
 0x68a   : > { %13090 = vmatpush1.bf16.msra.mxu0 %v14730_v47  ;;  %13131 = vmatpush1.bf16.msra.mxu1 %v14858_v33  ;;  %v14883_v60 = vcombine.high %v1118_v37, %v1122_v31  ;;  %v1014_v20 = vld [vmem:[%s16943_s17 + $0x1198] sm:$0xff] }
 0x68b   : > { %13091 = vmatprep.subr.bf16.mxu0 %v14739_v53  ;;  %13132 = vmatprep.subr.bf16.mxu1 %v14867_v25  ;;  %v1018_v22 = vld [vmem:[%s16943_s17 + $0x11b8] sm:$0xff] }
 0x68c   : > { %13121 = vmatprep.mubr.bf16.mxu0 %v17139_v49  ;;  %13162 = vmatprep.mubr.bf16.mxu1 %v17144_v52  ;;  %v1130_v49 = vld [vmem:[%s16943_s17 + $0x1538] sm:$0xff]  ;;  %v14882_v52 = vcombine.low %v1118_v37, %v1122_v31  ;;  %v14779_v13 = vcombine.high %v1014_v20, %v1018_v22 }
 0x68d   : > { %v14891_v1 = vcombine.high %v1126_v56, %v1130_v49  ;;  %v14890_v10 = vcombine.low %v1126_v56, %v1130_v49  ;;  %v1142_v12 = vld [vmem:[%s16943_s17 + $0x1598] sm:$0xff] }
 0x68e   : > { %13092 = vmatpush1.bf16.msra.mxu0 %v14738_v27  ;;  %13133 = vmatpush1.bf16.msra.mxu1 %v14866_v42  ;;  %v1146_v24 = vld [vmem:[%s16943_s17 + $0x15b8] sm:$0xff] }
 0x68f   : > { %13093 = vmatprep.subr.bf16.mxu0 %v14747_v44  ;;  %13134 = vmatprep.subr.bf16.mxu1 %v14875_v23  ;;  %v14907_v47 = vcombine.high %v1142_v12, %v1146_v24  ;;  %v1022_v33 = vld [vmem:[%s16943_s17 + $0x11d8] sm:$0xff]  ;;  %v14778_v23 = vcombine.low %v1014_v20, %v1018_v22 }
 0x690   : > { %v1026_v53 = vld [vmem:[%s16943_s17 + $0x11f8] sm:$0xff] }
 0x691   : > { %v1150_v39 = vld [vmem:[%s16943_s17 + $0x15d8] sm:$0xff]  ;;  %v14787_v31 = vcombine.high %v1022_v33, %v1026_v53  ;;  %v14786_v56 = vcombine.low %v1022_v33, %v1026_v53 }
 0x692   : > { %13094 = vmatpush1.bf16.msra.mxu0 %v14746_v41  ;;  %13135 = vmatpush1.bf16.msra.mxu1 %v14874_v59  ;;  %v1154_v32 = vld [vmem:[%s16943_s17 + $0x15f8] sm:$0xff] }
 0x693   : > { %13095 = vmatprep.subr.bf16.mxu0 %v14755_v54  ;;  %13136 = vmatprep.subr.bf16.mxu1 %v14883_v60  ;;  %v14915_v59 = vcombine.high %v1150_v39, %v1154_v32  ;;  %v1030_v54 = vld [vmem:[%s16943_s17 + $0x1218] sm:$0xff]  ;;  %v14914_v49 = vcombine.low %v1150_v39, %v1154_v32 }
 0x694   : > { %v1034_v60 = vld [vmem:[%s16943_s17 + $0x1238] sm:$0xff] }
 0x695   : > { %v1158_v48 = vld [vmem:[%s16943_s17 + $0x1618] sm:$0xff]  ;;  %v14794_v6 = vcombine.low %v1030_v54, %v1034_v60 }
 0x696   : > { %13096 = vmatpush1.bf16.msra.mxu0 %v14754_v57  ;;  %13137 = vmatpush1.bf16.msra.mxu1 %v14882_v52  ;;  %v1162_v43 = vld [vmem:[%s16943_s17 + $0x1638] sm:$0xff]  ;;  %v14795_v57 = vcombine.high %v1030_v54, %v1034_v60 }
 0x697   : > { %13097 = vmatprep.subr.bf16.mxu0 %v14763_v62  ;;  %13138 = vmatprep.subr.bf16.mxu1 %v14891_v1  ;;  %v14923_v52 = vcombine.high %v1158_v48, %v1162_v43  ;;  %v1038_v62 = vld [vmem:[%s16943_s17 + $0x1258] sm:$0xff]  ;;  %v14922_v8 = vcombine.low %v1158_v48, %v1162_v43 }
 0x698   : > { %v1042_v1 = vld [vmem:[%s16943_s17 + $0x1278] sm:$0xff] }
 0x699   : > { %v1166_v4 = vld [vmem:[%s16943_s17 + $0x1658] sm:$0xff] }
 0x69a   : > { %13098 = vmatpush1.bf16.msra.mxu0 %v14762_v9  ;;  %13139 = vmatpush1.bf16.msra.mxu1 %v14890_v10  ;;  %v1170_v5 = vld [vmem:[%s16943_s17 + $0x1678] sm:$0xff]  ;;  %v14803_v9 = vcombine.high %v1038_v62, %v1042_v1 }
 0x69b   : > { %13099 = vmatprep.subr.bf16.mxu0 %v14771_v16  ;;  %13140 = vmatprep.subr.bf16.mxu1 %v14899_v18  ;;  %v14931_v10 = vcombine.high %v1166_v4, %v1170_v5  ;;  %v1046_v16 = vld [vmem:[%s16943_s17 + $0x1298] sm:$0xff] }
 0x69c   : > { %v12795_v30 = vpop.f32.mrb[76].mxu0  ;;  %v12836_v36 = vpop.f32.mrb[76].mxu1  ;;  %v1050_v18 = vld [vmem:[%s16943_s17 + $0x12b8] sm:$0xff] }
 0x69d   : > { %v12796_v25 = vadd.f32 %v12795_v30, %v18679_v21  ;;  %v12797_v29 = vpop.f32.mrb[77].mxu0  ;;  %v12838_v42 = vpop.f32.mrb[77].mxu1  ;;  %v14906_v21 = vcombine.low %v1142_v12, %v1146_v24  ;;  %v1174_v20 = vld [vmem:[%s16943_s17 + $0x1698] sm:$0xff]  ;;  %v14802_v12 = vcombine.low %v1038_v62, %v1042_v1  ;;  %v14930_v24 = vcombine.low %v1166_v4, %v1170_v5 }
 0x69e   : > { %v12798_v27 = vadd.f32 %v12797_v29, %v18681_v34  ;;  %v12799_v44 = vpop.f32.mrb[78].mxu0  ;;  %13100 = vmatpush1.bf16.msra.mxu0 %v14770_v17  ;;  %v12840_v40 = vpop.f32.mrb[78].mxu1  ;;  %13141 = vmatpush1.bf16.msra.mxu1 %v14898_v26  ;;  %v1178_v22 = vld [vmem:[%s16943_s17 + $0x16b8] sm:$0xff]  ;;  %v14811_v17 = vcombine.high %v1046_v16, %v1050_v18  ;;  %v14810_v53 = vcombine.low %v1046_v16, %v1050_v18 }
 0x69f   : > { %v18753_v38 = vadd.f32 %v12836_v36, %v12796_v25  ;;  %v12800_v37 = vpop.f32.mrb[79].mxu0  ;;  %13101 = vmatprep.subr.bf16.mxu0 %v14779_v13  ;;  %v12841_v34 = vpop.f32.mrb[79].mxu1  ;;  %13142 = vmatprep.subr.bf16.mxu1 %v14907_v47  ;;  %v14939_v26 = vcombine.high %v1174_v20, %v1178_v22  ;;  %v1054_v13 = vld [vmem:[%s16943_s17 + $0x12d8] sm:$0xff]  ;;  %v14938_v25 = vcombine.low %v1174_v20, %v1178_v22 }
 0x6a0   : > { %v18755_v41 = vadd.f32 %v12838_v42, %v12798_v27  ;;  %v1058_v30 = vld [vmem:[%s16943_s17 + $0x12f8] sm:$0xff] }
 0x6a1   : > { %v1182_v47 = vld [vmem:[%s16943_s17 + $0x16d8] sm:$0xff]  ;;  %v14819_v36 = vcombine.high %v1054_v13, %v1058_v30  ;;  %v14818_v44 = vcombine.low %v1054_v13, %v1058_v30 }
 0x6a2   : > { %13102 = vmatpush1.bf16.msra.mxu0 %v14778_v23  ;;  %13143 = vmatpush1.bf16.msra.mxu1 %v14906_v21  ;;  %v1186_v33 = vld [vmem:[%s16943_s17 + $0x16f8] sm:$0xff] }
 0x6a3   : > { %13103 = vmatprep.subr.bf16.mxu0 %v14787_v31  ;;  %13144 = vmatprep.subr.bf16.mxu1 %v14915_v59  ;;  %v14947_v29 = vcombine.high %v1182_v47, %v1186_v33  ;;  %v1062_v39 = vld [vmem:[%s16943_s17 + $0x1318] sm:$0xff]  ;;  %v14946_v23 = vcombine.low %v1182_v47, %v1186_v33 }
 0x6a4   : > { %v1066_v32 = vld [vmem:[%s16943_s17 + $0x1338] sm:$0xff] }
 0x6a5   : > { %v1190_v27 = vld [vmem:[%s16943_s17 + $0x1718] sm:$0xff]  ;;  %v14827_v40 = vcombine.high %v1062_v39, %v1066_v32  ;;  %v14826_v54 = vcombine.low %v1062_v39, %v1066_v32 }
 0x6a6   : > { %13104 = vmatpush1.bf16.msra.mxu0 %v14786_v56  ;;  %13145 = vmatpush1.bf16.msra.mxu1 %v14914_v49  ;;  %v1194_v42 = vld [vmem:[%s16943_s17 + $0x1738] sm:$0xff] }
 0x6a7   : > { %13105 = vmatprep.subr.bf16.mxu0 %v14795_v57  ;;  %13146 = vmatprep.subr.bf16.mxu1 %v14923_v52  ;;  %v14955_v37 = vcombine.high %v1190_v27, %v1194_v42  ;;  %v1070_v21 = vld [vmem:[%s16943_s17 + $0x1358] sm:$0xff]  ;;  %v14954_v60 = vcombine.low %v1190_v27, %v1194_v42 }
 0x6a8   : > { %v1074_v31 = vld [vmem:[%s16943_s17 + $0x1378] sm:$0xff] }
 0x6a9   : > { %v1198_v34 = vld [vmem:[%s16943_s17 + $0x1758] sm:$0xff]  ;;  %v14835_v48 = vcombine.high %v1070_v21, %v1074_v31  ;;  %v14834_v62 = vcombine.low %v1070_v21, %v1074_v31 }
 0x6aa   : > { %13106 = vmatpush1.bf16.msra.mxu0 %v14794_v6  ;;  %13147 = vmatpush1.bf16.msra.mxu1 %v14922_v8  ;;  %v1202_v59 = vld [vmem:[%s16943_s17 + $0x1778] sm:$0xff] }
 0x6ab   : > { %13107 = vmatprep.subr.bf16.mxu0 %v14803_v9  ;;  %13148 = vmatprep.subr.bf16.mxu1 %v14931_v10  ;;  %v14963_v43 = vcombine.high %v1198_v34, %v1202_v59  ;;  %v1078_v56 = vld [vmem:[%s16943_s17 + $0x1398] sm:$0xff]  ;;  %v14962_v1 = vcombine.low %v1198_v34, %v1202_v59 }
 0x6ac   : > { %v1082_v49 = vld [vmem:[%s16943_s17 + $0x13b8] sm:$0xff] }
 0x6ad   : > { %v1206_v57 = vld [vmem:[%s16943_s17 + $0x1798] sm:$0xff]  ;;  %v14843_v4 = vcombine.high %v1078_v56, %v1082_v49  ;;  %v14842_v16 = vcombine.low %v1078_v56, %v1082_v49 }
 0x6ae   : > { %13108 = vmatpush1.bf16.msra.mxu0 %v14802_v12  ;;  %13149 = vmatpush1.bf16.msra.mxu1 %v14930_v24  ;;  %v1210_v52 = vld [vmem:[%s16943_s17 + $0x17b8] sm:$0xff] }
 0x6af   : > { %13109 = vmatprep.subr.bf16.mxu0 %v14811_v17  ;;  %13150 = vmatprep.subr.bf16.mxu1 %v14939_v26  ;;  %v14971_v5 = vcombine.high %v1206_v57, %v1210_v52  ;;  %v1086_v6 = vld [vmem:[%s16943_s17 + $0x13d8] sm:$0xff]  ;;  %v14970_v18 = vcombine.low %v1206_v57, %v1210_v52 }
 0x6b0   : > { %v1090_v8 = vld [vmem:[%s16943_s17 + $0x13f8] sm:$0xff] }
 0x6b1   : > { %v1214_v9 = vld [vmem:[%s16943_s17 + $0x17d8] sm:$0xff]  ;;  %v14851_v20 = vcombine.high %v1086_v6, %v1090_v8  ;;  %v14850_v13 = vcombine.low %v1086_v6, %v1090_v8 }
 0x6b2   : > { %13110 = vmatpush1.bf16.msra.mxu0 %v14810_v53  ;;  %13151 = vmatpush1.bf16.msra.mxu1 %v14938_v25  ;;  %v1218_v10 = vld [vmem:[%s16943_s17 + $0x17f8] sm:$0xff] }
 0x6b3   : > { %13111 = vmatprep.subr.bf16.mxu0 %v14819_v36  ;;  %13152 = vmatprep.subr.bf16.mxu1 %v14947_v29  ;;  %v14979_v22 = vcombine.high %v1214_v9, %v1218_v10  ;;  %v1222_v12 = vld [vmem:[%s16943_s17 + $0x1818] sm:$0xff]  ;;  %v14978_v30 = vcombine.low %v1214_v9, %v1218_v10 }
 0x6b4   : > { %v1226_v24 = vld [vmem:[%s16943_s17 + $0x1838] sm:$0xff] }
 0x6b5   : > { %v1350_v17 = vld [vmem:[%s16943_s17 + $0x1c18] sm:$0xff]  ;;  %v14987_v47 = vcombine.high %v1222_v12, %v1226_v24  ;;  %v14986_v39 = vcombine.low %v1222_v12, %v1226_v24 }
 0x6b6   : > { %13112 = vmatpush1.bf16.msra.mxu0 %v14818_v44  ;;  %13153 = vmatpush1.bf16.msra.mxu1 %v14946_v23  ;;  %v1354_v26 = vld [vmem:[%s16943_s17 + $0x1c38] sm:$0xff] }
 0x6b7   : > { %13113 = vmatprep.subr.bf16.mxu0 %v14827_v40  ;;  %13154 = vmatprep.subr.bf16.mxu1 %v14955_v37  ;;  %v15115_v33 = vcombine.high %v1350_v17, %v1354_v26  ;;  %v1230_v53 = vld [vmem:[%s16943_s17 + $0x1858] sm:$0xff]  ;;  %v15114_v32 = vcombine.low %v1350_v17, %v1354_v26 }
 0x6b8   : > { %v1234_v25 = vld [vmem:[%s16943_s17 + $0x1878] sm:$0xff] }
 0x6b9   : > { %v1358_v36 = vld [vmem:[%s16943_s17 + $0x1c58] sm:$0xff]  ;;  %v14995_v27 = vcombine.high %v1230_v53, %v1234_v25  ;;  %v14994_v21 = vcombine.low %v1230_v53, %v1234_v25 }
 0x6ba   : > { %13114 = vmatpush1.bf16.msra.mxu0 %v14826_v54  ;;  %13155 = vmatpush1.bf16.msra.mxu1 %v14954_v60  ;;  %v1362_v29 = vld [vmem:[%s16943_s17 + $0x1c78] sm:$0xff] }
 0x6bb   : > { %13115 = vmatprep.subr.bf16.mxu0 %v14835_v48  ;;  %13156 = vmatprep.subr.bf16.mxu1 %v14963_v43  ;;  %v15123_v42 = vcombine.high %v1358_v36, %v1362_v29  ;;  %v1238_v44 = vld [vmem:[%s16943_s17 + $0x1898] sm:$0xff]  ;;  %v15122_v31 = vcombine.low %v1358_v36, %v1362_v29 }
 0x6bc   : > { %v1242_v23 = vld [vmem:[%s16943_s17 + $0x18b8] sm:$0xff] }
 0x6bd   : > { %v1366_v40 = vld [vmem:[%s16943_s17 + $0x1c98] sm:$0xff]  ;;  %v15003_v34 = vcombine.high %v1238_v44, %v1242_v23 }
 0x6be   : > { %13116 = vmatpush1.bf16.msra.mxu0 %v14834_v62  ;;  %13157 = vmatpush1.bf16.msra.mxu1 %v14962_v1  ;;  %v1370_v37 = vld [vmem:[%s16943_s17 + $0x1cb8] sm:$0xff] }
 0x6bf   : > { %13117 = vmatprep.subr.bf16.mxu0 %v14843_v4  ;;  %13158 = vmatprep.subr.bf16.mxu1 %v14971_v5  ;;  %v15131_v59 = vcombine.high %v1366_v40, %v1370_v37  ;;  %v1246_v54 = vld [vmem:[%s16943_s17 + $0x18d8] sm:$0xff]  ;;  %v15130_v43 = vcombine.low %v1366_v40, %v1370_v37 }
 0x6c0   : > { %v1250_v60 = vld [vmem:[%s16943_s17 + $0x18f8] sm:$0xff] }
 0x6c1   : > { %v1378_v48 = vld [vmem:[%s16943_s17 + $0x1cf8] sm:$0xff]  ;;  %v15011_v56 = vcombine.high %v1246_v54, %v1250_v60  ;;  %v15010_v1 = vcombine.low %v1246_v54, %v1250_v60 }
 0x6c2   : > { %13118 = vmatpush1.bf16.msra.mxu0 %v14842_v16  ;;  %13159 = vmatpush1.bf16.msra.mxu1 %v14970_v18  ;;  %v1254_v57 = vld [vmem:[%s16943_s17 + $0x1918] sm:$0xff] }
 0x6c3   : > { %13119 = vmatprep.subr.bf16.mxu0 %v14851_v20  ;;  %13160 = vmatprep.subr.bf16.mxu1 %v14979_v22  ;;  %v1258_v52 = vld [vmem:[%s16943_s17 + $0x1938] sm:$0xff] }
 0x6c4   : > { %v1382_v62 = vld [vmem:[%s16943_s17 + $0x1d18] sm:$0xff]  ;;  %v15019_v4 = vcombine.high %v1254_v57, %v1258_v52  ;;  %v15018_v16 = vcombine.low %v1254_v57, %v1258_v52 }
 0x6c5   : > { %v1262_v6 = vld [vmem:[%s16943_s17 + $0x1958] sm:$0xff] }
 0x6c6   : > { %13120 = vmatpush1.bf16.msra.mxu0 %v14850_v13  ;;  %13161 = vmatpush1.bf16.msra.mxu1 %v14978_v30  ;;  %v1266_v8 = vld [vmem:[%s16943_s17 + $0x1978] sm:$0xff] }
 0x6c7   : > { %13171 = vmatprep.subr.bf16.mxu0 %v14987_v47  ;;  %13212 = vmatprep.subr.bf16.mxu1 %v15115_v33  ;;  %v1390_v9 = vld [vmem:[%s16943_s17 + $0x1d58] sm:$0xff]  ;;  %v15027_v20 = vcombine.high %v1262_v6, %v1266_v8  ;;  %v15026_v13 = vcombine.low %v1262_v6, %v1266_v8 }
 0x6c8   : > { %v1394_v10 = vld [vmem:[%s16943_s17 + $0x1d78] sm:$0xff] }
 0x6c9   : > { %13122 = vmatmul.mubr.bf16.vlgmr.msra.gmra.mrb[92].mxu0 %v17209_v3  ;;  %13163 = vmatmul.mubr.bf16.vlgmr.msra.gmra.mrb[92].mxu1 %v17214_v7  ;;  %v1374_v3 = vld [vmem:[%s16943_s17 + $0x1cd8] sm:$0xff]  ;;  %v15002_v7 = vcombine.low %v1238_v44, %v1242_v23  ;;  %v15155_v22 = vcombine.high %v1390_v9, %v1394_v10  ;;  %v15154_v30 = vcombine.low %v1390_v9, %v1394_v10  ;;  %v391_v44 = vld [vmem:[#allocation2 + $0x20] sm:$0xff] }
 0x6ca   : > { %13172 = vmatpush1.bf16.msra.mxu0 %v14986_v39  ;;  %13213 = vmatpush1.bf16.msra.mxu1 %v15114_v32  ;;  %v15139_v49 = vcombine.high %v1374_v3, %v1378_v48  ;;  %v1270_v12 = vld [vmem:[%s16943_s17 + $0x1998] sm:$0xff] }
 0x6cb   : > { %13173 = vmatprep.subr.bf16.mxu0 %v14995_v27  ;;  %13214 = vmatprep.subr.bf16.mxu1 %v15123_v42  ;;  %v1274_v24 = vld [vmem:[%s16943_s17 + $0x19b8] sm:$0xff] }
 0x6cc   : > { %13203 = vmatprep.mubr.bf16.mxu0 %v17219_v15  ;;  %13244 = vmatprep.mubr.bf16.mxu1 %v17224_v19  ;;  %v1386_v15 = vld [vmem:[%s16943_s17 + $0x1d38] sm:$0xff]  ;;  %v15138_v19 = vcombine.low %v1374_v3, %v1378_v48  ;;  %v15035_v47 = vcombine.high %v1270_v12, %v1274_v24 }
 0x6cd   : > { %v15147_v5 = vcombine.high %v1382_v62, %v1386_v15  ;;  %v15146_v18 = vcombine.low %v1382_v62, %v1386_v15  ;;  %v1398_v17 = vld [vmem:[%s16943_s17 + $0x1d98] sm:$0xff] }
 0x6ce   : > { %13174 = vmatpush1.bf16.msra.mxu0 %v14994_v21  ;;  %13215 = vmatpush1.bf16.msra.mxu1 %v15122_v31  ;;  %v1402_v26 = vld [vmem:[%s16943_s17 + $0x1db8] sm:$0xff]  ;;  %v15034_v21 = vcombine.low %v1270_v12, %v1274_v24 }
 0x6cf   : > { %13175 = vmatprep.subr.bf16.mxu0 %v15003_v34  ;;  %13216 = vmatprep.subr.bf16.mxu1 %v15131_v59  ;;  %v15163_v53 = vcombine.high %v1398_v17, %v1402_v26  ;;  %v1278_v25 = vld [vmem:[%s16943_s17 + $0x19d8] sm:$0xff]  ;;  %v392_v34 = vld [vmem:[#allocation2 + $0x28] sm:$0xff]  ;;  %v15162_v54 = vcombine.low %v1398_v17, %v1402_v26 }
 0x6d0   : > { %v1282_v36 = vld [vmem:[%s16943_s17 + $0x19f8] sm:$0xff] }
 0x6d1   : > { %v1406_v27 = vld [vmem:[%s16943_s17 + $0x1dd8] sm:$0xff]  ;;  %v15043_v60 = vcombine.high %v1278_v25, %v1282_v36  ;;  %v15042_v62 = vcombine.low %v1278_v25, %v1282_v36 }
 0x6d2   : > { %13176 = vmatpush1.bf16.msra.mxu0 %v15002_v7  ;;  %13217 = vmatpush1.bf16.msra.mxu1 %v15130_v43  ;;  %v1410_v42 = vld [vmem:[%s16943_s17 + $0x1df8] sm:$0xff] }
 0x6d3   : > { %13177 = vmatprep.subr.bf16.mxu0 %v15011_v56  ;;  %13218 = vmatprep.subr.bf16.mxu1 %v15139_v49  ;;  %v1286_v7 = vld [vmem:[%s16943_s17 + $0x1a18] sm:$0xff]  ;;  %v15170_v15 = vcombine.low %v1406_v27, %v1410_v42 }
 0x6d4   : > { %v1290_v43 = vld [vmem:[%s16943_s17 + $0x1a38] sm:$0xff] }
 0x6d5   : > { %v1414_v49 = vld [vmem:[%s16943_s17 + $0x1e18] sm:$0xff]  ;;  %v15050_v9 = vcombine.low %v1286_v7, %v1290_v43 }
 0x6d6   : > { %13178 = vmatpush1.bf16.msra.mxu0 %v15010_v1  ;;  %13219 = vmatpush1.bf16.msra.mxu1 %v15138_v19  ;;  %v1418_v57 = vld [vmem:[%s16943_s17 + $0x1e38] sm:$0xff]  ;;  %v15051_v1 = vcombine.high %v1286_v7, %v1290_v43 }
 0x6d7   : > { %13179 = vmatprep.subr.bf16.mxu0 %v15019_v4  ;;  %13220 = vmatprep.subr.bf16.mxu1 %v15147_v5  ;;  %v15179_v19 = vcombine.high %v1414_v49, %v1418_v57  ;;  %v1294_v4 = vld [vmem:[%s16943_s17 + $0x1a58] sm:$0xff]  ;;  %v15178_v10 = vcombine.low %v1414_v49, %v1418_v57 }
 0x6d8   : > { %v1298_v5 = vld [vmem:[%s16943_s17 + $0x1a78] sm:$0xff] }
 0x6d9   : > { %v1422_v6 = vld [vmem:[%s16943_s17 + $0x1e58] sm:$0xff]  ;;  %v15058_v17 = vcombine.low %v1294_v4, %v1298_v5 }
 0x6da   : > { %13180 = vmatpush1.bf16.msra.mxu0 %v15018_v16  ;;  %13221 = vmatpush1.bf16.msra.mxu1 %v15146_v18  ;;  %v1426_v8 = vld [vmem:[%s16943_s17 + $0x1e78] sm:$0xff]  ;;  %v15059_v16 = vcombine.high %v1294_v4, %v1298_v5 }
 0x6db   : > { %13181 = vmatprep.subr.bf16.mxu0 %v15027_v20  ;;  %13222 = vmatprep.subr.bf16.mxu1 %v15155_v22  ;;  %v15187_v18 = vcombine.high %v1422_v6, %v1426_v8  ;;  %v1302_v20 = vld [vmem:[%s16943_s17 + $0x1a98] sm:$0xff]  ;;  %v15186_v26 = vcombine.low %v1422_v6, %v1426_v8 }
 0x6dc   : > { %v12877_v33 = vpop.f32.mrb[80].mxu0  ;;  %v12918_v39 = vpop.f32.mrb[80].mxu1  ;;  %v1306_v22 = vld [vmem:[%s16943_s17 + $0x1ab8] sm:$0xff] }
 0x6dd   : > { %v12878_v29 = vadd.f32 %v12877_v33, %v18753_v38  ;;  %v12879_v32 = vpop.f32.mrb[81].mxu0  ;;  %v12920_v40 = vpop.f32.mrb[81].mxu1  ;;  %v1430_v12 = vld [vmem:[%s16943_s17 + $0x1e98] sm:$0xff]  ;;  %v15066_v36 = vcombine.low %v1302_v20, %v1306_v22 }
 0x6de   : > { %v12880_v23 = vadd.f32 %v12879_v32, %v18755_v41  ;;  %v12881_v37 = vpop.f32.mrb[82].mxu0  ;;  %13182 = vmatpush1.bf16.msra.mxu0 %v15026_v13  ;;  %v12922_v59 = vpop.f32.mrb[82].mxu1  ;;  %13223 = vmatpush1.bf16.msra.mxu1 %v15154_v30  ;;  %v15171_v41 = vcombine.high %v1406_v27, %v1410_v42  ;;  %v1434_v24 = vld [vmem:[%s16943_s17 + $0x1eb8] sm:$0xff]  ;;  %v15067_v13 = vcombine.high %v1302_v20, %v1306_v22 }
 0x6df   : > { %v12919_v31 = vadd.f32 %v12918_v39, %v12878_v29  ;;  %v12882_v38 = vpop.f32.mrb[83].mxu0  ;;  %13183 = vmatprep.subr.bf16.mxu0 %v15035_v47  ;;  %v12923_v48 = vpop.f32.mrb[83].mxu1  ;;  %13224 = vmatprep.subr.bf16.mxu1 %v15163_v53  ;;  %v15195_v30 = vcombine.high %v1430_v12, %v1434_v24  ;;  %v1310_v47 = vld [vmem:[%s16943_s17 + $0x1ad8] sm:$0xff]  ;;  %v15194_v29 = vcombine.low %v1430_v12, %v1434_v24 }
 0x6e0   : > { %v12921_v3 = vadd.f32 %v12920_v40, %v12880_v23  ;;  %v1314_v33 = vld [vmem:[%s16943_s17 + $0x1af8] sm:$0xff] }
 0x6e1   : > { %v13503_v56 = vadd.f32 %v12919_v31, %v391_v44  ;;  %v1438_v53 = vld [vmem:[%s16943_s17 + $0x1ed8] sm:$0xff]  ;;  %v15075_v39 = vcombine.high %v1310_v47, %v1314_v33  ;;  %v15074_v40 = vcombine.low %v1310_v47, %v1314_v33 }
 0x6e2   : > { %v13504_v52 = vadd.f32 %v12921_v3, %v392_v34  ;;  %13184 = vmatpush1.bf16.msra.mxu0 %v15034_v21  ;;  %13225 = vmatpush1.bf16.msra.mxu1 %v15162_v54  ;;  %v1442_v25 = vld [vmem:[%s16943_s17 + $0x1ef8] sm:$0xff] }
 0x6e3   : > { %13511 = vst [vmem:[#allocation2 + $0x20] sm:$0xff] %v13503_v56  ;;  %13185 = vmatprep.subr.bf16.mxu0 %v15043_v60  ;;  %13226 = vmatprep.subr.bf16.mxu1 %v15171_v41  ;;  %v15203_v32 = vcombine.high %v1438_v53, %v1442_v25  ;;  %v1318_v27 = vld [vmem:[%s16943_s17 + $0x1b18] sm:$0xff]  ;;  %v15202_v37 = vcombine.low %v1438_v53, %v1442_v25 }
 0x6e4   : > { %13512 = vst [vmem:[#allocation2 + $0x28] sm:$0xff] %v13504_v52  ;;  %v1322_v42 = vld [vmem:[%s16943_s17 + $0x1b38] sm:$0xff] }
 0x6e5   : > { %v1446_v44 = vld [vmem:[%s16943_s17 + $0x1f18] sm:$0xff]  ;;  %v15083_v21 = vcombine.high %v1318_v27, %v1322_v42  ;;  %v15082_v60 = vcombine.low %v1318_v27, %v1322_v42 }
 0x6e6   : > { %13186 = vmatpush1.bf16.msra.mxu0 %v15042_v62  ;;  %13227 = vmatpush1.bf16.msra.mxu1 %v15170_v15  ;;  %v1450_v23 = vld [vmem:[%s16943_s17 + $0x1f38] sm:$0xff] }
 0x6e7   : > { %13187 = vmatprep.subr.bf16.mxu0 %v15051_v1  ;;  %13228 = vmatprep.subr.bf16.mxu1 %v15179_v19  ;;  %v15211_v31 = vcombine.high %v1446_v44, %v1450_v23  ;;  %v1326_v34 = vld [vmem:[%s16943_s17 + $0x1b58] sm:$0xff]  ;;  %v15210_v3 = vcombine.low %v1446_v44, %v1450_v23 }
 0x6e8   : > { %v1330_v59 = vld [vmem:[%s16943_s17 + $0x1b78] sm:$0xff] }
 0x6e9   : > { %v1454_v38 = vld [vmem:[%s16943_s17 + $0x1f58] sm:$0xff]  ;;  %v15091_v48 = vcombine.high %v1326_v34, %v1330_v59  ;;  %v15090_v57 = vcombine.low %v1326_v34, %v1330_v59 }
 0x6ea   : > { %13188 = vmatpush1.bf16.msra.mxu0 %v15050_v9  ;;  %13229 = vmatpush1.bf16.msra.mxu1 %v15178_v10  ;;  %v1458_v54 = vld [vmem:[%s16943_s17 + $0x1f78] sm:$0xff] }
 0x6eb   : > { %13189 = vmatprep.subr.bf16.mxu0 %v15059_v16  ;;  %13230 = vmatprep.subr.bf16.mxu1 %v15187_v18  ;;  %v15219_v41 = vcombine.high %v1454_v38, %v1458_v54  ;;  %v1334_v7 = vld [vmem:[%s16943_s17 + $0x1b98] sm:$0xff]  ;;  %v15218_v52 = vcombine.low %v1454_v38, %v1458_v54 }
 0x6ec   : > { %v1338_v43 = vld [vmem:[%s16943_s17 + $0x1bb8] sm:$0xff] }
 0x6ed   : > { %v1462_v56 = vld [vmem:[%s16943_s17 + $0x1f98] sm:$0xff]  ;;  %v15099_v62 = vcombine.high %v1334_v7, %v1338_v43  ;;  %v15098_v6 = vcombine.low %v1334_v7, %v1338_v43 }
 0x6ee   : > { %13190 = vmatpush1.bf16.msra.mxu0 %v15058_v17  ;;  %13231 = vmatpush1.bf16.msra.mxu1 %v15186_v26  ;;  %v1466_v49 = vld [vmem:[%s16943_s17 + $0x1fb8] sm:$0xff] }
 0x6ef   : > { %13191 = vmatprep.subr.bf16.mxu0 %v15067_v13  ;;  %13232 = vmatprep.subr.bf16.mxu1 %v15195_v30  ;;  %v15227_v15 = vcombine.high %v1462_v56, %v1466_v49  ;;  %v1342_v1 = vld [vmem:[%s16943_s17 + $0x1bd8] sm:$0xff]  ;;  %v15226_v8 = vcombine.low %v1462_v56, %v1466_v49 }
 0x6f0   : > { %v1346_v19 = vld [vmem:[%s16943_s17 + $0x1bf8] sm:$0xff] }
 0x6f1   : > { %v1470_v4 = vld [vmem:[%s16943_s17 + $0x1fd8] sm:$0xff]  ;;  %v15107_v9 = vcombine.high %v1342_v1, %v1346_v19  ;;  %v15106_v12 = vcombine.low %v1342_v1, %v1346_v19 }
 0x6f2   : > { %13192 = vmatpush1.bf16.msra.mxu0 %v15066_v36  ;;  %13233 = vmatpush1.bf16.msra.mxu1 %v15194_v29  ;;  %v1474_v5 = vld [vmem:[%s16943_s17 + $0x1ff8] sm:$0xff] }
 0x6f3   : > { %13193 = vmatprep.subr.bf16.mxu0 %v15075_v39  ;;  %13234 = vmatprep.subr.bf16.mxu1 %v15203_v32  ;;  %v15235_v10 = vcombine.high %v1470_v4, %v1474_v5  ;;  %v1478_v16 = vld [vmem:[%s16943_s17 + $0x2018] sm:$0xff]  ;;  %v15234_v24 = vcombine.low %v1470_v4, %v1474_v5 }
 0x6f4   : > { %v1482_v18 = vld [vmem:[%s16943_s17 + $0x2038] sm:$0xff] }
 0x6f5   : > { %v1606_v20 = vld [vmem:[%s16943_s17 + $0x2418] sm:$0xff]  ;;  %v15243_v17 = vcombine.high %v1478_v16, %v1482_v18  ;;  %v15242_v53 = vcombine.low %v1478_v16, %v1482_v18 }
 0x6f6   : > { %13194 = vmatpush1.bf16.msra.mxu0 %v15074_v40  ;;  %13235 = vmatpush1.bf16.msra.mxu1 %v15202_v37  ;;  %v1610_v22 = vld [vmem:[%s16943_s17 + $0x2438] sm:$0xff] }
 0x6f7   : > { %13195 = vmatprep.subr.bf16.mxu0 %v15083_v21  ;;  %13236 = vmatprep.subr.bf16.mxu1 %v15211_v31  ;;  %v15371_v26 = vcombine.high %v1606_v20, %v1610_v22  ;;  %v1486_v13 = vld [vmem:[%s16943_s17 + $0x2058] sm:$0xff]  ;;  %v15370_v25 = vcombine.low %v1606_v20, %v1610_v22 }
 0x6f8   : > { %v1490_v30 = vld [vmem:[%s16943_s17 + $0x2078] sm:$0xff] }
 0x6f9   : > { %v1614_v47 = vld [vmem:[%s16943_s17 + $0x2458] sm:$0xff]  ;;  %v15251_v36 = vcombine.high %v1486_v13, %v1490_v30  ;;  %v15250_v44 = vcombine.low %v1486_v13, %v1490_v30 }
 0x6fa   : > { %13196 = vmatpush1.bf16.msra.mxu0 %v15082_v60  ;;  %13237 = vmatpush1.bf16.msra.mxu1 %v15210_v3  ;;  %v1618_v33 = vld [vmem:[%s16943_s17 + $0x2478] sm:$0xff] }
 0x6fb   : > { %13197 = vmatprep.subr.bf16.mxu0 %v15091_v48  ;;  %13238 = vmatprep.subr.bf16.mxu1 %v15219_v41  ;;  %v15379_v29 = vcombine.high %v1614_v47, %v1618_v33  ;;  %v1494_v39 = vld [vmem:[%s16943_s17 + $0x2098] sm:$0xff]  ;;  %v15378_v23 = vcombine.low %v1614_v47, %v1618_v33 }
 0x6fc   : > { %v1498_v32 = vld [vmem:[%s16943_s17 + $0x20b8] sm:$0xff] }
 0x6fd   : > { %v1622_v27 = vld [vmem:[%s16943_s17 + $0x2498] sm:$0xff]  ;;  %v15259_v40 = vcombine.high %v1494_v39, %v1498_v32 }
 0x6fe   : > { %13198 = vmatpush1.bf16.msra.mxu0 %v15090_v57  ;;  %13239 = vmatpush1.bf16.msra.mxu1 %v15218_v52  ;;  %v1626_v42 = vld [vmem:[%s16943_s17 + $0x24b8] sm:$0xff] }
 0x6ff   : > { %13199 = vmatprep.subr.bf16.mxu0 %v15099_v62  ;;  %13240 = vmatprep.subr.bf16.mxu1 %v15227_v15  ;;  %v15387_v37 = vcombine.high %v1622_v27, %v1626_v42  ;;  %v1502_v21 = vld [vmem:[%s16943_s17 + $0x20d8] sm:$0xff]  ;;  %v15386_v59 = vcombine.low %v1622_v27, %v1626_v42 }
 0x700   : > { %v1506_v31 = vld [vmem:[%s16943_s17 + $0x20f8] sm:$0xff] }
 0x701   : > { %v1634_v34 = vld [vmem:[%s16943_s17 + $0x24f8] sm:$0xff]  ;;  %v15267_v38 = vcombine.high %v1502_v21, %v1506_v31  ;;  %v15266_v41 = vcombine.low %v1502_v21, %v1506_v31 }
 0x702   : > { %13200 = vmatpush1.bf16.msra.mxu0 %v15098_v6  ;;  %13241 = vmatpush1.bf16.msra.mxu1 %v15226_v8  ;;  %v1510_v60 = vld [vmem:[%s16943_s17 + $0x2118] sm:$0xff] }
 0x703   : > { %13201 = vmatprep.subr.bf16.mxu0 %v15107_v9  ;;  %13242 = vmatprep.subr.bf16.mxu1 %v15235_v10  ;;  %v1514_v3 = vld [vmem:[%s16943_s17 + $0x2138] sm:$0xff] }
 0x704   : > { %v1638_v48 = vld [vmem:[%s16943_s17 + $0x2518] sm:$0xff]  ;;  %v15275_v7 = vcombine.high %v1510_v60, %v1514_v3  ;;  %v15274_v62 = vcombine.low %v1510_v60, %v1514_v3 }
 0x705   : > { %v1518_v56 = vld [vmem:[%s16943_s17 + $0x2158] sm:$0xff] }
 0x706   : > { %13202 = vmatpush1.bf16.msra.mxu0 %v15106_v12  ;;  %13243 = vmatpush1.bf16.msra.mxu1 %v15234_v24  ;;  %v1522_v49 = vld [vmem:[%s16943_s17 + $0x2178] sm:$0xff] }
 0x707   : > { %13253 = vmatprep.subr.bf16.mxu0 %v15243_v17  ;;  %13294 = vmatprep.subr.bf16.mxu1 %v15371_v26  ;;  %v1646_v57 = vld [vmem:[%s16943_s17 + $0x2558] sm:$0xff]  ;;  %v15283_v1 = vcombine.high %v1518_v56, %v1522_v49  ;;  %v15282_v9 = vcombine.low %v1518_v56, %v1522_v49 }
 0x708   : > { %v1650_v52 = vld [vmem:[%s16943_s17 + $0x2578] sm:$0xff] }
 0x709   : > { %13204 = vmatmul.mubr.bf16.vlgmr.msra.gmra.mrb[96].mxu0 %v17289_v45  ;;  %13245 = vmatmul.mubr.bf16.vlgmr.msra.gmra.mrb[96].mxu1 %v17294_v50  ;;  %v1630_v45 = vld [vmem:[%s16943_s17 + $0x24d8] sm:$0xff]  ;;  %v15258_v50 = vcombine.low %v1494_v39, %v1498_v32  ;;  %v15411_v19 = vcombine.high %v1646_v57, %v1650_v52  ;;  %v15410_v10 = vcombine.low %v1646_v57, %v1650_v52 }
 0x70a   : > { %13254 = vmatpush1.bf16.msra.mxu0 %v15242_v53  ;;  %13295 = vmatpush1.bf16.msra.mxu1 %v15370_v25  ;;  %v15395_v54 = vcombine.high %v1630_v45, %v1634_v34  ;;  %v1526_v4 = vld [vmem:[%s16943_s17 + $0x2198] sm:$0xff] }
 0x70b   : > { %13255 = vmatprep.subr.bf16.mxu0 %v15251_v36  ;;  %13296 = vmatprep.subr.bf16.mxu1 %v15379_v29  ;;  %v1530_v5 = vld [vmem:[%s16943_s17 + $0x21b8] sm:$0xff] }
 0x70c   : > { %13285 = vmatprep.mubr.bf16.mxu0 %v17299_v61  ;;  %13326 = vmatprep.mubr.bf16.mxu1 %v17304_v0  ;;  %v1642_v61 = vld [vmem:[%s16943_s17 + $0x2538] sm:$0xff]  ;;  %v15394_v0 = vcombine.low %v1630_v45, %v1634_v34  ;;  %v15291_v16 = vcombine.high %v1526_v4, %v1530_v5  ;;  %v15290_v53 = vcombine.low %v1526_v4, %v1530_v5 }
 0x70d   : > { %v15403_v43 = vcombine.high %v1638_v48, %v1642_v61  ;;  %v15402_v15 = vcombine.low %v1638_v48, %v1642_v61  ;;  %v1654_v6 = vld [vmem:[%s16943_s17 + $0x2598] sm:$0xff] }
 0x70e   : > { %13256 = vmatpush1.bf16.msra.mxu0 %v15250_v44  ;;  %13297 = vmatpush1.bf16.msra.mxu1 %v15378_v23  ;;  %v1658_v8 = vld [vmem:[%s16943_s17 + $0x25b8] sm:$0xff] }
 0x70f   : > { %13257 = vmatprep.subr.bf16.mxu0 %v15259_v40  ;;  %13298 = vmatprep.subr.bf16.mxu1 %v15387_v37  ;;  %v15419_v20 = vcombine.high %v1654_v6, %v1658_v8  ;;  %v1534_v22 = vld [vmem:[%s16943_s17 + $0x21d8] sm:$0xff]  ;;  %v15418_v39 = vcombine.low %v1654_v6, %v1658_v8 }
 0x710   : > { %v1538_v12 = vld [vmem:[%s16943_s17 + $0x21f8] sm:$0xff] }
 0x711   : > { %v1662_v26 = vld [vmem:[%s16943_s17 + $0x25d8] sm:$0xff]  ;;  %v15299_v32 = vcombine.high %v1534_v22, %v1538_v12  ;;  %v15298_v21 = vcombine.low %v1534_v22, %v1538_v12 }
 0x712   : > { %13258 = vmatpush1.bf16.msra.mxu0 %v15258_v50  ;;  %13299 = vmatpush1.bf16.msra.mxu1 %v15386_v59  ;;  %v1666_v13 = vld [vmem:[%s16943_s17 + $0x25f8] sm:$0xff] }
 0x713   : > { %13259 = vmatprep.subr.bf16.mxu0 %v15267_v38  ;;  %13300 = vmatprep.subr.bf16.mxu1 %v15395_v54  ;;  %v15427_v42 = vcombine.high %v1662_v26, %v1666_v13  ;;  %v1542_v44 = vld [vmem:[%s16943_s17 + $0x2218] sm:$0xff]  ;;  %v15426_v31 = vcombine.low %v1662_v26, %v1666_v13 }
 0x714   : > { %v1546_v23 = vld [vmem:[%s16943_s17 + $0x2238] sm:$0xff] }
 0x715   : > { %v1670_v40 = vld [vmem:[%s16943_s17 + $0x2618] sm:$0xff]  ;;  %v15307_v45 = vcombine.high %v1542_v44, %v1546_v23  ;;  %v15306_v60 = vcombine.low %v1542_v44, %v1546_v23 }
 0x716   : > { %13260 = vmatpush1.bf16.msra.mxu0 %v15266_v41  ;;  %13301 = vmatpush1.bf16.msra.mxu1 %v15394_v0  ;;  %v1674_v37 = vld [vmem:[%s16943_s17 + $0x2638] sm:$0xff] }
 0x717   : > { %13261 = vmatprep.subr.bf16.mxu0 %v15275_v7  ;;  %13302 = vmatprep.subr.bf16.mxu1 %v15403_v43  ;;  %v15435_v34 = vcombine.high %v1670_v40, %v1674_v37  ;;  %v1550_v50 = vld [vmem:[%s16943_s17 + $0x2258] sm:$0xff]  ;;  %v15434_v3 = vcombine.low %v1670_v40, %v1674_v37 }
 0x718   : > { %v1554_v59 = vld [vmem:[%s16943_s17 + $0x2278] sm:$0xff] }
 0x719   : > { %v1678_v38 = vld [vmem:[%s16943_s17 + $0x2658] sm:$0xff]  ;;  %v15315_v48 = vcombine.high %v1550_v50, %v1554_v59  ;;  %v15314_v56 = vcombine.low %v1550_v50, %v1554_v59 }
 0x71a   : > { %13262 = vmatpush1.bf16.msra.mxu0 %v15274_v62  ;;  %13303 = vmatpush1.bf16.msra.mxu1 %v15402_v15  ;;  %v1682_v54 = vld [vmem:[%s16943_s17 + $0x2678] sm:$0xff] }
 0x71b   : > { %13263 = vmatprep.subr.bf16.mxu0 %v15283_v1  ;;  %13304 = vmatprep.subr.bf16.mxu1 %v15411_v19  ;;  %v15443_v61 = vcombine.high %v1678_v38, %v1682_v54  ;;  %v1558_v41 = vld [vmem:[%s16943_s17 + $0x2298] sm:$0xff]  ;;  %v15442_v49 = vcombine.low %v1678_v38, %v1682_v54 }
 0x71c   : > { %v12959_v18 = vpop.f32.mrb[84].mxu0  ;;  %v13000_v24 = vpop.f32.mrb[84].mxu1  ;;  %v1562_v0 = vld [vmem:[%s16943_s17 + $0x22b8] sm:$0xff] }
 0x71d   : > { %v12961_v17 = vpop.f32.mrb[85].mxu0  ;;  %v18895_v30 = vadd.f32 %v13000_v24, %v12959_v18  ;;  %v13002_v47 = vpop.f32.mrb[85].mxu1  ;;  %v1686_v7 = vld [vmem:[%s16943_s17 + $0x2698] sm:$0xff]  ;;  %v15323_v57 = vcombine.high %v1558_v41, %v1562_v0  ;;  %v15322_v4 = vcombine.low %v1558_v41, %v1562_v0 }
 0x71e   : > { %v12963_v33 = vpop.f32.mrb[86].mxu0  ;;  %13264 = vmatpush1.bf16.msra.mxu0 %v15282_v9  ;;  %v18897_v25 = vadd.f32 %v13002_v47, %v12961_v17  ;;  %v13004_v36 = vpop.f32.mrb[86].mxu1  ;;  %13305 = vmatpush1.bf16.msra.mxu1 %v15410_v10  ;;  %v1690_v43 = vld [vmem:[%s16943_s17 + $0x26b8] sm:$0xff] }
 0x71f   : > { %v12964_v29 = vpop.f32.mrb[87].mxu0  ;;  %13265 = vmatprep.subr.bf16.mxu0 %v15291_v16  ;;  %v13005_v27 = vpop.f32.mrb[87].mxu1  ;;  %13306 = vmatprep.subr.bf16.mxu1 %v15419_v20  ;;  %v15451_v52 = vcombine.high %v1686_v7, %v1690_v43  ;;  %v1566_v62 = vld [vmem:[%s16943_s17 + $0x22d8] sm:$0xff]  ;;  %v15450_v5 = vcombine.low %v1686_v7, %v1690_v43 }
 0x720   : > { %v1570_v15 = vld [vmem:[%s16943_s17 + $0x22f8] sm:$0xff] }
 0x721   : > { %v1694_v1 = vld [vmem:[%s16943_s17 + $0x26d8] sm:$0xff]  ;;  %v15331_v6 = vcombine.high %v1566_v62, %v1570_v15  ;;  %v15330_v20 = vcombine.low %v1566_v62, %v1570_v15 }
 0x722   : > { %13266 = vmatpush1.bf16.msra.mxu0 %v15290_v53  ;;  %13307 = vmatpush1.bf16.msra.mxu1 %v15418_v39  ;;  %v1698_v19 = vld [vmem:[%s16943_s17 + $0x26f8] sm:$0xff] }
 0x723   : > { %13267 = vmatprep.subr.bf16.mxu0 %v15299_v32  ;;  %13308 = vmatprep.subr.bf16.mxu1 %v15427_v42  ;;  %v15459_v8 = vcombine.high %v1694_v1, %v1698_v19  ;;  %v1574_v9 = vld [vmem:[%s16943_s17 + $0x2318] sm:$0xff]  ;;  %v15458_v22 = vcombine.low %v1694_v1, %v1698_v19 }
 0x724   : > { %v1578_v10 = vld [vmem:[%s16943_s17 + $0x2338] sm:$0xff] }
 0x725   : > { %v1702_v16 = vld [vmem:[%s16943_s17 + $0x2718] sm:$0xff]  ;;  %v15339_v12 = vcombine.high %v1574_v9, %v1578_v10  ;;  %v15338_v33 = vcombine.low %v1574_v9, %v1578_v10 }
 0x726   : > { %13268 = vmatpush1.bf16.msra.mxu0 %v15298_v21  ;;  %13309 = vmatpush1.bf16.msra.mxu1 %v15426_v31  ;;  %v1706_v18 = vld [vmem:[%s16943_s17 + $0x2738] sm:$0xff] }
 0x727   : > { %13269 = vmatprep.subr.bf16.mxu0 %v15307_v45  ;;  %13310 = vmatprep.subr.bf16.mxu1 %v15435_v34  ;;  %v15467_v24 = vcombine.high %v1702_v16, %v1706_v18  ;;  %v1582_v17 = vld [vmem:[%s16943_s17 + $0x2358] sm:$0xff]  ;;  %v15466_v53 = vcombine.low %v1702_v16, %v1706_v18 }
 0x728   : > { %v1586_v26 = vld [vmem:[%s16943_s17 + $0x2378] sm:$0xff] }
 0x729   : > { %v1710_v13 = vld [vmem:[%s16943_s17 + $0x2758] sm:$0xff]  ;;  %v15347_v36 = vcombine.high %v1582_v17, %v1586_v26  ;;  %v15346_v44 = vcombine.low %v1582_v17, %v1586_v26 }
 0x72a   : > { %13270 = vmatpush1.bf16.msra.mxu0 %v15306_v60  ;;  %13311 = vmatpush1.bf16.msra.mxu1 %v15434_v3  ;;  %v1714_v47 = vld [vmem:[%s16943_s17 + $0x2778] sm:$0xff] }
 0x72b   : > { %13271 = vmatprep.subr.bf16.mxu0 %v15315_v48  ;;  %13312 = vmatprep.subr.bf16.mxu1 %v15443_v61  ;;  %v15475_v29 = vcombine.high %v1710_v13, %v1714_v47  ;;  %v1590_v39 = vld [vmem:[%s16943_s17 + $0x2398] sm:$0xff]  ;;  %v15474_v23 = vcombine.low %v1710_v13, %v1714_v47 }
 0x72c   : > { %v1594_v32 = vld [vmem:[%s16943_s17 + $0x23b8] sm:$0xff] }
 0x72d   : > { %v1718_v27 = vld [vmem:[%s16943_s17 + $0x2798] sm:$0xff]  ;;  %v15355_v40 = vcombine.high %v1590_v39, %v1594_v32  ;;  %v15354_v50 = vcombine.low %v1590_v39, %v1594_v32 }
 0x72e   : > { %13272 = vmatpush1.bf16.msra.mxu0 %v15314_v56  ;;  %13313 = vmatpush1.bf16.msra.mxu1 %v15442_v49  ;;  %v1722_v42 = vld [vmem:[%s16943_s17 + $0x27b8] sm:$0xff] }
 0x72f   : > { %13273 = vmatprep.subr.bf16.mxu0 %v15323_v57  ;;  %13314 = vmatprep.subr.bf16.mxu1 %v15451_v52  ;;  %v15483_v37 = vcombine.high %v1718_v27, %v1722_v42  ;;  %v1598_v21 = vld [vmem:[%s16943_s17 + $0x23d8] sm:$0xff]  ;;  %v15482_v59 = vcombine.low %v1718_v27, %v1722_v42 }
 0x730   : > { %v1602_v31 = vld [vmem:[%s16943_s17 + $0x23f8] sm:$0xff] }
 0x731   : > { %v1726_v45 = vld [vmem:[%s16943_s17 + $0x27d8] sm:$0xff]  ;;  %v15363_v38 = vcombine.high %v1598_v21, %v1602_v31  ;;  %v15362_v41 = vcombine.low %v1598_v21, %v1602_v31 }
 0x732   : > { %13274 = vmatpush1.bf16.msra.mxu0 %v15322_v4  ;;  %13315 = vmatpush1.bf16.msra.mxu1 %v15450_v5  ;;  %v1730_v34 = vld [vmem:[%s16943_s17 + $0x27f8] sm:$0xff] }
 0x733   : > { %13275 = vmatprep.subr.bf16.mxu0 %v15331_v6  ;;  %13316 = vmatprep.subr.bf16.mxu1 %v15459_v8  ;;  %v15491_v54 = vcombine.high %v1726_v45, %v1730_v34  ;;  %v1734_v60 = vld [vmem:[%s16943_s17 + $0x2818] sm:$0xff]  ;;  %v15490_v0 = vcombine.low %v1726_v45, %v1730_v34 }
 0x734   : > { %v1738_v3 = vld [vmem:[%s16943_s17 + $0x2838] sm:$0xff] }
 0x735   : > { %v1862_v48 = vld [vmem:[%s16943_s17 + $0x2c18] sm:$0xff]  ;;  %v15499_v7 = vcombine.high %v1734_v60, %v1738_v3  ;;  %v15498_v62 = vcombine.low %v1734_v60, %v1738_v3 }
 0x736   : > { %13276 = vmatpush1.bf16.msra.mxu0 %v15330_v20  ;;  %13317 = vmatpush1.bf16.msra.mxu1 %v15458_v22  ;;  %v1866_v61 = vld [vmem:[%s16943_s17 + $0x2c38] sm:$0xff] }
 0x737   : > { %13277 = vmatprep.subr.bf16.mxu0 %v15339_v12  ;;  %13318 = vmatprep.subr.bf16.mxu1 %v15467_v24  ;;  %v15627_v43 = vcombine.high %v1862_v48, %v1866_v61  ;;  %v1742_v56 = vld [vmem:[%s16943_s17 + $0x2858] sm:$0xff]  ;;  %v15626_v15 = vcombine.low %v1862_v48, %v1866_v61 }
 0x738   : > { %v1746_v49 = vld [vmem:[%s16943_s17 + $0x2878] sm:$0xff] }
 0x739   : > { %v1870_v57 = vld [vmem:[%s16943_s17 + $0x2c58] sm:$0xff]  ;;  %v15507_v1 = vcombine.high %v1742_v56, %v1746_v49  ;;  %v15506_v9 = vcombine.low %v1742_v56, %v1746_v49 }
 0x73a   : > { %13278 = vmatpush1.bf16.msra.mxu0 %v15338_v33  ;;  %13319 = vmatpush1.bf16.msra.mxu1 %v15466_v53  ;;  %v1874_v52 = vld [vmem:[%s16943_s17 + $0x2c78] sm:$0xff] }
 0x73b   : > { %13279 = vmatprep.subr.bf16.mxu0 %v15347_v36  ;;  %13320 = vmatprep.subr.bf16.mxu1 %v15475_v29  ;;  %v15635_v19 = vcombine.high %v1870_v57, %v1874_v52  ;;  %v1750_v4 = vld [vmem:[%s16943_s17 + $0x2898] sm:$0xff]  ;;  %v15634_v10 = vcombine.low %v1870_v57, %v1874_v52 }
 0x73c   : > { %v1754_v5 = vld [vmem:[%s16943_s17 + $0x28b8] sm:$0xff] }
 0x73d   : > { %v1878_v6 = vld [vmem:[%s16943_s17 + $0x2c98] sm:$0xff]  ;;  %v15515_v16 = vcombine.high %v1750_v4, %v1754_v5 }
 0x73e   : > { %13280 = vmatpush1.bf16.msra.mxu0 %v15346_v44  ;;  %13321 = vmatpush1.bf16.msra.mxu1 %v15474_v23  ;;  %v1882_v8 = vld [vmem:[%s16943_s17 + $0x2cb8] sm:$0xff] }
 0x73f   : > { %13281 = vmatprep.subr.bf16.mxu0 %v15355_v40  ;;  %13322 = vmatprep.subr.bf16.mxu1 %v15483_v37  ;;  %v15643_v18 = vcombine.high %v1878_v6, %v1882_v8  ;;  %v1758_v20 = vld [vmem:[%s16943_s17 + $0x28d8] sm:$0xff]  ;;  %v15642_v24 = vcombine.low %v1878_v6, %v1882_v8 }
 0x740   : > { %v1762_v22 = vld [vmem:[%s16943_s17 + $0x28f8] sm:$0xff] }
 0x741   : > { %v1890_v12 = vld [vmem:[%s16943_s17 + $0x2cf8] sm:$0xff]  ;;  %v15523_v17 = vcombine.high %v1758_v20, %v1762_v22  ;;  %v15522_v53 = vcombine.low %v1758_v20, %v1762_v22 }
 0x742   : > { %13282 = vmatpush1.bf16.msra.mxu0 %v15354_v50  ;;  %13323 = vmatpush1.bf16.msra.mxu1 %v15482_v59  ;;  %v1766_v13 = vld [vmem:[%s16943_s17 + $0x2918] sm:$0xff] }
 0x743   : > { %13283 = vmatprep.subr.bf16.mxu0 %v15363_v38  ;;  %13324 = vmatprep.subr.bf16.mxu1 %v15491_v54  ;;  %v1770_v47 = vld [vmem:[%s16943_s17 + $0x2938] sm:$0xff] }
 0x744   : > { %v1894_v33 = vld [vmem:[%s16943_s17 + $0x2d18] sm:$0xff]  ;;  %v15531_v36 = vcombine.high %v1766_v13, %v1770_v47  ;;  %v15530_v44 = vcombine.low %v1766_v13, %v1770_v47 }
 0x745   : > { %v1774_v39 = vld [vmem:[%s16943_s17 + $0x2958] sm:$0xff] }
 0x746   : > { %13284 = vmatpush1.bf16.msra.mxu0 %v15362_v41  ;;  %13325 = vmatpush1.bf16.msra.mxu1 %v15490_v0  ;;  %v1778_v32 = vld [vmem:[%s16943_s17 + $0x2978] sm:$0xff] }
 0x747   : > { %13335 = vmatprep.subr.bf16.mxu0 %v15499_v7  ;;  %13376 = vmatprep.subr.bf16.mxu1 %v15627_v43  ;;  %v1902_v27 = vld [vmem:[%s16943_s17 + $0x2d58] sm:$0xff]  ;;  %v15539_v40 = vcombine.high %v1774_v39, %v1778_v32  ;;  %v15538_v50 = vcombine.low %v1774_v39, %v1778_v32 }
 0x748   : > { %v1906_v42 = vld [vmem:[%s16943_s17 + $0x2d78] sm:$0xff] }
 0x749   : > { %13286 = vmatmul.mubr.bf16.vlgmr.msra.gmra.mrb[100].mxu0 %v17373_v55  ;;  %13327 = vmatmul.mubr.bf16.vlgmr.msra.gmra.mrb[100].mxu1 %v17378_v63  ;;  %v1886_v55 = vld [vmem:[%s16943_s17 + $0x2cd8] sm:$0xff]  ;;  %v15514_v63 = vcombine.low %v1750_v4, %v1754_v5  ;;  %v15667_v37 = vcombine.high %v1902_v27, %v1906_v42  ;;  %v15666_v59 = vcombine.low %v1902_v27, %v1906_v42 }
 0x74a   : > { %13336 = vmatpush1.bf16.msra.mxu0 %v15498_v62  ;;  %13377 = vmatpush1.bf16.msra.mxu1 %v15626_v15  ;;  %v15651_v26 = vcombine.high %v1886_v55, %v1890_v12  ;;  %v1782_v21 = vld [vmem:[%s16943_s17 + $0x2998] sm:$0xff] }
 0x74b   : > { %13337 = vmatprep.subr.bf16.mxu0 %v15507_v1  ;;  %13378 = vmatprep.subr.bf16.mxu1 %v15635_v19  ;;  %v1786_v31 = vld [vmem:[%s16943_s17 + $0x29b8] sm:$0xff] }
 0x74c   : > { %13367 = vmatprep.mubr.bf16.mxu0 %v17383_v11  ;;  %13408 = vmatprep.mubr.bf16.mxu1 %v17388_v14  ;;  %v1898_v11 = vld [vmem:[%s16943_s17 + $0x2d38] sm:$0xff]  ;;  %v15650_v14 = vcombine.low %v1886_v55, %v1890_v12  ;;  %v15547_v38 = vcombine.high %v1782_v21, %v1786_v31  ;;  %v15546_v52 = vcombine.low %v1782_v21, %v1786_v31 }
 0x74d   : > { %v15659_v29 = vcombine.high %v1894_v33, %v1898_v11  ;;  %v15658_v23 = vcombine.low %v1894_v33, %v1898_v11  ;;  %v1910_v45 = vld [vmem:[%s16943_s17 + $0x2d98] sm:$0xff] }
 0x74e   : > { %13338 = vmatpush1.bf16.msra.mxu0 %v15506_v9  ;;  %13379 = vmatpush1.bf16.msra.mxu1 %v15634_v10  ;;  %v1914_v34 = vld [vmem:[%s16943_s17 + $0x2db8] sm:$0xff] }
 0x74f   : > { %13339 = vmatprep.subr.bf16.mxu0 %v15515_v16  ;;  %13380 = vmatprep.subr.bf16.mxu1 %v15643_v18  ;;  %v15675_v60 = vcombine.high %v1910_v45, %v1914_v34  ;;  %v1790_v3 = vld [vmem:[%s16943_s17 + $0x29d8] sm:$0xff] }
 0x750   : > { %v1794_v48 = vld [vmem:[%s16943_s17 + $0x29f8] sm:$0xff] }
 0x751   : > { %v1918_v7 = vld [vmem:[%s16943_s17 + $0x2dd8] sm:$0xff]  ;;  %v15555_v19 = vcombine.high %v1790_v3, %v1794_v48  ;;  %v15554_v16 = vcombine.low %v1790_v3, %v1794_v48 }
 0x752   : > { %13340 = vmatpush1.bf16.msra.mxu0 %v15514_v63  ;;  %13381 = vmatpush1.bf16.msra.mxu1 %v15642_v24  ;;  %v1922_v43 = vld [vmem:[%s16943_s17 + $0x2df8] sm:$0xff] }
 0x753   : > { %13341 = vmatprep.subr.bf16.mxu0 %v15523_v17  ;;  %13382 = vmatprep.subr.bf16.mxu1 %v15651_v26  ;;  %v15683_v5 = vcombine.high %v1918_v7, %v1922_v43  ;;  %v1798_v6 = vld [vmem:[%s16943_s17 + $0x2a18] sm:$0xff]  ;;  %v15682_v18 = vcombine.low %v1918_v7, %v1922_v43 }
 0x754   : > { %v1802_v8 = vld [vmem:[%s16943_s17 + $0x2a38] sm:$0xff] }
 0x755   : > { %v1926_v9 = vld [vmem:[%s16943_s17 + $0x2e18] sm:$0xff]  ;;  %v15563_v20 = vcombine.high %v1798_v6, %v1802_v8  ;;  %v15562_v17 = vcombine.low %v1798_v6, %v1802_v8 }
 0x756   : > { %13342 = vmatpush1.bf16.msra.mxu0 %v15522_v53  ;;  %13383 = vmatpush1.bf16.msra.mxu1 %v15650_v14  ;;  %v1930_v10 = vld [vmem:[%s16943_s17 + $0x2e38] sm:$0xff] }
 0x757   : > { %13343 = vmatprep.subr.bf16.mxu0 %v15531_v36  ;;  %13384 = vmatprep.subr.bf16.mxu1 %v15659_v29  ;;  %v15691_v22 = vcombine.high %v1926_v9, %v1930_v10  ;;  %v1806_v55 = vld [vmem:[%s16943_s17 + $0x2a58] sm:$0xff]  ;;  %v15690_v26 = vcombine.low %v1926_v9, %v1930_v10 }
 0x758   : > { %v1810_v12 = vld [vmem:[%s16943_s17 + $0x2a78] sm:$0xff] }
 0x759   : > { %v1934_v63 = vld [vmem:[%s16943_s17 + $0x2e58] sm:$0xff]  ;;  %v15571_v13 = vcombine.high %v1806_v55, %v1810_v12  ;;  %v15570_v36 = vcombine.low %v1806_v55, %v1810_v12 }
 0x75a   : > { %13344 = vmatpush1.bf16.msra.mxu0 %v15530_v44  ;;  %13385 = vmatpush1.bf16.msra.mxu1 %v15658_v23  ;;  %v1938_v24 = vld [vmem:[%s16943_s17 + $0x2e78] sm:$0xff] }
 0x75b   : > { %13345 = vmatprep.subr.bf16.mxu0 %v15539_v40  ;;  %13386 = vmatprep.subr.bf16.mxu1 %v15667_v37  ;;  %v15699_v47 = vcombine.high %v1934_v63, %v1938_v24  ;;  %v1814_v33 = vld [vmem:[%s16943_s17 + $0x2a98] sm:$0xff]  ;;  %v15698_v29 = vcombine.low %v1934_v63, %v1938_v24 }
 0x75c   : > { %v13041_v54 = vpop.f32.mrb[88].mxu0  ;;  %v13082_v41 = vpop.f32.mrb[88].mxu1  ;;  %v1818_v11 = vld [vmem:[%s16943_s17 + $0x2ab8] sm:$0xff] }
 0x75d   : > { %v13042_v61 = vadd.f32 %v13041_v54, %v18895_v30  ;;  %v13043_v0 = vpop.f32.mrb[89].mxu0  ;;  %v13084_v49 = vpop.f32.mrb[89].mxu1  ;;  %v15674_v30 = vcombine.low %v1910_v45, %v1914_v34  ;;  %v1942_v53 = vld [vmem:[%s16943_s17 + $0x2e98] sm:$0xff]  ;;  %v15579_v39 = vcombine.high %v1814_v33, %v1818_v11  ;;  %v15578_v40 = vcombine.low %v1814_v33, %v1818_v11 }
 0x75e   : > { %v13044_v56 = vadd.f32 %v13043_v0, %v18897_v25  ;;  %v13045_v57 = vpop.f32.mrb[90].mxu0  ;;  %13346 = vmatpush1.bf16.msra.mxu0 %v15538_v50  ;;  %v13086_v15 = vpop.f32.mrb[90].mxu1  ;;  %13387 = vmatpush1.bf16.msra.mxu1 %v15666_v59  ;;  %v1946_v14 = vld [vmem:[%s16943_s17 + $0x2eb8] sm:$0xff] }
 0x75f   : > { %v18969_v62 = vadd.f32 %v13082_v41, %v13042_v61  ;;  %v13046_v1 = vpop.f32.mrb[91].mxu0  ;;  %13347 = vmatprep.subr.bf16.mxu0 %v15547_v38  ;;  %v13087_v25 = vpop.f32.mrb[91].mxu1  ;;  %13388 = vmatprep.subr.bf16.mxu1 %v15675_v60  ;;  %v15707_v32 = vcombine.high %v1942_v53, %v1946_v14  ;;  %v1822_v27 = vld [vmem:[%s16943_s17 + $0x2ad8] sm:$0xff]  ;;  %v15706_v37 = vcombine.low %v1942_v53, %v1946_v14 }
 0x760   : > { %v18971_v4 = vadd.f32 %v13084_v49, %v13044_v56  ;;  %v1826_v42 = vld [vmem:[%s16943_s17 + $0x2af8] sm:$0xff] }
 0x761   : > { %v1950_v44 = vld [vmem:[%s16943_s17 + $0x2ed8] sm:$0xff]  ;;  %v15587_v21 = vcombine.high %v1822_v27, %v1826_v42  ;;  %v15586_v38 = vcombine.low %v1822_v27, %v1826_v42 }
 0x762   : > { %13348 = vmatpush1.bf16.msra.mxu0 %v15546_v52  ;;  %13389 = vmatpush1.bf16.msra.mxu1 %v15674_v30  ;;  %v1954_v23 = vld [vmem:[%s16943_s17 + $0x2ef8] sm:$0xff] }
 0x763   : > { %13349 = vmatprep.subr.bf16.mxu0 %v15555_v19  ;;  %13390 = vmatprep.subr.bf16.mxu1 %v15683_v5  ;;  %v15715_v31 = vcombine.high %v1950_v44, %v1954_v23  ;;  %v1830_v45 = vld [vmem:[%s16943_s17 + $0x2b18] sm:$0xff]  ;;  %v15714_v54 = vcombine.low %v1950_v44, %v1954_v23 }
 0x764   : > { %v1834_v34 = vld [vmem:[%s16943_s17 + $0x2b38] sm:$0xff] }
 0x765   : > { %v1958_v50 = vld [vmem:[%s16943_s17 + $0x2f18] sm:$0xff]  ;;  %v15595_v60 = vcombine.high %v1830_v45, %v1834_v34  ;;  %v15594_v7 = vcombine.low %v1830_v45, %v1834_v34 }
 0x766   : > { %13350 = vmatpush1.bf16.msra.mxu0 %v15554_v16  ;;  %13391 = vmatpush1.bf16.msra.mxu1 %v15682_v18  ;;  %v1962_v59 = vld [vmem:[%s16943_s17 + $0x2f38] sm:$0xff] }
 0x767   : > { %13351 = vmatprep.subr.bf16.mxu0 %v15563_v20  ;;  %13392 = vmatprep.subr.bf16.mxu1 %v15691_v22  ;;  %v15723_v3 = vcombine.high %v1958_v50, %v1962_v59  ;;  %v1838_v48 = vld [vmem:[%s16943_s17 + $0x2b58] sm:$0xff]  ;;  %v15722_v43 = vcombine.low %v1958_v50, %v1962_v59 }
 0x768   : > { %v1842_v61 = vld [vmem:[%s16943_s17 + $0x2b78] sm:$0xff] }
 0x769   : > { %v1966_v41 = vld [vmem:[%s16943_s17 + $0x2f58] sm:$0xff]  ;;  %v15603_v56 = vcombine.high %v1838_v48, %v1842_v61  ;;  %v15602_v30 = vcombine.low %v1838_v48, %v1842_v61 }
 0x76a   : > { %13352 = vmatpush1.bf16.msra.mxu0 %v15562_v17  ;;  %13393 = vmatpush1.bf16.msra.mxu1 %v15690_v26  ;;  %v1970_v0 = vld [vmem:[%s16943_s17 + $0x2f78] sm:$0xff] }
 0x76b   : > { %13353 = vmatprep.subr.bf16.mxu0 %v15571_v13  ;;  %13394 = vmatprep.subr.bf16.mxu1 %v15699_v47  ;;  %v15731_v49 = vcombine.high %v1966_v41, %v1970_v0  ;;  %v1846_v57 = vld [vmem:[%s16943_s17 + $0x2b98] sm:$0xff]  ;;  %v15730_v19 = vcombine.low %v1966_v41, %v1970_v0 }
 0x76c   : > { %v1850_v52 = vld [vmem:[%s16943_s17 + $0x2bb8] sm:$0xff] }
 0x76d   : > { %v1974_v15 = vld [vmem:[%s16943_s17 + $0x2f98] sm:$0xff]  ;;  %v15611_v25 = vcombine.high %v1846_v57, %v1850_v52  ;;  %v15610_v16 = vcombine.low %v1846_v57, %v1850_v52 }
 0x76e   : > { %13354 = vmatpush1.bf16.msra.mxu0 %v15570_v36  ;;  %13395 = vmatpush1.bf16.msra.mxu1 %v15698_v29  ;;  %v1978_v1 = vld [vmem:[%s16943_s17 + $0x2fb8] sm:$0xff] }
 0x76f   : > { %13355 = vmatprep.subr.bf16.mxu0 %v15579_v39  ;;  %13396 = vmatprep.subr.bf16.mxu1 %v15707_v32  ;;  %v15739_v5 = vcombine.high %v1974_v15, %v1978_v1  ;;  %v1854_v6 = vld [vmem:[%s16943_s17 + $0x2bd8] sm:$0xff]  ;;  %v15738_v18 = vcombine.low %v1974_v15, %v1978_v1 }
 0x770   : > { %v1858_v8 = vld [vmem:[%s16943_s17 + $0x2bf8] sm:$0xff] }
 0x771   : > { %v1982_v9 = vld [vmem:[%s16943_s17 + $0x2fd8] sm:$0xff]  ;;  %v15619_v20 = vcombine.high %v1854_v6, %v1858_v8  ;;  %v15618_v17 = vcombine.low %v1854_v6, %v1858_v8 }
 0x772   : > { %13356 = vmatpush1.bf16.msra.mxu0 %v15578_v40  ;;  %13397 = vmatpush1.bf16.msra.mxu1 %v15706_v37  ;;  %v1986_v10 = vld [vmem:[%s16943_s17 + $0x2ff8] sm:$0xff] }
 0x773   : > { %13357 = vmatprep.subr.bf16.mxu0 %v15587_v21  ;;  %13398 = vmatprep.subr.bf16.mxu1 %v15715_v31  ;;  %v15747_v22 = vcombine.high %v1982_v9, %v1986_v10  ;;  %v1990_v55 = vld [vmem:[%s16943_s17 + $0x3018] sm:$0xff]  ;;  %v15746_v26 = vcombine.low %v1982_v9, %v1986_v10 }
 0x774   : > { %v1994_v12 = vld [vmem:[%s16943_s17 + $0x3038] sm:$0xff] }
 0x775   : > { %v2118_v63 = vld [vmem:[%s16943_s17 + $0x3418] sm:$0xff]  ;;  %v15755_v13 = vcombine.high %v1990_v55, %v1994_v12  ;;  %v15754_v36 = vcombine.low %v1990_v55, %v1994_v12 }
 0x776   : > { %13358 = vmatpush1.bf16.msra.mxu0 %v15586_v38  ;;  %13399 = vmatpush1.bf16.msra.mxu1 %v15714_v54  ;;  %v2122_v24 = vld [vmem:[%s16943_s17 + $0x3438] sm:$0xff] }
 0x777   : > { %13359 = vmatprep.subr.bf16.mxu0 %v15595_v60  ;;  %13400 = vmatprep.subr.bf16.mxu1 %v15723_v3  ;;  %v15883_v47 = vcombine.high %v2118_v63, %v2122_v24  ;;  %v1998_v33 = vld [vmem:[%s16943_s17 + $0x3058] sm:$0xff]  ;;  %v15882_v29 = vcombine.low %v2118_v63, %v2122_v24 }
 0x778   : > { %v2002_v11 = vld [vmem:[%s16943_s17 + $0x3078] sm:$0xff] }
 0x779   : > { %v2126_v53 = vld [vmem:[%s16943_s17 + $0x3458] sm:$0xff]  ;;  %v15763_v39 = vcombine.high %v1998_v33, %v2002_v11  ;;  %v15762_v40 = vcombine.low %v1998_v33, %v2002_v11 }
 0x77a   : > { %13360 = vmatpush1.bf16.msra.mxu0 %v15594_v7  ;;  %13401 = vmatpush1.bf16.msra.mxu1 %v15722_v43  ;;  %v2130_v14 = vld [vmem:[%s16943_s17 + $0x3478] sm:$0xff] }
 0x77b   : > { %13361 = vmatprep.subr.bf16.mxu0 %v15603_v56  ;;  %13402 = vmatprep.subr.bf16.mxu1 %v15731_v49  ;;  %v15891_v32 = vcombine.high %v2126_v53, %v2130_v14  ;;  %v2006_v27 = vld [vmem:[%s16943_s17 + $0x3098] sm:$0xff]  ;;  %v15890_v37 = vcombine.low %v2126_v53, %v2130_v14 }
 0x77c   : > { %v2010_v42 = vld [vmem:[%s16943_s17 + $0x30b8] sm:$0xff] }
 0x77d   : > { %v2134_v44 = vld [vmem:[%s16943_s17 + $0x3498] sm:$0xff]  ;;  %v15771_v21 = vcombine.high %v2006_v27, %v2010_v42 }
 0x77e   : > { %13362 = vmatpush1.bf16.msra.mxu0 %v15602_v30  ;;  %13403 = vmatpush1.bf16.msra.mxu1 %v15730_v19  ;;  %v2138_v23 = vld [vmem:[%s16943_s17 + $0x34b8] sm:$0xff] }
 0x77f   : > { %13363 = vmatprep.subr.bf16.mxu0 %v15611_v25  ;;  %13404 = vmatprep.subr.bf16.mxu1 %v15739_v5  ;;  %v15899_v31 = vcombine.high %v2134_v44, %v2138_v23  ;;  %v2014_v45 = vld [vmem:[%s16943_s17 + $0x30d8] sm:$0xff]  ;;  %v15898_v59 = vcombine.low %v2134_v44, %v2138_v23 }
 0x780   : > { %v2018_v34 = vld [vmem:[%s16943_s17 + $0x30f8] sm:$0xff] }
 0x781   : > { %v2146_v50 = vld [vmem:[%s16943_s17 + $0x34f8] sm:$0xff]  ;;  %v15779_v38 = vcombine.high %v2014_v45, %v2018_v34  ;;  %v15778_v61 = vcombine.low %v2014_v45, %v2018_v34 }
 0x782   : > { %13364 = vmatpush1.bf16.msra.mxu0 %v15610_v16  ;;  %13405 = vmatpush1.bf16.msra.mxu1 %v15738_v18  ;;  %v2022_v60 = vld [vmem:[%s16943_s17 + $0x3118] sm:$0xff] }
 0x783   : > { %13365 = vmatprep.subr.bf16.mxu0 %v15619_v20  ;;  %13406 = vmatprep.subr.bf16.mxu1 %v15747_v22  ;;  %v2026_v3 = vld [vmem:[%s16943_s17 + $0x3138] sm:$0xff] }
 0x784   : > { %v2150_v48 = vld [vmem:[%s16943_s17 + $0x3518] sm:$0xff]  ;;  %v15787_v41 = vcombine.high %v2022_v60, %v2026_v3  ;;  %v15786_v57 = vcombine.low %v2022_v60, %v2026_v3 }
 0x785   : > { %v2030_v7 = vld [vmem:[%s16943_s17 + $0x3158] sm:$0xff] }
 0x786   : > { %13366 = vmatpush1.bf16.msra.mxu0 %v15618_v17  ;;  %13407 = vmatpush1.bf16.msra.mxu1 %v15746_v26  ;;  %v2034_v43 = vld [vmem:[%s16943_s17 + $0x3178] sm:$0xff] }
 0x787   : > { %13417 = vmatprep.subr.bf16.mxu0 %v15755_v13  ;;  %13458 = vmatprep.subr.bf16.mxu1 %v15883_v47  ;;  %v2158_v56 = vld [vmem:[%s16943_s17 + $0x3558] sm:$0xff]  ;;  %v15795_v15 = vcombine.high %v2030_v7, %v2034_v43  ;;  %v15794_v6 = vcombine.low %v2030_v7, %v2034_v43 }
 0x788   : > { %v2162_v49 = vld [vmem:[%s16943_s17 + $0x3578] sm:$0xff] }
 0x789   : > { %13368 = vmatmul.mubr.bf16.vlgmr.msra.gmra.mrb[104].mxu0 %v17459_v58  ;;  %13409 = vmatmul.mubr.bf16.vlgmr.msra.gmra.mrb[104].mxu1 %v17464_v35  ;;  %v2142_v58 = vld [vmem:[%s16943_s17 + $0x34d8] sm:$0xff]  ;;  %v15770_v35 = vcombine.low %v2006_v27, %v2010_v42  ;;  %v15923_v1 = vcombine.high %v2158_v56, %v2162_v49  ;;  %v15922_v8 = vcombine.low %v2158_v56, %v2162_v49 }
 0x78a   : > { %13418 = vmatpush1.bf16.msra.mxu0 %v15754_v36  ;;  %13459 = vmatpush1.bf16.msra.mxu1 %v15882_v29  ;;  %v15907_v54 = vcombine.high %v2142_v58, %v2146_v50  ;;  %v2038_v30 = vld [vmem:[%s16943_s17 + $0x3198] sm:$0xff] }
 0x78b   : > { %13419 = vmatprep.subr.bf16.mxu0 %v15763_v39  ;;  %13460 = vmatprep.subr.bf16.mxu1 %v15891_v32  ;;  %v2042_v19 = vld [vmem:[%s16943_s17 + $0x31b8] sm:$0xff] }
 0x78c   : > { %13449 = vmatprep.mubr.bf16.mxu0 %v17469_v46  ;;  %13490 = vmatprep.mubr.bf16.mxu1 %v17474_v51  ;;  %v2154_v46 = vld [vmem:[%s16943_s17 + $0x3538] sm:$0xff]  ;;  %v15906_v51 = vcombine.low %v2142_v58, %v2146_v50  ;;  %v15803_v9 = vcombine.high %v2038_v30, %v2042_v19  ;;  %v15802_v47 = vcombine.low %v2038_v30, %v2042_v19 }
 0x78d   : > { %v15915_v0 = vcombine.high %v2150_v48, %v2154_v46  ;;  %v15914_v52 = vcombine.low %v2150_v48, %v2154_v46  ;;  %v2166_v25 = vld [vmem:[%s16943_s17 + $0x3598] sm:$0xff] }
 0x78e   : > { %13420 = vmatpush1.bf16.msra.mxu0 %v15762_v40  ;;  %13461 = vmatpush1.bf16.msra.mxu1 %v15890_v37  ;;  %v2170_v5 = vld [vmem:[%s16943_s17 + $0x35b8] sm:$0xff] }
 0x78f   : > { %13421 = vmatprep.subr.bf16.mxu0 %v15771_v21  ;;  %13462 = vmatprep.subr.bf16.mxu1 %v15899_v31  ;;  %v15931_v16 = vcombine.high %v2166_v25, %v2170_v5  ;;  %v2046_v18 = vld [vmem:[%s16943_s17 + $0x31d8] sm:$0xff] }
 0x790   : > { %v2050_v20 = vld [vmem:[%s16943_s17 + $0x31f8] sm:$0xff] }
 0x791   : > { %v2174_v63 = vld [vmem:[%s16943_s17 + $0x35d8] sm:$0xff]  ;;  %v15811_v14 = vcombine.high %v2046_v18, %v2050_v20  ;;  %v15810_v44 = vcombine.low %v2046_v18, %v2050_v20 }
 0x792   : > { %13422 = vmatpush1.bf16.msra.mxu0 %v15770_v35  ;;  %13463 = vmatpush1.bf16.msra.mxu1 %v15898_v59  ;;  %v2178_v24 = vld [vmem:[%s16943_s17 + $0x35f8] sm:$0xff] }
 0x793   : > { %13423 = vmatprep.subr.bf16.mxu0 %v15779_v38  ;;  %13464 = vmatprep.subr.bf16.mxu1 %v15907_v54  ;;  %v15939_v29 = vcombine.high %v2174_v63, %v2178_v24  ;;  %v2054_v39 = vld [vmem:[%s16943_s17 + $0x3218] sm:$0xff]  ;;  %v15938_v23 = vcombine.low %v2174_v63, %v2178_v24 }
 0x794   : > { %v2058_v32 = vld [vmem:[%s16943_s17 + $0x3238] sm:$0xff] }
 0x795   : > { %v2182_v27 = vld [vmem:[%s16943_s17 + $0x3618] sm:$0xff]  ;;  %v15819_v40 = vcombine.high %v2054_v39, %v2058_v32  ;;  %v15818_v58 = vcombine.low %v2054_v39, %v2058_v32 }
 0x796   : > { %13424 = vmatpush1.bf16.msra.mxu0 %v15778_v61  ;;  %13465 = vmatpush1.bf16.msra.mxu1 %v15906_v51  ;;  %v2186_v42 = vld [vmem:[%s16943_s17 + $0x3638] sm:$0xff] }
 0x797   : > { %13425 = vmatprep.subr.bf16.mxu0 %v15787_v41  ;;  %13466 = vmatprep.subr.bf16.mxu1 %v15915_v0  ;;  %v15947_v37 = vcombine.high %v2182_v27, %v2186_v42  ;;  %v2062_v21 = vld [vmem:[%s16943_s17 + $0x3258] sm:$0xff]  ;;  %v15946_v50 = vcombine.low %v2182_v27, %v2186_v42 }
 0x798   : > { %v2066_v31 = vld [vmem:[%s16943_s17 + $0x3278] sm:$0xff] }
 0x799   : > { %v2190_v45 = vld [vmem:[%s16943_s17 + $0x3658] sm:$0xff]  ;;  %v15827_v35 = vcombine.high %v2062_v21, %v2066_v31  ;;  %v15826_v48 = vcombine.low %v2062_v21, %v2066_v31 }
 0x79a   : > { %13426 = vmatpush1.bf16.msra.mxu0 %v15786_v57  ;;  %13467 = vmatpush1.bf16.msra.mxu1 %v15914_v52  ;;  %v2194_v34 = vld [vmem:[%s16943_s17 + $0x3678] sm:$0xff] }
 0x79b   : > { %13427 = vmatprep.subr.bf16.mxu0 %v15795_v15  ;;  %13468 = vmatprep.subr.bf16.mxu1 %v15923_v1  ;;  %v15955_v59 = vcombine.high %v2190_v45, %v2194_v34  ;;  %v2070_v38 = vld [vmem:[%s16943_s17 + $0x3298] sm:$0xff]  ;;  %v15954_v46 = vcombine.low %v2190_v45, %v2194_v34 }
 0x79c   : > { %v13123_v10 = vpop.f32.mrb[92].mxu0  ;;  %v13164_v55 = vpop.f32.mrb[92].mxu1  ;;  %v2074_v54 = vld [vmem:[%s16943_s17 + $0x32b8] sm:$0xff] }
 0x79d   : > { %v13124_v22 = vadd.f32 %v13123_v10, %v18969_v62  ;;  %v13125_v12 = vpop.f32.mrb[93].mxu0  ;;  %v13166_v26 = vpop.f32.mrb[93].mxu1  ;;  %v15930_v62 = vcombine.low %v2166_v25, %v2170_v5  ;;  %v2198_v60 = vld [vmem:[%s16943_s17 + $0x3698] sm:$0xff]  ;;  %v15835_v61 = vcombine.high %v2070_v38, %v2074_v54  ;;  %v15834_v56 = vcombine.low %v2070_v38, %v2074_v54 }
 0x79e   : > { %v13126_v17 = vadd.f32 %v13125_v12, %v18971_v4  ;;  %v13127_v13 = vpop.f32.mrb[94].mxu0  ;;  %13428 = vmatpush1.bf16.msra.mxu0 %v15794_v6  ;;  %v13168_v11 = vpop.f32.mrb[94].mxu1  ;;  %13469 = vmatpush1.bf16.msra.mxu1 %v15922_v8  ;;  %v2202_v3 = vld [vmem:[%s16943_s17 + $0x36b8] sm:$0xff] }
 0x79f   : > { %v19043_v33 = vadd.f32 %v13164_v55, %v13124_v22  ;;  %v13128_v53 = vpop.f32.mrb[95].mxu0  ;;  %13429 = vmatprep.subr.bf16.mxu0 %v15803_v9  ;;  %v13169_v4 = vpop.f32.mrb[95].mxu1  ;;  %13470 = vmatprep.subr.bf16.mxu1 %v15931_v16  ;;  %v15963_v51 = vcombine.high %v2198_v60, %v2202_v3  ;;  %v2078_v41 = vld [vmem:[%s16943_s17 + $0x32d8] sm:$0xff]  ;;  %v15962_v49 = vcombine.low %v2198_v60, %v2202_v3 }
 0x7a0   : > { %v19045_v36 = vadd.f32 %v13166_v26, %v13126_v17  ;;  %v2082_v0 = vld [vmem:[%s16943_s17 + $0x32f8] sm:$0xff] }
 0x7a1   : > { %v2206_v7 = vld [vmem:[%s16943_s17 + $0x36d8] sm:$0xff]  ;;  %v15843_v57 = vcombine.high %v2078_v41, %v2082_v0  ;;  %v15842_v25 = vcombine.low %v2078_v41, %v2082_v0 }
 0x7a2   : > { %13430 = vmatpush1.bf16.msra.mxu0 %v15802_v47  ;;  %13471 = vmatpush1.bf16.msra.mxu1 %v15930_v62  ;;  %v2210_v43 = vld [vmem:[%s16943_s17 + $0x36f8] sm:$0xff] }
 0x7a3   : > { %13431 = vmatprep.subr.bf16.mxu0 %v15811_v14  ;;  %13472 = vmatprep.subr.bf16.mxu1 %v15939_v29  ;;  %v15971_v52 = vcombine.high %v2206_v7, %v2210_v43  ;;  %v2086_v15 = vld [vmem:[%s16943_s17 + $0x3318] sm:$0xff]  ;;  %v15970_v5 = vcombine.low %v2206_v7, %v2210_v43 }
 0x7a4   : > { %v2090_v1 = vld [vmem:[%s16943_s17 + $0x3338] sm:$0xff] }
 0x7a5   : > { %v2214_v30 = vld [vmem:[%s16943_s17 + $0x3718] sm:$0xff]  ;;  %v15851_v6 = vcombine.high %v2086_v15, %v2090_v1  ;;  %v15850_v20 = vcombine.low %v2086_v15, %v2090_v1 }
 0x7a6   : > { %13432 = vmatpush1.bf16.msra.mxu0 %v15810_v44  ;;  %13473 = vmatpush1.bf16.msra.mxu1 %v15938_v23  ;;  %v2218_v19 = vld [vmem:[%s16943_s17 + $0x3738] sm:$0xff] }
 0x7a7   : > { %13433 = vmatprep.subr.bf16.mxu0 %v15819_v40  ;;  %13474 = vmatprep.subr.bf16.mxu1 %v15947_v37  ;;  %v15979_v8 = vcombine.high %v2214_v30, %v2218_v19  ;;  %v2094_v9 = vld [vmem:[%s16943_s17 + $0x3358] sm:$0xff]  ;;  %v15978_v22 = vcombine.low %v2214_v30, %v2218_v19 }
 0x7a8   : > { %v2098_v10 = vld [vmem:[%s16943_s17 + $0x3378] sm:$0xff] }
 0x7a9   : > { %v2222_v16 = vld [vmem:[%s16943_s17 + $0x3758] sm:$0xff]  ;;  %v15859_v55 = vcombine.high %v2094_v9, %v2098_v10  ;;  %v15858_v13 = vcombine.low %v2094_v9, %v2098_v10 }
 0x7aa   : > { %13434 = vmatpush1.bf16.msra.mxu0 %v15818_v58  ;;  %13475 = vmatpush1.bf16.msra.mxu1 %v15946_v50  ;;  %v2226_v18 = vld [vmem:[%s16943_s17 + $0x3778] sm:$0xff] }
 0x7ab   : > { %13435 = vmatprep.subr.bf16.mxu0 %v15827_v35  ;;  %13476 = vmatprep.subr.bf16.mxu1 %v15955_v59  ;;  %v15987_v12 = vcombine.high %v2222_v16, %v2226_v18  ;;  %v2102_v63 = vld [vmem:[%s16943_s17 + $0x3398] sm:$0xff]  ;;  %v15986_v47 = vcombine.low %v2222_v16, %v2226_v18  ;;  %v393_v16 = vld [vmem:[#allocation2 + $0x30] sm:$0xff] }
 0x7ac   : > { %v2106_v24 = vld [vmem:[%s16943_s17 + $0x33b8] sm:$0xff] }
 0x7ad   : > { %v2230_v17 = vld [vmem:[%s16943_s17 + $0x3798] sm:$0xff]  ;;  %v15867_v11 = vcombine.high %v2102_v63, %v2106_v24  ;;  %v15866_v39 = vcombine.low %v2102_v63, %v2106_v24 }
 0x7ae   : > { %13436 = vmatpush1.bf16.msra.mxu0 %v15826_v48  ;;  %13477 = vmatpush1.bf16.msra.mxu1 %v15954_v46  ;;  %v2234_v26 = vld [vmem:[%s16943_s17 + $0x37b8] sm:$0xff] }
 0x7af   : > { %13437 = vmatprep.subr.bf16.mxu0 %v15835_v61  ;;  %13478 = vmatprep.subr.bf16.mxu1 %v15963_v51  ;;  %v15995_v53 = vcombine.high %v2230_v17, %v2234_v26  ;;  %v2110_v62 = vld [vmem:[%s16943_s17 + $0x33d8] sm:$0xff]  ;;  %v15994_v32 = vcombine.low %v2230_v17, %v2234_v26 }
 0x7b0   : > { %v2114_v14 = vld [vmem:[%s16943_s17 + $0x33f8] sm:$0xff] }
 0x7b1   : > { %v2238_v4 = vld [vmem:[%s16943_s17 + $0x37d8] sm:$0xff]  ;;  %v15875_v27 = vcombine.high %v2110_v62, %v2114_v14  ;;  %v15874_v44 = vcombine.low %v2110_v62, %v2114_v14  ;;  %v13585_v62 = vld [vmem:[#allocation7] sm:$0xff] (!%p16004_p12) }
 0x7b2   : > { %13438 = vmatpush1.bf16.msra.mxu0 %v15834_v56  ;;  %13479 = vmatpush1.bf16.msra.mxu1 %v15962_v49  ;;  %v2242_v29 = vld [vmem:[%s16943_s17 + $0x37f8] sm:$0xff] }
 0x7b3   : > { %13439 = vmatprep.subr.bf16.mxu0 %v15843_v57  ;;  %13480 = vmatprep.subr.bf16.mxu1 %v15971_v52  ;;  %v16003_v42 = vcombine.high %v2238_v4, %v2242_v29  ;;  %v16002_v23 = vcombine.low %v2238_v4, %v2242_v29  ;;  %v13586_v4 = vld [vmem:[#allocation7 + $0x8] sm:$0xff] (!%p16004_p12)  ;;  %v13633_v29 = vld [vmem:[#allocation7 + $0x180] sm:$0xff] (!%p16004_p12) }
 0x7b6   : > { %13440 = vmatpush1.bf16.msra.mxu0 %v15842_v25  ;;  %13481 = vmatpush1.bf16.msra.mxu1 %v15970_v5 }
 0x7b7   : > { %13441 = vmatprep.subr.bf16.mxu0 %v15851_v6  ;;  %13482 = vmatprep.subr.bf16.mxu1 %v15979_v8 }
 0x7ba   : > { %13442 = vmatpush1.bf16.msra.mxu0 %v15850_v20  ;;  %13483 = vmatpush1.bf16.msra.mxu1 %v15978_v22 }
 0x7bb   : > { %13443 = vmatprep.subr.bf16.mxu0 %v15859_v55  ;;  %13484 = vmatprep.subr.bf16.mxu1 %v15987_v12  ;;  %v394_v12 = vld [vmem:[#allocation2 + $0x38] sm:$0xff] }
 0x7be   : > { %13444 = vmatpush1.bf16.msra.mxu0 %v15858_v13  ;;  %13485 = vmatpush1.bf16.msra.mxu1 %v15986_v47 }
 0x7bf   : > { %13445 = vmatprep.subr.bf16.mxu0 %v15867_v11  ;;  %13486 = vmatprep.subr.bf16.mxu1 %v15995_v53  ;;  %v13601_v11 = vld [vmem:[#allocation7 + $0x80] sm:$0xff] (!%p16004_p12)  ;;  %v13602_v53 = vld [vmem:[#allocation7 + $0x88] sm:$0xff] (!%p16004_p12) }
 0x7c0   : > { %v16204_v14 = vpack.c.bf16 (!%p16004_p12), %v13602_v53, %v13601_v11 }
 0x7c2   : > { %13446 = vmatpush1.bf16.msra.mxu0 %v15866_v39  ;;  %13487 = vmatpush1.bf16.msra.mxu1 %v15994_v32  ;;  %v13634_v39 = vld [vmem:[#allocation7 + $0x188] sm:$0xff] (!%p16004_p12)  ;;  %v16206_v32 = vpack.c.bf16 (!%p16004_p12), %v13586_v4, %v13585_v62  ;;  %v13596_v4 = vld [vmem:[#allocation7 + $0x58] sm:$0xff] (!%p16004_p12) }
 0x7c3   : > { %13447 = vmatprep.subr.bf16.mxu0 %v15875_v27  ;;  %13488 = vmatprep.subr.bf16.mxu1 %v16003_v42  ;;  %v16236_v27 = vpack.c.bf16 (!%p16004_p12), %v13634_v39, %v13633_v29  ;;  %v13617_v42 = vld [vmem:[#allocation7 + $0x100] sm:$0xff] (!%p16004_p12)  ;;  %v13627_v29 = vld [vmem:[#allocation7 + $0x150] sm:$0xff] (!%p16004_p12) }
 0x7c6   : > { %13448 = vmatpush1.bf16.msra.mxu0 %v15874_v44  ;;  %13489 = vmatpush1.bf16.msra.mxu1 %v16002_v23  ;;  %v13618_v44 = vld [vmem:[#allocation7 + $0x108] sm:$0xff] (!%p16004_p12)  ;;  %v13603_v23 = vld [vmem:[#allocation7 + $0x90] sm:$0xff] (!%p16004_p12) }
 0x7c7   : > { %16205 = vmatprep.subr.bf16.mxu0 (!%p16004_p12), %v16204_v14  ;;  %16237 = vmatprep.subr.bf16.mxu1 (!%p16004_p12), %v16236_v27  ;;  %v13595_v14 = vld [vmem:[#allocation7 + $0x50] sm:$0xff] (!%p16004_p12)  ;;  %v13613_v27 = vld [vmem:[#allocation7 + $0xe0] sm:$0xff] (!%p16004_p12) }
 0x7c9   : > { %13450 = vmatmul.mubr.bf16.vlgmr.msra.gmra.mrb[108].mxu0 %v17545_v28  ;;  %13491 = vmatmul.mubr.bf16.vlgmr.msra.gmra.mrb[108].mxu1 %v17549_v2 }
 0x7ca   : > { %16207 = vmatpush3.bf16.msra.mxu0 (!%p16004_p12), %v16206_v32  ;;  %v13628_v32 = vld [vmem:[#allocation7 + $0x158] sm:$0xff] (!%p16004_p12) }
 0x7dc   : > { %v13205_v40 = vpop.f32.mrb[96].mxu0  ;;  %v13246_v21 = vpop.f32.mrb[96].mxu1 }
 0x7dd   : > { %v13206_v37 = vadd.f32 %v13205_v40, %v19043_v33  ;;  %v13207_v31 = vpop.f32.mrb[97].mxu0  ;;  %v13248_v34 = vpop.f32.mrb[97].mxu1  ;;  %v16238_v40 = vpack.c.bf16 (!%p16004_p12), %v13618_v44, %v13617_v42  ;;  %v13614_v42 = vld [vmem:[#allocation7 + $0xe8] sm:$0xff] (!%p16004_p12) }
 0x7de   : > { %v13208_v45 = vadd.f32 %v13207_v31, %v19045_v36  ;;  %v13209_v58 = vpop.f32.mrb[98].mxu0  ;;  %v13250_v35 = vpop.f32.mrb[98].mxu1  ;;  %v13588_v31 = vld [vmem:[#allocation7 + $0x18] sm:$0xff] (!%p16004_p12) }
 0x7df   : > { %v13247_v50 = vadd.f32 %v13246_v21, %v13206_v37  ;;  %v13210_v59 = vpop.f32.mrb[99].mxu0  ;;  %v13251_v54 = vpop.f32.mrb[99].mxu1  ;;  %v13604_v37 = vld [vmem:[#allocation7 + $0x98] sm:$0xff] (!%p16004_p12)  ;;  %v13587_v21 = vld [vmem:[#allocation7 + $0x10] sm:$0xff] (!%p16004_p12)  ;;  %16239 = vmatpush3.bf16.msra.mxu1 (!%p16004_p12), %v16238_v40  ;;  %v13645_v40 = vld [vmem:[#allocation7 + $0x1e0] sm:$0xff] (!%p16004_p12) }
 0x7e0   : > { %v13249_v38 = vadd.f32 %v13248_v34, %v13208_v45  ;;  %v16208_v45 = vpack.c.bf16 (!%p16004_p12), %v13604_v37, %v13603_v23  ;;  %v16210_v34 = vpack.c.bf16 (!%p16004_p12), %v13588_v31, %v13587_v21  ;;  %v13635_v58 = vld [vmem:[#allocation7 + $0x190] sm:$0xff] (!%p16004_p12)  ;;  %v13605_v54 = vld [vmem:[#allocation7 + $0xa0] sm:$0xff] (!%p16004_p12)  ;;  %v13646_v37 = vld [vmem:[#allocation7 + $0x1e8] sm:$0xff] (!%p16004_p12)  ;;  %v16226_v31 = vpack.c.bf16 (!%p16004_p12), %v13596_v4, %v13595_v14 }
 0x7e1   : > { %v13619_v35 = vld [vmem:[#allocation7 + $0x110] sm:$0xff] (!%p16004_p12)  ;;  %v13700_v4 = vld [vmem:[#allocation7 + $0x398] sm:$0xff] (!%p16004_p12) }
 0x7e2   : > { %16209 = vmatprep.subr.bf16.mxu0 (!%p16004_p12), %v16208_v45  ;;  %v13597_v45 = vld [vmem:[#allocation7 + $0x60] sm:$0xff] (!%p16004_p12)  ;;  %v13699_v14 = vld [vmem:[#allocation7 + $0x390] sm:$0xff] (!%p16004_p12) }
 0x7e3   : > { %16211 = vmatpush3.bf16.msra.mxu0 (!%p16004_p12), %v16210_v34  ;;  %v13598_v34 = vld [vmem:[#allocation7 + $0x68] sm:$0xff] (!%p16004_p12) }
 0x81c   : > { %v13287_v60 = vpop.f32.mrb[100].mxu0  ;;  %v13328_v48 = vpop.f32.mrb[100].mxu1 }
 0x81d   : > { %v13288_v3 = vadd.f32 %v13287_v60, %v13247_v50  ;;  %v13289_v28 = vpop.f32.mrb[101].mxu0  ;;  %v13330_v2 = vpop.f32.mrb[101].mxu1  ;;  %v13636_v50 = vld [vmem:[#allocation7 + $0x198] sm:$0xff] (!%p16004_p12)  ;;  %v13606_v60 = vld [vmem:[#allocation7 + $0xa8] sm:$0xff] (!%p16004_p12) }
 0x81e   : > { %v13290_v46 = vadd.f32 %v13289_v28, %v13249_v38  ;;  %v13291_v61 = vpop.f32.mrb[102].mxu0  ;;  %v13332_v33 = vpop.f32.mrb[102].mxu1  ;;  %v16240_v59 = vpack.c.bf16 (!%p16004_p12), %v13636_v50, %v13635_v58  ;;  %v13620_v38 = vld [vmem:[#allocation7 + $0x118] sm:$0xff] (!%p16004_p12)  ;;  %v13589_v28 = vld [vmem:[#allocation7 + $0x20] sm:$0xff] (!%p16004_p12)  ;;  %v16258_v50 = vpack.c.bf16 (!%p16004_p12), %v13628_v32, %v13627_v29 }
 0x81f   : > { %v13329_v51 = vadd.f32 %v13328_v48, %v13288_v3  ;;  %v13292_v41 = vpop.f32.mrb[103].mxu0  ;;  %v13333_v7 = vpop.f32.mrb[103].mxu1  ;;  %v16242_v3 = vpack.c.bf16 (!%p16004_p12), %v13620_v38, %v13619_v35  ;;  %v16212_v48 = vpack.c.bf16 (!%p16004_p12), %v13606_v60, %v13605_v54  ;;  %v13638_v61 = vld [vmem:[#allocation7 + $0x1a8] sm:$0xff] (!%p16004_p12)  ;;  %v16228_v35 = vpack.c.bf16 (!%p16004_p12), %v13614_v42, %v13613_v27  ;;  %v13520_v38 = vld [vmem:[#allocation2 + $0x8] sm:$0xff] (!%p16004_p12)  ;;  %v19090_v54 = vld [vmem:[#allocation5] sm:$0xff] (!%p16004_p12) }
 0x820   : > { %v13331_v0 = vadd.f32 %v13330_v2, %v13290_v46  ;;  %v13590_v46 = vld [vmem:[#allocation7 + $0x28] sm:$0xff] (!%p16004_p12)  ;;  %v13637_v2 = vld [vmem:[#allocation7 + $0x1a0] sm:$0xff] (!%p16004_p12)  ;;  %16241 = vmatprep.subr.bf16.mxu1 (!%p16004_p12), %v16240_v59  ;;  %v13607_v7 = vld [vmem:[#allocation7 + $0xb0] sm:$0xff] (!%p16004_p12)  ;;  %v16260_v60 = vpack.c.bf16 (!%p16004_p12), %v13646_v37, %v13645_v40  ;;  %v16304_v40 = vpack.c.bf16 (!%p16004_p12), %v13700_v4, %v13699_v14 }
 0x821   : > { %v13622_v33 = vld [vmem:[#allocation7 + $0x128] sm:$0xff] (!%p16004_p12)  ;;  %v16214_v41 = vpack.c.bf16 (!%p16004_p12), %v13590_v46, %v13589_v28  ;;  %16243 = vmatpush3.bf16.msra.mxu1 (!%p16004_p12), %v16242_v3  ;;  %16213 = vmatprep.subr.bf16.mxu0 (!%p16004_p12), %v16212_v48  ;;  %v13629_v59 = vld [vmem:[#allocation7 + $0x160] sm:$0xff] (!%p16004_p12)  ;;  %v13615_v48 = vld [vmem:[#allocation7 + $0xf0] sm:$0xff] (!%p16004_p12) }
 0x822   : > { %v13630_v3 = vld [vmem:[#allocation7 + $0x168] sm:$0xff] (!%p16004_p12)  ;;  %v13616_v28 = vld [vmem:[#allocation7 + $0xf8] sm:$0xff] (!%p16004_p12)  ;;  %v13651_v42 = vld [vmem:[#allocation7 + $0x210] sm:$0xff] (!%p16004_p12) }
 0x823   : > { %16215 = vmatpush3.bf16.msra.mxu0 (!%p16004_p12), %v16214_v41  ;;  %v13522_v41 = vld [vmem:[#allocation2 + $0x18] sm:$0xff] (!%p16004_p12)  ;;  %v13684_v37 = vld [vmem:[#allocation7 + $0x318] sm:$0xff] (!%p16004_p12) }
 0x85c   : > { %v13369_v36 = vpop.f32.mrb[104].mxu0  ;;  %v13410_v56 = vpop.f32.mrb[104].mxu1 }
 0x85d   : > { %v13370_v43 = vadd.f32 %v13369_v36, %v13329_v51  ;;  %v13371_v49 = vpop.f32.mrb[105].mxu0  ;;  %v13412_v52 = vpop.f32.mrb[105].mxu1  ;;  %v13621_v51 = vld [vmem:[#allocation7 + $0x120] sm:$0xff] (!%p16004_p12)  ;;  %v13608_v36 = vld [vmem:[#allocation7 + $0xb8] sm:$0xff] (!%p16004_p12) }
 0x85e   : > { %v13372_v57 = vadd.f32 %v13371_v49, %v13331_v0  ;;  %v13373_v15 = vpop.f32.mrb[106].mxu0  ;;  %v13414_v30 = vpop.f32.mrb[106].mxu1  ;;  %v16244_v0 = vpack.c.bf16 (!%p16004_p12), %v13638_v61, %v13637_v2  ;;  %v16216_v49 = vpack.c.bf16 (!%p16004_p12), %v13608_v36, %v13607_v7  ;;  %v13647_v61 = vld [vmem:[#allocation7 + $0x1f0] sm:$0xff] (!%p16004_p12) }
 0x85f   : > { %v13411_v1 = vadd.f32 %v13410_v56, %v13370_v43  ;;  %v13374_v19 = vpop.f32.mrb[107].mxu0  ;;  %v13415_v5 = vpop.f32.mrb[107].mxu1  ;;  %v13591_v43 = vld [vmem:[#allocation7 + $0x30] sm:$0xff] (!%p16004_p12)  ;;  %v16246_v56 = vpack.c.bf16 (!%p16004_p12), %v13622_v33, %v13621_v51  ;;  %v13640_v15 = vld [vmem:[#allocation7 + $0x1b8] sm:$0xff] (!%p16004_p12) }
 0x860   : > { %v13413_v25 = vadd.f32 %v13412_v52, %v13372_v57  ;;  %v13592_v57 = vld [vmem:[#allocation7 + $0x38] sm:$0xff] (!%p16004_p12)  ;;  %v13639_v52 = vld [vmem:[#allocation7 + $0x1b0] sm:$0xff] (!%p16004_p12)  ;;  %16245 = vmatprep.subr.bf16.mxu1 (!%p16004_p12), %v16244_v0  ;;  %v13529_v5 = vlaneseq (!%p16004_p12)  ;;  %16217 = vmatprep.subr.bf16.mxu0 (!%p16004_p12), %v16216_v49  ;;  %v16230_v0 = vpack.c.bf16 (!%p16004_p12), %v13598_v34, %v13597_v45  ;;  %v13701_v45 = vld [vmem:[#allocation7 + $0x3a0] sm:$0xff] (!%p16004_p12) }
 0x861   : > { %v13623_v30 = vld [vmem:[#allocation7 + $0x130] sm:$0xff] (!%p16004_p12)  ;;  %v13624_v19 = vld [vmem:[#allocation7 + $0x138] sm:$0xff] (!%p16004_p12)  ;;  %16247 = vmatpush3.bf16.msra.mxu1 (!%p16004_p12), %v16246_v56  ;;  %v13702_v34 = vld [vmem:[#allocation7 + $0x3a8] sm:$0xff] (!%p16004_p12) }
 0x862   : > { %v13648_v51 = vld [vmem:[#allocation7 + $0x1f8] sm:$0xff] (!%p16004_p12)  ;;  %v13599_v7 = vld [vmem:[#allocation7 + $0x70] sm:$0xff] (!%p16004_p12) }
 0x89c   : > { %v13451_v6 = vpop.f32.mrb[108].mxu0  ;;  %v13492_v9 = vpop.f32.mrb[108].mxu1 }
 0x89d   : > { %v13452_v8 = vadd.f32 %v13451_v6, %v13411_v1  ;;  %v13453_v10 = vpop.f32.mrb[109].mxu0  ;;  %v13494_v20 = vpop.f32.mrb[109].mxu1  ;;  %v16248_v1 = vpack.c.bf16 (!%p16004_p12), %v13640_v15, %v13639_v52  ;;  %v13610_v6 = vld [vmem:[#allocation7 + $0xc8] sm:$0xff] (!%p16004_p12)  ;;  %v16232_v52 = vpack.c.bf16 (!%p16004_p12), %v13616_v28, %v13615_v48  ;;  %v13600_v15 = vld [vmem:[#allocation7 + $0x78] sm:$0xff] (!%p16004_p12)  ;;  %v16308_v48 = vpack.c.bf16 (!%p16004_p12), %v13702_v34, %v13701_v45 }
 0x89e   : > { %v13454_v18 = vadd.f32 %v13453_v10, %v13413_v25  ;;  %v13455_v22 = vpop.f32.mrb[110].mxu0  ;;  %v13496_v63 = vpop.f32.mrb[110].mxu1  ;;  %13518 = sbr.rel (%p16004_p12) target bundleno = 2696 (0xa88), region = 80  ;;  %v13609_v25 = vld [vmem:[#allocation7 + $0xc0] sm:$0xff] (!%p16004_p12)  ;;  %v13642_v10 = vld [vmem:[#allocation7 + $0x1c8] sm:$0xff] (!%p16004_p12) }
 0x89f   : > { %v13493_v55 = vadd.f32 %v13492_v9, %v13452_v8  ;;  %v13456_v24 = vpop.f32.mrb[111].mxu0  ;;  %v13497_v26 = vpop.f32.mrb[111].mxu1  ;;  %v16218_v8 = vpack.c.bf16 (!%p16004_p12), %v13592_v57, %v13591_v43  ;;  %v13641_v9 = vld [vmem:[#allocation7 + $0x1c0] sm:$0xff] (!%p16004_p12)  ;;  %v13594_v22 = vld [vmem:[#allocation7 + $0x48] sm:$0xff] (!%p16004_p12)  ;;  %16249 = vmatprep.subr.bf16.mxu1 (!%p16004_p12), %v16248_v1  ;;  %v13519_v43 = vld [vmem:[#allocation2] sm:$0xff] (!%p16004_p12)  ;;  %v16262_v57 = vpack.c.bf16 (!%p16004_p12), %v13630_v3, %v13629_v59 }
 0x8a0   : > { %v13495_v17 = vadd.f32 %v13494_v20, %v13454_v18  ;;  %v16220_v18 = vpack.c.bf16 (!%p16004_p12), %v13610_v6, %v13609_v25  ;;  %v13593_v20 = vld [vmem:[#allocation7 + $0x40] sm:$0xff] (!%p16004_p12)  ;;  %v13626_v63 = vld [vmem:[#allocation7 + $0x148] sm:$0xff] (!%p16004_p12)  ;;  %v13611_v24 = vld [vmem:[#allocation7 + $0xd0] sm:$0xff] (!%p16004_p12)  ;;  %v19084_v26 = vshrl.u32 (!%p16004_p12), %v13529_v5, 7 }
 0x8a1   : > { %v13505_v13 = vadd.f32 %v13493_v55, %v393_v16  ;;  %v16250_v16 = vpack.c.bf16 (!%p16004_p12), %v13624_v19, %v13623_v30  ;;  %v13625_v55 = vld [vmem:[#allocation7 + $0x140] sm:$0xff] (!%p16004_p12)  ;;  %16219 = vmatpush3.bf16.msra.mxu0 (!%p16004_p12), %v16218_v8  ;;  %v16222_v11 = vpack.c.bf16 (!%p16004_p12), %v13594_v22, %v13593_v20  ;;  %v13631_v1 = vld [vmem:[#allocation7 + $0x170] sm:$0xff] (!%p16004_p12)  ;;  %v13521_v30 = vld [vmem:[#allocation2 + $0x10] sm:$0xff] (!%p16004_p12)  ;;  %v16264_v19 = vpack.c.bf16 (!%p16004_p12), %v13648_v51, %v13647_v61 }
 0x8a2   : > { %v13506_v47 = vadd.f32 %v13495_v17, %v394_v12  ;;  %v16252_v12 = vpack.c.bf16 (!%p16004_p12), %v13642_v10, %v13641_v9  ;;  %v13612_v17 = vld [vmem:[#allocation7 + $0xd8] sm:$0xff] (!%p16004_p12)  ;;  %16221 = vmatprep.subr.bf16.mxu0 (!%p16004_p12), %v16220_v18  ;;  %v16254_v53 = vpack.c.bf16 (!%p16004_p12), %v13626_v63, %v13625_v55  ;;  %v13535_v44 = vsub.s32 (!%p16004_p12), 1, %v19084_v26  ;;  %v13665_v6 = vld [vmem:[#allocation7 + $0x280] sm:$0xff] (!%p16004_p12)  ;;  %v13666_v8 = vld [vmem:[#allocation7 + $0x288] sm:$0xff] (!%p16004_p12) }
 0x8a3   : > { %13513 = vst [vmem:[#allocation2 + $0x30] sm:$0xff] %v13505_v13  ;;  %v13643_v13 = vld [vmem:[#allocation7 + $0x1d0] sm:$0xff] (!%p16004_p12)  ;;  %16251 = vmatpush3.bf16.msra.mxu1 (!%p16004_p12), %v16250_v16  ;;  %v16224_v62 = vpack.c.bf16 (!%p16004_p12), %v13612_v17, %v13611_v24  ;;  %v13543_v23 = vsub.s32 (!%p16004_p12), 3, %v19084_v26  ;;  %v13531_v21 = vsub.s32 (!%p16004_p12), 0, %v19084_v26  ;;  %v13539_v58 = vsub.s32 (!%p16004_p12), 2, %v19084_v26  ;;  %v13632_v25 = vld [vmem:[#allocation7 + $0x178] sm:$0xff] (!%p16004_p12) }
 0x8a4   : > { %13514 = vst [vmem:[#allocation2 + $0x38] sm:$0xff] %v13506_v47  ;;  %v13644_v47 = vld [vmem:[#allocation7 + $0x1d8] sm:$0xff] (!%p16004_p12)  ;;  %16253 = vmatprep.subr.bf16.mxu1 (!%p16004_p12), %v16252_v12  ;;  %v13536_v46 = vrot.slane (!%p16004_p12), %v19090_v54, %v13535_v44  ;;  %v13697_v16 = vld [vmem:[#allocation7 + $0x380] sm:$0xff] (!%p16004_p12)  ;;  %v13698_v18 = vld [vmem:[#allocation7 + $0x388] sm:$0xff] (!%p16004_p12)  ;;  %v16234_v20 = vpack.c.bf16 (!%p16004_p12), %v13600_v15, %v13599_v7  ;;  %v16266_v55 = vpack.c.bf16 (!%p16004_p12), %v13632_v25, %v13631_v1  ;;  %v13551_v3 = vsub.s32 (!%p16004_p12), 5, %v19084_v26 }
 0x8a5   : > { %v16256_v39 = vpack.c.bf16 %v13644_v47, %v13643_v13  ;;  %16223 = vmatpush3.bf16.msra.mxu0 %v16222_v11  ;;  %v13544_v2 = vrot.slane %v19090_v54, %v13543_v23  ;;  %v13532_v33 = vrot.slane %v19090_v54, %v13531_v21  ;;  %v13540_v49 = vrot.slane %v19090_v54, %v13539_v58  ;;  %v13649_v63 = vld [vmem:[#allocation7 + $0x200] sm:$0xff]  ;;  %v13650_v24 = vld [vmem:[#allocation7 + $0x208] sm:$0xff]  ;;  %v13667_v11 = vld [vmem:[#allocation7 + $0x290] sm:$0xff] }
 0x8a6   : > { %16225 = vmatprep.subr.bf16.mxu0 %v16224_v62  ;;  %v13570_v36 = vadd.f32 %v13536_v46, %v13520_v38  ;;  %v16268_v12 = vpack.c.bf16 %v13666_v8, %v13665_v6  ;;  %v13681_v17 = vld [vmem:[#allocation7 + $0x300] sm:$0xff]  ;;  %v16300_v13 = vpack.c.bf16 %v13698_v18, %v13697_v16  ;;  %v13682_v47 = vld [vmem:[#allocation7 + $0x308] sm:$0xff]  ;;  %v16270_v29 = vpack.c.bf16 %v13650_v24, %v13649_v63  ;;  %v13652_v44 = vld [vmem:[#allocation7 + $0x218] sm:$0xff] }
 0x8a7   : > { %16255 = vmatpush3.bf16.msra.mxu1 %v16254_v53  ;;  %v13572_v56 = vadd.f32 %v13544_v2, %v13522_v41  ;;  %v13569_v10 = vadd.f32 %v13532_v33, %v13519_v43  ;;  %v13571_v22 = vadd.f32 %v13540_v49, %v13521_v30  ;;  %v13668_v53 = vld [vmem:[#allocation7 + $0x298] sm:$0xff]  ;;  %v16302_v32 = vpack.c.bf16 %v13682_v47, %v13681_v17  ;;  %v13683_v23 = vld [vmem:[#allocation7 + $0x310] sm:$0xff]  ;;  %v13669_v21 = vld [vmem:[#allocation7 + $0x2a0] sm:$0xff] }
 0x8a8   : > { %16257 = vmatprep.subr.bf16.mxu1 %v16256_v39  ;;  %v13578_v5 = vmax.f32 %v13570_v36, 0.0  ;;  %v16272_v27 = vpack.c.bf16 %v13668_v53, %v13667_v11  ;;  %v16274_v58 = vpack.c.bf16 %v13652_v44, %v13651_v42  ;;  %v13653_v59 = vld [vmem:[#allocation7 + $0x220] sm:$0xff]  ;;  %v13654_v38 = vld [vmem:[#allocation7 + $0x228] sm:$0xff]  ;;  %v13671_v46 = vld [vmem:[#allocation7 + $0x2b0] sm:$0xff]  ;;  %v13559_v61 = vsub.s32 7, %v19084_v26 }
 0x8a9   : > { %16227 = vmatpush3.bf16.msra.mxu0 %v16226_v31  ;;  %v13580_v9 = vmax.f32 %v13572_v56, 0.0  ;;  %v13577_v62 = vmax.f32 %v13569_v10, 0.0  ;;  %v13579_v39 = vmax.f32 %v13571_v22, 0.0  ;;  %v13670_v31 = vld [vmem:[#allocation7 + $0x2a8] sm:$0xff]  ;;  %v13672_v2 = vld [vmem:[#allocation7 + $0x2b8] sm:$0xff]  ;;  %v13703_v51 = vld [vmem:[#allocation7 + $0x3b0] sm:$0xff]  ;;  %v16278_v41 = vpack.c.bf16 %v13654_v38, %v13653_v59 }
 0x8aa   : > { %16229 = vmatprep.subr.bf16.mxu0 %v16228_v35  ;;  %13784 = vmatprep.mubr.f32.mxu0 %v13578_v5  ;;  %v16276_v35 = vpack.c.bf16 %v13670_v31, %v13669_v21  ;;  %v13686_v28 = vld [vmem:[#allocation7 + $0x328] sm:$0xff]  ;;  %v13704_v33 = vld [vmem:[#allocation7 + $0x3b8] sm:$0xff]  ;;  %v16280_v7 = vpack.c.bf16 %v13672_v2, %v13671_v46  ;;  %v13655_v36 = vld [vmem:[#allocation7 + $0x230] sm:$0xff]  ;;  %v13552_v49 = vrot.slane %v19090_v54, %v13551_v3  ;;  %v13547_v21 = vsub.s32 4, %v19084_v26 }
 0x8ab   : > { %16259 = vmatpush3.bf16.msra.mxu1 %v16258_v50  ;;  %13854 = vmatprep.mubr.f32.mxu1 %v13580_v9  ;;  %v16306_v50 = vpack.c.bf16 %v13684_v37, %v13683_v23  ;;  %v13656_v43 = vld [vmem:[#allocation7 + $0x238] sm:$0xff]  ;;  %v13687_v56 = vld [vmem:[#allocation7 + $0x330] sm:$0xff]  ;;  %v13673_v15 = vld [vmem:[#allocation7 + $0x2c0] sm:$0xff]  ;;  %v13560_v30 = vrot.slane %v19090_v54, %v13559_v61  ;;  %v13555_v45 = vsub.s32 6, %v19084_v26 }
 0x8ac   : > { %16261 = vmatprep.subr.bf16.mxu1 %v16260_v60  ;;  %v13685_v60 = vld [vmem:[#allocation7 + $0x320] sm:$0xff]  ;;  %v13674_v1 = vld [vmem:[#allocation7 + $0x2c8] sm:$0xff]  ;;  %v16282_v5 = vpack.c.bf16 %v13656_v43, %v13655_v36  ;;  %v13526_v22 = vld [vmem:[#allocation2 + $0x38] sm:$0xff]  ;;  %v13548_v2 = vrot.slane %v19090_v54, %v13547_v21 }
 0x8ad   : > { %16231 = vmatpush3.bf16.msra.mxu0 %v16230_v0  ;;  %v16310_v0 = vpack.c.bf16 %v13686_v28, %v13685_v60  ;;  %v13706_v25 = vld [vmem:[#allocation7 + $0x3c8] sm:$0xff]  ;;  %v13657_v6 = vld [vmem:[#allocation7 + $0x240] sm:$0xff]  ;;  %v16284_v10 = vpack.c.bf16 %v13674_v1, %v13673_v15  ;;  %v13675_v63 = vld [vmem:[#allocation7 + $0x2d0] sm:$0xff]  ;;  %v13576_v17 = vadd.f32 %v13560_v30, %v13526_v22  ;;  %v13556_v26 = vrot.slane %v19090_v54, %v13555_v45 }
 0x8ae   : > { %16233 = vmatprep.subr.bf16.mxu0 %v16232_v52  ;;  %v13688_v52 = vld [vmem:[#allocation7 + $0x338] sm:$0xff]  ;;  %v13524_v8 = vld [vmem:[#allocation2 + $0x28] sm:$0xff]  ;;  %v13658_v16 = vld [vmem:[#allocation7 + $0x248] sm:$0xff] }
 0x8af   : > { %16263 = vmatpush3.bf16.msra.mxu1 %v16262_v57  ;;  %v16312_v57 = vpack.c.bf16 %v13704_v33, %v13703_v51  ;;  %v16314_v9 = vpack.c.bf16 %v13688_v52, %v13687_v56  ;;  %v13689_v18 = vld [vmem:[#allocation7 + $0x340] sm:$0xff]  ;;  %v13676_v24 = vld [vmem:[#allocation7 + $0x2d8] sm:$0xff]  ;;  %v16286_v53 = vpack.c.bf16 %v13658_v16, %v13657_v6  ;;  %v13678_v23 = vld [vmem:[#allocation7 + $0x2e8] sm:$0xff]  ;;  %v16685_v6 = vmov 0.0|0.0  }
 0x8b0   : > { %16265 = vmatprep.subr.bf16.mxu1 %v16264_v19  ;;  %v13705_v19 = vld [vmem:[#allocation7 + $0x3c0] sm:$0xff]  ;;  %v13708_v47 = vld [vmem:[#allocation7 + $0x3d8] sm:$0xff]  ;;  %v16288_v4 = vpack.c.bf16 %v13676_v24, %v13675_v63  ;;  %v13710_v37 = vld [vmem:[#allocation7 + $0x3e8] sm:$0xff] }
 0x8b1   : > { %16235 = vmatpush3.bf16.msra.mxu0 %v16234_v20  ;;  %v13574_v20 = vadd.f32 %v13552_v49, %v13524_v8  ;;  %v13692_v42 = vld [vmem:[#allocation7 + $0x358] sm:$0xff]  ;;  %v13677_v44 = vld [vmem:[#allocation7 + $0x2e0] sm:$0xff]  ;;  %v13694_v60 = vld [vmem:[#allocation7 + $0x368] sm:$0xff] }
 0x8b2   : > { %16269 = vmatprep.subr.bf16.mxu0 %v16268_v12  ;;  %v13690_v12 = vld [vmem:[#allocation7 + $0x348] sm:$0xff]  ;;  %v13693_v59 = vld [vmem:[#allocation7 + $0x360] sm:$0xff]  ;;  %v13679_v3 = vld [vmem:[#allocation7 + $0x2f0] sm:$0xff] }
 0x8b3   : > { %16267 = vmatpush3.bf16.msra.mxu1 %v16266_v55  ;;  %v16316_v55 = vpack.c.bf16 %v13706_v25, %v13705_v19  ;;  %v13582_v11 = vmax.f32 %v13574_v20, 0.0  ;;  %v16318_v14 = vpack.c.bf16 %v13690_v12, %v13689_v18  ;;  %v13711_v28 = vld [vmem:[#allocation7 + $0x3f0] sm:$0xff]  ;;  %v13712_v46 = vld [vmem:[#allocation7 + $0x3f8] sm:$0xff]  ;;  %v16326_v33 = vpack.c.bf16 %v13694_v60, %v13693_v59  ;;  %v13525_v36 = vld [vmem:[#allocation2 + $0x30] sm:$0xff] }
 0x8b4   : > { %16301 = vmatprep.subr.bf16.mxu1 %v16300_v13  ;;  %13785 = vmatmul.mubr.f32.vlgmr.msra.gmra.mrb[0].mxu0 %v13577_v62  ;;  %v13707_v13 = vld [vmem:[#allocation7 + $0x3d0] sm:$0xff]  ;;  %v13584_v62 = vmax.f32 %v13576_v17, 0.0  ;;  %v13523_v51 = vld [vmem:[#allocation2 + $0x20] sm:$0xff]  ;;  %v16328_v43 = vpack.c.bf16 %v13712_v46, %v13711_v28  ;;  %v13575_v15 = vadd.f32 %v13556_v26, %v13525_v36  ;;  %v14001_v19 = vld [vmem:[#allocation10] sm:$0xff] }
 0x8b5   : > { %16271 = vmatpush3.bf16.msra.mxu0 %v16270_v29  ;;  %v13659_v29 = vld [vmem:[#allocation7 + $0x250] sm:$0xff]  ;;  %13924 = vmatprep.mubr.f32.mxu0 %v13582_v11  ;;  %v13696_v49 = vld [vmem:[#allocation7 + $0x378] sm:$0xff]  ;;  %v14005_v16 = vld [vmem:[#allocation10 + $0x20] sm:$0xff] }
 0x8b6   : > { %13855 = vmatmul.mubr.f32.vlgmr.msra.gmra.mrb[0].mxu1 %v13579_v39  ;;  %16273 = vmatprep.subr.bf16.mxu0 %v16272_v27  ;;  %v13660_v39 = vld [vmem:[#allocation7 + $0x258] sm:$0xff]  ;;  %v16320_v27 = vpack.c.bf16 %v13708_v47, %v13707_v13  ;;  %v13695_v56 = vld [vmem:[#allocation7 + $0x370] sm:$0xff]  ;;  %v13583_v30 = vmax.f32 %v13575_v15, 0.0  ;;  %v14009_v63 = vld [vmem:[#allocation10 + $0x40] sm:$0xff] }
 0x8b7   : > { %16303 = vmatpush3.bf16.msra.mxu1 %v16302_v32  ;;  %v13691_v32 = vld [vmem:[#allocation7 + $0x350] sm:$0xff]  ;;  %13994 = vmatprep.mubr.f32.mxu1 %v13584_v62  ;;  %v16290_v31 = vpack.c.bf16 %v13660_v39, %v13659_v29  ;;  %v16330_v1 = vpack.c.bf16 %v13696_v49, %v13695_v56  ;;  %v14012_v47 = vld [vmem:[#allocation10 + $0x58] sm:$0xff]  ;;  %v16006_v28 = vld [vmem:[#allocation11] ss:$0 sm:$0xff] }
 0x8b8   : > { %16305 = vmatprep.subr.bf16.mxu1 %v16304_v40  ;;  %v13709_v40 = vld [vmem:[#allocation7 + $0x3e0] sm:$0xff]  ;;  %v16322_v34 = vpack.c.bf16 %v13692_v42, %v13691_v32  ;;  %v14002_v25 = vld [vmem:[#allocation10 + $0x8] sm:$0xff]  ;;  %v14007_v22 = vld [vmem:[#allocation10 + $0x30] sm:$0xff]  ;;  %v16687_v32 = vmov 0.0  }
 0x8b9   : > { %16275 = vmatpush3.bf16.msra.mxu0 %v16274_v58  ;;  %v16292_v58 = vpack.c.bf16 %v13678_v23, %v13677_v44  ;;  %v16324_v38 = vpack.c.bf16 %v13710_v37, %v13709_v40  ;;  %v16333_v8 = vpack.c.bf16 %v14002_v25, %v14001_v19  ;;  %v14006_v18 = vld [vmem:[#allocation10 + $0x28] sm:$0xff]  ;;  %v14011_v13 = vld [vmem:[#allocation10 + $0x50] sm:$0xff]  ;;  %v14016_v29 = vld [vmem:[#allocation10 + $0x78] sm:$0xff] }
 0x8ba   : > { %16277 = vmatprep.subr.bf16.mxu0 %v16276_v35  ;;  %v13662_v35 = vld [vmem:[#allocation7 + $0x268] sm:$0xff]  ;;  %v16339_v20 = vpack.c.bf16 %v14006_v18, %v14005_v16  ;;  %v16348_v11 = vpack.c.bf16 %v14012_v47, %v14011_v13  ;;  %v16005_v42 = vld [vmem:[#allocation8] ss:$0 sm:$0xff] }
 0x8bb   : > { %16307 = vmatpush3.bf16.msra.mxu1 %v16306_v50  ;;  %v13661_v50 = vld [vmem:[#allocation7 + $0x260] sm:$0xff]  ;;  %v14010_v24 = vld [vmem:[#allocation10 + $0x48] sm:$0xff] }
 0x8bc   : > { %16309 = vmatprep.subr.bf16.mxu1 %v16308_v48  ;;  %v13680_v48 = vld [vmem:[#allocation7 + $0x2f8] sm:$0xff]  ;;  %v16294_v61 = vpack.c.bf16 %v13662_v35, %v13661_v50  ;;  %v16345_v17 = vpack.c.bf16 %v14010_v24, %v14009_v63  ;;  %v14014_v62 = vld [vmem:[#allocation10 + $0x68] sm:$0xff] }
 0x8bd   : > { %16279 = vmatpush3.bf16.msra.mxu0 %v16278_v41  ;;  %v16296_v41 = vpack.c.bf16 %v13680_v48, %v13679_v3 }
 0x8be   : > { %16281 = vmatprep.subr.bf16.mxu0 %v16280_v7  ;;  %v13664_v7 = vld [vmem:[#allocation7 + $0x278] sm:$0xff] }
 0x8bf   : > { %16311 = vmatpush3.bf16.msra.mxu1 %v16310_v0  ;;  %v13663_v0 = vld [vmem:[#allocation7 + $0x270] sm:$0xff] }
 0x8c0   : > { %16313 = vmatprep.subr.bf16.mxu1 %v16312_v57  ;;  %v13573_v57 = vadd.f32 %v13548_v2, %v13523_v51  ;;  %v16298_v52 = vpack.c.bf16 %v13664_v7, %v13663_v0 }
 0x8c1   : > { %16283 = vmatpush3.bf16.msra.mxu0 %v16282_v5  ;;  %v14003_v5 = vld [vmem:[#allocation10 + $0x10] sm:$0xff] }
 0x8c2   : > { %16285 = vmatprep.subr.bf16.mxu0 %v16284_v10  ;;  %v13581_v54 = vmax.f32 %v13573_v57, 0.0 }
 0x8c3   : > { %16315 = vmatpush3.bf16.msra.mxu1 %v16314_v9  ;;  %v14004_v9 = vld [vmem:[#allocation10 + $0x18] sm:$0xff] }
 0x8c4   : > { %16317 = vmatprep.subr.bf16.mxu1 %v16316_v55  ;;  %v16336_v10 = vpack.c.bf16 %v14004_v9, %v14003_v5  ;;  %v14008_v55 = vld [vmem:[#allocation10 + $0x38] sm:$0xff] }
 0x8c5   : > { %16287 = vmatpush3.bf16.msra.mxu0 %v16286_v53  ;;  %v16342_v12 = vpack.c.bf16 %v14008_v55, %v14007_v22  ;;  %v14013_v53 = vld [vmem:[#allocation10 + $0x60] sm:$0xff] }
 0x8c6   : > { %16289 = vmatprep.subr.bf16.mxu0 %v16288_v4  ;;  %v14015_v4 = vld [vmem:[#allocation10 + $0x70] sm:$0xff] }
 0x8c7   : > { %16319 = vmatpush3.bf16.msra.mxu1 %v16318_v14  ;;  %v16351_v14 = vpack.c.bf16 %v14014_v62, %v14013_v53  ;;  %v16354_v39 = vpack.c.bf16 %v14016_v29, %v14015_v4 }
 0x8c8   : > { %16321 = vmatprep.subr.bf16.mxu1 %v16320_v27 }
 0x8c9   : > { %16291 = vmatpush3.bf16.msra.mxu0 %v16290_v31 }
 0x8ca   : > { %16293 = vmatprep.subr.bf16.mxu0 %v16292_v58 }
 0x8cb   : > { %16323 = vmatpush3.bf16.msra.mxu1 %v16322_v34 }
 0x8cc   : > { %16325 = vmatprep.subr.bf16.mxu1 %v16324_v38 }
 0x8cd   : > { %16295 = vmatpush3.bf16.msra.mxu0 %v16294_v61 }
 0x8ce   : > { %16297 = vmatprep.subr.bf16.mxu0 %v16296_v41 }
 0x8cf   : > { %16327 = vmatpush3.bf16.msra.mxu1 %v16326_v33 }
 0x8d0   : > { %16329 = vmatprep.subr.bf16.mxu1 %v16328_v43 }
 0x8d1   : > { %16299 = vmatpush3.bf16.msra.mxu0 %v16298_v52 }
 0x8d2   : > { %16332 = vmatprep.subr.bf16.mxu0 %v16685_v6 }
 0x8d3   : > { %16331 = vmatpush3.bf16.msra.mxu1 %v16330_v1 }
 0x8d4   : > { %13925 = vmatmul.mubr.f32.vlgmr.msra.gmra.mrb[2].mxu0 %v13581_v54 }
 0x8d5   : > { %16334 = vmatpush3.bf16.msra.mxu0 %v16333_v8  ;;  %16201 = vmatprep.mubr.msk.f32.mxu0 %vm16686_vm0, %v16687_v32 }
 0x8d6   : > { %13995 = vmatmul.mubr.f32.vlgmr.msra.gmra.mrb[2].mxu1 %v13583_v30  ;;  %16335 = vmatprep.subr.bf16.mxu0 %v16685_v6 }
 0x8d9   : > { %16337 = vmatpush3.bf16.msra.mxu0 %v16336_v10 }
 0x8da   : > { %16338 = vmatprep.subr.bf16.mxu0 %v16685_v6 }
 0x8dd   : > { %16340 = vmatpush3.bf16.msra.mxu0 %v16339_v20 }
 0x8de   : > { %16341 = vmatprep.subr.bf16.mxu0 %v16685_v6 }
 0x8e1   : > { %16343 = vmatpush3.bf16.msra.mxu0 %v16342_v12 }
 0x8e2   : > { %16344 = vmatprep.subr.bf16.mxu0 %v16685_v6 }
 0x8e5   : > { %16346 = vmatpush3.bf16.msra.mxu0 %v16345_v17 }
 0x8e6   : > { %16347 = vmatprep.subr.bf16.mxu0 %v16685_v6 }
 0x8e9   : > { %16349 = vmatpush3.bf16.msra.mxu0 %v16348_v11 }
 0x8ea   : > { %16350 = vmatprep.subr.bf16.mxu0 %v16685_v6 }
 0x8ed   : > { %16352 = vmatpush3.bf16.msra.mxu0 %v16351_v14 }
 0x8ee   : > { %16353 = vmatprep.subr.bf16.mxu0 %v16685_v6 }
 0x8f1   : > { %16355 = vmatpush3.bf16.msra.mxu0 %v16354_v39 }
 0x987   : > { %v16044_v27 = vpop.f32.mrb[0].mxu0 }
 0x988   : > { %v16045_v44 = vpop.f32.mrb[1].mxu0 }
 0x989   : > { %v16079_v23 = vpop.f32.mrb[0].mxu1  ;;  %v16046_v40 = vadd.f32 %v16045_v44, %v16044_v27 }
 0x98a   : > { %v16080_v37 = vpop.f32.mrb[1].mxu1 }
 0x98b   : > { %v16081_v21 = vadd.f32 %v16080_v37, %v16079_v23  ;;  %v13787_v31 = vadd.f32 %v16046_v40, %v16005_v42 }
 0x98d   : > { %v13857_v45 = vadd.f32 %v16081_v21, %v13787_v31 }
 0x9a7   : > { %v16114_v34 = vpop.f32.mrb[2].mxu0 }
 0x9a8   : > { %v16115_v58 = vpop.f32.mrb[3].mxu0 }
 0x9a9   : > { %v16149_v50 = vpop.f32.mrb[2].mxu1  ;;  %v16116_v35 = vadd.f32 %v16115_v58, %v16114_v34 }
 0x9aa   : > { %v16150_v59 = vpop.f32.mrb[3].mxu1 }
 0x9ab   : > { %v16151_v38 = vadd.f32 %v16150_v59, %v16149_v50  ;;  %v13927_v60 = vadd.f32 %v16116_v35, %v13857_v45 }
 0x9ad   : > { %v13997_v3 = vadd.f32 %v16151_v38, %v13927_v60 }
 0x9af   : > { %v14000_v48 = vmax.f32 %v13997_v3, 0.0 }
 0x9b1   : > { %16202 = vmatmul.mubr.f32.vlgmr.msra.gmra.mrb[4].mxu0 %v14000_v48 }
 0xa84   : > { %v14090_v46 = vpop.f32.mrb[4].mxu0 }
 0xa85   : > { %v14091_v2 = vadd.f32 %v16006_v28, %v14090_v46  ;;  %v16203_v61 = vpop.f32.mrb[5].mxu0 }
 0xa87   : > { %14094 = vst [vmem:[%s19127_s7] sm:$0xff] %v14091_v2 }
 0xa88 PF: > { %p20_p0 = scmp.ge.s32.totalorder %s16879_s19, 5   ;;  %s19146_s24 = smov %s16664_s25 }
 0xa89   : > { %s19147_s25 = smov %s16668_s26  ;;  %s19148_s26 = smov %s16890_s12 }
 0xa8a   : > { %s19149_s27 = smov %s16879_s19  ;;  %22 = sbr.rel (!%p20_p0) target bundleno = 8 (0x8), region = 115 }
 0xa91   :  { %14106 = vsyncpa [#allocation4], 1 }
 0xa92   :  { %14108 = vsyncpa [#allocation4 + $0x1], 1 }
 0xa93   :  { %14109 = vsyncpa [#allocation6], 1 }
 0xa94   :  { %14110 = vsyncpa [#allocation9], 1 }
 0xa95   :  { %14111 = vsyncpa [#allocation12], 1 }

</bundles_post_ra>
